<compile_context>
chip_gen: v6e
topology: v6e:2x2x1
jax: 0.10.0
libtpu: 0.0.40
codegen_flags: <defaults>
</compile_context>

<pallas_src>
import functools

import jax
import jax.numpy as jnp
from jax.experimental import pallas as pl
from jax.experimental.pallas import tpu as pltpu


VMEM_LIMIT_BYTES = 48 * 1024 * 1024   # above scoped defaults, below v7x physical
_NEG_INF = -1e30


# ------------------------------ tile helpers --------------------------------

def _pick_sub_tile(dim, target):
    """Largest tile <= target that divides dim (sublane axis: mult of 8 or full)."""
    if dim <= target:
        return dim
    t = target
    while t >= 8:
        if dim % t == 0:
            return t
        t //= 2
    return dim


def _pick_lane_tile(dim, target):
    """Largest tile <= target that divides dim (lane axis: mult of 128 or full)."""
    if dim <= target:
        return dim
    t = target
    while t >= 128:
        if dim % t == 0:
            return t
        t //= 2
    return dim


# ------------------------------ RMSNorm kernels ------------------------------

def _rmsnorm_kernel(eps, x_ref, w_ref, o_ref):
    x = x_ref[...].astype(jnp.float32)
    var = jnp.mean(x * x, axis=-1, keepdims=True)
    inv = jax.lax.rsqrt(var + eps)
    o_ref[...] = (x * inv * w_ref[...].astype(jnp.float32)).astype(o_ref.dtype)


def rmsnorm(x, w, eps, block_rows=256):
    S, H = x.shape
    bm = _pick_sub_tile(S, block_rows)
    return pl.pallas_call(
        functools.partial(_rmsnorm_kernel, eps),
        grid=(S // bm,),
        in_specs=[pl.BlockSpec((bm, H), lambda i: (i, 0)),
                  pl.BlockSpec((1, H), lambda i: (0, 0))],
        out_specs=pl.BlockSpec((bm, H), lambda i: (i, 0)),
        out_shape=jax.ShapeDtypeStruct(x.shape, x.dtype),
        compiler_params=pltpu.CompilerParams(
            dimension_semantics=("parallel",),
            vmem_limit_bytes=VMEM_LIMIT_BYTES),
    )(x, w)


def _rmsnorm_add_kernel(eps, x_ref, r_ref, w_ref, o_ref, nr_ref):
    # vLLM fused add + RMSNorm: residual' = x + residual ; out = rmsnorm(residual')
    x = x_ref[...].astype(jnp.float32) + r_ref[...].astype(jnp.float32)
    nr_ref[...] = x.astype(nr_ref.dtype)
    var = jnp.mean(x * x, axis=-1, keepdims=True)
    inv = jax.lax.rsqrt(var + eps)
    o_ref[...] = (x * inv * w_ref[...].astype(jnp.float32)).astype(o_ref.dtype)


def rmsnorm_add(x, residual, w, eps, block_rows=256):
    S, H = x.shape
    bm = _pick_sub_tile(S, block_rows)
    row_spec = pl.BlockSpec((bm, H), lambda i: (i, 0))
    out, new_res = pl.pallas_call(
        functools.partial(_rmsnorm_add_kernel, eps),
        grid=(S // bm,),
        in_specs=[row_spec, row_spec, pl.BlockSpec((1, H), lambda i: (0, 0))],
        out_specs=(row_spec, row_spec),
        out_shape=(jax.ShapeDtypeStruct(x.shape, x.dtype),
                   jax.ShapeDtypeStruct(x.shape, x.dtype)),
        input_output_aliases={1: 1},   # update residual stream in place
        compiler_params=pltpu.CompilerParams(
            dimension_semantics=("parallel",),
            vmem_limit_bytes=VMEM_LIMIT_BYTES),
    )(x, residual, w)
    return out, new_res


# --------------------------- tiled matmul kernels ----------------------------

def _matmul_kernel(out_scale, x_ref, w_ref, o_ref, acc_ref):
    @pl.when(pl.program_id(2) == 0)
    def _zero():
        acc_ref[...] = jnp.zeros_like(acc_ref)

    acc_ref[...] += jnp.dot(x_ref[...], w_ref[...],
                            preferred_element_type=jnp.float32)

    @pl.when(pl.program_id(2) == pl.num_programs(2) - 1)
    def _store():
        acc = acc_ref[...]
        if out_scale != 1.0:          # trace-time constant fold
            acc = acc * out_scale
        o_ref[...] = acc.astype(o_ref.dtype)


def linear(x, w, out_scale=1.0, tm=256, tn=512, tk=512):
    M, K = x.shape
    K2, N = w.shape
    assert K == K2
    tm = _pick_sub_tile(M, tm)
    tn = _pick_lane_tile(N, tn)
    tk = _pick_lane_tile(K, tk)
    grid = (M // tm, N // tn, K // tk)
    return pl.pallas_call(
        functools.partial(_matmul_kernel, float(out_scale)),
        grid=grid,
        in_specs=[pl.BlockSpec((tm, tk), lambda i, j, k: (i, k)),
                  pl.BlockSpec((tk, tn), lambda i, j, k: (k, j))],
        out_specs=pl.BlockSpec((tm, tn), lambda i, j, k: (i, j)),
        out_shape=jax.ShapeDtypeStruct((M, N), x.dtype),
        scratch_shapes=[pltpu.VMEM((tm, tn), jnp.float32)],
        compiler_params=pltpu.CompilerParams(
            dimension_semantics=("parallel", "parallel", "arbitrary"),
            vmem_limit_bytes=VMEM_LIMIT_BYTES),
    )(x, w)


def _gate_up_kernel(x_ref, wg_ref, wu_ref, o_ref, accg_ref, accu_ref):
    @pl.when(pl.program_id(2) == 0)
    def _zero():
        accg_ref[...] = jnp.zeros_like(accg_ref)
        accu_ref[...] = jnp.zeros_like(accu_ref)

    x = x_ref[...]
    accg_ref[...] += jnp.dot(x, wg_ref[...], preferred_element_type=jnp.float32)
    accu_ref[...] += jnp.dot(x, wu_ref[...], preferred_element_type=jnp.float32)

    @pl.when(pl.program_id(2) == pl.num_programs(2) - 1)
    def _store():
        g = accg_ref[...]
        o_ref[...] = (g * jax.lax.logistic(g) * accu_ref[...]).astype(o_ref.dtype)


def gate_up_mlp(x, wg, wu, tm=256, tn=512, tk=512):
    """SwiGLU first half: SiLU(x@Wg) * (x@Wu), both matmuls share x tiles."""
    M, K = x.shape
    _, N = wg.shape
    assert wu.shape == (K, N)
    tm = _pick_sub_tile(M, tm)
    tn = _pick_lane_tile(N, tn)
    tk = _pick_lane_tile(K, tk)
    grid = (M // tm, N // tn, K // tk)
    return pl.pallas_call(
        _gate_up_kernel,
        grid=grid,
        in_specs=[pl.BlockSpec((tm, tk), lambda i, j, k: (i, k)),
                  pl.BlockSpec((tk, tn), lambda i, j, k: (k, j)),
                  pl.BlockSpec((tk, tn), lambda i, j, k: (k, j))],
        out_specs=pl.BlockSpec((tm, tn), lambda i, j, k: (i, j)),
        out_shape=jax.ShapeDtypeStruct((M, N), x.dtype),
        scratch_shapes=[pltpu.VMEM((tm, tn), jnp.float32),
                        pltpu.VMEM((tm, tn), jnp.float32)],
        compiler_params=pltpu.CompilerParams(
            dimension_semantics=("parallel", "parallel", "arbitrary"),
            vmem_limit_bytes=VMEM_LIMIT_BYTES),
    )(x, wg, wu)


# ------------------------ flash attention (GQA + RoPE) -----------------------

def _rotate_half_swap(x, half):
    """Swap halves along the last (lane) dim: [x2 | x1]. Sign lives in the sin table."""
    return jnp.concatenate([x[:, half:], x[:, :half]], axis=-1)


def _flash_attn_kernel(sm_scale, group, head_dim,
                       q_ref, k_ref, v_ref,
                       cosq_ref, sinq_ref, cosk_ref, sink_ref,
                       o_ref,
                       q_rot, m_scr, l_scr, acc_scr):
    D = head_dim
    half = D // 2
    tq = q_ref.shape[0]
    tkv = k_ref.shape[0]
    qi = pl.program_id(1)
    ki = pl.program_id(2)

    @pl.when(ki == 0)
    def _init():
        cos_q = cosq_ref[...]
        sin_q = sinq_ref[...]
        for g in range(group):
            qg = q_ref[:, g * D:(g + 1) * D].astype(jnp.float32)
            # NeoX rotate_half via half-swap; sign already folded into sin table.
            qg = qg * cos_q + _rotate_half_swap(qg, half) * sin_q
            q_rot[g] = (qg * sm_scale).astype(q_rot.dtype)
            m_scr[g] = jnp.full((tq, 1), _NEG_INF, jnp.float32)
            l_scr[g] = jnp.zeros((tq, 1), jnp.float32)
            acc_scr[g] = jnp.zeros((tq, D), jnp.float32)

    # Causal block skip: with tq == tkv, kv block `ki` contributes to q block
    # `qi` only when ki <= qi (index maps clamp the K/V DMAs accordingly, so
    # skipped blocks re-use the already-resident tile and their DMAs are elided).
    @pl.when(ki <= qi)
    def _compute():
        kf = k_ref[...].astype(jnp.float32)
        k_rot = (kf * cosk_ref[...] +
                 _rotate_half_swap(kf, half) * sink_ref[...]).astype(k_ref.dtype)
        v = v_ref[...]
        row = qi * tq + jax.lax.broadcasted_iota(jnp.int32, (tq, tkv), 0)
        col = ki * tkv + jax.lax.broadcasted_iota(jnp.int32, (tq, tkv), 1)
        causal = col <= row
        for g in range(group):               # K/V reused across the GQA group
            s = jnp.einsum("qd,kd->qk", q_rot[g], k_rot,
                           preferred_element_type=jnp.float32)
            s = jnp.where(causal, s, _NEG_INF)
            m_prev = m_scr[g]
            m_new = jnp.maximum(m_prev, jnp.max(s, axis=-1, keepdims=True))
            alpha = jnp.exp(m_prev - m_new)
            p = jnp.exp(s - m_new)
            l_scr[g] = alpha * l_scr[g] + jnp.sum(p, axis=-1, keepdims=True)
            acc_scr[g] = alpha * acc_scr[g] + jnp.einsum(
                "qk,kd->qd", p.astype(v.dtype), v,
                preferred_element_type=jnp.float32)
            m_scr[g] = m_new

    @pl.when(ki == qi)   # last contributing kv block for this q block
    def _finalize():
        for g in range(group):
            inv_l = 1.0 / l_scr[g]
            o_ref[:, g * D:(g + 1) * D] = (acc_scr[g] * inv_l).astype(o_ref.dtype)


def flash_attention(qkv, cos, sin_rope, num_heads, num_kv_heads, head_dim,
                    q_block=256):
    """Causal GQA attention reading Q/K/V directly from the fused QKV output.

    qkv:      (S, (nH + 2*nKV) * D) bf16, columns ordered [Q | K | V].
    returns:  (S, nH * D) lane-dense attention output.
    """
    S = qkv.shape[0]
    D = head_dim
    assert num_heads % num_kv_heads == 0
    group = num_heads // num_kv_heads
    assert D % 128 == 0, "fused attention kernel assumes head_dim % 128 == 0"
    assert qkv.shape[1] == (num_heads + 2 * num_kv_heads) * D

    tq = _pick_sub_tile(S, q_block)
    tkv = tq                       # equal tiles keep the causal block logic simple
    grid = (num_kv_heads, S // tq, S // tkv)
    sm_scale = D ** -0.5

    # Column block indices into the fused qkv slab.
    def q_map(kv, qi, ki):                       # block width = group * D
        return (qi, kv)

    def k_map(kv, qi, ki):                       # block width = D
        return (jnp.minimum(ki, qi), num_heads + kv)

    def v_map(kv, qi, ki):
        return (jnp.minimum(ki, qi), num_heads + num_kv_heads + kv)

    def rope_q_map(kv, qi, ki):
        return (qi, 0)

    def rope_k_map(kv, qi, ki):
        return (jnp.minimum(ki, qi), 0)

    kernel = functools.partial(_flash_attn_kernel, sm_scale, group, D)
    return pl.pallas_call(
        kernel,
        grid=grid,
        in_specs=[
            pl.BlockSpec((tq, group * D), q_map),
            pl.BlockSpec((tkv, D), k_map),
            pl.BlockSpec((tkv, D), v_map),
            pl.BlockSpec((tq, D), rope_q_map),
            pl.BlockSpec((tq, D), rope_q_map),
            pl.BlockSpec((tkv, D), rope_k_map),
            pl.BlockSpec((tkv, D), rope_k_map),
        ],
        out_specs=pl.BlockSpec((tq, group * D), q_map),
        out_shape=jax.ShapeDtypeStruct((S, num_heads * D), qkv.dtype),
        scratch_shapes=[
            pltpu.VMEM((group, tq, D), qkv.dtype),    # RoPE'd, pre-scaled q tiles
            pltpu.VMEM((group, tq, 1), jnp.float32),  # running max
            pltpu.VMEM((group, tq, 1), jnp.float32),  # running sum
            pltpu.VMEM((group, tq, D), jnp.float32),  # output accumulator
        ],
        compiler_params=pltpu.CompilerParams(
            dimension_semantics=("parallel", "parallel", "arbitrary"),
            vmem_limit_bytes=VMEM_LIMIT_BYTES),
    )(qkv, qkv, qkv, cos, sin_rope, cos, sin_rope)


# -------------------------------- JAX glue -----------------------------------

def rope_tables(positions, head_dim, theta):
    half = head_dim // 2
    inv_freq = 1.0 / (theta ** (jnp.arange(half, dtype=jnp.float32) / half))
    angles = positions.astype(jnp.float32)[:, None] * inv_freq[None, :]   # (S, half)
    cos = jnp.concatenate([jnp.cos(angles), jnp.cos(angles)], axis=-1)    # (S, D)
    sin = jnp.sin(angles)
    # rotate_half(x) == swap_halves(x) * [-1...,+1...]; fold sign into sin.
    sin_rope = jnp.concatenate([-sin, sin], axis=-1)                      # (S, D)
    return cos, sin_rope


def decoder_layer(h, residual, lp, cos, sin_rope, cfg, scale):
    eps = cfg["eps"]
    nH, nKV, D = cfg["num_heads"], cfg["num_kv_heads"], cfg["head_dim"]

    # input_layernorm (first layer: residual=None -> plain norm, residual := x)
    if residual is None:
        residual = h
        x = rmsnorm(h, lp["input_ln"], eps)
    else:
        x, residual = rmsnorm_add(h, residual, lp["input_ln"], eps)

    # self-attention: fused QKV matmul -> flash attention (RoPE fused) -> O proj
    qkv = linear(x, lp["w_qkv"])
    attn = flash_attention(qkv, cos, sin_rope, nH, nKV, D)
    x = linear(attn, lp["w_o"])

    # post_attention_layernorm (fused add) then SwiGLU MLP; the per-layer
    # CustomLlamaDecoderLayer scale is fused into the down-projection epilogue.
    x, residual = rmsnorm_add(x, residual, lp["post_ln"], eps)
    gu = gate_up_mlp(x, lp["w_gate"], lp["w_up"])
    x = linear(gu, lp["w_down"], out_scale=scale)
    return x, residual


def custom_llama_model(params, input_ids, positions, cfg):
    # Embedding gather (glue, not the hot path).
    h = jnp.take(params["embed"], input_ids, axis=0)                # (S, H) bf16
    cos, sin_rope = rope_tables(positions, cfg["head_dim"], cfg["rope_theta"])
    residual = None
    for i in range(cfg["num_layers"]):
        scale = cfg["scales"][i] if i < len(cfg["scales"]) else 1.0
        h, residual = decoder_layer(h, residual, params["layers"][i],
                                    cos, sin_rope, cfg, scale)
    out, _ = rmsnorm_add(h, residual, params["final_ln"], cfg["eps"])
    return out


def init_params(key, cfg):
    H = cfg["hidden_size"]
    D = cfg["head_dim"]
    nH = cfg["num_heads"]
    nKV = cfg["num_kv_heads"]
    I = cfg["intermediate_size"]
    V = cfg["vocab_size"]

    keys = jax.random.split(key, 1 + 5 * cfg["num_layers"])

    def w(k, shape):
        return (0.02 * jax.random.normal(k, shape, dtype=jnp.float32)
                ).astype(jnp.bfloat16)

    params = {
        "embed": w(keys[0], (V, H)),
        "final_ln": jnp.ones((1, H), jnp.bfloat16),
        "layers": [],
    }
    ki = 1
    for _ in range(cfg["num_layers"]):
        lp = {
            "input_ln": jnp.ones((1, H), jnp.bfloat16),
            "post_ln": jnp.ones((1, H), jnp.bfloat16),
            "w_qkv": w(keys[ki + 0], (H, (nH + 2 * nKV) * D)),
            "w_o": w(keys[ki + 1], (nH * D, H)),
            "w_gate": w(keys[ki + 2], (H, I)),
            "w_up": w(keys[ki + 3], (H, I)),
            "w_down": w(keys[ki + 4], (I, H)),
        }
        ki += 5
        params["layers"].append(lp)
    return params


# ------------------------- pure-JAX f32 reference ----------------------------

def reference_forward(params, input_ids, positions, cfg):
    f32 = jnp.float32
    D, nH, nKV = cfg["head_dim"], cfg["num_heads"], cfg["num_kv_heads"]
    group = nH // nKV
    eps = cfg["eps"]
    half = D // 2

    inv_freq = 1.0 / (cfg["rope_theta"] ** (jnp.arange(half, dtype=f32) / half))
    ang = positions.astype(f32)[:, None] * inv_freq[None, :]
    cos = jnp.concatenate([jnp.cos(ang), jnp.cos(ang)], axis=-1)
    sin = jnp.concatenate([jnp.sin(ang), jnp.sin(ang)], axis=-1)

    def rms(x, wt):
        var = jnp.mean(x * x, axis=-1, keepdims=True)
        return x * jax.lax.rsqrt(var + eps) * wt.astype(f32)

    def rope(x):  # (S, n, D) neox rotate_half
        x1, x2 = x[..., :half], x[..., half:]
        rot = jnp.concatenate([-x2, x1], axis=-1)
        return x * cos[:, None, :] + rot * sin[:, None, :]

    h = params["embed"].astype(f32)[input_ids]
    S = h.shape[0]
    residual = None
    for i in range(cfg["num_layers"]):
        lp = params["layers"][i]
        scale = cfg["scales"][i] if i < len(cfg["scales"]) else 1.0
        if residual is None:
            residual = h
            x = rms(h, lp["input_ln"][0])
        else:
            residual = residual + h
            x = rms(residual, lp["input_ln"][0])
        qkv = x @ lp["w_qkv"].astype(f32)
        q = qkv[:, :nH * D].reshape(S, nH, D)
        k = qkv[:, nH * D:(nH + nKV) * D].reshape(S, nKV, D)
        v = qkv[:, (nH + nKV) * D:].reshape(S, nKV, D)
        q, k = rope(q), rope(k)
        k = jnp.repeat(k, group, axis=1)
        v = jnp.repeat(v, group, axis=1)
        s = jnp.einsum("qhd,khd->hqk", q, k) * (D ** -0.5)
        causal = jnp.tril(jnp.ones((S, S), dtype=bool))
        s = jnp.where(causal[None], s, -jnp.inf)
        p = jax.nn.softmax(s, axis=-1)
        attn = jnp.einsum("hqk,khd->qhd", p, v).reshape(S, nH * D)
        x = attn @ lp["w_o"].astype(f32)
        residual = residual + x
        x = rms(residual, lp["post_ln"][0])
        g = x @ lp["w_gate"].astype(f32)
        u = x @ lp["w_up"].astype(f32)
        x = (jax.nn.silu(g) * u) @ lp["w_down"].astype(f32)
        h = x * scale
    return rms(residual + h, params["final_ln"][0])


# ----------------------------------- main ------------------------------------

if __name__ == "__main__":
    cfg = dict(
        vocab_size=256,
        hidden_size=512,       # num_heads * head_dim
        num_layers=2,
        num_heads=4,
        num_kv_heads=2,
        head_dim=128,          # lane-aligned heads (standard Llama head_dim)
        intermediate_size=1024,
        eps=1e-6,
        rope_theta=10000.0,
        scales=[0.9, 1.1],
    )

    key = jax.random.PRNGKey(0)
    params = init_params(key, cfg)

    S = 16
    input_ids = jax.random.randint(jax.random.fold_in(key, 123), (S,), 0,
                                   cfg["vocab_size"], dtype=jnp.int32)
    positions = jnp.arange(S, dtype=jnp.int32)

    fwd = jax.jit(functools.partial(custom_llama_model, cfg=cfg))
    out = jax.block_until_ready(fwd(params, input_ids, positions))

    assert out.shape == (S, cfg["hidden_size"])
    out_f32 = out.astype(jnp.float32)
    assert bool(jnp.all(jnp.isfinite(out_f32)))

    # Loose check against a pure-JAX f32 reference (kernel streams bf16
    # activations, so allow a few percent relative Frobenius error).
    ref = reference_forward(params, input_ids, positions, cfg)
    rel = float(jnp.linalg.norm(out_f32 - ref) / (jnp.linalg.norm(ref) + 1e-9))
    assert rel < 0.05, f"kernel/reference mismatch: rel={rel:.4f}"

    print("KERNEL_OK")
</pallas_src>

<mosaic_0001>
module attributes {stable_mosaic.version = 11 : i64} {
  func.func @_rmsnorm_kernel(%arg0: i32, %arg1: memref<16x512xbf16, #tpu.memory_space<vmem>>, %arg2: memref<1x512xbf16, #tpu.memory_space<vmem>>, %arg3: memref<16x512xbf16, #tpu.memory_space<vmem>>) attributes {dimension_semantics = [#tpu.dimension_semantics<parallel>], iteration_bounds = array<i64: 1>, scalar_prefetch = 0 : i64, scratch_operands = 0 : i64, tpu.core_type = #tpu.core_type<tc>, window_params = [{transform_indices = @transform_0, window_bounds = array<i64: 16, 512>}, {pipeline_mode = #tpu.pipeline_mode<synchronous>, transform_indices = @transform_1, window_bounds = array<i64: 1, 512>}, {transform_indices = @transform_2, window_bounds = array<i64: 16, 512>}]} {
    %c0 = arith.constant 0 : index
    %c0_0 = arith.constant 0 : index
    %0 = vector.load %arg1[%c0, %c0_0] : memref<16x512xbf16, #tpu.memory_space<vmem>>, vector<16x512xbf16>
    %1 = arith.extf %0 : vector<16x512xbf16> to vector<16x512xf32>
    %2 = arith.mulf %1, %1 : vector<16x512xf32>
    %cst = arith.constant dense<0.000000e+00> : vector<16xf32>
    %3 = vector.multi_reduction <add>, %2, %cst [1] : vector<16x512xf32> to vector<16xf32>
    %4 = vector.shape_cast %3 : vector<16xf32> to vector<16x1xf32>
    %cst_1 = arith.constant 5.120000e+02 : f32
    %5 = vector.broadcast %cst_1 : f32 to vector<16x1xf32>
    %6 = arith.divf %4, %5 : vector<16x1xf32>
    %cst_2 = arith.constant 9.99999997E-7 : f32
    %7 = vector.broadcast %cst_2 : f32 to vector<16x1xf32>
    %8 = arith.addf %6, %7 : vector<16x1xf32>
    %9 = math.rsqrt %8 : vector<16x1xf32>
    %10 = vector.broadcast %9 : vector<16x1xf32> to vector<16x512xf32>
    %11 = arith.mulf %1, %10 : vector<16x512xf32>
    %c0_3 = arith.constant 0 : index
    %c0_4 = arith.constant 0 : index
    %12 = vector.load %arg2[%c0_3, %c0_4] : memref<1x512xbf16, #tpu.memory_space<vmem>>, vector<1x512xbf16>
    %13 = arith.extf %12 : vector<1x512xbf16> to vector<1x512xf32>
    %14 = vector.broadcast %13 : vector<1x512xf32> to vector<16x512xf32>
    %15 = arith.mulf %11, %14 : vector<16x512xf32>
    %16 = arith.truncf %15 : vector<16x512xf32> to vector<16x512xbf16>
    %c0_5 = arith.constant 0 : index
    %c0_6 = arith.constant 0 : index
    %17 = vector.load %arg3[%c0_5, %c0_6] : memref<16x512xbf16, #tpu.memory_space<vmem>>, vector<16x512xbf16>
    tpu.vector_store %arg3[%c0_5, %c0_6], %16 {strides = array<i32>} : memref<16x512xbf16, #tpu.memory_space<vmem>>, vector<16x512xbf16>,
    return
  }
  func.func @transform_0(%arg0: i32) -> (i32, i32) {
    %c0_i32 = arith.constant 0 : i32
    %c0_i32_0 = arith.constant 0 : i32
    return %arg0, %c0_i32 : i32, i32
  }
  func.func @transform_1(%arg0: i32) -> (i32, i32) {
    %c0_i32 = arith.constant 0 : i32
    %c0_i32_0 = arith.constant 0 : i32
    %c0_i32_1 = arith.constant 0 : i32
    return %c0_i32, %c0_i32_0 : i32, i32
  }
  func.func @transform_2(%arg0: i32) -> (i32, i32) {
    %c0_i32 = arith.constant 0 : i32
    %c0_i32_0 = arith.constant 0 : i32
    return %arg0, %c0_i32 : i32, i32
  }
}

module attributes {stable_mosaic.version = 11 : i64} {
  func.func @_matmul_kernel(%arg0: i32, %arg1: i32, %arg2: i32, %arg3: memref<16x512xbf16, #tpu.memory_space<vmem>>, %arg4: memref<512x512xbf16, #tpu.memory_space<vmem>>, %arg5: memref<16x512xbf16, #tpu.memory_space<vmem>>, %arg6: memref<16x512xf32, #tpu.memory_space<vmem>>) attributes {dimension_semantics = [#tpu.dimension_semantics<parallel>, #tpu.dimension_semantics<parallel>, #tpu.dimension_semantics<arbitrary>], iteration_bounds = array<i64: 1, 2, 1>, scalar_prefetch = 0 : i64, scratch_operands = 1 : i64, tpu.core_type = #tpu.core_type<tc>, window_params = [{transform_indices = @transform_0, window_bounds = array<i64: 16, 512>}, {transform_indices = @transform_1, window_bounds = array<i64: 512, 512>}, {transform_indices = @transform_2, window_bounds = array<i64: 16, 512>}]} {
    %c0_i32 = arith.constant 0 : i32
    %0 = arith.cmpi eq, %arg2, %c0_i32 : i32
    %1 = arith.extui %0 : i1 to i32
    %c0_i32_0 = arith.constant 0 : i32
    %2 = arith.cmpi ne, %1, %c0_i32_0 : i32
    scf.if %2 {
      %cst_10 = arith.constant 0.000000e+00 : f32
      %12 = vector.broadcast %cst_10 : f32 to vector<16x512xf32>
      %c0_11 = arith.constant 0 : index
      %c0_12 = arith.constant 0 : index
      %13 = vector.load %arg6[%c0_11, %c0_12] : memref<16x512xf32, #tpu.memory_space<vmem>>, vector<16x512xf32>
      tpu.vector_store %arg6[%c0_11, %c0_12], %12 {strides = array<i32>} : memref<16x512xf32, #tpu.memory_space<vmem>>, vector<16x512xf32>,
    } else {
    }
    %c0 = arith.constant 0 : index
    %c0_1 = arith.constant 0 : index
    %3 = vector.load %arg6[%c0, %c0_1] : memref<16x512xf32, #tpu.memory_space<vmem>>, vector<16x512xf32>
    %c0_2 = arith.constant 0 : index
    %c0_3 = arith.constant 0 : index
    %4 = vector.load %arg3[%c0_2, %c0_3] : memref<16x512xbf16, #tpu.memory_space<vmem>>, vector<16x512xbf16>
    %c0_4 = arith.constant 0 : index
    %c0_5 = arith.constant 0 : index
    %5 = vector.load %arg4[%c0_4, %c0_5] : memref<512x512xbf16, #tpu.memory_space<vmem>>, vector<512x512xbf16>
    %cst = arith.constant dense<0.000000e+00> : vector<16x512xf32>
    %6 = tpu.matmul %4, %5, %cst {dimension_numbers = #tpu.dot_dimension_numbers<[1], [0], [0], [1], [0, 0, 1, 1], [], []>} : vector<16x512xbf16>, vector<512x512xbf16>, vector<16x512xf32> -> vector<16x512xf32>
    %7 = arith.addf %3, %6 : vector<16x512xf32>
    %c0_6 = arith.constant 0 : index
    %c0_7 = arith.constant 0 : index
    %8 = vector.load %arg6[%c0_6, %c0_7] : memref<16x512xf32, #tpu.memory_space<vmem>>, vector<16x512xf32>
    tpu.vector_store %arg6[%c0_6, %c0_7], %7 {strides = array<i32>} : memref<16x512xf32, #tpu.memory_space<vmem>>, vector<16x512xf32>,
    %c0_i32_8 = arith.constant 0 : i32
    %9 = arith.cmpi eq, %arg2, %c0_i32_8 : i32
    %10 = arith.extui %9 : i1 to i32
    %c0_i32_9 = arith.constant 0 : i32
    %11 = arith.cmpi ne, %10, %c0_i32_9 : i32
    scf.if %11 {
      %c0_10 = arith.constant 0 : index
      %c0_11 = arith.constant 0 : index
      %12 = vector.load %arg6[%c0_10, %c0_11] : memref<16x512xf32, #tpu.memory_space<vmem>>, vector<16x512xf32>
      %13 = arith.truncf %12 : vector<16x512xf32> to vector<16x512xbf16>
      %c0_12 = arith.constant 0 : index
      %c0_13 = arith.constant 0 : index
      %14 = vector.load %arg5[%c0_12, %c0_13] : memref<16x512xbf16, #tpu.memory_space<vmem>>, vector<16x512xbf16>
      tpu.vector_store %arg5[%c0_12, %c0_13], %13 {strides = array<i32>} : memref<16x512xbf16, #tpu.memory_space<vmem>>, vector<16x512xbf16>,
    } else {
    }
    return
  }
  func.func @transform_0(%arg0: i32, %arg1: i32, %arg2: i32) -> (i32, i32) {
    %c0_i32 = arith.constant 0 : i32
    return %arg0, %arg2 : i32, i32
  }
  func.func @transform_1(%arg0: i32, %arg1: i32, %arg2: i32) -> (i32, i32) {
    %c0_i32 = arith.constant 0 : i32
    return %arg2, %arg1 : i32, i32
  }
  func.func @transform_2(%arg0: i32, %arg1: i32, %arg2: i32) -> (i32, i32) {
    %c0_i32 = arith.constant 0 : i32
    return %arg0, %arg1 : i32, i32
  }
}

module attributes {stable_mosaic.version = 11 : i64} {
  func.func @_flash_attn_kernel(%arg0: i32, %arg1: i32, %arg2: i32, %arg3: memref<16x256xbf16, #tpu.memory_space<vmem>>, %arg4: memref<16x128xbf16, #tpu.memory_space<vmem>>, %arg5: memref<16x128xbf16, #tpu.memory_space<vmem>>, %arg6: memref<16x128xf32, #tpu.memory_space<vmem>>, %arg7: memref<16x128xf32, #tpu.memory_space<vmem>>, %arg8: memref<16x128xf32, #tpu.memory_space<vmem>>, %arg9: memref<16x128xf32, #tpu.memory_space<vmem>>, %arg10: memref<16x256xbf16, #tpu.memory_space<vmem>>, %arg11: memref<2x16x128xbf16, #tpu.memory_space<vmem>>, %arg12: memref<2x16x1xf32, #tpu.memory_space<vmem>>, %arg13: memref<2x16x1xf32, #tpu.memory_space<vmem>>, %arg14: memref<2x16x128xf32, #tpu.memory_space<vmem>>) attributes {dimension_semantics = [#tpu.dimension_semantics<parallel>, #tpu.dimension_semantics<parallel>, #tpu.dimension_semantics<arbitrary>], iteration_bounds = array<i64: 2, 1, 1>, scalar_prefetch = 0 : i64, scratch_operands = 4 : i64, tpu.core_type = #tpu.core_type<tc>, window_params = [{transform_indices = @transform_0, window_bounds = array<i64: 16, 256>}, {transform_indices = @transform_1, window_bounds = array<i64: 16, 128>}, {transform_indices = @transform_2, window_bounds = array<i64: 16, 128>}, {transform_indices = @transform_3, window_bounds = array<i64: 16, 128>}, {transform_indices = @transform_4, window_bounds = array<i64: 16, 128>}, {transform_indices = @transform_5, window_bounds = array<i64: 16, 128>}, {transform_indices = @transform_6, window_bounds = array<i64: 16, 128>}, {transform_indices = @transform_7, window_bounds = array<i64: 16, 256>}]} {
    %c0_i32 = arith.constant 0 : i32
    %0 = arith.cmpi eq, %arg2, %c0_i32 : i32
    %1 = arith.extui %0 : i1 to i32
    %c0_i32_0 = arith.constant 0 : i32
    %2 = arith.cmpi ne, %1, %c0_i32_0 : i32
    scf.if %2 {
      %c0 = arith.constant 0 : index
      %c0_3 = arith.constant 0 : index
      %9 = vector.load %arg6[%c0, %c0_3] : memref<16x128xf32, #tpu.memory_space<vmem>>, vector<16x128xf32>
      %c0_4 = arith.constant 0 : index
      %c0_5 = arith.constant 0 : index
      %10 = vector.load %arg7[%c0_4, %c0_5] : memref<16x128xf32, #tpu.memory_space<vmem>>, vector<16x128xf32>
      %c0_6 = arith.constant 0 : index
      %c0_7 = arith.constant 0 : index
      %11 = vector.load %arg3[%c0_6, %c0_7] : memref<16x256xbf16, #tpu.memory_space<vmem>>, vector<16x128xbf16>
      %12 = arith.extf %11 : vector<16x128xbf16> to vector<16x128xf32>
      %13 = arith.mulf %12, %9 : vector<16x128xf32>
      %14 = vector.extract_strided_slice %12 {offsets = [0, 64], sizes = [16, 64], strides = [1, 1]} : vector<16x128xf32> to vector<16x64xf32>
      %15 = vector.extract_strided_slice %12 {offsets = [0, 0], sizes = [16, 64], strides = [1, 1]} : vector<16x128xf32> to vector<16x64xf32>
      %16 = tpu.concatenate %14, %15 in 1 : vector<16x64xf32>, vector<16x64xf32> -> vector<16x128xf32>
      %17 = arith.mulf %16, %10 : vector<16x128xf32>
      %18 = arith.addf %13, %17 : vector<16x128xf32>
      %cst = arith.constant 0.0883883461 : f32
      %19 = vector.broadcast %cst : f32 to vector<16x128xf32>
      %20 = arith.mulf %18, %19 : vector<16x128xf32>
      %21 = arith.truncf %20 : vector<16x128xf32> to vector<16x128xbf16>
      %c0_8 = arith.constant 0 : index
      %c0_9 = arith.constant 0 : index
      %c0_10 = arith.constant 0 : index
      %22 = vector.load %arg11[%c0_8, %c0_9, %c0_10] : memref<2x16x128xbf16, #tpu.memory_space<vmem>>, vector<1x16x128xbf16>
      %23 = vector.shape_cast %22 : vector<1x16x128xbf16> to vector<16x128xbf16>
      %24 = vector.shape_cast %21 : vector<16x128xbf16> to vector<1x16x128xbf16>
      tpu.vector_store %arg11[%c0_8, %c0_9, %c0_10], %24 {strides = array<i32>} : memref<2x16x128xbf16, #tpu.memory_space<vmem>>, vector<1x16x128xbf16>,
      %cst_11 = arith.constant -1.000000e+30 : f32
      %25 = vector.broadcast %cst_11 : f32 to vector<16x1xf32>
      %c0_12 = arith.constant 0 : index
      %c0_13 = arith.constant 0 : index
      %c0_14 = arith.constant 0 : index
      %26 = vector.load %arg12[%c0_12, %c0_13, %c0_14] : memref<2x16x1xf32, #tpu.memory_space<vmem>>, vector<1x16x1xf32>
      %27 = vector.shape_cast %26 : vector<1x16x1xf32> to vector<16x1xf32>
      %28 = vector.shape_cast %25 : vector<16x1xf32> to vector<1x16x1xf32>
      tpu.vector_store %arg12[%c0_12, %c0_13, %c0_14], %28 {strides = array<i32>} : memref<2x16x1xf32, #tpu.memory_space<vmem>>, vector<1x16x1xf32>,
      %cst_15 = arith.constant 0.000000e+00 : f32
      %29 = vector.broadcast %cst_15 : f32 to vector<16x1xf32>
      %c0_16 = arith.constant 0 : index
      %c0_17 = arith.constant 0 : index
      %c0_18 = arith.constant 0 : index
      %30 = vector.load %arg13[%c0_16, %c0_17, %c0_18] : memref<2x16x1xf32, #tpu.memory_space<vmem>>, vector<1x16x1xf32>
      %31 = vector.shape_cast %30 : vector<1x16x1xf32> to vector<16x1xf32>
      %32 = vector.shape_cast %29 : vector<16x1xf32> to vector<1x16x1xf32>
      tpu.vector_store %arg13[%c0_16, %c0_17, %c0_18], %32 {strides = array<i32>} : memref<2x16x1xf32, #tpu.memory_space<vmem>>, vector<1x16x1xf32>,
      %cst_19 = arith.constant 0.000000e+00 : f32
      %33 = vector.broadcast %cst_19 : f32 to vector<16x128xf32>
      %c0_20 = arith.constant 0 : index
      %c0_21 = arith.constant 0 : index
      %c0_22 = arith.constant 0 : index
      %34 = vector.load %arg14[%c0_20, %c0_21, %c0_22] : memref<2x16x128xf32, #tpu.memory_space<vmem>>, vector<1x16x128xf32>
      %35 = vector.shape_cast %34 : vector<1x16x128xf32> to vector<16x128xf32>
      %36 = vector.shape_cast %33 : vector<16x128xf32> to vector<1x16x128xf32>
      tpu.vector_store %arg14[%c0_20, %c0_21, %c0_22], %36 {strides = array<i32>} : memref<2x16x128xf32, #tpu.memory_space<vmem>>, vector<1x16x128xf32>,
      %c0_23 = arith.constant 0 : index
      %c128 = arith.constant 128 : index
      %37 = vector.load %arg3[%c0_23, %c128] : memref<16x256xbf16, #tpu.memory_space<vmem>>, vector<16x128xbf16>
      %38 = arith.extf %37 : vector<16x128xbf16> to vector<16x128xf32>
      %39 = arith.mulf %38, %9 : vector<16x128xf32>
      %40 = vector.extract_strided_slice %38 {offsets = [0, 64], sizes = [16, 64], strides = [1, 1]} : vector<16x128xf32> to vector<16x64xf32>
      %41 = vector.extract_strided_slice %38 {offsets = [0, 0], sizes = [16, 64], strides = [1, 1]} : vector<16x128xf32> to vector<16x64xf32>
      %42 = tpu.concatenate %40, %41 in 1 : vector<16x64xf32>, vector<16x64xf32> -> vector<16x128xf32>
      %43 = arith.mulf %42, %10 : vector<16x128xf32>
      %44 = arith.addf %39, %43 : vector<16x128xf32>
      %cst_24 = arith.constant 0.0883883461 : f32
      %45 = vector.broadcast %cst_24 : f32 to vector<16x128xf32>
      %46 = arith.mulf %44, %45 : vector<16x128xf32>
      %47 = arith.truncf %46 : vector<16x128xf32> to vector<16x128xbf16>
      %c1 = arith.constant 1 : index
      %c0_25 = arith.constant 0 : index
      %c0_26 = arith.constant 0 : index
      %48 = vector.load %arg11[%c1, %c0_25, %c0_26] : memref<2x16x128xbf16, #tpu.memory_space<vmem>>, vector<1x16x128xbf16>
      %49 = vector.shape_cast %48 : vector<1x16x128xbf16> to vector<16x128xbf16>
      %50 = vector.shape_cast %47 : vector<16x128xbf16> to vector<1x16x128xbf16>
      tpu.vector_store %arg11[%c1, %c0_25, %c0_26], %50 {strides = array<i32>} : memref<2x16x128xbf16, #tpu.memory_space<vmem>>, vector<1x16x128xbf16>,
      %cst_27 = arith.constant -1.000000e+30 : f32
      %51 = vector.broadcast %cst_27 : f32 to vector<16x1xf32>
      %c1_28 = arith.constant 1 : index
      %c0_29 = arith.constant 0 : index
      %c0_30 = arith.constant 0 : index
      %52 = vector.load %arg12[%c1_28, %c0_29, %c0_30] : memref<2x16x1xf32, #tpu.memory_space<vmem>>, vector<1x16x1xf32>
      %53 = vector.shape_cast %52 : vector<1x16x1xf32> to vector<16x1xf32>
      %54 = vector.shape_cast %51 : vector<16x1xf32> to vector<1x16x1xf32>
      tpu.vector_store %arg12[%c1_28, %c0_29, %c0_30], %54 {strides = array<i32>} : memref<2x16x1xf32, #tpu.memory_space<vmem>>, vector<1x16x1xf32>,
      %cst_31 = arith.constant 0.000000e+00 : f32
      %55 = vector.broadcast %cst_31 : f32 to vector<16x1xf32>
      %c1_32 = arith.constant 1 : index
      %c0_33 = arith.constant 0 : index
      %c0_34 = arith.constant 0 : index
      %56 = vector.load %arg13[%c1_32, %c0_33, %c0_34] : memref<2x16x1xf32, #tpu.memory_space<vmem>>, vector<1x16x1xf32>
      %57 = vector.shape_cast %56 : vector<1x16x1xf32> to vector<16x1xf32>
      %58 = vector.shape_cast %55 : vector<16x1xf32> to vector<1x16x1xf32>
      tpu.vector_store %arg13[%c1_32, %c0_33, %c0_34], %58 {strides = array<i32>} : memref<2x16x1xf32, #tpu.memory_space<vmem>>, vector<1x16x1xf32>,
      %cst_35 = arith.constant 0.000000e+00 : f32
      %59 = vector.broadcast %cst_35 : f32 to vector<16x128xf32>
      %c1_36 = arith.constant 1 : index
      %c0_37 = arith.constant 0 : index
      %c0_38 = arith.constant 0 : index
      %60 = vector.load %arg14[%c1_36, %c0_37, %c0_38] : memref<2x16x128xf32, #tpu.memory_space<vmem>>, vector<1x16x128xf32>
      %61 = vector.shape_cast %60 : vector<1x16x128xf32> to vector<16x128xf32>
      %62 = vector.shape_cast %59 : vector<16x128xf32> to vector<1x16x128xf32>
      tpu.vector_store %arg14[%c1_36, %c0_37, %c0_38], %62 {strides = array<i32>} : memref<2x16x128xf32, #tpu.memory_space<vmem>>, vector<1x16x128xf32>,
    } else {
    }
    %3 = arith.cmpi sle, %arg2, %arg1 : i32
    %4 = arith.extui %3 : i1 to i32
    %c0_i32_1 = arith.constant 0 : i32
    %5 = arith.cmpi ne, %4, %c0_i32_1 : i32
    scf.if %5 {
      %c0 = arith.constant 0 : index
      %c0_3 = arith.constant 0 : index
      %9 = vector.load %arg4[%c0, %c0_3] : memref<16x128xbf16, #tpu.memory_space<vmem>>, vector<16x128xbf16>
      %10 = arith.extf %9 : vector<16x128xbf16> to vector<16x128xf32>
      %c0_4 = arith.constant 0 : index
      %c0_5 = arith.constant 0 : index
      %11 = vector.load %arg8[%c0_4, %c0_5] : memref<16x128xf32, #tpu.memory_space<vmem>>, vector<16x128xf32>
      %12 = arith.mulf %10, %11 : vector<16x128xf32>
      %13 = vector.extract_strided_slice %10 {offsets = [0, 64], sizes = [16, 64], strides = [1, 1]} : vector<16x128xf32> to vector<16x64xf32>
      %14 = vector.extract_strided_slice %10 {offsets = [0, 0], sizes = [16, 64], strides = [1, 1]} : vector<16x128xf32> to vector<16x64xf32>
      %15 = tpu.concatenate %13, %14 in 1 : vector<16x64xf32>, vector<16x64xf32> -> vector<16x128xf32>
      %c0_6 = arith.constant 0 : index
      %c0_7 = arith.constant 0 : index
      %16 = vector.load %arg9[%c0_6, %c0_7] : memref<16x128xf32, #tpu.memory_space<vmem>>, vector<16x128xf32>
      %17 = arith.mulf %15, %16 : vector<16x128xf32>
      %18 = arith.addf %12, %17 : vector<16x128xf32>
      %19 = arith.truncf %18 : vector<16x128xf32> to vector<16x128xbf16>
      %c0_8 = arith.constant 0 : index
      %c0_9 = arith.constant 0 : index
      %20 = vector.load %arg5[%c0_8, %c0_9] : memref<16x128xbf16, #tpu.memory_space<vmem>>, vector<16x128xbf16>
      %c16_i32 = arith.constant 16 : i32
      %21 = arith.muli %arg1, %c16_i32 : i32
      %22 = tpu.iota {dimensions = array<i32: 0>} : vector<16x16xi32>
      %23 = vector.broadcast %21 : i32 to vector<16x16xi32>
      %24 = arith.addi %23, %22 : vector<16x16xi32>
      %c16_i32_10 = arith.constant 16 : i32
      %25 = arith.muli %arg2, %c16_i32_10 : i32
      %26 = tpu.iota {dimensions = array<i32: 1>} : vector<16x16xi32>
      %27 = vector.broadcast %25 : i32 to vector<16x16xi32>
      %28 = arith.addi %27, %26 : vector<16x16xi32>
      %29 = arith.cmpi sle, %28, %24 : vector<16x16xi32>
      %c0_11 = arith.constant 0 : index
      %c0_12 = arith.constant 0 : index
      %c0_13 = arith.constant 0 : index
      %30 = vector.load %arg11[%c0_11, %c0_12, %c0_13] : memref<2x16x128xbf16, #tpu.memory_space<vmem>>, vector<1x16x128xbf16>
      %31 = vector.shape_cast %30 : vector<1x16x128xbf16> to vector<16x128xbf16>
      "tpu.trace_start"() <{level = 10 : i32, message = "qd,kd->qk"}> : () -> ()
      %cst = arith.constant dense<0.000000e+00> : vector<16x16xf32>
      %32 = tpu.matmul %31, %19, %cst {dimension_numbers = #tpu.dot_dimension_numbers<[1], [1], [0], [0], [0, 0, 1, 0], [], []>} : vector<16x128xbf16>, vector<16x128xbf16>, vector<16x16xf32> -> vector<16x16xf32>
      %cst_14 = arith.constant -1.000000e+30 : f32
      "tpu.trace_stop"() : () -> ()
      %33 = vector.broadcast %cst_14 : f32 to vector<16x16xf32>
      %34 = arith.select %29, %32, %33 : vector<16x16xi1>, vector<16x16xf32>
      %c0_15 = arith.constant 0 : index
      %c0_16 = arith.constant 0 : index
      %c0_17 = arith.constant 0 : index
      %35 = vector.load %arg12[%c0_15, %c0_16, %c0_17] : memref<2x16x1xf32, #tpu.memory_space<vmem>>, vector<1x16x1xf32>
      %36 = vector.shape_cast %35 : vector<1x16x1xf32> to vector<16x1xf32>
      %cst_18 = arith.constant dense<0xFF800000> : vector<16xf32>
      %37 = vector.multi_reduction <maximumf>, %34, %cst_18 [1] : vector<16x16xf32> to vector<16xf32>
      %38 = vector.shape_cast %37 : vector<16xf32> to vector<16x1xf32>
      %39 = arith.maximumf %36, %38 : vector<16x1xf32>
      %40 = arith.subf %36, %39 : vector<16x1xf32>
      %41 = math.exp %40 : vector<16x1xf32>
      %42 = vector.broadcast %39 : vector<16x1xf32> to vector<16x16xf32>
      %43 = arith.subf %34, %42 : vector<16x16xf32>
      %44 = math.exp %43 : vector<16x16xf32>
      %c0_19 = arith.constant 0 : index
      %c0_20 = arith.constant 0 : index
      %c0_21 = arith.constant 0 : index
      %45 = vector.load %arg13[%c0_19, %c0_20, %c0_21] : memref<2x16x1xf32, #tpu.memory_space<vmem>>, vector<1x16x1xf32>
      %46 = vector.shape_cast %45 : vector<1x16x1xf32> to vector<16x1xf32>
      %47 = arith.mulf %41, %46 : vector<16x1xf32>
      %cst_22 = arith.constant dense<0.000000e+00> : vector<16xf32>
      %48 = vector.multi_reduction <add>, %44, %cst_22 [1] : vector<16x16xf32> to vector<16xf32>
      %49 = vector.shape_cast %48 : vector<16xf32> to vector<16x1xf32>
      %50 = arith.addf %47, %49 : vector<16x1xf32>
      %c0_23 = arith.constant 0 : index
      %c0_24 = arith.constant 0 : index
      %c0_25 = arith.constant 0 : index
      %51 = vector.load %arg13[%c0_23, %c0_24, %c0_25] : memref<2x16x1xf32, #tpu.memory_space<vmem>>, vector<1x16x1xf32>
      %52 = vector.shape_cast %51 : vector<1x16x1xf32> to vector<16x1xf32>
      %53 = vector.shape_cast %50 : vector<16x1xf32> to vector<1x16x1xf32>
      tpu.vector_store %arg13[%c0_23, %c0_24, %c0_25], %53 {strides = array<i32>} : memref<2x16x1xf32, #tpu.memory_space<vmem>>, vector<1x16x1xf32>,
      %c0_26 = arith.constant 0 : index
      %c0_27 = arith.constant 0 : index
      %c0_28 = arith.constant 0 : index
      %54 = vector.load %arg14[%c0_26, %c0_27, %c0_28] : memref<2x16x128xf32, #tpu.memory_space<vmem>>, vector<1x16x128xf32>
      %55 = vector.shape_cast %54 : vector<1x16x128xf32> to vector<16x128xf32>
      %56 = vector.broadcast %41 : vector<16x1xf32> to vector<16x128xf32>
      %57 = arith.mulf %56, %55 : vector<16x128xf32>
      %58 = arith.truncf %44 : vector<16x16xf32> to vector<16x16xbf16>
      "tpu.trace_start"() <{level = 10 : i32, message = "qk,kd->qd"}> : () -> ()
      %cst_29 = arith.constant dense<0.000000e+00> : vector<16x128xf32>
      %59 = tpu.matmul %58, %20, %cst_29 {dimension_numbers = #tpu.dot_dimension_numbers<[1], [0], [0], [1], [0, 0, 1, 1], [], []>} : vector<16x16xbf16>, vector<16x128xbf16>, vector<16x128xf32> -> vector<16x128xf32>
      "tpu.trace_stop"() : () -> ()
      %60 = arith.addf %57, %59 : vector<16x128xf32>
      %c0_30 = arith.constant 0 : index
      %c0_31 = arith.constant 0 : index
      %c0_32 = arith.constant 0 : index
      %61 = vector.load %arg14[%c0_30, %c0_31, %c0_32] : memref<2x16x128xf32, #tpu.memory_space<vmem>>, vector<1x16x128xf32>
      %62 = vector.shape_cast %61 : vector<1x16x128xf32> to vector<16x128xf32>
      %63 = vector.shape_cast %60 : vector<16x128xf32> to vector<1x16x128xf32>
      tpu.vector_store %arg14[%c0_30, %c0_31, %c0_32], %63 {strides = array<i32>} : memref<2x16x128xf32, #tpu.memory_space<vmem>>, vector<1x16x128xf32>,
      %c0_33 = arith.constant 0 : index
      %c0_34 = arith.constant 0 : index
      %c0_35 = arith.constant 0 : index
      %64 = vector.load %arg12[%c0_33, %c0_34, %c0_35] : memref<2x16x1xf32, #tpu.memory_space<vmem>>, vector<1x16x1xf32>
      %65 = vector.shape_cast %64 : vector<1x16x1xf32> to vector<16x1xf32>
      %66 = vector.shape_cast %39 : vector<16x1xf32> to vector<1x16x1xf32>
      tpu.vector_store %arg12[%c0_33, %c0_34, %c0_35], %66 {strides = array<i32>} : memref<2x16x1xf32, #tpu.memory_space<vmem>>, vector<1x16x1xf32>,
      %c1 = arith.constant 1 : index
      %c0_36 = arith.constant 0 : index
      %c0_37 = arith.constant 0 : index
      %67 = vector.load %arg11[%c1, %c0_36, %c0_37] : memref<2x16x128xbf16, #tpu.memory_space<vmem>>, vector<1x16x128xbf16>
      %68 = vector.shape_cast %67 : vector<1x16x128xbf16> to vector<16x128xbf16>
      "tpu.trace_start"() <{level = 10 : i32, message = "qd,kd->qk"}> : () -> ()
      %cst_38 = arith.constant dense<0.000000e+00> : vector<16x16xf32>
      %69 = tpu.matmul %68, %19, %cst_38 {dimension_numbers = #tpu.dot_dimension_numbers<[1], [1], [0], [0], [0, 0, 1, 0], [], []>} : vector<16x128xbf16>, vector<16x128xbf16>, vector<16x16xf32> -> vector<16x16xf32>
      %cst_39 = arith.constant -1.000000e+30 : f32
      "tpu.trace_stop"() : () -> ()
      %70 = vector.broadcast %cst_39 : f32 to vector<16x16xf32>
      %71 = arith.select %29, %69, %70 : vector<16x16xi1>, vector<16x16xf32>
      %c1_40 = arith.constant 1 : index
      %c0_41 = arith.constant 0 : index
      %c0_42 = arith.constant 0 : index
      %72 = vector.load %arg12[%c1_40, %c0_41, %c0_42] : memref<2x16x1xf32, #tpu.memory_space<vmem>>, vector<1x16x1xf32>
      %73 = vector.shape_cast %72 : vector<1x16x1xf32> to vector<16x1xf32>
      %cst_43 = arith.constant dense<0xFF800000> : vector<16xf32>
      %74 = vector.multi_reduction <maximumf>, %71, %cst_43 [1] : vector<16x16xf32> to vector<16xf32>
      %75 = vector.shape_cast %74 : vector<16xf32> to vector<16x1xf32>
      %76 = arith.maximumf %73, %75 : vector<16x1xf32>
      %77 = arith.subf %73, %76 : vector<16x1xf32>
      %78 = math.exp %77 : vector<16x1xf32>
      %79 = vector.broadcast %76 : vector<16x1xf32> to vector<16x16xf32>
      %80 = arith.subf %71, %79 : vector<16x16xf32>
      %81 = math.exp %80 : vector<16x16xf32>
      %c1_44 = arith.constant 1 : index
      %c0_45 = arith.constant 0 : index
      %c0_46 = arith.constant 0 : index
      %82 = vector.load %arg13[%c1_44, %c0_45, %c0_46] : memref<2x16x1xf32, #tpu.memory_space<vmem>>, vector<1x16x1xf32>
      %83 = vector.shape_cast %82 : vector<1x16x1xf32> to vector<16x1xf32>
      %84 = arith.mulf %78, %83 : vector<16x1xf32>
      %cst_47 = arith.constant dense<0.000000e+00> : vector<16xf32>
      %85 = vector.multi_reduction <add>, %81, %cst_47 [1] : vector<16x16xf32> to vector<16xf32>
      %86 = vector.shape_cast %85 : vector<16xf32> to vector<16x1xf32>
      %87 = arith.addf %84, %86 : vector<16x1xf32>
      %c1_48 = arith.constant 1 : index
      %c0_49 = arith.constant 0 : index
      %c0_50 = arith.constant 0 : index
      %88 = vector.load %arg13[%c1_48, %c0_49, %c0_50] : memref<2x16x1xf32, #tpu.memory_space<vmem>>, vector<1x16x1xf32>
      %89 = vector.shape_cast %88 : vector<1x16x1xf32> to vector<16x1xf32>
      %90 = vector.shape_cast %87 : vector<16x1xf32> to vector<1x16x1xf32>
      tpu.vector_store %arg13[%c1_48, %c0_49, %c0_50], %90 {strides = array<i32>} : memref<2x16x1xf32, #tpu.memory_space<vmem>>, vector<1x16x1xf32>,
      %c1_51 = arith.constant 1 : index
      %c0_52 = arith.constant 0 : index
      %c0_53 = arith.constant 0 : index
      %91 = vector.load %arg14[%c1_51, %c0_52, %c0_53] : memref<2x16x128xf32, #tpu.memory_space<vmem>>, vector<1x16x128xf32>
      %92 = vector.shape_cast %91 : vector<1x16x128xf32> to vector<16x128xf32>
      %93 = vector.broadcast %78 : vector<16x1xf32> to vector<16x128xf32>
      %94 = arith.mulf %93, %92 : vector<16x128xf32>
      %95 = arith.truncf %81 : vector<16x16xf32> to vector<16x16xbf16>
      "tpu.trace_start"() <{level = 10 : i32, message = "qk,kd->qd"}> : () -> ()
      %cst_54 = arith.constant dense<0.000000e+00> : vector<16x128xf32>
      %96 = tpu.matmul %95, %20, %cst_54 {dimension_numbers = #tpu.dot_dimension_numbers<[1], [0], [0], [1], [0, 0, 1, 1], [], []>} : vector<16x16xbf16>, vector<16x128xbf16>, vector<16x128xf32> -> vector<16x128xf32>
      "tpu.trace_stop"() : () -> ()
      %97 = arith.addf %94, %96 : vector<16x128xf32>
      %c1_55 = arith.constant 1 : index
      %c0_56 = arith.constant 0 : index
      %c0_57 = arith.constant 0 : index
      %98 = vector.load %arg14[%c1_55, %c0_56, %c0_57] : memref<2x16x128xf32, #tpu.memory_space<vmem>>, vector<1x16x128xf32>
      %99 = vector.shape_cast %98 : vector<1x16x128xf32> to vector<16x128xf32>
      %100 = vector.shape_cast %97 : vector<16x128xf32> to vector<1x16x128xf32>
      tpu.vector_store %arg14[%c1_55, %c0_56, %c0_57], %100 {strides = array<i32>} : memref<2x16x128xf32, #tpu.memory_space<vmem>>, vector<1x16x128xf32>,
      %c1_58 = arith.constant 1 : index
      %c0_59 = arith.constant 0 : index
      %c0_60 = arith.constant 0 : index
      %101 = vector.load %arg12[%c1_58, %c0_59, %c0_60] : memref<2x16x1xf32, #tpu.memory_space<vmem>>, vector<1x16x1xf32>
      %102 = vector.shape_cast %101 : vector<1x16x1xf32> to vector<16x1xf32>
      %103 = vector.shape_cast %76 : vector<16x1xf32> to vector<1x16x1xf32>
      tpu.vector_store %arg12[%c1_58, %c0_59, %c0_60], %103 {strides = array<i32>} : memref<2x16x1xf32, #tpu.memory_space<vmem>>, vector<1x16x1xf32>,
    } else {
    }
    %6 = arith.cmpi eq, %arg2, %arg1 : i32
    %7 = arith.extui %6 : i1 to i32
    %c0_i32_2 = arith.constant 0 : i32
    %8 = arith.cmpi ne, %7, %c0_i32_2 : i32
    scf.if %8 {
      %c0 = arith.constant 0 : index
      %c0_3 = arith.constant 0 : index
      %c0_4 = arith.constant 0 : index
      %9 = vector.load %arg13[%c0, %c0_3, %c0_4] : memref<2x16x1xf32, #tpu.memory_space<vmem>>, vector<1x16x1xf32>
      %10 = vector.shape_cast %9 : vector<1x16x1xf32> to vector<16x1xf32>
      %cst = arith.constant 1.000000e+00 : f32
      %11 = vector.broadcast %cst : f32 to vector<16x1xf32>
      %12 = arith.divf %11, %10 : vector<16x1xf32>
      %c0_5 = arith.constant 0 : index
      %c0_6 = arith.constant 0 : index
      %c0_7 = arith.constant 0 : index
      %13 = vector.load %arg14[%c0_5, %c0_6, %c0_7] : memref<2x16x128xf32, #tpu.memory_space<vmem>>, vector<1x16x128xf32>
      %14 = vector.shape_cast %13 : vector<1x16x128xf32> to vector<16x128xf32>
      %15 = vector.broadcast %12 : vector<16x1xf32> to vector<16x128xf32>
      %16 = arith.mulf %14, %15 : vector<16x128xf32>
      %17 = arith.truncf %16 : vector<16x128xf32> to vector<16x128xbf16>
      %c0_8 = arith.constant 0 : index
      %c0_9 = arith.constant 0 : index
      %18 = vector.load %arg10[%c0_8, %c0_9] : memref<16x256xbf16, #tpu.memory_space<vmem>>, vector<16x128xbf16>
      tpu.vector_store %arg10[%c0_8, %c0_9], %17 {strides = array<i32>} : memref<16x256xbf16, #tpu.memory_space<vmem>>, vector<16x128xbf16>,
      %c1 = arith.constant 1 : index
      %c0_10 = arith.constant 0 : index
      %c0_11 = arith.constant 0 : index
      %19 = vector.load %arg13[%c1, %c0_10, %c0_11] : memref<2x16x1xf32, #tpu.memory_space<vmem>>, vector<1x16x1xf32>
      %20 = vector.shape_cast %19 : vector<1x16x1xf32> to vector<16x1xf32>
      %cst_12 = arith.constant 1.000000e+00 : f32
      %21 = vector.broadcast %cst_12 : f32 to vector<16x1xf32>
      %22 = arith.divf %21, %20 : vector<16x1xf32>
      %c1_13 = arith.constant 1 : index
      %c0_14 = arith.constant 0 : index
      %c0_15 = arith.constant 0 : index
      %23 = vector.load %arg14[%c1_13, %c0_14, %c0_15] : memref<2x16x128xf32, #tpu.memory_space<vmem>>, vector<1x16x128xf32>
      %24 = vector.shape_cast %23 : vector<1x16x128xf32> to vector<16x128xf32>
      %25 = vector.broadcast %22 : vector<16x1xf32> to vector<16x128xf32>
      %26 = arith.mulf %24, %25 : vector<16x128xf32>
      %27 = arith.truncf %26 : vector<16x128xf32> to vector<16x128xbf16>
      %c0_16 = arith.constant 0 : index
      %c128 = arith.constant 128 : index
      %28 = vector.load %arg10[%c0_16, %c128] : memref<16x256xbf16, #tpu.memory_space<vmem>>, vector<16x128xbf16>
      tpu.vector_store %arg10[%c0_16, %c128], %27 {strides = array<i32>} : memref<16x256xbf16, #tpu.memory_space<vmem>>, vector<16x128xbf16>,
    } else {
    }
    return
  }
  func.func @transform_0(%arg0: i32, %arg1: i32, %arg2: i32) -> (i32, i32) {
    %c0_i32 = arith.constant 0 : i32
    return %arg1, %arg0 : i32, i32
  }
  func.func @transform_1(%arg0: i32, %arg1: i32, %arg2: i32) -> (i32, i32) {
    %0 = arith.minsi %arg2, %arg1 : i32
    %c4_i32 = arith.constant 4 : i32
    %1 = arith.addi %c4_i32, %arg0 : i32
    %c0_i32 = arith.constant 0 : i32
    return %0, %1 : i32, i32
  }
  func.func @transform_2(%arg0: i32, %arg1: i32, %arg2: i32) -> (i32, i32) {
    %0 = arith.minsi %arg2, %arg1 : i32
    %c6_i32 = arith.constant 6 : i32
    %1 = arith.addi %c6_i32, %arg0 : i32
    %c0_i32 = arith.constant 0 : i32
    return %0, %1 : i32, i32
  }
  func.func @transform_3(%arg0: i32, %arg1: i32, %arg2: i32) -> (i32, i32) {
    %c0_i32 = arith.constant 0 : i32
    %c0_i32_0 = arith.constant 0 : i32
    return %arg1, %c0_i32 : i32, i32
  }
  func.func @transform_4(%arg0: i32, %arg1: i32, %arg2: i32) -> (i32, i32) {
    %c0_i32 = arith.constant 0 : i32
    %c0_i32_0 = arith.constant 0 : i32
    return %arg1, %c0_i32 : i32, i32
  }
  func.func @transform_5(%arg0: i32, %arg1: i32, %arg2: i32) -> (i32, i32) {
    %0 = arith.minsi %arg2, %arg1 : i32
    %c0_i32 = arith.constant 0 : i32
    %c0_i32_0 = arith.constant 0 : i32
    return %0, %c0_i32 : i32, i32
  }
  func.func @transform_6(%arg0: i32, %arg1: i32, %arg2: i32) -> (i32, i32) {
    %0 = arith.minsi %arg2, %arg1 : i32
    %c0_i32 = arith.constant 0 : i32
    %c0_i32_0 = arith.constant 0 : i32
    return %0, %c0_i32 : i32, i32
  }
  func.func @transform_7(%arg0: i32, %arg1: i32, %arg2: i32) -> (i32, i32) {
    %c0_i32 = arith.constant 0 : i32
    return %arg1, %arg0 : i32, i32
  }
}

module attributes {stable_mosaic.version = 11 : i64} {
  func.func @_matmul_kernel(%arg0: i32, %arg1: i32, %arg2: i32, %arg3: memref<16x512xbf16, #tpu.memory_space<vmem>>, %arg4: memref<512x512xbf16, #tpu.memory_space<vmem>>, %arg5: memref<16x512xbf16, #tpu.memory_space<vmem>>, %arg6: memref<16x512xf32, #tpu.memory_space<vmem>>) attributes {dimension_semantics = [#tpu.dimension_semantics<parallel>, #tpu.dimension_semantics<parallel>, #tpu.dimension_semantics<arbitrary>], iteration_bounds = array<i64: 1, 1, 1>, scalar_prefetch = 0 : i64, scratch_operands = 1 : i64, tpu.core_type = #tpu.core_type<tc>, window_params = [{transform_indices = @transform_0, window_bounds = array<i64: 16, 512>}, {transform_indices = @transform_1, window_bounds = array<i64: 512, 512>}, {transform_indices = @transform_2, window_bounds = array<i64: 16, 512>}]} {
    %c0_i32 = arith.constant 0 : i32
    %0 = arith.cmpi eq, %arg2, %c0_i32 : i32
    %1 = arith.extui %0 : i1 to i32
    %c0_i32_0 = arith.constant 0 : i32
    %2 = arith.cmpi ne, %1, %c0_i32_0 : i32
    scf.if %2 {
      %cst_10 = arith.constant 0.000000e+00 : f32
      %12 = vector.broadcast %cst_10 : f32 to vector<16x512xf32>
      %c0_11 = arith.constant 0 : index
      %c0_12 = arith.constant 0 : index
      %13 = vector.load %arg6[%c0_11, %c0_12] : memref<16x512xf32, #tpu.memory_space<vmem>>, vector<16x512xf32>
      tpu.vector_store %arg6[%c0_11, %c0_12], %12 {strides = array<i32>} : memref<16x512xf32, #tpu.memory_space<vmem>>, vector<16x512xf32>,
    } else {
    }
    %c0 = arith.constant 0 : index
    %c0_1 = arith.constant 0 : index
    %3 = vector.load %arg6[%c0, %c0_1] : memref<16x512xf32, #tpu.memory_space<vmem>>, vector<16x512xf32>
    %c0_2 = arith.constant 0 : index
    %c0_3 = arith.constant 0 : index
    %4 = vector.load %arg3[%c0_2, %c0_3] : memref<16x512xbf16, #tpu.memory_space<vmem>>, vector<16x512xbf16>
    %c0_4 = arith.constant 0 : index
    %c0_5 = arith.constant 0 : index
    %5 = vector.load %arg4[%c0_4, %c0_5] : memref<512x512xbf16, #tpu.memory_space<vmem>>, vector<512x512xbf16>
    %cst = arith.constant dense<0.000000e+00> : vector<16x512xf32>
    %6 = tpu.matmul %4, %5, %cst {dimension_numbers = #tpu.dot_dimension_numbers<[1], [0], [0], [1], [0, 0, 1, 1], [], []>} : vector<16x512xbf16>, vector<512x512xbf16>, vector<16x512xf32> -> vector<16x512xf32>
    %7 = arith.addf %3, %6 : vector<16x512xf32>
    %c0_6 = arith.constant 0 : index
    %c0_7 = arith.constant 0 : index
    %8 = vector.load %arg6[%c0_6, %c0_7] : memref<16x512xf32, #tpu.memory_space<vmem>>, vector<16x512xf32>
    tpu.vector_store %arg6[%c0_6, %c0_7], %7 {strides = array<i32>} : memref<16x512xf32, #tpu.memory_space<vmem>>, vector<16x512xf32>,
    %c0_i32_8 = arith.constant 0 : i32
    %9 = arith.cmpi eq, %arg2, %c0_i32_8 : i32
    %10 = arith.extui %9 : i1 to i32
    %c0_i32_9 = arith.constant 0 : i32
    %11 = arith.cmpi ne, %10, %c0_i32_9 : i32
    scf.if %11 {
      %c0_10 = arith.constant 0 : index
      %c0_11 = arith.constant 0 : index
      %12 = vector.load %arg6[%c0_10, %c0_11] : memref<16x512xf32, #tpu.memory_space<vmem>>, vector<16x512xf32>
      %13 = arith.truncf %12 : vector<16x512xf32> to vector<16x512xbf16>
      %c0_12 = arith.constant 0 : index
      %c0_13 = arith.constant 0 : index
      %14 = vector.load %arg5[%c0_12, %c0_13] : memref<16x512xbf16, #tpu.memory_space<vmem>>, vector<16x512xbf16>
      tpu.vector_store %arg5[%c0_12, %c0_13], %13 {strides = array<i32>} : memref<16x512xbf16, #tpu.memory_space<vmem>>, vector<16x512xbf16>,
    } else {
    }
    return
  }
  func.func @transform_0(%arg0: i32, %arg1: i32, %arg2: i32) -> (i32, i32) {
    %c0_i32 = arith.constant 0 : i32
    return %arg0, %arg2 : i32, i32
  }
  func.func @transform_1(%arg0: i32, %arg1: i32, %arg2: i32) -> (i32, i32) {
    %c0_i32 = arith.constant 0 : i32
    return %arg2, %arg1 : i32, i32
  }
  func.func @transform_2(%arg0: i32, %arg1: i32, %arg2: i32) -> (i32, i32) {
    %c0_i32 = arith.constant 0 : i32
    return %arg0, %arg1 : i32, i32
  }
}

module attributes {stable_mosaic.version = 11 : i64} {
  func.func @_rmsnorm_add_kernel(%arg0: i32, %arg1: memref<16x512xbf16, #tpu.memory_space<vmem>>, %arg2: memref<16x512xbf16, #tpu.memory_space<vmem>>, %arg3: memref<1x512xbf16, #tpu.memory_space<vmem>>, %arg4: memref<16x512xbf16, #tpu.memory_space<vmem>>, %arg5: memref<16x512xbf16, #tpu.memory_space<vmem>>) attributes {dimension_semantics = [#tpu.dimension_semantics<parallel>], iteration_bounds = array<i64: 1>, scalar_prefetch = 0 : i64, scratch_operands = 0 : i64, tpu.core_type = #tpu.core_type<tc>, window_params = [{transform_indices = @transform_0, window_bounds = array<i64: 16, 512>}, {transform_indices = @transform_1, window_bounds = array<i64: 16, 512>}, {pipeline_mode = #tpu.pipeline_mode<synchronous>, transform_indices = @transform_2, window_bounds = array<i64: 1, 512>}, {transform_indices = @transform_3, window_bounds = array<i64: 16, 512>}, {transform_indices = @transform_4, window_bounds = array<i64: 16, 512>}]} {
    %c0 = arith.constant 0 : index
    %c0_0 = arith.constant 0 : index
    %0 = vector.load %arg1[%c0, %c0_0] : memref<16x512xbf16, #tpu.memory_space<vmem>>, vector<16x512xbf16>
    %1 = arith.extf %0 : vector<16x512xbf16> to vector<16x512xf32>
    %c0_1 = arith.constant 0 : index
    %c0_2 = arith.constant 0 : index
    %2 = vector.load %arg2[%c0_1, %c0_2] : memref<16x512xbf16, #tpu.memory_space<vmem>>, vector<16x512xbf16>
    %3 = arith.extf %2 : vector<16x512xbf16> to vector<16x512xf32>
    %4 = arith.addf %1, %3 : vector<16x512xf32>
    %5 = arith.truncf %4 : vector<16x512xf32> to vector<16x512xbf16>
    %c0_3 = arith.constant 0 : index
    %c0_4 = arith.constant 0 : index
    %6 = vector.load %arg5[%c0_3, %c0_4] : memref<16x512xbf16, #tpu.memory_space<vmem>>, vector<16x512xbf16>
    tpu.vector_store %arg5[%c0_3, %c0_4], %5 {strides = array<i32>} : memref<16x512xbf16, #tpu.memory_space<vmem>>, vector<16x512xbf16>,
    %7 = arith.mulf %4, %4 : vector<16x512xf32>
    %cst = arith.constant dense<0.000000e+00> : vector<16xf32>
    %8 = vector.multi_reduction <add>, %7, %cst [1] : vector<16x512xf32> to vector<16xf32>
    %9 = vector.shape_cast %8 : vector<16xf32> to vector<16x1xf32>
    %cst_5 = arith.constant 5.120000e+02 : f32
    %10 = vector.broadcast %cst_5 : f32 to vector<16x1xf32>
    %11 = arith.divf %9, %10 : vector<16x1xf32>
    %cst_6 = arith.constant 9.99999997E-7 : f32
    %12 = vector.broadcast %cst_6 : f32 to vector<16x1xf32>
    %13 = arith.addf %11, %12 : vector<16x1xf32>
    %14 = math.rsqrt %13 : vector<16x1xf32>
    %15 = vector.broadcast %14 : vector<16x1xf32> to vector<16x512xf32>
    %16 = arith.mulf %4, %15 : vector<16x512xf32>
    %c0_7 = arith.constant 0 : index
    %c0_8 = arith.constant 0 : index
    %17 = vector.load %arg3[%c0_7, %c0_8] : memref<1x512xbf16, #tpu.memory_space<vmem>>, vector<1x512xbf16>
    %18 = arith.extf %17 : vector<1x512xbf16> to vector<1x512xf32>
    %19 = vector.broadcast %18 : vector<1x512xf32> to vector<16x512xf32>
    %20 = arith.mulf %16, %19 : vector<16x512xf32>
    %21 = arith.truncf %20 : vector<16x512xf32> to vector<16x512xbf16>
    %c0_9 = arith.constant 0 : index
    %c0_10 = arith.constant 0 : index
    %22 = vector.load %arg4[%c0_9, %c0_10] : memref<16x512xbf16, #tpu.memory_space<vmem>>, vector<16x512xbf16>
    tpu.vector_store %arg4[%c0_9, %c0_10], %21 {strides = array<i32>} : memref<16x512xbf16, #tpu.memory_space<vmem>>, vector<16x512xbf16>,
    return
  }
  func.func @transform_0(%arg0: i32) -> (i32, i32) {
    %c0_i32 = arith.constant 0 : i32
    %c0_i32_0 = arith.constant 0 : i32
    return %arg0, %c0_i32 : i32, i32
  }
  func.func @transform_1(%arg0: i32) -> (i32, i32) {
    %c0_i32 = arith.constant 0 : i32
    %c0_i32_0 = arith.constant 0 : i32
    return %arg0, %c0_i32 : i32, i32
  }
  func.func @transform_2(%arg0: i32) -> (i32, i32) {
    %c0_i32 = arith.constant 0 : i32
    %c0_i32_0 = arith.constant 0 : i32
    %c0_i32_1 = arith.constant 0 : i32
    return %c0_i32, %c0_i32_0 : i32, i32
  }
  func.func @transform_3(%arg0: i32) -> (i32, i32) {
    %c0_i32 = arith.constant 0 : i32
    %c0_i32_0 = arith.constant 0 : i32
    return %arg0, %c0_i32 : i32, i32
  }
  func.func @transform_4(%arg0: i32) -> (i32, i32) {
    %c0_i32 = arith.constant 0 : i32
    %c0_i32_0 = arith.constant 0 : i32
    return %arg0, %c0_i32 : i32, i32
  }
}

module attributes {stable_mosaic.version = 11 : i64} {
  func.func @_gate_up_kernel(%arg0: i32, %arg1: i32, %arg2: i32, %arg3: memref<16x512xbf16, #tpu.memory_space<vmem>>, %arg4: memref<512x512xbf16, #tpu.memory_space<vmem>>, %arg5: memref<512x512xbf16, #tpu.memory_space<vmem>>, %arg6: memref<16x512xbf16, #tpu.memory_space<vmem>>, %arg7: memref<16x512xf32, #tpu.memory_space<vmem>>, %arg8: memref<16x512xf32, #tpu.memory_space<vmem>>) attributes {dimension_semantics = [#tpu.dimension_semantics<parallel>, #tpu.dimension_semantics<parallel>, #tpu.dimension_semantics<arbitrary>], iteration_bounds = array<i64: 1, 2, 1>, scalar_prefetch = 0 : i64, scratch_operands = 2 : i64, tpu.core_type = #tpu.core_type<tc>, window_params = [{transform_indices = @transform_0, window_bounds = array<i64: 16, 512>}, {transform_indices = @transform_1, window_bounds = array<i64: 512, 512>}, {transform_indices = @transform_2, window_bounds = array<i64: 512, 512>}, {transform_indices = @transform_3, window_bounds = array<i64: 16, 512>}]} {
    %c0_i32 = arith.constant 0 : i32
    %0 = arith.cmpi eq, %arg2, %c0_i32 : i32
    %1 = arith.extui %0 : i1 to i32
    %c0_i32_0 = arith.constant 0 : i32
    %2 = arith.cmpi ne, %1, %c0_i32_0 : i32
    scf.if %2 {
      %cst_17 = arith.constant 0.000000e+00 : f32
      %17 = vector.broadcast %cst_17 : f32 to vector<16x512xf32>
      %c0_18 = arith.constant 0 : index
      %c0_19 = arith.constant 0 : index
      %18 = vector.load %arg7[%c0_18, %c0_19] : memref<16x512xf32, #tpu.memory_space<vmem>>, vector<16x512xf32>
      tpu.vector_store %arg7[%c0_18, %c0_19], %17 {strides = array<i32>} : memref<16x512xf32, #tpu.memory_space<vmem>>, vector<16x512xf32>,
      %cst_20 = arith.constant 0.000000e+00 : f32
      %19 = vector.broadcast %cst_20 : f32 to vector<16x512xf32>
      %c0_21 = arith.constant 0 : index
      %c0_22 = arith.constant 0 : index
      %20 = vector.load %arg8[%c0_21, %c0_22] : memref<16x512xf32, #tpu.memory_space<vmem>>, vector<16x512xf32>
      tpu.vector_store %arg8[%c0_21, %c0_22], %19 {strides = array<i32>} : memref<16x512xf32, #tpu.memory_space<vmem>>, vector<16x512xf32>,
    } else {
    }
    %c0 = arith.constant 0 : index
    %c0_1 = arith.constant 0 : index
    %3 = vector.load %arg3[%c0, %c0_1] : memref<16x512xbf16, #tpu.memory_space<vmem>>, vector<16x512xbf16>
    %c0_2 = arith.constant 0 : index
    %c0_3 = arith.constant 0 : index
    %4 = vector.load %arg7[%c0_2, %c0_3] : memref<16x512xf32, #tpu.memory_space<vmem>>, vector<16x512xf32>
    %c0_4 = arith.constant 0 : index
    %c0_5 = arith.constant 0 : index
    %5 = vector.load %arg4[%c0_4, %c0_5] : memref<512x512xbf16, #tpu.memory_space<vmem>>, vector<512x512xbf16>
    %cst = arith.constant dense<0.000000e+00> : vector<16x512xf32>
    %6 = tpu.matmul %3, %5, %cst {dimension_numbers = #tpu.dot_dimension_numbers<[1], [0], [0], [1], [0, 0, 1, 1], [], []>} : vector<16x512xbf16>, vector<512x512xbf16>, vector<16x512xf32> -> vector<16x512xf32>
    %7 = arith.addf %4, %6 : vector<16x512xf32>
    %c0_6 = arith.constant 0 : index
    %c0_7 = arith.constant 0 : index
    %8 = vector.load %arg7[%c0_6, %c0_7] : memref<16x512xf32, #tpu.memory_space<vmem>>, vector<16x512xf32>
    tpu.vector_store %arg7[%c0_6, %c0_7], %7 {strides = array<i32>} : memref<16x512xf32, #tpu.memory_space<vmem>>, vector<16x512xf32>,
    %c0_8 = arith.constant 0 : index
    %c0_9 = arith.constant 0 : index
    %9 = vector.load %arg8[%c0_8, %c0_9] : memref<16x512xf32, #tpu.memory_space<vmem>>, vector<16x512xf32>
    %c0_10 = arith.constant 0 : index
    %c0_11 = arith.constant 0 : index
    %10 = vector.load %arg5[%c0_10, %c0_11] : memref<512x512xbf16, #tpu.memory_space<vmem>>, vector<512x512xbf16>
    %cst_12 = arith.constant dense<0.000000e+00> : vector<16x512xf32>
    %11 = tpu.matmul %3, %10, %cst_12 {dimension_numbers = #tpu.dot_dimension_numbers<[1], [0], [0], [1], [0, 0, 1, 1], [], []>} : vector<16x512xbf16>, vector<512x512xbf16>, vector<16x512xf32> -> vector<16x512xf32>
    %12 = arith.addf %9, %11 : vector<16x512xf32>
    %c0_13 = arith.constant 0 : index
    %c0_14 = arith.constant 0 : index
    %13 = vector.load %arg8[%c0_13, %c0_14] : memref<16x512xf32, #tpu.memory_space<vmem>>, vector<16x512xf32>
    tpu.vector_store %arg8[%c0_13, %c0_14], %12 {strides = array<i32>} : memref<16x512xf32, #tpu.memory_space<vmem>>, vector<16x512xf32>,
    %c0_i32_15 = arith.constant 0 : i32
    %14 = arith.cmpi eq, %arg2, %c0_i32_15 : i32
    %15 = arith.extui %14 : i1 to i32
    %c0_i32_16 = arith.constant 0 : i32
    %16 = arith.cmpi ne, %15, %c0_i32_16 : i32
    scf.if %16 {
      %c0_17 = arith.constant 0 : index
      %c0_18 = arith.constant 0 : index
      %17 = vector.load %arg7[%c0_17, %c0_18] : memref<16x512xf32, #tpu.memory_space<vmem>>, vector<16x512xf32>
      %18 = arith.negf %17 : vector<16x512xf32>
      %19 = math.exp %18 : vector<16x512xf32>
      %cst_19 = arith.constant 1.000000e+00 : f32
      %20 = vector.broadcast %cst_19 : f32 to vector<16x512xf32>
      %21 = arith.addf %20, %19 : vector<16x512xf32>
      %22 = arith.divf %20, %21 : vector<16x512xf32>
      %23 = arith.mulf %17, %22 : vector<16x512xf32>
      %c0_20 = arith.constant 0 : index
      %c0_21 = arith.constant 0 : index
      %24 = vector.load %arg8[%c0_20, %c0_21] : memref<16x512xf32, #tpu.memory_space<vmem>>, vector<16x512xf32>
      %25 = arith.mulf %23, %24 : vector<16x512xf32>
      %26 = arith.truncf %25 : vector<16x512xf32> to vector<16x512xbf16>
      %c0_22 = arith.constant 0 : index
      %c0_23 = arith.constant 0 : index
      %27 = vector.load %arg6[%c0_22, %c0_23] : memref<16x512xbf16, #tpu.memory_space<vmem>>, vector<16x512xbf16>
      tpu.vector_store %arg6[%c0_22, %c0_23], %26 {strides = array<i32>} : memref<16x512xbf16, #tpu.memory_space<vmem>>, vector<16x512xbf16>,
    } else {
    }
    return
  }
  func.func @transform_0(%arg0: i32, %arg1: i32, %arg2: i32) -> (i32, i32) {
    %c0_i32 = arith.constant 0 : i32
    return %arg0, %arg2 : i32, i32
  }
  func.func @transform_1(%arg0: i32, %arg1: i32, %arg2: i32) -> (i32, i32) {
    %c0_i32 = arith.constant 0 : i32
    return %arg2, %arg1 : i32, i32
  }
  func.func @transform_2(%arg0: i32, %arg1: i32, %arg2: i32) -> (i32, i32) {
    %c0_i32 = arith.constant 0 : i32
    return %arg2, %arg1 : i32, i32
  }
  func.func @transform_3(%arg0: i32, %arg1: i32, %arg2: i32) -> (i32, i32) {
    %c0_i32 = arith.constant 0 : i32
    return %arg0, %arg1 : i32, i32
  }
}

module attributes {stable_mosaic.version = 11 : i64} {
  func.func @_matmul_kernel(%arg0: i32, %arg1: i32, %arg2: i32, %arg3: memref<16x512xbf16, #tpu.memory_space<vmem>>, %arg4: memref<512x512xbf16, #tpu.memory_space<vmem>>, %arg5: memref<16x512xbf16, #tpu.memory_space<vmem>>, %arg6: memref<16x512xf32, #tpu.memory_space<vmem>>) attributes {dimension_semantics = [#tpu.dimension_semantics<parallel>, #tpu.dimension_semantics<parallel>, #tpu.dimension_semantics<arbitrary>], iteration_bounds = array<i64: 1, 1, 2>, scalar_prefetch = 0 : i64, scratch_operands = 1 : i64, tpu.core_type = #tpu.core_type<tc>, window_params = [{transform_indices = @transform_0, window_bounds = array<i64: 16, 512>}, {transform_indices = @transform_1, window_bounds = array<i64: 512, 512>}, {transform_indices = @transform_2, window_bounds = array<i64: 16, 512>}]} {
    %c0_i32 = arith.constant 0 : i32
    %0 = arith.cmpi eq, %arg2, %c0_i32 : i32
    %1 = arith.extui %0 : i1 to i32
    %c0_i32_0 = arith.constant 0 : i32
    %2 = arith.cmpi ne, %1, %c0_i32_0 : i32
    scf.if %2 {
      %cst_9 = arith.constant 0.000000e+00 : f32
      %12 = vector.broadcast %cst_9 : f32 to vector<16x512xf32>
      %c0_10 = arith.constant 0 : index
      %c0_11 = arith.constant 0 : index
      %13 = vector.load %arg6[%c0_10, %c0_11] : memref<16x512xf32, #tpu.memory_space<vmem>>, vector<16x512xf32>
      tpu.vector_store %arg6[%c0_10, %c0_11], %12 {strides = array<i32>} : memref<16x512xf32, #tpu.memory_space<vmem>>, vector<16x512xf32>,
    } else {
    }
    %c0 = arith.constant 0 : index
    %c0_1 = arith.constant 0 : index
    %3 = vector.load %arg6[%c0, %c0_1] : memref<16x512xf32, #tpu.memory_space<vmem>>, vector<16x512xf32>
    %c0_2 = arith.constant 0 : index
    %c0_3 = arith.constant 0 : index
    %4 = vector.load %arg3[%c0_2, %c0_3] : memref<16x512xbf16, #tpu.memory_space<vmem>>, vector<16x512xbf16>
    %c0_4 = arith.constant 0 : index
    %c0_5 = arith.constant 0 : index
    %5 = vector.load %arg4[%c0_4, %c0_5] : memref<512x512xbf16, #tpu.memory_space<vmem>>, vector<512x512xbf16>
    %cst = arith.constant dense<0.000000e+00> : vector<16x512xf32>
    %6 = tpu.matmul %4, %5, %cst {dimension_numbers = #tpu.dot_dimension_numbers<[1], [0], [0], [1], [0, 0, 1, 1], [], []>} : vector<16x512xbf16>, vector<512x512xbf16>, vector<16x512xf32> -> vector<16x512xf32>
    %7 = arith.addf %3, %6 : vector<16x512xf32>
    %c0_6 = arith.constant 0 : index
    %c0_7 = arith.constant 0 : index
    %8 = vector.load %arg6[%c0_6, %c0_7] : memref<16x512xf32, #tpu.memory_space<vmem>>, vector<16x512xf32>
    tpu.vector_store %arg6[%c0_6, %c0_7], %7 {strides = array<i32>} : memref<16x512xf32, #tpu.memory_space<vmem>>, vector<16x512xf32>,
    %c1_i32 = arith.constant 1 : i32
    %9 = arith.cmpi eq, %arg2, %c1_i32 : i32
    %10 = arith.extui %9 : i1 to i32
    %c0_i32_8 = arith.constant 0 : i32
    %11 = arith.cmpi ne, %10, %c0_i32_8 : i32
    scf.if %11 {
      %c0_9 = arith.constant 0 : index
      %c0_10 = arith.constant 0 : index
      %12 = vector.load %arg6[%c0_9, %c0_10] : memref<16x512xf32, #tpu.memory_space<vmem>>, vector<16x512xf32>
      %cst_11 = arith.constant 0.899999976 : f32
      %13 = vector.broadcast %cst_11 : f32 to vector<16x512xf32>
      %14 = arith.mulf %12, %13 : vector<16x512xf32>
      %15 = arith.truncf %14 : vector<16x512xf32> to vector<16x512xbf16>
      %c0_12 = arith.constant 0 : index
      %c0_13 = arith.constant 0 : index
      %16 = vector.load %arg5[%c0_12, %c0_13] : memref<16x512xbf16, #tpu.memory_space<vmem>>, vector<16x512xbf16>
      tpu.vector_store %arg5[%c0_12, %c0_13], %15 {strides = array<i32>} : memref<16x512xbf16, #tpu.memory_space<vmem>>, vector<16x512xbf16>,
    } else {
    }
    return
  }
  func.func @transform_0(%arg0: i32, %arg1: i32, %arg2: i32) -> (i32, i32) {
    %c0_i32 = arith.constant 0 : i32
    return %arg0, %arg2 : i32, i32
  }
  func.func @transform_1(%arg0: i32, %arg1: i32, %arg2: i32) -> (i32, i32) {
    %c0_i32 = arith.constant 0 : i32
    return %arg2, %arg1 : i32, i32
  }
  func.func @transform_2(%arg0: i32, %arg1: i32, %arg2: i32) -> (i32, i32) {
    %c0_i32 = arith.constant 0 : i32
    return %arg0, %arg1 : i32, i32
  }
}

module attributes {stable_mosaic.version = 11 : i64} {
  func.func @_matmul_kernel(%arg0: i32, %arg1: i32, %arg2: i32, %arg3: memref<16x512xbf16, #tpu.memory_space<vmem>>, %arg4: memref<512x512xbf16, #tpu.memory_space<vmem>>, %arg5: memref<16x512xbf16, #tpu.memory_space<vmem>>, %arg6: memref<16x512xf32, #tpu.memory_space<vmem>>) attributes {dimension_semantics = [#tpu.dimension_semantics<parallel>, #tpu.dimension_semantics<parallel>, #tpu.dimension_semantics<arbitrary>], iteration_bounds = array<i64: 1, 2, 1>, scalar_prefetch = 0 : i64, scratch_operands = 1 : i64, tpu.core_type = #tpu.core_type<tc>, window_params = [{transform_indices = @transform_0, window_bounds = array<i64: 16, 512>}, {transform_indices = @transform_1, window_bounds = array<i64: 512, 512>}, {transform_indices = @transform_2, window_bounds = array<i64: 16, 512>}]} {
    %c0_i32 = arith.constant 0 : i32
    %0 = arith.cmpi eq, %arg2, %c0_i32 : i32
    %1 = arith.extui %0 : i1 to i32
    %c0_i32_0 = arith.constant 0 : i32
    %2 = arith.cmpi ne, %1, %c0_i32_0 : i32
    scf.if %2 {
      %cst_10 = arith.constant 0.000000e+00 : f32
      %12 = vector.broadcast %cst_10 : f32 to vector<16x512xf32>
      %c0_11 = arith.constant 0 : index
      %c0_12 = arith.constant 0 : index
      %13 = vector.load %arg6[%c0_11, %c0_12] : memref<16x512xf32, #tpu.memory_space<vmem>>, vector<16x512xf32>
      tpu.vector_store %arg6[%c0_11, %c0_12], %12 {strides = array<i32>} : memref<16x512xf32, #tpu.memory_space<vmem>>, vector<16x512xf32>,
    } else {
    }
    %c0 = arith.constant 0 : index
    %c0_1 = arith.constant 0 : index
    %3 = vector.load %arg6[%c0, %c0_1] : memref<16x512xf32, #tpu.memory_space<vmem>>, vector<16x512xf32>
    %c0_2 = arith.constant 0 : index
    %c0_3 = arith.constant 0 : index
    %4 = vector.load %arg3[%c0_2, %c0_3] : memref<16x512xbf16, #tpu.memory_space<vmem>>, vector<16x512xbf16>
    %c0_4 = arith.constant 0 : index
    %c0_5 = arith.constant 0 : index
    %5 = vector.load %arg4[%c0_4, %c0_5] : memref<512x512xbf16, #tpu.memory_space<vmem>>, vector<512x512xbf16>
    %cst = arith.constant dense<0.000000e+00> : vector<16x512xf32>
    %6 = tpu.matmul %4, %5, %cst {dimension_numbers = #tpu.dot_dimension_numbers<[1], [0], [0], [1], [0, 0, 1, 1], [], []>} : vector<16x512xbf16>, vector<512x512xbf16>, vector<16x512xf32> -> vector<16x512xf32>
    %7 = arith.addf %3, %6 : vector<16x512xf32>
    %c0_6 = arith.constant 0 : index
    %c0_7 = arith.constant 0 : index
    %8 = vector.load %arg6[%c0_6, %c0_7] : memref<16x512xf32, #tpu.memory_space<vmem>>, vector<16x512xf32>
    tpu.vector_store %arg6[%c0_6, %c0_7], %7 {strides = array<i32>} : memref<16x512xf32, #tpu.memory_space<vmem>>, vector<16x512xf32>,
    %c0_i32_8 = arith.constant 0 : i32
    %9 = arith.cmpi eq, %arg2, %c0_i32_8 : i32
    %10 = arith.extui %9 : i1 to i32
    %c0_i32_9 = arith.constant 0 : i32
    %11 = arith.cmpi ne, %10, %c0_i32_9 : i32
    scf.if %11 {
      %c0_10 = arith.constant 0 : index
      %c0_11 = arith.constant 0 : index
      %12 = vector.load %arg6[%c0_10, %c0_11] : memref<16x512xf32, #tpu.memory_space<vmem>>, vector<16x512xf32>
      %13 = arith.truncf %12 : vector<16x512xf32> to vector<16x512xbf16>
      %c0_12 = arith.constant 0 : index
      %c0_13 = arith.constant 0 : index
      %14 = vector.load %arg5[%c0_12, %c0_13] : memref<16x512xbf16, #tpu.memory_space<vmem>>, vector<16x512xbf16>
      tpu.vector_store %arg5[%c0_12, %c0_13], %13 {strides = array<i32>} : memref<16x512xbf16, #tpu.memory_space<vmem>>, vector<16x512xbf16>,
    } else {
    }
    return
  }
  func.func @transform_0(%arg0: i32, %arg1: i32, %arg2: i32) -> (i32, i32) {
    %c0_i32 = arith.constant 0 : i32
    return %arg0, %arg2 : i32, i32
  }
  func.func @transform_1(%arg0: i32, %arg1: i32, %arg2: i32) -> (i32, i32) {
    %c0_i32 = arith.constant 0 : i32
    return %arg2, %arg1 : i32, i32
  }
  func.func @transform_2(%arg0: i32, %arg1: i32, %arg2: i32) -> (i32, i32) {
    %c0_i32 = arith.constant 0 : i32
    return %arg0, %arg1 : i32, i32
  }
}

module attributes {stable_mosaic.version = 11 : i64} {
  func.func @_matmul_kernel(%arg0: i32, %arg1: i32, %arg2: i32, %arg3: memref<16x512xbf16, #tpu.memory_space<vmem>>, %arg4: memref<512x512xbf16, #tpu.memory_space<vmem>>, %arg5: memref<16x512xbf16, #tpu.memory_space<vmem>>, %arg6: memref<16x512xf32, #tpu.memory_space<vmem>>) attributes {dimension_semantics = [#tpu.dimension_semantics<parallel>, #tpu.dimension_semantics<parallel>, #tpu.dimension_semantics<arbitrary>], iteration_bounds = array<i64: 1, 1, 1>, scalar_prefetch = 0 : i64, scratch_operands = 1 : i64, tpu.core_type = #tpu.core_type<tc>, window_params = [{transform_indices = @transform_0, window_bounds = array<i64: 16, 512>}, {transform_indices = @transform_1, window_bounds = array<i64: 512, 512>}, {transform_indices = @transform_2, window_bounds = array<i64: 16, 512>}]} {
    %c0_i32 = arith.constant 0 : i32
    %0 = arith.cmpi eq, %arg2, %c0_i32 : i32
    %1 = arith.extui %0 : i1 to i32
    %c0_i32_0 = arith.constant 0 : i32
    %2 = arith.cmpi ne, %1, %c0_i32_0 : i32
    scf.if %2 {
      %cst_10 = arith.constant 0.000000e+00 : f32
      %12 = vector.broadcast %cst_10 : f32 to vector<16x512xf32>
      %c0_11 = arith.constant 0 : index
      %c0_12 = arith.constant 0 : index
      %13 = vector.load %arg6[%c0_11, %c0_12] : memref<16x512xf32, #tpu.memory_space<vmem>>, vector<16x512xf32>
      tpu.vector_store %arg6[%c0_11, %c0_12], %12 {strides = array<i32>} : memref<16x512xf32, #tpu.memory_space<vmem>>, vector<16x512xf32>,
    } else {
    }
    %c0 = arith.constant 0 : index
    %c0_1 = arith.constant 0 : index
    %3 = vector.load %arg6[%c0, %c0_1] : memref<16x512xf32, #tpu.memory_space<vmem>>, vector<16x512xf32>
    %c0_2 = arith.constant 0 : index
    %c0_3 = arith.constant 0 : index
    %4 = vector.load %arg3[%c0_2, %c0_3] : memref<16x512xbf16, #tpu.memory_space<vmem>>, vector<16x512xbf16>
    %c0_4 = arith.constant 0 : index
    %c0_5 = arith.constant 0 : index
    %5 = vector.load %arg4[%c0_4, %c0_5] : memref<512x512xbf16, #tpu.memory_space<vmem>>, vector<512x512xbf16>
    %cst = arith.constant dense<0.000000e+00> : vector<16x512xf32>
    %6 = tpu.matmul %4, %5, %cst {dimension_numbers = #tpu.dot_dimension_numbers<[1], [0], [0], [1], [0, 0, 1, 1], [], []>} : vector<16x512xbf16>, vector<512x512xbf16>, vector<16x512xf32> -> vector<16x512xf32>
    %7 = arith.addf %3, %6 : vector<16x512xf32>
    %c0_6 = arith.constant 0 : index
    %c0_7 = arith.constant 0 : index
    %8 = vector.load %arg6[%c0_6, %c0_7] : memref<16x512xf32, #tpu.memory_space<vmem>>, vector<16x512xf32>
    tpu.vector_store %arg6[%c0_6, %c0_7], %7 {strides = array<i32>} : memref<16x512xf32, #tpu.memory_space<vmem>>, vector<16x512xf32>,
    %c0_i32_8 = arith.constant 0 : i32
    %9 = arith.cmpi eq, %arg2, %c0_i32_8 : i32
    %10 = arith.extui %9 : i1 to i32
    %c0_i32_9 = arith.constant 0 : i32
    %11 = arith.cmpi ne, %10, %c0_i32_9 : i32
    scf.if %11 {
      %c0_10 = arith.constant 0 : index
      %c0_11 = arith.constant 0 : index
      %12 = vector.load %arg6[%c0_10, %c0_11] : memref<16x512xf32, #tpu.memory_space<vmem>>, vector<16x512xf32>
      %13 = arith.truncf %12 : vector<16x512xf32> to vector<16x512xbf16>
      %c0_12 = arith.constant 0 : index
      %c0_13 = arith.constant 0 : index
      %14 = vector.load %arg5[%c0_12, %c0_13] : memref<16x512xbf16, #tpu.memory_space<vmem>>, vector<16x512xbf16>
      tpu.vector_store %arg5[%c0_12, %c0_13], %13 {strides = array<i32>} : memref<16x512xbf16, #tpu.memory_space<vmem>>, vector<16x512xbf16>,
    } else {
    }
    return
  }
  func.func @transform_0(%arg0: i32, %arg1: i32, %arg2: i32) -> (i32, i32) {
    %c0_i32 = arith.constant 0 : i32
    return %arg0, %arg2 : i32, i32
  }
  func.func @transform_1(%arg0: i32, %arg1: i32, %arg2: i32) -> (i32, i32) {
    %c0_i32 = arith.constant 0 : i32
    return %arg2, %arg1 : i32, i32
  }
  func.func @transform_2(%arg0: i32, %arg1: i32, %arg2: i32) -> (i32, i32) {
    %c0_i32 = arith.constant 0 : i32
    return %arg0, %arg1 : i32, i32
  }
}

module attributes {stable_mosaic.version = 11 : i64} {
  func.func @_matmul_kernel(%arg0: i32, %arg1: i32, %arg2: i32, %arg3: memref<16x512xbf16, #tpu.memory_space<vmem>>, %arg4: memref<512x512xbf16, #tpu.memory_space<vmem>>, %arg5: memref<16x512xbf16, #tpu.memory_space<vmem>>, %arg6: memref<16x512xf32, #tpu.memory_space<vmem>>) attributes {dimension_semantics = [#tpu.dimension_semantics<parallel>, #tpu.dimension_semantics<parallel>, #tpu.dimension_semantics<arbitrary>], iteration_bounds = array<i64: 1, 1, 2>, scalar_prefetch = 0 : i64, scratch_operands = 1 : i64, tpu.core_type = #tpu.core_type<tc>, window_params = [{transform_indices = @transform_0, window_bounds = array<i64: 16, 512>}, {transform_indices = @transform_1, window_bounds = array<i64: 512, 512>}, {transform_indices = @transform_2, window_bounds = array<i64: 16, 512>}]} {
    %c0_i32 = arith.constant 0 : i32
    %0 = arith.cmpi eq, %arg2, %c0_i32 : i32
    %1 = arith.extui %0 : i1 to i32
    %c0_i32_0 = arith.constant 0 : i32
    %2 = arith.cmpi ne, %1, %c0_i32_0 : i32
    scf.if %2 {
      %cst_9 = arith.constant 0.000000e+00 : f32
      %12 = vector.broadcast %cst_9 : f32 to vector<16x512xf32>
      %c0_10 = arith.constant 0 : index
      %c0_11 = arith.constant 0 : index
      %13 = vector.load %arg6[%c0_10, %c0_11] : memref<16x512xf32, #tpu.memory_space<vmem>>, vector<16x512xf32>
      tpu.vector_store %arg6[%c0_10, %c0_11], %12 {strides = array<i32>} : memref<16x512xf32, #tpu.memory_space<vmem>>, vector<16x512xf32>,
    } else {
    }
    %c0 = arith.constant 0 : index
    %c0_1 = arith.constant 0 : index
    %3 = vector.load %arg6[%c0, %c0_1] : memref<16x512xf32, #tpu.memory_space<vmem>>, vector<16x512xf32>
    %c0_2 = arith.constant 0 : index
    %c0_3 = arith.constant 0 : index
    %4 = vector.load %arg3[%c0_2, %c0_3] : memref<16x512xbf16, #tpu.memory_space<vmem>>, vector<16x512xbf16>
    %c0_4 = arith.constant 0 : index
    %c0_5 = arith.constant 0 : index
    %5 = vector.load %arg4[%c0_4, %c0_5] : memref<512x512xbf16, #tpu.memory_space<vmem>>, vector<512x512xbf16>
    %cst = arith.constant dense<0.000000e+00> : vector<16x512xf32>
    %6 = tpu.matmul %4, %5, %cst {dimension_numbers = #tpu.dot_dimension_numbers<[1], [0], [0], [1], [0, 0, 1, 1], [], []>} : vector<16x512xbf16>, vector<512x512xbf16>, vector<16x512xf32> -> vector<16x512xf32>
    %7 = arith.addf %3, %6 : vector<16x512xf32>
    %c0_6 = arith.constant 0 : index
    %c0_7 = arith.constant 0 : index
    %8 = vector.load %arg6[%c0_6, %c0_7] : memref<16x512xf32, #tpu.memory_space<vmem>>, vector<16x512xf32>
    tpu.vector_store %arg6[%c0_6, %c0_7], %7 {strides = array<i32>} : memref<16x512xf32, #tpu.memory_space<vmem>>, vector<16x512xf32>,
    %c1_i32 = arith.constant 1 : i32
    %9 = arith.cmpi eq, %arg2, %c1_i32 : i32
    %10 = arith.extui %9 : i1 to i32
    %c0_i32_8 = arith.constant 0 : i32
    %11 = arith.cmpi ne, %10, %c0_i32_8 : i32
    scf.if %11 {
      %c0_9 = arith.constant 0 : index
      %c0_10 = arith.constant 0 : index
      %12 = vector.load %arg6[%c0_9, %c0_10] : memref<16x512xf32, #tpu.memory_space<vmem>>, vector<16x512xf32>
      %cst_11 = arith.constant 1.100000e+00 : f32
      %13 = vector.broadcast %cst_11 : f32 to vector<16x512xf32>
      %14 = arith.mulf %12, %13 : vector<16x512xf32>
      %15 = arith.truncf %14 : vector<16x512xf32> to vector<16x512xbf16>
      %c0_12 = arith.constant 0 : index
      %c0_13 = arith.constant 0 : index
      %16 = vector.load %arg5[%c0_12, %c0_13] : memref<16x512xbf16, #tpu.memory_space<vmem>>, vector<16x512xbf16>
      tpu.vector_store %arg5[%c0_12, %c0_13], %15 {strides = array<i32>} : memref<16x512xbf16, #tpu.memory_space<vmem>>, vector<16x512xbf16>,
    } else {
    }
    return
  }
  func.func @transform_0(%arg0: i32, %arg1: i32, %arg2: i32) -> (i32, i32) {
    %c0_i32 = arith.constant 0 : i32
    return %arg0, %arg2 : i32, i32
  }
  func.func @transform_1(%arg0: i32, %arg1: i32, %arg2: i32) -> (i32, i32) {
    %c0_i32 = arith.constant 0 : i32
    return %arg2, %arg1 : i32, i32
  }
  func.func @transform_2(%arg0: i32, %arg1: i32, %arg2: i32) -> (i32, i32) {
    %c0_i32 = arith.constant 0 : i32
    return %arg0, %arg1 : i32, i32
  }
}

module attributes {stable_mosaic.version = 11 : i64} {
  func.func @_rmsnorm_add_kernel(%arg0: i32, %arg1: memref<16x512xbf16, #tpu.memory_space<vmem>>, %arg2: memref<16x512xbf16, #tpu.memory_space<vmem>>, %arg3: memref<1x512xbf16, #tpu.memory_space<vmem>>, %arg4: memref<16x512xbf16, #tpu.memory_space<vmem>>, %arg5: memref<16x512xbf16, #tpu.memory_space<vmem>>) attributes {dimension_semantics = [#tpu.dimension_semantics<parallel>], iteration_bounds = array<i64: 1>, scalar_prefetch = 0 : i64, scratch_operands = 0 : i64, tpu.core_type = #tpu.core_type<tc>, window_params = [{transform_indices = @transform_0, window_bounds = array<i64: 16, 512>}, {transform_indices = @transform_1, window_bounds = array<i64: 16, 512>}, {pipeline_mode = #tpu.pipeline_mode<synchronous>, transform_indices = @transform_2, window_bounds = array<i64: 1, 512>}, {transform_indices = @transform_3, window_bounds = array<i64: 16, 512>}, {transform_indices = @transform_4, window_bounds = array<i64: 16, 512>}]} {
    %c0 = arith.constant 0 : index
    %c0_0 = arith.constant 0 : index
    %0 = vector.load %arg1[%c0, %c0_0] : memref<16x512xbf16, #tpu.memory_space<vmem>>, vector<16x512xbf16>
    %1 = arith.extf %0 : vector<16x512xbf16> to vector<16x512xf32>
    %c0_1 = arith.constant 0 : index
    %c0_2 = arith.constant 0 : index
    %2 = vector.load %arg2[%c0_1, %c0_2] : memref<16x512xbf16, #tpu.memory_space<vmem>>, vector<16x512xbf16>
    %3 = arith.extf %2 : vector<16x512xbf16> to vector<16x512xf32>
    %4 = arith.addf %1, %3 : vector<16x512xf32>
    %5 = arith.truncf %4 : vector<16x512xf32> to vector<16x512xbf16>
    %c0_3 = arith.constant 0 : index
    %c0_4 = arith.constant 0 : index
    %6 = vector.load %arg5[%c0_3, %c0_4] : memref<16x512xbf16, #tpu.memory_space<vmem>>, vector<16x512xbf16>
    tpu.vector_store %arg5[%c0_3, %c0_4], %5 {strides = array<i32>} : memref<16x512xbf16, #tpu.memory_space<vmem>>, vector<16x512xbf16>,
    %7 = arith.mulf %4, %4 : vector<16x512xf32>
    %cst = arith.constant dense<0.000000e+00> : vector<16xf32>
    %8 = vector.multi_reduction <add>, %7, %cst [1] : vector<16x512xf32> to vector<16xf32>
    %9 = vector.shape_cast %8 : vector<16xf32> to vector<16x1xf32>
    %cst_5 = arith.constant 5.120000e+02 : f32
    %10 = vector.broadcast %cst_5 : f32 to vector<16x1xf32>
    %11 = arith.divf %9, %10 : vector<16x1xf32>
    %cst_6 = arith.constant 9.99999997E-7 : f32
    %12 = vector.broadcast %cst_6 : f32 to vector<16x1xf32>
    %13 = arith.addf %11, %12 : vector<16x1xf32>
    %14 = math.rsqrt %13 : vector<16x1xf32>
    %15 = vector.broadcast %14 : vector<16x1xf32> to vector<16x512xf32>
    %16 = arith.mulf %4, %15 : vector<16x512xf32>
    %c0_7 = arith.constant 0 : index
    %c0_8 = arith.constant 0 : index
    %17 = vector.load %arg3[%c0_7, %c0_8] : memref<1x512xbf16, #tpu.memory_space<vmem>>, vector<1x512xbf16>
    %18 = arith.extf %17 : vector<1x512xbf16> to vector<1x512xf32>
    %19 = vector.broadcast %18 : vector<1x512xf32> to vector<16x512xf32>
    %20 = arith.mulf %16, %19 : vector<16x512xf32>
    %21 = arith.truncf %20 : vector<16x512xf32> to vector<16x512xbf16>
    %c0_9 = arith.constant 0 : index
    %c0_10 = arith.constant 0 : index
    %22 = vector.load %arg4[%c0_9, %c0_10] : memref<16x512xbf16, #tpu.memory_space<vmem>>, vector<16x512xbf16>
    tpu.vector_store %arg4[%c0_9, %c0_10], %21 {strides = array<i32>} : memref<16x512xbf16, #tpu.memory_space<vmem>>, vector<16x512xbf16>,
    return
  }
  func.func @transform_0(%arg0: i32) -> (i32, i32) {
    %c0_i32 = arith.constant 0 : i32
    %c0_i32_0 = arith.constant 0 : i32
    return %arg0, %c0_i32 : i32, i32
  }
  func.func @transform_1(%arg0: i32) -> (i32, i32) {
    %c0_i32 = arith.constant 0 : i32
    %c0_i32_0 = arith.constant 0 : i32
    return %arg0, %c0_i32 : i32, i32
  }
  func.func @transform_2(%arg0: i32) -> (i32, i32) {
    %c0_i32 = arith.constant 0 : i32
    %c0_i32_0 = arith.constant 0 : i32
    %c0_i32_1 = arith.constant 0 : i32
    return %c0_i32, %c0_i32_0 : i32, i32
  }
  func.func @transform_3(%arg0: i32) -> (i32, i32) {
    %c0_i32 = arith.constant 0 : i32
    %c0_i32_0 = arith.constant 0 : i32
    return %arg0, %c0_i32 : i32, i32
  }
  func.func @transform_4(%arg0: i32) -> (i32, i32) {
    %c0_i32 = arith.constant 0 : i32
    %c0_i32_0 = arith.constant 0 : i32
    return %arg0, %c0_i32 : i32, i32
  }
}

</mosaic_0001>

<bundles_post_ra>
// kernel: custom_llama_model.15
= control target key start
LH: loop header
LB: loop body
LE: loop exit
PB: predicated region body
PF: predicated region fallthrough
CT: control target
= control target key end

     0   :  { %v59_v26 = vlaneseq  ;;  %s189_s0 = inlined_call_operand.vmem [shape: bf16[16,512], index: 0, kind: input, shape index: {}]   ;;  %s190_s1 = inlined_call_operand.vmem [shape: bf16[1,512], index: 1, kind: input, shape index: {}]   ;;  %s191_s2 = inlined_call_operand.vmem [shape: bf16[16,512], index: 2, kind: output, shape index: {}]  }
   0x1   :  { %v11_v0 = vld [vmem:[%s189_s0] sm:$0xff]  ;;  %v12_v1 = vld [vmem:[%s189_s0 + $0x8] sm:$0xff]  ;;  %v13_v2 = vld [vmem:[%s189_s0 + $0x10] sm:$0xff] }
   0x2   :  { %v15_v3 = vunpack.c.l.bf16 %v11_v0  ;;  %v16_v4 = vunpack.c.h.bf16 %v11_v0  ;;  %v17_v5 = vunpack.c.l.bf16 %v12_v1  ;;  %v18_v6 = vunpack.c.h.bf16 %v12_v1  ;;  %v14_v7 = vld [vmem:[%s189_s0 + $0x18] sm:$0xff]  ;;  %v56_v32 = vld [vmem:[%s190_s1] sm:$0xf] }
   0x3   :  { %v19_v8 = vunpack.c.l.bf16 %v13_v2  ;;  %v20_v9 = vunpack.c.h.bf16 %v13_v2  ;;  %v21_v10 = vunpack.c.l.bf16 %v14_v7  ;;  %v22_v14 = vunpack.c.h.bf16 %v14_v7 }
   0x4   :  { %v23_v11 = vmul.f32 %v15_v3, %v15_v3  ;;  %v24_v12 = vmul.f32 %v16_v4, %v16_v4  ;;  %v25_v13 = vmul.f32 %v17_v5, %v17_v5  ;;  %v26_v18 = vmul.f32 %v18_v6, %v18_v6 }
   0x5   :  { %v27_v15 = vmul.f32 %v19_v8, %v19_v8  ;;  %v28_v16 = vmul.f32 %v20_v9, %v20_v9  ;;  %v29_v17 = vmul.f32 %v21_v10, %v21_v10  ;;  %v30_v22 = vmul.f32 %v22_v14, %v22_v14 }
   0x6   :  { %v31_v19 = vadd.f32 %v24_v12, %v23_v11  ;;  %v60_v30 = vshrl.u32 %v59_v26, 7  ;;  %v57_v35 = vunpack.c.l.bf16 %v56_v32 }
   0x7   :  { %v36_v20 = vadd.f32 %v28_v16, %v27_v15 }
   0x8   :  { %v32_v21 = vadd.f32 %v31_v19, %v25_v13  ;;  %v61_v36 = vsub.s32 0, %v60_v30  ;;  %v65_v37 = vsub.s32 2, %v60_v30  ;;  %v69_v38 = vsub.s32 4, %v60_v30 }
   0x9   :  { %v37_v23 = vadd.f32 %v36_v20, %v29_v17  ;;  %v73_v39 = vsub.s32 6, %v60_v30 }
   0xa   :  { %v33_v24 = vadd.f32 %v32_v21, %v26_v18  ;;  %v62_v40 = vrot.slane %v57_v35, %v61_v36  ;;  %v66_v41 = vrot.slane %v57_v35, %v65_v37  ;;  %v70_v42 = vrot.slane %v57_v35, %v69_v38 }
   0xb   :  { %v38_v25 = vadd.f32 %v37_v23, %v30_v22  ;;  %v74_v43 = vrot.slane %v57_v35, %v73_v39 }
   0xc   :  { %34 = vadd.xlane.f32.xlu0 %v33_v24  ;;  %v82_v44 = vrot.slane %v62_v40, %v61_v36  ;;  %v86_v45 = vrot.slane %v66_v41, %v61_v36  ;;  %v90_v46 = vrot.slane %v70_v42, %v61_v36 }
   0xd   :  { %v94_v47 = vrot.slane %v74_v43, %v61_v36 }
  0x10   :  { %39 = vadd.xlane.f32.xlu0 %v38_v25 }
  0x95   :  { %v35_v27 = vpop.xlane.xlu0 %34 }
  0x96   :  { %v42_v28 = vmul.f32 0.001953125, %v35_v27 }
  0x98   :  { %v44_v29 = vadd.f32 1e-06, %v42_v28 }
  0x99   :  { %v40_v31 = vpop.xlane.xlu0 %39 }
  0x9a   :  { %143 = vrsqrt.f32 %v44_v29  ;;  %v43_v33 = vmul.f32 0.001953125, %v40_v31 }
  0x9c   :  { %v45_v34 = vadd.f32 1e-06, %v43_v33 }
  0x9e   :  { %145 = vrsqrt.f32 %v45_v34 }
  0xa7   :  { %v144_v48 = vpop.eup %143 }
  0xa8   :  { %v48_v49 = vmul.f32 %v144_v48, %v15_v3  ;;  %v49_v50 = vmul.f32 %v144_v48, %v16_v4  ;;  %v50_v51 = vmul.f32 %v144_v48, %v17_v5  ;;  %v51_v52 = vmul.f32 %v144_v48, %v18_v6 }
  0xaa   :  { %v95_v53 = vmul.f32 %v82_v44, %v48_v49  ;;  %v96_v54 = vmul.f32 %v86_v45, %v49_v50  ;;  %v97_v55 = vmul.f32 %v90_v46, %v50_v51  ;;  %v98_v56 = vmul.f32 %v94_v47, %v51_v52 }
  0xab   :  { %v146_v57 = vpop.eup %145 }
  0xac   :  { %v139_v58 = vpack.c.bf16 %v96_v54, %v95_v53  ;;  %v140_v59 = vpack.c.bf16 %v98_v56, %v97_v55  ;;  %v52_v60 = vmul.f32 %v146_v57, %v19_v8  ;;  %v53_v61 = vmul.f32 %v146_v57, %v20_v9 }
  0xad   :  { %v54_v62 = vmul.f32 %v146_v57, %v21_v10  ;;  %v55_v63 = vmul.f32 %v146_v57, %v22_v14 }
  0xae   :  { %127 = vst [vmem:[%s191_s2] sm:$0xff] %v139_v58  ;;  %128 = vst [vmem:[%s191_s2 + $0x8] sm:$0xff] %v140_v59  ;;  %v99_v0 = vmul.f32 %v82_v44, %v52_v60  ;;  %v100_v1 = vmul.f32 %v86_v45, %v53_v61 }
  0xaf   :  { %v101_v2 = vmul.f32 %v90_v46, %v54_v62  ;;  %v102_v3 = vmul.f32 %v94_v47, %v55_v63 }
  0xb0   :  { %v141_v4 = vpack.c.bf16 %v100_v1, %v99_v0 }
  0xb1   :  { %v142_v5 = vpack.c.bf16 %v102_v3, %v101_v2 }
  0xb2   :  { %129 = vst [vmem:[%s191_s2 + $0x10] sm:$0xff] %v141_v4 }
  0xb3   :  { %130 = vst [vmem:[%s191_s2 + $0x18] sm:$0xff] %v142_v5 }

// kernel: custom_llama_model.17
= control target key start
LH: loop header
LB: loop body
LE: loop exit
PB: predicated region body
PF: predicated region fallthrough
CT: control target
= control target key end

     0   :  { %s2038_s0 = inlined_call_operand.vmem [shape: bf16[16,1024], index: 0, kind: input, shape index: {}, may-alias: {0,1,2}]   ;;  %s2039_s1 = inlined_call_operand.vmem [shape: bf16[16,1024], index: 1, kind: input, shape index: {}, may-alias: {0,1,2}]   ;;  %s2040_s2 = inlined_call_operand.vmem [shape: bf16[16,1024], index: 2, kind: input, shape index: {}, may-alias: {0,1,2}]   ;;  %s2041_s3 = inlined_call_operand.vmem [shape: f32[16,128], index: 3, kind: input, shape index: {}, may-alias: {3,5}]   ;;  %s2042_s4 = inlined_call_operand.vmem [shape: f32[16,128], index: 4, kind: input, shape index: {}, may-alias: {4,6}]   ;;  %s2043_s5 = inlined_call_operand.vmem [shape: f32[16,128], index: 5, kind: input, shape index: {}, may-alias: {3,5}]   ;;  %s2044_s6 = inlined_call_operand.vmem [shape: f32[16,128], index: 6, kind: input, shape index: {}, may-alias: {4,6}]   ;;  %s2045_s7 = inlined_call_operand.vmem [shape: bf16[16,512], index: 7, kind: output, shape index: {}]  }
   0x1   :  { %2048 = sst [smem:[#allocation14_spill]] %s2045_s7 }
   0x2   :  { %s1722_s24 = smov 0   ;;  %s1724_s25 = smov 0  }
   0x3   :  { %s1726_s26 = smov 0   ;;  %s1728_s27 = smov 0  }
   0x4   :  { %s1730_s28 = smov 0   ;;  %s1732_s29 = smov 0  }
   0x5   :  { %s1734_s30 = smov 0   ;;  %s1736_s8 = smov 0  }
   0x6   :  { %s1738_s9 = smov 0  }
   0x7 LB: > { %2049 = sst [smem:[#allocation10_spill]] %s1663_s29  ;;  %s1386_s10 = sadd.s32 4294967295, %s1675_s9   ;;  %s1675_s9 = sphi %s1738_s9, %s17_s9   ;;  %s1671_s8 = sphi %s1736_s8, %s2067_s8   ;;  %s1667_s30 = sphi %s1734_s30, %s2066_s30   ;;  %s1663_s29 = sphi %s1732_s29, %s2060_s29   ;;  %s1659_s28 = sphi %s1730_s28, %s2059_s28   ;;  %s1655_s27 = sphi %s1728_s27, %s2065_s27   ;;  %s1651_s26 = sphi %s1726_s26, %s2064_s26   ;;  %s1647_s25 = sphi %s1724_s25, %s2063_s25   ;;  %s1643_s24 = sphi %s1722_s24, %s2062_s24  }
   0x8   : > { %s36_s11 = sadd.s32 1, %s1671_s8  ;;  %s45_s12 = sadd.s32 1, %s1663_s29 }
   0x9   : > { %p38_p0 = scmp.ge.s32.totalorder %s36_s11, 2  ;;  %p52_p1 = scmp.ne.s32.totalorder %s1663_s29, %s1659_s28 }
   0xa   : > { %p53_p2 = scmp.eq.s32.totalorder %s1675_s9, 0  ;;  %s70_s14 = sadd.s32 4, %s1671_s8 }
   0xb   : > { %s2069_s11 = smov (%p38_p0, %s36_s11), 0  ;;  %s79_s18 = sadd.s32 1, %s1655_s27 }
   0xc   : > { %2050 = sst [smem:[#allocation11_spill]] %s2069_s11  ;;  %p1780_p3 = por %p53_p2, %p52_p1 }
   0xd   : > { %s41_s15 = ssub.s32 %s1671_s8, %s2069_s11  ;;  %s73_s16 = sadd.s32 4, %s2069_s11 }
   0xe   : > { %p43_p4 = scmp.eq.s32.totalorder %s41_s15, 0  ;;  %s75_s17 = ssub.s32 %s70_s14, %s73_s16 }
   0xf   : > { %p77_p5 = scmp.eq.s32.totalorder %s75_s17, 0  ;;  %p86_p6 = scmp.ne.s32.totalorder %s1655_s27, %s1651_s26 }
  0x10   : > { %s1790_s19 = scalar_select %p43_p4, %s1663_s29, %s45_s12  }
  0x11   : > { %s1793_s20 = scalar_select %p77_p5, %s1655_s27, %s79_s18  }
  0x12   : > { %2052 = sst [smem:[#allocation12_spill]] %s1790_s19  ;;  %s104_s21 = sadd.s32 6, %s1671_s8 }
  0x13   : > { %2053 = sst [smem:[#allocation13_spill]] %s1793_s20  ;;  %s107_s22 = sadd.s32 6, %s2069_s11 }
  0x14   : > { %s113_s23 = sadd.s32 1, %s1647_s25  ;;  %p1802_p7 = por %p86_p6, %p53_p2 }
  0x15   : > { %s109_s15 = ssub.s32 %s104_s21, %s107_s22  ;;  %p120_p9 = scmp.ne.s32.totalorder %s1647_s25, %s1643_s24 }
  0x16   : > { %p111_p8 = scmp.eq.s32.totalorder %s109_s15, 0  ;;  %p264_p10 = scmp.eq.s32.totalorder %s1386_s10, 1 }
  0x17   : > { %p1813_p11 = por %p120_p9, %p53_p2  ;;  %p1393_p13 = scmp.ge.s32.totalorder %s1675_s9, 2 }
  0x18   : > { %s1809_s14 = scalar_select %p111_p8, %s1647_s25, %s113_s23  }
  0x19   : > { %p1820_p12 = por %p264_p10, %p52_p1  ;;  %330 = sbr.rel (%p1393_p13) target bundleno = 48 (0x30), region = 32 }
  0x1e   : > { %333 = sbr.rel (!%p1780_p3) target bundleno = 36 (0x24), region = 36  ;;  %s335_s10 = sand.u32 (%p1780_p3), 1, %s1663_s29  }
  0x1f   : > { %s1428_s17 = sshll.u32 (%p1780_p3), %s1671_s8, 3  ;;  %s1394_s18 = sshll.u32 (%p1780_p3), %s335_s10, 4 }
  0x20   : > { %s343_s23 = scalar_lea.vmem (%p1780_p3), %s2038_s0, %s1428_s17  ;;  %s337_s15 = scalar_lea.vmem (%p1780_p3), [#allocation6], %s1394_s18 }
  0x21   : > { %v374_v0 = vld [vmem:[%s343_s23] sm:$0xff] (%p1780_p3) }
  0x22   : > { %v376_v1 = vld [vmem:[%s343_s23 + $0x20] sm:$0xff] (%p1780_p3)  ;;  %375 = vst [vmem:[%s337_s15] sm:$0xff] (%p1780_p3), %v374_v0 }
  0x23   : > { %377 = vst [vmem:[%s337_s15 + $0x8] sm:$0xff] %v376_v1 }
  0x24 PF: > { %383 = sbr.rel (!%p1802_p7) target bundleno = 42 (0x2a), region = 74  ;;  %s385_s13 = sand.u32 (%p1802_p7), 1, %s1655_s27  }
  0x25   : > { %s1398_s11 = sshll.u32 (%p1802_p7), %s1671_s8, 2  ;;  %s1397_s19 = sshll.u32 (%p1802_p7), %s385_s13, 3 }
  0x26   : > { %s1242_s20 = scalar_lea.vmem (%p1802_p7), %s2039_s1, %s1398_s11  ;;  %s387_s17 = scalar_lea.vmem (%p1802_p7), [#allocation7], %s1397_s19 }
  0x27   : > { %v1399_v2 = vld [vmem:[%s1242_s20 + $0x10] sm:$0xf] (%p1802_p7) }
  0x28   : > { %v1400_v3 = vld [vmem:[%s1242_s20 + $0x30] sm:$0xf] (%p1802_p7)  ;;  %413 = vst [vmem:[%s387_s17] sm:$0xf] (%p1802_p7), %v1399_v2 }
  0x29   : > { %415 = vst [vmem:[%s387_s17 + $0x4] sm:$0xf] %v1400_v3 }
  0x2a PF: > { %443 = sbr.rel (!%p1813_p11) target bundleno = 48 (0x30), region = 115  ;;  %s445_s7 = sand.u32 (%p1813_p11), 1, %s1647_s25  }
  0x2b   : > { %s1402_s18 = sshll.u32 (%p1813_p11), %s1671_s8, 2  ;;  %s1401_s21 = sshll.u32 (%p1813_p11), %s445_s7, 3 }
  0x2c   : > { %s1249_s15 = scalar_lea.vmem (%p1813_p11), %s2040_s2, %s1402_s18  ;;  %s447_s29 = scalar_lea.vmem (%p1813_p11), [#allocation8], %s1401_s21 }
  0x2d   : > { %v1403_v4 = vld [vmem:[%s1249_s15 + $0x18] sm:$0xf] (%p1813_p11) }
  0x2e   : > { %v1404_v5 = vld [vmem:[%s1249_s15 + $0x38] sm:$0xf] (%p1813_p11)  ;;  %473 = vst [vmem:[%s447_s29] sm:$0xf] (%p1813_p11), %v1403_v4 }
  0x2f   : > { %475 = vst [vmem:[%s447_s29 + $0x4] sm:$0xf] %v1404_v5 }
  0x30 PF: > { %p1405_p0 = scmp.ge.s32.totalorder %s1675_s9, 1  ;;  %p502_p1 = scmp.lt.s32.totalorder %s1675_s9, 3 }
  0x32   : > { %p503_p2 = pnand %p1405_p0, %p502_p1 }
  0x33   : > { %s509_s11 = sand.u32 (!%p503_p2), 1, %s1659_s28   ;;  %s516_s20 = sand.u32 (!%p503_p2), 1, %s1651_s26  }
  0x34   : > { %506 = sbr.rel (%p503_p2) target bundleno = 1468 (0x5bc), region = 156  ;;  %s1849_s19 = sshll.u32 (!%p503_p2), %s509_s11, 4 }
  0x35   : > { %s1407_s12 = sshll.u32 (!%p503_p2), %s516_s20, 3  ;;  %s511_s13 = scalar_lea.vmem (!%p503_p2), [#allocation6], %s1849_s19 }
  0x36   : > { %s518_s10 = scalar_lea.vmem (!%p503_p2), [#allocation7], %s1407_s12  ;;  %s1678_s26 = smov (!%p503_p2), 64  }
  0x37   : > { %s523_s7 = sand.u32 (!%p503_p2), 1, %s1643_s24   ;;  %s584_s24 = scalar_lea.vmem (!%p503_p2), [#allocation9], %s1849_s19 }
  0x38   : > { %s1408_s18 = sshll.u32 (!%p503_p2), %s523_s7, 3 }
  0x39   : > { %v1853_v6 = vld [vmem:[%s511_s13] sm:$0xff]   ;;  %v1855_v7 = vld [vmem:[%s511_s13 + $0x8] sm:$0xff]   ;;  %v1677_v14 = vmov 0.0   ;;  %vm1679_vm0 = vmmov 0   ;;  %vm668_vm1 = vcmask 7168   ;;  %v745_v48 = vlaneseq  ;;  %s525_s21 = scalar_lea.vmem [#allocation8], %s1408_s18 }
  0x3a   : > { %v640_v8 = vunpack.c.l.bf16 %v1853_v6  ;;  %v641_v9 = vunpack.c.l.bf16 %v1855_v7  ;;  %v1449_v10 = vld [vmem:[%s518_s10] sm:$0xff]   ;;  %1460 = vmatprep.subr.bf16.mxu0 %v1677_v14  ;;  %1466 = vmatprep.subr.bf16.mxu1 %v1677_v14  ;;  %v1870_v16 = vld [vmem:[%s2041_s3] sm:$0xff]  ;;  %v1875_v17 = vld [vmem:[%s2041_s3 + $0x8] sm:$0xff]  ;;  %v1680_v47 = vmov -1e+30   ;;  %671 = vst.msk [vmem:[#allocation4] sm:$0xff] %vm668_vm1, %v1677_v14  ;;  %v677_v62 = vunpack.c.h.bf16 %v1853_v6 }
  0x3b   : > { %v1450_v11 = vunpack.c.l.bf16 %v1449_v10  ;;  %v1451_v12 = vunpack.c.h.bf16 %v1449_v10  ;;  %1462 = vmatprep.mubr.msk.bf16.mxu0 %vm1679_vm0, %v1677_v14  ;;  %1468 = vmatprep.mubr.msk.bf16.mxu1 %vm1679_vm0, %v1677_v14  ;;  %v1880_v18 = vld [vmem:[%s2042_s4] sm:$0xff]  ;;  %v1885_v19 = vld [vmem:[%s2042_s4 + $0x8] sm:$0xff]  ;;  %669 = vst.msk [vmem:[#allocation3] sm:$0xff] %vm668_vm1, %v1680_v47  ;;  %670 = vst.msk [vmem:[#allocation3 + $0x8] sm:$0xff] %vm668_vm1, %v1680_v47  ;;  %v1921_v49 = vshrl.u32 %v745_v48, 7  ;;  %v1923_v50 = vand.u32 127, %v745_v48 }
  0x3c   : > { %v1561_v13 = vpack.i.bf16 %v641_v9, %v640_v8  ;;  %v643_v21 = vmul.f32 %v641_v9, %v1875_v17  ;;  %v642_v22 = vmul.f32 %v640_v8, %v1870_v16  ;;  %v723_v25 = vld [vmem:[%s2043_s5] sm:$0xff]  ;;  %v724_v26 = vld [vmem:[%s2043_s5 + $0x8] sm:$0xff]  ;;  %672 = vst.msk [vmem:[#allocation4 + $0x8] sm:$0xff] %vm668_vm1, %v1677_v14  ;;  %707 = vst.msk [vmem:[#allocation3 + $0x10] sm:$0xff] %vm668_vm1, %v1680_v47  ;;  %vm811_vm3 = vcmask 130048   ;;  %s1437_s19 = sshll.u32 (%p1820_p12), %s1667_s30, 3 }
  0x3d   : > { %v1566_v15 = vpack.i.bf16 %v1451_v12, %v1450_v11  ;;  %v735_v29 = vld [vmem:[%s2044_s6] sm:$0xff]  ;;  %v736_v30 = vld [vmem:[%s2044_s6 + $0x8] sm:$0xff]  ;;  %v725_v32 = vmul.f32 %v1450_v11, %v723_v25  ;;  %v726_v33 = vmul.f32 %v1451_v12, %v724_v26  ;;  %708 = vst.msk [vmem:[#allocation3 + $0x18] sm:$0xff] %vm668_vm1, %v1680_v47  ;;  %710 = vst.msk [vmem:[#allocation4 + $0x10] sm:$0xff] %vm668_vm1, %v1677_v14  ;;  %v1928_v51 = vadd.s32 8, %v1921_v49  ;;  %s2057_s23 = sld [smem:[#allocation14_spill]] (%p1820_p12) }
  0x3e   : > { %1562 = vrot.lane.b32.xlu0 %v1561_v13, %s1678_s26  ;;  %711 = vst.msk [vmem:[#allocation4 + $0x18] sm:$0xff] %vm668_vm1, %v1677_v14  ;;  %vm756_vm2 = vcmp.le.s32.totalorder %v1923_v50, %v1921_v49  ;;  %v1681_v60 = vmov 0   ;;  %v678_v63 = vunpack.c.h.bf16 %v1855_v7  ;;  %v1579_v8 = vld [vmem:[%s525_s21] sm:$0xff]   ;;  %v679_v13 = vmul.f32 %v677_v62, %v1870_v16 }
  0x3f   : > { %vm757_vm4 = vcmp.le.s32.totalorder %v1923_v50, %v1928_v51  ;;  %1571 = vset.pattern.permute.xlu0 %v1681_v60  ;;  %1572 = vset.pattern.permute.xlu1 %v1681_v60 }
  0x40   : > { %v1573_v4 = vpack.i.bf16 %v678_v63, %v677_v62  ;;  %1467 = vmatpush3.bf16.msra.mxu1 %v1579_v8 }
  0x41   : > { %1472 = vmatprep.subr.bf16.mxu1 %v1677_v14 }
  0x42   : > { %1567 = vrot.lane.b32.xlu0 %v1566_v15, %s1678_s26  ;;  %v1940_v61 = vld [vmem:[#allocation3] sm:$0xff]  ;;  %v1947_v2 = vld [vmem:[#allocation3 + $0x8] sm:$0xff] }
  0x43   : > { %s1172_s15 = scalar_lea.vmem (%p1820_p12), %s2057_s23, %s1437_s19 }
  0xb0   : > { %v1563_v20 = vpop.permute.xlu0 %1562 }
  0xb1   : > { %v1565_v23 = vunpack.i.h.bf16 %v1563_v20  ;;  %v1564_v24 = vunpack.i.l.bf16 %v1563_v20 }
  0xb3   : > { %v653_v27 = vmul.f32 %v1565_v23, %v1885_v19  ;;  %v652_v28 = vmul.f32 %v1564_v24, %v1880_v18 }
  0xb4   : > { %v1568_v31 = vpop.permute.xlu0 %1567 }
  0xb5   : > { %v655_v34 = vadd.f32 %v653_v27, %v643_v21  ;;  %v654_v35 = vadd.f32 %v652_v28, %v642_v22  ;;  %v1570_v36 = vunpack.i.h.bf16 %v1568_v31  ;;  %v1569_v37 = vunpack.i.l.bf16 %v1568_v31 }
  0xb6   : > { %v680_v21 = vmul.f32 %v678_v63, %v1875_v17 }
  0xb7   : > { %v657_v38 = vmul.f32 0.088388346, %v655_v34  ;;  %v656_v39 = vmul.f32 0.088388346, %v654_v35  ;;  %v738_v40 = vmul.f32 %v1570_v36, %v736_v30  ;;  %v737_v41 = vmul.f32 %v1569_v37, %v735_v29 }
  0xb9   : > { %v1441_v42 = vpack.c.bf16 %v657_v38, %v656_v39  ;;  %v739_v43 = vadd.f32 %v737_v41, %v725_v32  ;;  %v740_v44 = vadd.f32 %v738_v40, %v726_v33 }
  0xbb   : > { %1442 = vst [vmem:[#allocation2] sm:$0xff] %v1441_v42   ;;  %v1903_v45 = vpack.c.bf16 %v740_v44, %v739_v43  ;;  %v981_v43 = vld [vmem:[#allocation3 + $0x10] sm:$0xff] }
  0xbd   : > { %1461 = vmatpush3.bf16.xpose.msra.mxu0 %v1903_v45 }
  0xbe   : > { %1478 = vmatprep.subr.bf16.mxu0 %v1677_v14 }
  0xc2   : > { %v1578_v46 = vld [vmem:[#allocation2] sm:$0xff]  }
  0xc4   : > { %1463 = vmatmul.mubr.bf16.vlgmr.msra.gmra.mxu0 %v1578_v46  ;;  %v982_v46 = vld [vmem:[#allocation3 + $0x18] sm:$0xff] }
  0xc5   : > { %1480 = vmatprep.mubr.msk.bf16.mxu0 %vm1679_vm0, %v1677_v14  ;;  %1479 = vmatpush3.bf16.msra.mxu0 %v1579_v8 }
 0x184   : > { %v800_v52 = vpop.f32.mrf.mxu0 }
 0x185   : > { %v807_v53 = vsel %vm756_vm2, %v800_v52, -1e+30 }
 0x186   : > { %v1464_v54 = vpop.f32.mrf.mxu0  ;;  %v812_v55 = vsel %vm811_vm3, %v807_v53, -inf }
 0x187   : > { %813 = vmax.xlane.f32.xlu1 %v812_v55 }
 0x188   : > { %v803_v56 = vpop.f32.mrf.mxu0 }
 0x189   : > { %v808_v57 = vsel %vm757_vm4, %v803_v56, -1e+30 }
 0x18a   : > { %v1465_v58 = vpop.f32.mrf.mxu0  ;;  %v815_v59 = vsel %vm811_vm3, %v808_v57, -inf }
 0x18b   : > { %816 = vmax.xlane.f32.xlu1 %v815_v59 }
 0x210   : > { %v814_v0 = vpop.xlane.xlu1 %813 }
 0x211   : > { %v1945_v1 = vmax.f32 %v1940_v61, %v814_v0 }
 0x213   : > { %v820_v3 = vsub.f32 %v1940_v61, %v1945_v1  ;;  %926 = vst.msk [vmem:[#allocation3] sm:$0xff] %vm668_vm1, %v1945_v1  ;;  %828 = vperm.xlu0 %1571, %v1945_v1  }
 0x214   : > { %v817_v5 = vpop.xlane.xlu1 %816 }
 0x215   : > { %v1955_v6 = vmax.f32 %v1947_v2, %v817_v5 }
 0x217   : > { %v821_v7 = vsub.f32 %v1947_v2, %v1955_v6  ;;  %927 = vst.msk [vmem:[#allocation3 + $0x8] sm:$0xff] %vm668_vm1, %v1955_v6  ;;  %833 = vperm.xlu1 %1572, %v1955_v6   ;;  %1574 = vrot.lane.b32.xlu0 %v1573_v4, %s1678_s26 }
 0x219   : > { %v824_v51 = vmul.f32 1.442695, %v821_v7  ;;  %v822_v7 = vmul.f32 1.442695, %v820_v3 }
 0x28e   : > { %v829_v9 = vpop.permute.xlu0 %828 }
 0x28f   : > { %v836_v10 = vsub.f32 %v807_v53, %v829_v9 }
 0x291   : > { %v838_v11 = vmul.f32 1.442695, %v836_v10  ;;  %v842_v10 = vld [vmem:[#allocation4] sm:$0xff] }
 0x292   : > { %v834_v12 = vpop.permute.xlu1 %833  ;;  %v1575_v15 = vpop.permute.xlu0 %1574 }
 0x293   : > { %v837_v20 = vsub.f32 %v808_v57, %v834_v12  ;;  %v1577_v22 = vunpack.i.h.bf16 %v1575_v15  ;;  %v1576_v23 = vunpack.i.l.bf16 %v1575_v15  ;;  %1581 = vpow2.f32 %v838_v11 }
 0x295   : > { %v840_v24 = vmul.f32 1.442695, %v837_v20  ;;  %v690_v25 = vmul.f32 %v1577_v22, %v1885_v19  ;;  %v689_v26 = vmul.f32 %v1576_v23, %v1880_v18  ;;  %v843_v20 = vld [vmem:[#allocation4 + $0x8] sm:$0xff] }
 0x297   : > { %1583 = vpow2.f32 %v840_v24  ;;  %v692_v27 = vadd.f32 %v690_v25, %v680_v21  ;;  %v691_v28 = vadd.f32 %v689_v26, %v679_v13  ;;  %v1014_v25 = vld [vmem:[#allocation4 + $0x10] sm:$0xff] }
 0x298   : > { %1585 = vpow2.f32 %v824_v51 }
 0x299   : > { %v694_v29 = vmul.f32 0.088388346, %v692_v27  ;;  %v693_v30 = vmul.f32 0.088388346, %v691_v28  ;;  %v1015_v28 = vld [vmem:[#allocation4 + $0x18] sm:$0xff] }
 0x29b   : > { %v1446_v31 = vpack.c.bf16 %v694_v29, %v693_v30 }
 0x29d   : > { %1447 = vst [vmem:[#allocation2 + $0x8] sm:$0xff] %v1446_v31  }
 0x2a0   : > { %v1582_v16 = vpop.eup %1581 }
 0x2a1   : > { %v846_v50 = vsel %vm811_vm3, %v1582_v16, 0.0 }
 0x2a4   : > { %v1584_v32 = vpop.eup %1583  ;;  %v1580_v17 = vld [vmem:[#allocation2 + $0x8] sm:$0xff]  }
 0x2a5   : > { %v871_v33 = vpack.c.bf16 %v1584_v32, %v1582_v16  ;;  %v849_v53 = vsel %vm811_vm3, %v1584_v32, 0.0  ;;  %v1586_v55 = vpop.eup %1585 }
 0x2a6   : > { %v845_v21 = vmul.f32 %v1586_v55, %v843_v20 }
 0x2a7   : > { %1469 = vmatmul.mubr.msk.bf16.vlgmr.msra.gmra.mxu1 %vm811_vm3, %v871_v33 }
 0x2a8   : > { %1473 = vmatpush3.bf16.xpose.msra.mxu1 %v1903_v45  ;;  %1474 = vmatprep.mubr.msk.bf16.mxu1 %vm1679_vm0, %v1677_v14 }
 0x2af   : > { %1475 = vmatmul.mubr.bf16.vlgmr.msra.gmra.mxu1 %v1580_v17 }
 0x367   : > { %v1973_v18 = vpop.f32.mrf.mxu1 }
 0x369   : > { %v1470_v19 = vpop.f32.mrf.mxu1 }
 0x36b   : > { %v1975_v34 = vpop.f32.mrf.mxu1 }
 0x36d   : > { %v1471_v35 = vpop.f32.mrf.mxu1 }
 0x36f   : > { %v971_v36 = vpop.f32.mrf.mxu1 }
 0x370   : > { %v978_v37 = vsel %vm756_vm2, %v971_v36, -1e+30 }
 0x371   : > { %v1476_v38 = vpop.f32.mrf.mxu1  ;;  %v983_v39 = vsel %vm811_vm3, %v978_v37, -inf }
 0x372   : > { %984 = vmax.xlane.f32.xlu0 %v983_v39 }
 0x373   : > { %v974_v40 = vpop.f32.mrf.mxu1 }
 0x374   : > { %v979_v14 = vsel %vm757_vm4, %v974_v40, -1e+30 }
 0x375   : > { %v1477_v41 = vpop.f32.mrf.mxu1  ;;  %v986_v42 = vsel %vm811_vm3, %v979_v14, -inf }
 0x376   : > { %987 = vmax.xlane.f32.xlu1 %v986_v42 }
 0x3fb   : > { %v985_v44 = vpop.xlane.xlu0 %984 }
 0x3fc   : > { %v989_v45 = vmax.f32 %v981_v43, %v985_v44 }
 0x3fe   : > { %1092 = vst.msk [vmem:[#allocation3 + $0x10] sm:$0xff] %vm668_vm1, %v989_v45  ;;  %999 = vperm.xlu0 %1571, %v989_v45   ;;  %v991_v52 = vsub.f32 %v981_v43, %v989_v45 }
 0x3ff   : > { %v988_v47 = vpop.xlane.xlu1 %987 }
 0x400   : > { %v990_v48 = vmax.f32 %v982_v46, %v988_v47  ;;  %v993_v54 = vmul.f32 1.442695, %v991_v52 }
 0x402   : > { %v992_v49 = vsub.f32 %v982_v46, %v990_v48  ;;  %1093 = vst.msk [vmem:[#allocation3 + $0x18] sm:$0xff] %vm668_vm1, %v990_v48  ;;  %1004 = vperm.xlu1 %1572, %v990_v48   ;;  %1587 = vpow2.f32 %v993_v54 }
 0x404   : > { %v995_v8 = vmul.f32 1.442695, %v992_v49 }
 0x40f   : > { %v1588_v56 = vpop.eup %1587 }
 0x410   : > { %v1016_v26 = vmul.f32 %v1588_v56, %v1014_v25 }
 0x41d   : > { %847 = vadd.xlane.f32.xlu0 %v846_v50 }
 0x426   : > { %850 = vadd.xlane.f32.xlu1 %v849_v53 }
 0x437   : > { %866 = vperm.xlu1 %1572, %v1586_v55  }
 0x43b   : > { %1033 = vperm.xlu1 %1572, %v1588_v56  }
 0x479   : > { %v1000_v57 = vpop.permute.xlu0 %999 }
 0x47a   : > { %v1007_v58 = vsub.f32 %v978_v37, %v1000_v57 }
 0x47c   : > { %v1009_v59 = vmul.f32 1.442695, %v1007_v58 }
 0x47d   : > { %v1005_v60 = vpop.permute.xlu1 %1004 }
 0x47e   : > { %1589 = vpow2.f32 %v1009_v59  ;;  %v1008_v62 = vsub.f32 %v979_v14, %v1005_v60 }
 0x480   : > { %v1011_v63 = vmul.f32 1.442695, %v1008_v62 }
 0x482   : > { %1591 = vpow2.f32 %v1011_v63 }
 0x483   : > { %1593 = vpow2.f32 %v822_v7 }
 0x484   : > { %1595 = vpow2.f32 %v995_v8 }
 0x48b   : > { %v1590_v0 = vpop.eup %1589 }
 0x48c   : > { %v1018_v2 = vsel %vm811_vm3, %v1590_v0, 0.0 }
 0x48d   : > { %1019 = vadd.xlane.f32.xlu0 %v1018_v2 }
 0x48f   : > { %v1592_v4 = vpop.eup %1591 }
 0x490   : > { %v1021_v5 = vsel %vm811_vm3, %v1592_v4, 0.0  ;;  %v1043_v6 = vpack.c.bf16 %v1592_v4, %v1590_v0  ;;  %v1594_v9 = vpop.eup %1593 }
 0x491   : > { %1022 = vadd.xlane.f32.xlu0 %v1021_v5  ;;  %v844_v11 = vmul.f32 %v1594_v9, %v842_v10  ;;  %v1596_v15 = vpop.eup %1595 }
 0x492   : > { %1481 = vmatmul.mubr.msk.bf16.vlgmr.msra.gmra.mxu0 %vm811_vm3, %v1043_v6  ;;  %v1017_v30 = vmul.f32 %v1596_v15, %v1015_v28 }
 0x4a6   : > { %v848_v12 = vpop.xlane.xlu0 %847 }
 0x4a7   : > { %v852_v13 = vadd.f32 %v848_v12, %v844_v11  ;;  %861 = vperm.xlu0 %1571, %v1594_v9  }
 0x4a9   : > { %855 = vst.msk [vmem:[#allocation4] sm:$0xff] %vm668_vm1, %v852_v13 }
 0x4ab   : > { %1038 = vperm.xlu0 %1571, %v1596_v15  }
 0x4af   : > { %v851_v61 = vpop.xlane.xlu1 %850 }
 0x4b0   : > { %v853_v1 = vadd.f32 %v851_v61, %v845_v21  ;;  %v1098_v3 = vld [vmem:[#allocation4] sm:$0xff] }
 0x4b1   : > { %1597 = vrcp.f32 %v1098_v3 }
 0x4b2   : > { %856 = vst.msk [vmem:[#allocation4 + $0x8] sm:$0xff] %vm668_vm1, %v853_v1 }
 0x4b3   : > { %v867_v19 = vpop.permute.xlu1 %866 }
 0x4b4   : > { %v870_v42 = vmul.f32 0.0, %v867_v19 }
 0x4b6   : > { %v923_v44 = vadd.f32 %v1975_v34, %v870_v42 }
 0x4b7   : > { %v1034_v38 = vpop.permute.xlu1 %1033 }
 0x4b9   : > { %v1099_v22 = vld [vmem:[#allocation4 + $0x8] sm:$0xff] }
 0x4ba   : > { %1599 = vrcp.f32 %v1099_v22 }
 0x4be   : > { %v1598_v23 = vpop.eup %1597 }
 0x4bf   : > { %1108 = vperm.xlu1 %1572, %v1598_v23  }
 0x4c7   : > { %v1600_v24 = vpop.eup %1599 }
 0x4c8   : > { %1113 = vperm.xlu0 %1571, %v1600_v24  }
 0x516   : > { %v1020_v27 = vpop.xlane.xlu0 %1019 }
 0x517   : > { %v1024_v29 = vadd.f32 %v1020_v27, %v1016_v26 }
 0x519   : > { %1026 = vst.msk [vmem:[#allocation4 + $0x10] sm:$0xff] %vm668_vm1, %v1024_v29 }
 0x51a   : > { %v1023_v31 = vpop.xlane.xlu0 %1022 }
 0x51b   : > { %v1025_v16 = vadd.f32 %v1023_v31, %v1017_v30 }
 0x51d   : > { %1027 = vst.msk [vmem:[#allocation4 + $0x18] sm:$0xff] %vm668_vm1, %v1025_v16 }
 0x520   : > { %v1129_v32 = vld [vmem:[#allocation4 + $0x10] sm:$0xff] }
 0x521   : > { %1601 = vrcp.f32 %v1129_v32 }
 0x522   : > { %v862_v36 = vpop.permute.xlu0 %861 }
 0x523   : > { %v869_v37 = vmul.f32 0.0, %v862_v36 }
 0x524   : > { %v1130_v33 = vld [vmem:[#allocation4 + $0x18] sm:$0xff] }
 0x525   : > { %1603 = vrcp.f32 %v1130_v33  ;;  %v922_v39 = vadd.f32 %v1973_v18, %v869_v37  ;;  %v1041_v18 = vmul.f32 0.0, %v1034_v38 }
 0x526   : > { %v1039_v43 = vpop.permute.xlu0 %1038 }
 0x527   : > { %v1042_v50 = vmul.f32 0.0, %v1039_v43 }
 0x52e   : > { %v1602_v17 = vpop.eup %1601 }
 0x52f   : > { %1140 = vperm.xlu1 %1572, %v1602_v17  }
 0x532   : > { %v1604_v35 = vpop.eup %1603 }
 0x533   : > { %1145 = vperm.xlu0 %1571, %v1604_v35  }
 0x53a   : > { %v1109_v40 = vpop.permute.xlu1 %1108 }
 0x53b   : > { %v1116_v14 = vmul.f32 %v1109_v40, %v922_v39 }
 0x53d   : > { %v1433_v41 = vpack.c.bf16 %v1116_v14, %v1116_v14 }
 0x53f   : > { %1126 = vst [vmem:[%s584_s24] sm:$0xf] %v1433_v41 }
 0x543   : > { %v1114_v45 = vpop.permute.xlu0 %1113 }
 0x544   : > { %v1117_v46 = vmul.f32 %v1114_v45, %v923_v44 }
 0x546   : > { %v1434_v47 = vpack.c.bf16 %v1117_v46, %v1117_v46 }
 0x548   : > { %1127 = vst [vmem:[%s584_s24 + $0x8] sm:$0xf] %v1434_v47 }
 0x552   : > { %v1081_v48 = vpop.f32.mrf.mxu0 }
 0x553   : > { %v1088_v54 = vadd.f32 %v1081_v48, %v1041_v18 }
 0x554   : > { %v1482_v49 = vpop.f32.mrf.mxu0 }
 0x556   : > { %v1084_v51 = vpop.f32.mrf.mxu0 }
 0x557   : > { %v1089_v52 = vadd.f32 %v1084_v51, %v1042_v50 }
 0x558   : > { %v1483_v53 = vpop.f32.mrf.mxu0 }
 0x5aa   : > { %v1141_v55 = vpop.permute.xlu1 %1140 }
 0x5ab   : > { %v1148_v56 = vmul.f32 %v1141_v55, %v1088_v54 }
 0x5ad   : > { %v1435_v57 = vpack.c.bf16 %v1148_v56, %v1148_v56 }
 0x5ae   : > { %v1146_v58 = vpop.permute.xlu0 %1145 }
 0x5af   : > { %1158 = vst [vmem:[%s584_s24 + $0x4] sm:$0xf] %v1435_v57  ;;  %v1149_v59 = vmul.f32 %v1146_v58, %v1089_v52  ;;  %1166 = sbr.rel (!%p1820_p12) target bundleno = 1468 (0x5bc), region = 184 }
 0x5b1   : > { %v1436_v60 = vpack.c.bf16 %v1149_v59, %v1149_v59 }
 0x5b3   : > { %1159 = vst [vmem:[%s584_s24 + $0xc] sm:$0xf] %v1436_v60 }
 0x5b6   : > { %v1203_v34 = vld [vmem:[%s584_s24] sm:$0xff] }
 0x5b7   : > { %1204 = vst [vmem:[%s1172_s15] sm:$0xff] %v1203_v34 }
 0x5ba   : > { %v1205_v62 = vld [vmem:[%s584_s24 + $0x8] sm:$0xff] }
 0x5bb   : > { %1206 = vst [vmem:[%s1172_s15 + $0x10] sm:$0xff] %v1205_v62 }
 0x5bc PF: > { %s17_s9 = sadd.s32 1, %s1675_s9   ;;  %s2058_s16 = sld [smem:[#allocation13_spill]] }
 0x5bd   : > { %p14_p3 = scmp.ge.s32.totalorder %s17_s9, 4   ;;  %s2059_s28 = sld [smem:[#allocation10_spill]] }
 0x5be   : > { %s2060_s29 = sld [smem:[#allocation12_spill]]  ;;  %s2062_s24 = smov %s1647_s25 }
 0x5bf   : > { %s2061_s11 = sld [smem:[#allocation11_spill]]  ;;  %s2063_s25 = smov %s1809_s14 }
 0x5c0   : > { %s2064_s26 = smov %s1655_s27  ;;  %s2066_s30 = smov %s1671_s8 }
 0x5c1   :  { %16 = sbr.rel (!%p14_p3) target bundleno = 7 (0x7), region = 291 }
 0x5c2   : > { %s2065_s27 = smov %s2058_s16 }
 0x5c5   : > { %s2067_s8 = smov %s2061_s11 }

// kernel: custom_llama_model.16
= control target key start
LH: loop header
LB: loop body
LE: loop exit
PB: predicated region body
PF: predicated region fallthrough
CT: control target
= control target key end

     0   :  { %7 = vsyncpa [#allocation4], 0  ;;  %s2175_s0 = inlined_call_operand.vmem [shape: bf16[16,512], index: 0, kind: input, shape index: {}]   ;;  %s2176_s1 = inlined_call_operand.hbm [shape: bf16[512,1024], index: 1, kind: input, shape index: {}]   ;;  %s2177_s2 = inlined_call_operand.vmem [shape: bf16[16,1024], index: 2, kind: output, shape index: {}]  }
   0x1   :  { %9 = vsyncpa [#allocation4 + $0x1], 0  ;;  %s1917_s9 = smov 0   ;;  %s1919_s10 = smov 0  }
   0x2   :  { %s1921_s11 = smov 0   ;;  %s1923_s12 = smov 0  }
   0x3   :  { %s1925_s13 = smov 0   ;;  %s1927_s14 = smov 0  }
   0x4 LB: > { %s1404_s15 = sadd.s32 4294967295, %s1896_s14   ;;  %s30_s16 = sadd.s32 1, %s1892_s13  ;;  %s1896_s14 = sphi %s1927_s14, %s15_s14   ;;  %s1892_s13 = sphi %s1925_s13, %s2186_s13   ;;  %s1888_s12 = sphi %s1923_s12, %s2185_s12   ;;  %s1884_s11 = sphi %s1921_s11, %s2184_s11   ;;  %s1880_s10 = sphi %s1919_s10, %s2183_s10   ;;  %s1876_s9 = sphi %s1917_s9, %s2182_s9  }
   0x5   : > { %p32_p0 = scmp.ge.s32.totalorder %s30_s16, 2  ;;  %s71_s17 = sadd.s32 1, %s1884_s11 }
   0x6   : > { %p78_p1 = scmp.ne.s32.totalorder %s1884_s11, %s1880_s10  ;;  %p79_p2 = scmp.eq.s32.totalorder %s1896_s14, 0 }
   0x7   : > { %s2188_s16 = smov (%p32_p0, %s30_s16), 0  ;;  %p84_p4 = scmp.ne.s32.totalorder %s1880_s10, %s1876_s9 }
   0x8   : > { %p1953_p3 = por %p79_p2, %p78_p1  ;;  %s67_s19 = ssub.s32 %s1892_s13, %s2188_s16 }
   0x9   : > { %p85_p5 = scmp.eq.s32.totalorder %s1404_s15, 0  ;;  %p69_p6 = scmp.eq.s32.totalorder %s67_s19, 0 }
   0xa   : > { %p110_p7 = scmp.eq.s32.totalorder %s1404_s15, 1  ;;  %p1568_p10 = scmp.lt.s32.totalorder %s1896_s14, 2 }
   0xb   : > { %p1960_p8 = por %p85_p5, %p84_p4  ;;  %s151_s23 = sand.u32 1, %s1884_s11  }
   0xc   : > { %s1965_s21 = scalar_select %p69_p6, %s1884_s11, %s71_s17  }
   0xd   : > { %p1967_p9 = por %p110_p7, %p78_p1  ;;  %s1556_s24 = sshll.u32 %s1892_s13, 8 }
   0xe   : > { %s1409_s25 = sshll.u32 %s151_s23, 10  ;;  %s164_s28 = scalar_lea.hbm %s2176_s1, %s1556_s24 }
   0xf   : > { %s155_s29 = scalar_lea.vmem [#allocation3], %s1409_s25  ;;  %p1979_p11 = pnand %p1568_p10, %p1953_p3 }
  0x10   : > { %s165_s30 = sshll.u32 %s155_s29, 4  ;;  %p1412_p12 = scmp.ge.s32.totalorder %s1896_s14, 1  ;;  %s166_s30 = int_to_ptr.vmem [resolvable:$true] %s165_s30 }
  0x11   : > { %s152_s4 = scalar_lea.sflag [#allocation4], %s151_s23  ;;  %p1820_p13 = pneg %p1979_p11 }
  0x12   : > { %s1831_s5 = scalar_lea.vmem %s166_s30, 16384  ;;  %s1898_s6 = smov [#allocation3]  }
  0x13   : > { %p1832_p0 = scmp.ne.s32.totalorder %s166_s30, %s1831_s5  ;;  %s1836_s7 = sshll.u32 %s1898_s6, 4  ;;  %s1837_s7 = int_to_ptr.vmem [resolvable:$false] %s1836_s7 }
  0x14   : > { %s1838_s8 = scalar_lea.vmem %s1837_s7, 32768  ;;  %p1839_p4 = scmp.lt.s32.totalorder %s166_s30, %s1837_s7 }
  0x15   : > { %p1834_p1 = pnand %p1832_p0, %p1820_p13  ;;  %p1840_p5 = scmp.lt.s32.totalorder %s1838_s8, %s1831_s5 }
  0x17   : > { %p1835_p2 = pneg %p1834_p1  ;;  %p1841_p3 = por %p1840_p5, %p1839_p4 }
  0x19   : > { %p1842_p6 = pnand %p1841_p3, %p1835_p2 }
  0x1b   : > { %1845 = shalt.err (!%p1842_p6)
}
  0x1c   : > { %s1899_s9 = smov 512   ;;  %s1900_s15 = smov 256  }
  0x1d   : > { %s1901_s17 = smov 16   ;;  %p173_p7 = scmp.lt.s32.totalorder %s1896_s14, 3 }
  0x1e   : > { %1567 = dma.hbm_to_vmem [thread:$0]  (!%p1979_p11), %s164_s28, 16384, %s166_s30, %s152_s4, %s1899_s9, %s1900_s15, %s1901_s17  }
  0x1f   : > { %p174_p10 = pnand %p1412_p12, %p173_p7 }
  0x20   : > { %s1992_s18 = sand.u32 (!%p174_p10), 1, %s1880_s10  }
  0x21   : > { %177 = sbr.rel (%p174_p10) target bundleno = 381 (0x17d), region = 28  ;;  %s1413_s19 = sshll.u32 (!%p174_p10), %s1992_s18, 10 }
  0x22   : > { %s180_s23 = scalar_lea.sflag (!%p174_p10), [#allocation4], %s1992_s18  ;;  %s1996_s24 = scalar_lea.vmem (!%p174_p10), [#allocation3], %s1413_s19 }
  0x26   : > { %1871 = dma.done.wait (%p1960_p8), %s180_s23, 16384  }
  0x27   : > { %1873 = vsyncadd (%p1960_p8), %s180_s23, 4294950912  ;;  %v1620_v0 = vld [vmem:[%s1996_s24 + $0xe4] ss:$16 sps:$4 sm:$0xff]   ;;  %v1624_v2 = vld [vmem:[%s1996_s24 + $0xe0] ss:$16 sps:$4 sm:$0xff]   ;;  %s1414_s4 = sshll.u32 %s1992_s18, 5 }
  0x28   : > { %v1622_v1 = vld [vmem:[%s1996_s24 + $0x2e4] ss:$16 sps:$4 sm:$0xff]   ;;  %1041 = vmatprep.subr.bf16.mxu0 %v1620_v0  ;;  %v1625_v3 = vld [vmem:[%s1996_s24 + $0x2e0] ss:$16 sps:$4 sm:$0xff]   ;;  %v1721_v51 = vld [vmem:[%s2175_s0 + $0xc] ss:$16 sps:$4 sm:$0xff]  }
  0x29   : > { %1084 = vmatprep.subr.bf16.mxu1 %v1622_v1  ;;  %v1626_v4 = vld [vmem:[%s1996_s24 + $0xc4] ss:$16 sps:$4 sm:$0xff]   ;;  %1042 = vmatpush1.bf16.msra.mxu0 %v1624_v2  ;;  %v1630_v6 = vld [vmem:[%s1996_s24 + $0xc0] ss:$16 sps:$4 sm:$0xff]   ;;  %v1724_v2 = vld [vmem:[%s1996_s24 + $0xec] ss:$16 sps:$4 sm:$0xff]  }
  0x2a   : > { %1085 = vmatpush1.bf16.msra.mxu1 %v1625_v3  ;;  %v1628_v5 = vld [vmem:[%s1996_s24 + $0x2c4] ss:$16 sps:$4 sm:$0xff]   ;;  %1043 = vmatprep.subr.bf16.mxu0 %v1626_v4  ;;  %v1631_v7 = vld [vmem:[%s1996_s24 + $0x2c0] ss:$16 sps:$4 sm:$0xff]   ;;  %v1727_v3 = vld [vmem:[%s1996_s24 + $0x2ec] ss:$16 sps:$4 sm:$0xff]  }
  0x2b   : > { %1086 = vmatprep.subr.bf16.mxu1 %v1628_v5  ;;  %v1632_v8 = vld [vmem:[%s1996_s24 + $0xa4] ss:$16 sps:$4 sm:$0xff]   ;;  %v1636_v10 = vld [vmem:[%s1996_s24 + $0xa0] ss:$16 sps:$4 sm:$0xff]   ;;  %1116 = vmatprep.mubr.bf16.mxu1 %v1721_v51  ;;  %v2082_v5 = vld [vmem:[%s2175_s0 + $0x8] ss:$16 sps:$4 sm:$0xff]  }
  0x2c   : > { %v1634_v9 = vld [vmem:[%s1996_s24 + $0x2a4] ss:$16 sps:$4 sm:$0xff]   ;;  %v1637_v11 = vld [vmem:[%s1996_s24 + $0x2a0] ss:$16 sps:$4 sm:$0xff]   ;;  %s212_s5 = scalar_lea.vmem [#allocation5], %s1414_s4  ;;  %s1561_s6 = sshll.u32 (%p1967_p9), %s1888_s12, 4 }
  0x2d   : > { %1044 = vmatpush1.bf16.msra.mxu0 %v1630_v6  ;;  %v1638_v12 = vld [vmem:[%s1996_s24 + $0x84] ss:$16 sps:$4 sm:$0xff]   ;;  %v1642_v14 = vld [vmem:[%s1996_s24 + $0x80] ss:$16 sps:$4 sm:$0xff]   ;;  %v1722_v6 = vld [vmem:[%s1996_s24 + $0xe8] ss:$16 sps:$4 sm:$0xff]   ;;  %s1280_s9 = scalar_lea.vmem (%p1967_p9), %s2177_s2, %s1561_s6 }
  0x2e   : > { %1087 = vmatpush1.bf16.msra.mxu1 %v1631_v7  ;;  %1045 = vmatprep.subr.bf16.mxu0 %v1632_v8  ;;  %v1640_v13 = vld [vmem:[%s1996_s24 + $0x284] ss:$16 sps:$4 sm:$0xff]   ;;  %v1643_v15 = vld [vmem:[%s1996_s24 + $0x280] ss:$16 sps:$4 sm:$0xff]   ;;  %v1725_v7 = vld [vmem:[%s1996_s24 + $0x2e8] ss:$16 sps:$4 sm:$0xff]  }
  0x2f   : > { %1088 = vmatprep.subr.bf16.mxu1 %v1634_v9  ;;  %v1644_v16 = vld [vmem:[%s1996_s24 + $0x64] ss:$16 sps:$4 sm:$0xff]   ;;  %v1648_v18 = vld [vmem:[%s1996_s24 + $0x60] ss:$16 sps:$4 sm:$0xff]   ;;  %v1730_v8 = vld [vmem:[%s1996_s24 + $0xcc] ss:$16 sps:$4 sm:$0xff]  }
  0x30   : > { %v1646_v17 = vld [vmem:[%s1996_s24 + $0x264] ss:$16 sps:$4 sm:$0xff]   ;;  %v1649_v19 = vld [vmem:[%s1996_s24 + $0x260] ss:$16 sps:$4 sm:$0xff]   ;;  %v1733_v9 = vld [vmem:[%s1996_s24 + $0x2cc] ss:$16 sps:$4 sm:$0xff]  }
  0x31   : > { %1046 = vmatpush1.bf16.msra.mxu0 %v1636_v10  ;;  %v1650_v20 = vld [vmem:[%s1996_s24 + $0x44] ss:$16 sps:$4 sm:$0xff]   ;;  %v1654_v22 = vld [vmem:[%s1996_s24 + $0x40] ss:$16 sps:$4 sm:$0xff]   ;;  %v1728_v10 = vld [vmem:[%s1996_s24 + $0xc8] ss:$16 sps:$4 sm:$0xff]  }
  0x32   : > { %1089 = vmatpush1.bf16.msra.mxu1 %v1637_v11  ;;  %1047 = vmatprep.subr.bf16.mxu0 %v1638_v12  ;;  %v1652_v21 = vld [vmem:[%s1996_s24 + $0x244] ss:$16 sps:$4 sm:$0xff]   ;;  %v1655_v23 = vld [vmem:[%s1996_s24 + $0x240] ss:$16 sps:$4 sm:$0xff]   ;;  %v1731_v11 = vld [vmem:[%s1996_s24 + $0x2c8] ss:$16 sps:$4 sm:$0xff]  }
  0x33   : > { %1090 = vmatprep.subr.bf16.mxu1 %v1640_v13  ;;  %v1656_v24 = vld [vmem:[%s1996_s24 + $0x24] ss:$16 sps:$4 sm:$0xff]   ;;  %v1660_v26 = vld [vmem:[%s1996_s24 + $0x20] ss:$16 sps:$4 sm:$0xff]   ;;  %v1736_v12 = vld [vmem:[%s1996_s24 + $0xac] ss:$16 sps:$4 sm:$0xff]  }
  0x34   : > { %v1658_v25 = vld [vmem:[%s1996_s24 + $0x224] ss:$16 sps:$4 sm:$0xff]   ;;  %v1661_v27 = vld [vmem:[%s1996_s24 + $0x220] ss:$16 sps:$4 sm:$0xff]   ;;  %v1739_v13 = vld [vmem:[%s1996_s24 + $0x2ac] ss:$16 sps:$4 sm:$0xff]  }
  0x35   : > { %1048 = vmatpush1.bf16.msra.mxu0 %v1642_v14  ;;  %v1662_v28 = vld [vmem:[%s1996_s24 + $0x4] ss:$16 sps:$4 sm:$0xff]   ;;  %v1666_v30 = vld [vmem:[%s1996_s24] ss:$16 sps:$4 sm:$0xff]   ;;  %v1734_v14 = vld [vmem:[%s1996_s24 + $0xa8] ss:$16 sps:$4 sm:$0xff]  }
  0x36   : > { %1091 = vmatpush1.bf16.msra.mxu1 %v1643_v15  ;;  %1049 = vmatprep.subr.bf16.mxu0 %v1644_v16  ;;  %v1664_v29 = vld [vmem:[%s1996_s24 + $0x204] ss:$16 sps:$4 sm:$0xff]   ;;  %v1667_v31 = vld [vmem:[%s1996_s24 + $0x200] ss:$16 sps:$4 sm:$0xff]   ;;  %v1737_v15 = vld [vmem:[%s1996_s24 + $0x2a8] ss:$16 sps:$4 sm:$0xff]  }
  0x37   : > { %1092 = vmatprep.subr.bf16.mxu1 %v1646_v17  ;;  %v1668_v32 = vld [vmem:[%s1996_s24 + $0x1e4] ss:$16 sps:$4 sm:$0xff]   ;;  %v1672_v34 = vld [vmem:[%s1996_s24 + $0x1e0] ss:$16 sps:$4 sm:$0xff]   ;;  %v1742_v16 = vld [vmem:[%s1996_s24 + $0x8c] ss:$16 sps:$4 sm:$0xff]  }
  0x38   : > { %v1670_v33 = vld [vmem:[%s1996_s24 + $0x3e4] ss:$16 sps:$4 sm:$0xff]   ;;  %v1673_v35 = vld [vmem:[%s1996_s24 + $0x3e0] ss:$16 sps:$4 sm:$0xff]   ;;  %v1745_v17 = vld [vmem:[%s1996_s24 + $0x28c] ss:$16 sps:$4 sm:$0xff]  }
  0x39   : > { %1050 = vmatpush1.bf16.msra.mxu0 %v1648_v18  ;;  %v1674_v36 = vld [vmem:[%s1996_s24 + $0x1c4] ss:$16 sps:$4 sm:$0xff]   ;;  %v1678_v38 = vld [vmem:[%s1996_s24 + $0x1c0] ss:$16 sps:$4 sm:$0xff]   ;;  %v1740_v18 = vld [vmem:[%s1996_s24 + $0x88] ss:$16 sps:$4 sm:$0xff]  }
  0x3a   : > { %1093 = vmatpush1.bf16.msra.mxu1 %v1649_v19  ;;  %1051 = vmatprep.subr.bf16.mxu0 %v1650_v20  ;;  %v1676_v37 = vld [vmem:[%s1996_s24 + $0x3c4] ss:$16 sps:$4 sm:$0xff]   ;;  %v1679_v39 = vld [vmem:[%s1996_s24 + $0x3c0] ss:$16 sps:$4 sm:$0xff]   ;;  %v1743_v19 = vld [vmem:[%s1996_s24 + $0x288] ss:$16 sps:$4 sm:$0xff]  }
  0x3b   : > { %1094 = vmatprep.subr.bf16.mxu1 %v1652_v21  ;;  %v1680_v40 = vld [vmem:[%s1996_s24 + $0x1a4] ss:$16 sps:$4 sm:$0xff]   ;;  %v1684_v42 = vld [vmem:[%s1996_s24 + $0x1a0] ss:$16 sps:$4 sm:$0xff]   ;;  %v1748_v20 = vld [vmem:[%s1996_s24 + $0x6c] ss:$16 sps:$4 sm:$0xff]  }
  0x3c   : > { %v1682_v41 = vld [vmem:[%s1996_s24 + $0x3a4] ss:$16 sps:$4 sm:$0xff]   ;;  %v1685_v43 = vld [vmem:[%s1996_s24 + $0x3a0] ss:$16 sps:$4 sm:$0xff]   ;;  %v1751_v21 = vld [vmem:[%s1996_s24 + $0x26c] ss:$16 sps:$4 sm:$0xff]  }
  0x3d   : > { %1052 = vmatpush1.bf16.msra.mxu0 %v1654_v22  ;;  %v1686_v44 = vld [vmem:[%s1996_s24 + $0x184] ss:$16 sps:$4 sm:$0xff]   ;;  %v1690_v46 = vld [vmem:[%s1996_s24 + $0x180] ss:$16 sps:$4 sm:$0xff]   ;;  %v1746_v22 = vld [vmem:[%s1996_s24 + $0x68] ss:$16 sps:$4 sm:$0xff]  }
  0x3e   : > { %1095 = vmatpush1.bf16.msra.mxu1 %v1655_v23  ;;  %1053 = vmatprep.subr.bf16.mxu0 %v1656_v24  ;;  %v1688_v45 = vld [vmem:[%s1996_s24 + $0x384] ss:$16 sps:$4 sm:$0xff]   ;;  %v1691_v47 = vld [vmem:[%s1996_s24 + $0x380] ss:$16 sps:$4 sm:$0xff]   ;;  %v1749_v23 = vld [vmem:[%s1996_s24 + $0x268] ss:$16 sps:$4 sm:$0xff]  }
  0x3f   : > { %1096 = vmatprep.subr.bf16.mxu1 %v1658_v25  ;;  %v1692_v48 = vld [vmem:[%s1996_s24 + $0x164] ss:$16 sps:$4 sm:$0xff]   ;;  %v1696_v52 = vld [vmem:[%s1996_s24 + $0x160] ss:$16 sps:$4 sm:$0xff]   ;;  %v1754_v24 = vld [vmem:[%s1996_s24 + $0x4c] ss:$16 sps:$4 sm:$0xff]  }
  0x40   : > { %v1718_v49 = vld [vmem:[%s2175_s0 + $0x4] ss:$16 sps:$4 sm:$0xff]   ;;  %v1697_v53 = vld [vmem:[%s1996_s24 + $0x360] ss:$16 sps:$4 sm:$0xff]   ;;  %v1757_v25 = vld [vmem:[%s1996_s24 + $0x24c] ss:$16 sps:$4 sm:$0xff]  }
  0x41   : > { %1054 = vmatpush1.bf16.msra.mxu0 %v1660_v26  ;;  %v1694_v50 = vld [vmem:[%s1996_s24 + $0x364] ss:$16 sps:$4 sm:$0xff]   ;;  %1073 = vmatprep.mubr.bf16.mxu0 %v1718_v49  ;;  %v1702_v56 = vld [vmem:[%s1996_s24 + $0x140] ss:$16 sps:$4 sm:$0xff]   ;;  %v1752_v26 = vld [vmem:[%s1996_s24 + $0x48] ss:$16 sps:$4 sm:$0xff]  }
  0x42   : > { %1097 = vmatpush1.bf16.msra.mxu1 %v1661_v27  ;;  %1055 = vmatprep.subr.bf16.mxu0 %v1662_v28  ;;  %v1698_v54 = vld [vmem:[%s1996_s24 + $0x144] ss:$16 sps:$4 sm:$0xff]   ;;  %v1703_v57 = vld [vmem:[%s1996_s24 + $0x340] ss:$16 sps:$4 sm:$0xff]   ;;  %v1755_v27 = vld [vmem:[%s1996_s24 + $0x248] ss:$16 sps:$4 sm:$0xff]  }
  0x43   : > { %1098 = vmatprep.subr.bf16.mxu1 %v1664_v29  ;;  %v1700_v55 = vld [vmem:[%s1996_s24 + $0x344] ss:$16 sps:$4 sm:$0xff]   ;;  %v1708_v60 = vld [vmem:[%s1996_s24 + $0x120] ss:$16 sps:$4 sm:$0xff]   ;;  %v1760_v28 = vld [vmem:[%s1996_s24 + $0x2c] ss:$16 sps:$4 sm:$0xff]  }
  0x44   : > { %v1704_v58 = vld [vmem:[%s1996_s24 + $0x124] ss:$16 sps:$4 sm:$0xff]   ;;  %v1709_v61 = vld [vmem:[%s1996_s24 + $0x320] ss:$16 sps:$4 sm:$0xff]   ;;  %v1763_v29 = vld [vmem:[%s1996_s24 + $0x22c] ss:$16 sps:$4 sm:$0xff]  }
  0x45   : > { %1056 = vmatpush1.bf16.msra.mxu0 %v1666_v30  ;;  %v1706_v59 = vld [vmem:[%s1996_s24 + $0x324] ss:$16 sps:$4 sm:$0xff]   ;;  %v1714_v0 = vld [vmem:[%s1996_s24 + $0x100] ss:$16 sps:$4 sm:$0xff]   ;;  %v1758_v30 = vld [vmem:[%s1996_s24 + $0x28] ss:$16 sps:$4 sm:$0xff]  }
  0x46   : > { %1099 = vmatpush1.bf16.msra.mxu1 %v1667_v31  ;;  %1057 = vmatprep.subr.bf16.mxu0 %v1668_v32  ;;  %v1710_v62 = vld [vmem:[%s1996_s24 + $0x104] ss:$16 sps:$4 sm:$0xff]   ;;  %v1715_v1 = vld [vmem:[%s1996_s24 + $0x300] ss:$16 sps:$4 sm:$0xff]   ;;  %v1761_v31 = vld [vmem:[%s1996_s24 + $0x228] ss:$16 sps:$4 sm:$0xff]  }
  0x47   : > { %1100 = vmatprep.subr.bf16.mxu1 %v1670_v33  ;;  %v1712_v63 = vld [vmem:[%s1996_s24 + $0x304] ss:$16 sps:$4 sm:$0xff]   ;;  %v2077_v4 = vld [vmem:[%s2175_s0] ss:$16 sps:$4 sm:$0xff]   ;;  %v1766_v32 = vld [vmem:[%s1996_s24 + $0xc] ss:$16 sps:$4 sm:$0xff]  }
  0x48   : > { %v1769_v33 = vld [vmem:[%s1996_s24 + $0x20c] ss:$16 sps:$4 sm:$0xff]  }
  0x49   : > { %1058 = vmatpush2.bf16.msra.mxu0 %v1672_v34  ;;  %v1764_v34 = vld [vmem:[%s1996_s24 + $0x8] ss:$16 sps:$4 sm:$0xff]  }
  0x4a   : > { %1101 = vmatpush2.bf16.msra.mxu1 %v1673_v35  ;;  %1059 = vmatprep.subr.bf16.mxu0 %v1674_v36  ;;  %v1767_v35 = vld [vmem:[%s1996_s24 + $0x208] ss:$16 sps:$4 sm:$0xff]   ;;  %v1772_v36 = vld [vmem:[%s1996_s24 + $0x1ec] ss:$16 sps:$4 sm:$0xff]  }
  0x4b   : > { %1102 = vmatprep.subr.bf16.mxu1 %v1676_v37  ;;  %v1775_v37 = vld [vmem:[%s1996_s24 + $0x3ec] ss:$16 sps:$4 sm:$0xff]  }
  0x4d   : > { %1060 = vmatpush2.bf16.msra.mxu0 %v1678_v38  ;;  %v1770_v38 = vld [vmem:[%s1996_s24 + $0x1e8] ss:$16 sps:$4 sm:$0xff]  }
  0x4e   : > { %1103 = vmatpush2.bf16.msra.mxu1 %v1679_v39  ;;  %1061 = vmatprep.subr.bf16.mxu0 %v1680_v40  ;;  %v1773_v39 = vld [vmem:[%s1996_s24 + $0x3e8] ss:$16 sps:$4 sm:$0xff]   ;;  %v1778_v40 = vld [vmem:[%s1996_s24 + $0x1cc] ss:$16 sps:$4 sm:$0xff]  }
  0x4f   : > { %1104 = vmatprep.subr.bf16.mxu1 %v1682_v41  ;;  %v1781_v41 = vld [vmem:[%s1996_s24 + $0x3cc] ss:$16 sps:$4 sm:$0xff]  }
  0x51   : > { %1062 = vmatpush2.bf16.msra.mxu0 %v1684_v42  ;;  %v1776_v42 = vld [vmem:[%s1996_s24 + $0x1c8] ss:$16 sps:$4 sm:$0xff]  }
  0x52   : > { %1105 = vmatpush2.bf16.msra.mxu1 %v1685_v43  ;;  %1063 = vmatprep.subr.bf16.mxu0 %v1686_v44  ;;  %v1779_v43 = vld [vmem:[%s1996_s24 + $0x3c8] ss:$16 sps:$4 sm:$0xff]   ;;  %v1784_v44 = vld [vmem:[%s1996_s24 + $0x1ac] ss:$16 sps:$4 sm:$0xff]  }
  0x53   : > { %1106 = vmatprep.subr.bf16.mxu1 %v1688_v45  ;;  %v1787_v45 = vld [vmem:[%s1996_s24 + $0x3ac] ss:$16 sps:$4 sm:$0xff]  }
  0x55   : > { %1064 = vmatpush2.bf16.msra.mxu0 %v1690_v46  ;;  %v1782_v46 = vld [vmem:[%s1996_s24 + $0x1a8] ss:$16 sps:$4 sm:$0xff]  }
  0x56   : > { %1107 = vmatpush2.bf16.msra.mxu1 %v1691_v47  ;;  %1065 = vmatprep.subr.bf16.mxu0 %v1692_v48  ;;  %v1785_v47 = vld [vmem:[%s1996_s24 + $0x3a8] ss:$16 sps:$4 sm:$0xff]   ;;  %v1790_v48 = vld [vmem:[%s1996_s24 + $0x18c] ss:$16 sps:$4 sm:$0xff]  }
  0x57   : > { %1108 = vmatprep.subr.bf16.mxu1 %v1694_v50  ;;  %v1788_v50 = vld [vmem:[%s1996_s24 + $0x188] ss:$16 sps:$4 sm:$0xff]  }
  0x59   : > { %1066 = vmatpush2.bf16.msra.mxu0 %v1696_v52  ;;  %v1796_v52 = vld [vmem:[%s1996_s24 + $0x16c] ss:$16 sps:$4 sm:$0xff]  }
  0x5a   : > { %1109 = vmatpush2.bf16.msra.mxu1 %v1697_v53  ;;  %1067 = vmatprep.subr.bf16.mxu0 %v1698_v54  ;;  %v1799_v53 = vld [vmem:[%s1996_s24 + $0x36c] ss:$16 sps:$4 sm:$0xff]   ;;  %v1794_v54 = vld [vmem:[%s1996_s24 + $0x168] ss:$16 sps:$4 sm:$0xff]  }
  0x5b   : > { %1110 = vmatprep.subr.bf16.mxu1 %v1700_v55  ;;  %v1797_v55 = vld [vmem:[%s1996_s24 + $0x368] ss:$16 sps:$4 sm:$0xff]  }
  0x5d   : > { %1068 = vmatpush2.bf16.msra.mxu0 %v1702_v56  ;;  %v1802_v56 = vld [vmem:[%s1996_s24 + $0x14c] ss:$16 sps:$4 sm:$0xff]  }
  0x5e   : > { %1111 = vmatpush2.bf16.msra.mxu1 %v1703_v57  ;;  %1069 = vmatprep.subr.bf16.mxu0 %v1704_v58  ;;  %v1805_v57 = vld [vmem:[%s1996_s24 + $0x34c] ss:$16 sps:$4 sm:$0xff]   ;;  %v1800_v58 = vld [vmem:[%s1996_s24 + $0x148] ss:$16 sps:$4 sm:$0xff]  }
  0x5f   : > { %1112 = vmatprep.subr.bf16.mxu1 %v1706_v59  ;;  %v1803_v59 = vld [vmem:[%s1996_s24 + $0x348] ss:$16 sps:$4 sm:$0xff]  }
  0x61   : > { %1070 = vmatpush2.bf16.msra.mxu0 %v1708_v60  ;;  %v1808_v60 = vld [vmem:[%s1996_s24 + $0x12c] ss:$16 sps:$4 sm:$0xff]  }
  0x62   : > { %1113 = vmatpush2.bf16.msra.mxu1 %v1709_v61  ;;  %1071 = vmatprep.subr.bf16.mxu0 %v1710_v62  ;;  %v1811_v61 = vld [vmem:[%s1996_s24 + $0x32c] ss:$16 sps:$4 sm:$0xff]   ;;  %v1806_v62 = vld [vmem:[%s1996_s24 + $0x128] ss:$16 sps:$4 sm:$0xff]  }
  0x63   : > { %1114 = vmatprep.subr.bf16.mxu1 %v1712_v63  ;;  %v1809_v63 = vld [vmem:[%s1996_s24 + $0x328] ss:$16 sps:$4 sm:$0xff]  }
  0x65   : > { %1072 = vmatpush2.bf16.msra.mxu0 %v1714_v0  ;;  %v1814_v0 = vld [vmem:[%s1996_s24 + $0x10c] ss:$16 sps:$4 sm:$0xff]  }
  0x66   : > { %1115 = vmatpush2.bf16.msra.mxu1 %v1715_v1  ;;  %1127 = vmatprep.subr.bf16.mxu0 %v1724_v2  ;;  %v1817_v1 = vld [vmem:[%s1996_s24 + $0x30c] ss:$16 sps:$4 sm:$0xff]   ;;  %v1812_v2 = vld [vmem:[%s1996_s24 + $0x108] ss:$16 sps:$4 sm:$0xff]  }
  0x67   : > { %1170 = vmatprep.subr.bf16.mxu1 %v1727_v3  ;;  %v1815_v3 = vld [vmem:[%s1996_s24 + $0x308] ss:$16 sps:$4 sm:$0xff]  }
  0x68   : > { %1074 = vmatmul.mubr.bf16.vlgmr.msra.gmra.mxu0 %v2077_v4 }
  0x69   : > { %1117 = vmatmul.mubr.bf16.vlgmr.msra.gmra.mxu1 %v2082_v5  ;;  %1128 = vmatpush1.bf16.msra.mxu0 %v1722_v6 }
  0x6a   : > { %1171 = vmatpush1.bf16.msra.mxu1 %v1725_v7  ;;  %1129 = vmatprep.subr.bf16.mxu0 %v1730_v8 }
  0x6b   : > { %1172 = vmatprep.subr.bf16.mxu1 %v1733_v9  ;;  %1159 = vmatprep.mubr.bf16.mxu0 %v1718_v49  ;;  %v1793_v49 = vld [vmem:[%s1996_s24 + $0x38c] ss:$16 sps:$4 sm:$0xff]  }
  0x6c   : > { %1202 = vmatprep.mubr.bf16.mxu1 %v1721_v51  ;;  %v1791_v51 = vld [vmem:[%s1996_s24 + $0x388] ss:$16 sps:$4 sm:$0xff]  }
  0x6d   : > { %1130 = vmatpush1.bf16.msra.mxu0 %v1728_v10 }
  0x6e   : > { %1173 = vmatpush1.bf16.msra.mxu1 %v1731_v11  ;;  %1131 = vmatprep.subr.bf16.mxu0 %v1736_v12 }
  0x6f   : > { %1174 = vmatprep.subr.bf16.mxu1 %v1739_v13 }
  0x71   : > { %1132 = vmatpush1.bf16.msra.mxu0 %v1734_v14 }
  0x72   : > { %1175 = vmatpush1.bf16.msra.mxu1 %v1737_v15  ;;  %1133 = vmatprep.subr.bf16.mxu0 %v1742_v16 }
  0x73   : > { %1176 = vmatprep.subr.bf16.mxu1 %v1745_v17 }
  0x75   : > { %1134 = vmatpush1.bf16.msra.mxu0 %v1740_v18 }
  0x76   : > { %1177 = vmatpush1.bf16.msra.mxu1 %v1743_v19  ;;  %1135 = vmatprep.subr.bf16.mxu0 %v1748_v20 }
  0x77   : > { %1178 = vmatprep.subr.bf16.mxu1 %v1751_v21 }
  0x79   : > { %1136 = vmatpush1.bf16.msra.mxu0 %v1746_v22 }
  0x7a   : > { %1179 = vmatpush1.bf16.msra.mxu1 %v1749_v23  ;;  %1137 = vmatprep.subr.bf16.mxu0 %v1754_v24 }
  0x7b   : > { %1180 = vmatprep.subr.bf16.mxu1 %v1757_v25 }
  0x7d   : > { %1138 = vmatpush1.bf16.msra.mxu0 %v1752_v26 }
  0x7e   : > { %1181 = vmatpush1.bf16.msra.mxu1 %v1755_v27  ;;  %1139 = vmatprep.subr.bf16.mxu0 %v1760_v28 }
  0x7f   : > { %1182 = vmatprep.subr.bf16.mxu1 %v1763_v29 }
  0x81   : > { %1140 = vmatpush1.bf16.msra.mxu0 %v1758_v30 }
  0x82   : > { %1183 = vmatpush1.bf16.msra.mxu1 %v1761_v31  ;;  %1141 = vmatprep.subr.bf16.mxu0 %v1766_v32 }
  0x83   : > { %1184 = vmatprep.subr.bf16.mxu1 %v1769_v33 }
  0x85   : > { %1142 = vmatpush1.bf16.msra.mxu0 %v1764_v34 }
  0x86   : > { %1185 = vmatpush1.bf16.msra.mxu1 %v1767_v35  ;;  %1143 = vmatprep.subr.bf16.mxu0 %v1772_v36 }
  0x87   : > { %1186 = vmatprep.subr.bf16.mxu1 %v1775_v37 }
  0x89   : > { %1144 = vmatpush2.bf16.msra.mxu0 %v1770_v38 }
  0x8a   : > { %1187 = vmatpush2.bf16.msra.mxu1 %v1773_v39  ;;  %1145 = vmatprep.subr.bf16.mxu0 %v1778_v40 }
  0x8b   : > { %1188 = vmatprep.subr.bf16.mxu1 %v1781_v41 }
  0x8d   : > { %1146 = vmatpush2.bf16.msra.mxu0 %v1776_v42 }
  0x8e   : > { %1189 = vmatpush2.bf16.msra.mxu1 %v1779_v43  ;;  %1147 = vmatprep.subr.bf16.mxu0 %v1784_v44 }
  0x8f   : > { %1190 = vmatprep.subr.bf16.mxu1 %v1787_v45 }
  0x91   : > { %1148 = vmatpush2.bf16.msra.mxu0 %v1782_v46 }
  0x92   : > { %1191 = vmatpush2.bf16.msra.mxu1 %v1785_v47  ;;  %1149 = vmatprep.subr.bf16.mxu0 %v1790_v48 }
  0x93   : > { %1192 = vmatprep.subr.bf16.mxu1 %v1793_v49 }
  0x95   : > { %1150 = vmatpush2.bf16.msra.mxu0 %v1788_v50 }
  0x96   : > { %1193 = vmatpush2.bf16.msra.mxu1 %v1791_v51  ;;  %1151 = vmatprep.subr.bf16.mxu0 %v1796_v52 }
  0x97   : > { %1194 = vmatprep.subr.bf16.mxu1 %v1799_v53 }
  0x99   : > { %1152 = vmatpush2.bf16.msra.mxu0 %v1794_v54 }
  0x9a   : > { %1195 = vmatpush2.bf16.msra.mxu1 %v1797_v55  ;;  %1153 = vmatprep.subr.bf16.mxu0 %v1802_v56 }
  0x9b   : > { %1196 = vmatprep.subr.bf16.mxu1 %v1805_v57 }
  0x9d   : > { %1154 = vmatpush2.bf16.msra.mxu0 %v1800_v58 }
  0x9e   : > { %1197 = vmatpush2.bf16.msra.mxu1 %v1803_v59  ;;  %1155 = vmatprep.subr.bf16.mxu0 %v1808_v60 }
  0x9f   : > { %1198 = vmatprep.subr.bf16.mxu1 %v1811_v61 }
  0xa1   : > { %1156 = vmatpush2.bf16.msra.mxu0 %v1806_v62 }
  0xa2   : > { %1199 = vmatpush2.bf16.msra.mxu1 %v1809_v63  ;;  %1157 = vmatprep.subr.bf16.mxu0 %v1814_v0 }
  0xa3   : > { %1200 = vmatprep.subr.bf16.mxu1 %v1817_v1 }
  0xa5   : > { %1158 = vmatpush2.bf16.msra.mxu0 %v1812_v2 }
  0xa6   : > { %1201 = vmatpush2.bf16.msra.mxu1 %v1815_v3 }
  0xa8   : > { %1160 = vmatmul.mubr.bf16.vlgmr.msra.gmra.mxu0 %v2077_v4 }
  0xa9   : > { %1203 = vmatmul.mubr.bf16.vlgmr.msra.gmra.mxu1 %v2082_v5 }
 0x128   : > { %v1075_v6 = vpop.f32.mrf.mxu0 }
 0x129   : > { %v1118_v7 = vpop.f32.mrf.mxu1 }
 0x12a   : > { %v1119_v8 = vadd.f32 %v1118_v7, %v1075_v6  ;;  %v1077_v9 = vpop.f32.mrf.mxu0 }
 0x12b   : > { %v1120_v10 = vpop.f32.mrf.mxu1 }
 0x12c   : > { %v1121_v11 = vadd.f32 %v1120_v10, %v1077_v9  ;;  %v1079_v12 = vpop.f32.mrf.mxu0 }
 0x12d   : > { %v1122_v13 = vpop.f32.mrf.mxu1 }
 0x12e   : > { %v1557_v14 = vpack.c.bf16 %v1121_v11, %v1119_v8  ;;  %v1081_v15 = vpop.f32.mrf.mxu0  ;;  %v1123_v17 = vadd.f32 %v1122_v13, %v1079_v12 }
 0x12f   : > { %v1124_v16 = vpop.f32.mrf.mxu1 }
 0x130   : > { %1264 = vst [vmem:[%s212_s5] sm:$0xff] %v1557_v14  ;;  %v1125_v18 = vadd.f32 %v1124_v16, %v1081_v15 }
 0x132   : > { %v1559_v19 = vpack.c.bf16 %v1125_v18, %v1123_v17 }
 0x134   : > { %1266 = vst [vmem:[%s212_s5 + $0x10] sm:$0xff] %v1559_v19 }
 0x137   : > { %v1293_v32 = vld [vmem:[%s212_s5] sm:$0xff] (%p1967_p9) }
 0x138   : > { %1294 = vst [vmem:[%s1280_s9] sm:$0xff] (%p1967_p9), %v1293_v32 }
 0x13b   : > { %v1297_v34 = vld [vmem:[%s212_s5 + $0x10] sm:$0xff] (%p1967_p9) }
 0x13c   : > { %1298 = vst [vmem:[%s1280_s9 + $0x20] sm:$0xff] (%p1967_p9), %v1297_v34 }
 0x168   : > { %v1161_v4 = vpop.f32.mrf.mxu0 }
 0x169   : > { %v1204_v5 = vpop.f32.mrf.mxu1 }
 0x16a   : > { %v1163_v20 = vpop.f32.mrf.mxu0  ;;  %v1205_v22 = vadd.f32 %v1204_v5, %v1161_v4 }
 0x16b   : > { %v1206_v21 = vpop.f32.mrf.mxu1 }
 0x16c   : > { %v1207_v23 = vadd.f32 %v1206_v21, %v1163_v20  ;;  %v1165_v24 = vpop.f32.mrf.mxu0 }
 0x16d   : > { %v1208_v25 = vpop.f32.mrf.mxu1 }
 0x16e   : > { %v1558_v26 = vpack.c.bf16 %v1207_v23, %v1205_v22  ;;  %v1167_v27 = vpop.f32.mrf.mxu0  ;;  %v1209_v29 = vadd.f32 %v1208_v25, %v1165_v24 }
 0x16f   : > { %v1210_v28 = vpop.f32.mrf.mxu1 }
 0x170   : > { %1265 = vst [vmem:[%s212_s5 + $0x8] sm:$0xff] %v1558_v26  ;;  %v1211_v30 = vadd.f32 %v1210_v28, %v1167_v27  ;;  %1274 = sbr.rel (!%p1967_p9) target bundleno = 381 (0x17d), region = 44 }
 0x172   : > { %v1560_v31 = vpack.c.bf16 %v1211_v30, %v1209_v29 }
 0x174   : > { %1267 = vst [vmem:[%s212_s5 + $0x18] sm:$0xff] %v1560_v31 }
 0x177   : > { %v1295_v33 = vld [vmem:[%s212_s5 + $0x8] sm:$0xff] }
 0x178   : > { %1296 = vst [vmem:[%s1280_s9 + $0x8] sm:$0xff] %v1295_v33 }
 0x17b   : > { %v1299_v35 = vld [vmem:[%s212_s5 + $0x18] sm:$0xff] }
 0x17c   : > { %1300 = vst [vmem:[%s1280_s9 + $0x28] sm:$0xff] %v1299_v35 }
 0x17d PF: > { %s15_s14 = sadd.s32 1, %s1896_s14   ;;  %s2182_s9 = smov %s1880_s10 }
 0x17e   : > { %p12_p8 = scmp.ge.s32.totalorder %s15_s14, 4   ;;  %s2183_s10 = smov %s1884_s11 }
 0x17f   : > { %s2184_s11 = smov %s1965_s21  ;;  %s2185_s12 = smov %s1892_s13 }
 0x180   : > { %s2186_s13 = smov %s2188_s16  ;;  %14 = sbr.rel (!%p12_p8) target bundleno = 4 (0x4), region = 102 }
 0x185   :  { %1316 = vsyncpa [#allocation4], 1 }
 0x186   :  { %1318 = vsyncpa [#allocation4 + $0x1], 1 }

// kernel: custom_llama_model.19
= control target key start
LH: loop header
LB: loop body
LE: loop exit
PB: predicated region body
PF: predicated region fallthrough
CT: control target
= control target key end

     0   :  { %v112_v50 = vlaneseq  ;;  %s312_s0 = inlined_call_operand.vmem [shape: bf16[16,512], index: 0, kind: input, shape index: {}]   ;;  %s313_s1 = inlined_call_operand.vmem [shape: bf16[16,512], index: 1, kind: input, shape index: {}, may-alias: {1,4}]   ;;  %s314_s4 = inlined_call_operand.vmem [shape: bf16[16,512], index: 4, kind: output, shape index: {1}, may-alias: {1,4}]   ;;  %s315_s2 = inlined_call_operand.vmem [shape: bf16[1,512], index: 2, kind: input, shape index: {}]   ;;  %s316_s3 = inlined_call_operand.vmem [shape: bf16[16,512], index: 3, kind: output, shape index: {0}]  }
   0x1   :  { %v16_v0 = vld [vmem:[%s312_s0] sm:$0xff]  ;;  %v17_v1 = vld [vmem:[%s312_s0 + $0x8] sm:$0xff]  ;;  %v18_v8 = vld [vmem:[%s312_s0 + $0x10] sm:$0xff] }
   0x2   :  { %v28_v2 = vld [vmem:[%s313_s1] sm:$0xff]  ;;  %v20_v3 = vunpack.c.l.bf16 %v16_v0  ;;  %v21_v4 = vunpack.c.h.bf16 %v16_v0  ;;  %v22_v5 = vunpack.c.l.bf16 %v17_v1  ;;  %v23_v6 = vunpack.c.h.bf16 %v17_v1  ;;  %v29_v7 = vld [vmem:[%s313_s1 + $0x8] sm:$0xff]  ;;  %v19_v9 = vld [vmem:[%s312_s0 + $0x18] sm:$0xff] }
   0x3   :  { %v32_v10 = vunpack.c.l.bf16 %v28_v2  ;;  %v33_v11 = vunpack.c.h.bf16 %v28_v2  ;;  %v34_v12 = vunpack.c.l.bf16 %v29_v7  ;;  %v35_v13 = vunpack.c.h.bf16 %v29_v7  ;;  %v30_v14 = vld [vmem:[%s313_s1 + $0x10] sm:$0xff]  ;;  %v31_v15 = vld [vmem:[%s313_s1 + $0x18] sm:$0xff]  ;;  %v109_v56 = vld [vmem:[%s315_s2] sm:$0xf] }
   0x4   :  { %v24_v16 = vunpack.c.l.bf16 %v18_v8  ;;  %v25_v17 = vunpack.c.h.bf16 %v18_v8  ;;  %v26_v18 = vunpack.c.l.bf16 %v19_v9  ;;  %v27_v19 = vunpack.c.h.bf16 %v19_v9 }
   0x5   :  { %v261_v20 = vadd.f32 %v32_v10, %v20_v3  ;;  %v263_v21 = vadd.f32 %v33_v11, %v21_v4  ;;  %v265_v22 = vadd.f32 %v34_v12, %v22_v5  ;;  %v267_v23 = vadd.f32 %v35_v13, %v23_v6 }
   0x6   :  { %v36_v24 = vunpack.c.l.bf16 %v30_v14  ;;  %v37_v25 = vunpack.c.h.bf16 %v30_v14  ;;  %v38_v26 = vunpack.c.l.bf16 %v31_v15  ;;  %v39_v27 = vunpack.c.h.bf16 %v31_v15 }
   0x7   :  { %v201_v28 = vpack.c.bf16 %v267_v23, %v265_v22  ;;  %v76_v29 = vmul.f32 %v261_v20, %v261_v20  ;;  %v77_v30 = vmul.f32 %v263_v21, %v263_v21  ;;  %v78_v31 = vmul.f32 %v265_v22, %v265_v22 }
   0x8   :  { %v200_v32 = vpack.c.bf16 %v263_v21, %v261_v20  ;;  %v44_v33 = vadd.f32 %v36_v24, %v24_v16  ;;  %v45_v34 = vadd.f32 %v37_v25, %v25_v17  ;;  %v79_v35 = vmul.f32 %v267_v23, %v267_v23 }
   0x9   :  { %73 = vst [vmem:[%s314_s4 + $0x8] sm:$0xff] %v201_v28  ;;  %v84_v36 = vadd.f32 %v77_v30, %v76_v29  ;;  %v46_v37 = vadd.f32 %v38_v26, %v26_v18  ;;  %v47_v38 = vadd.f32 %v39_v27, %v27_v19  ;;  %v113_v54 = vshrl.u32 %v112_v50, 7 }
   0xa   :  { %72 = vst [vmem:[%s314_s4] sm:$0xff] %v200_v32  ;;  %v202_v39 = vpack.c.bf16 %v45_v34, %v44_v33  ;;  %v80_v40 = vmul.f32 %v44_v33, %v44_v33  ;;  %v81_v41 = vmul.f32 %v45_v34, %v45_v34  ;;  %v110_v59 = vunpack.c.l.bf16 %v109_v56 }
   0xb   :  { %v85_v42 = vadd.f32 %v84_v36, %v78_v31  ;;  %v203_v43 = vpack.c.bf16 %v47_v38, %v46_v37  ;;  %v82_v44 = vmul.f32 %v46_v37, %v46_v37  ;;  %v83_v45 = vmul.f32 %v47_v38, %v47_v38 }
   0xc   :  { %74 = vst [vmem:[%s314_s4 + $0x10] sm:$0xff] %v202_v39  ;;  %v89_v46 = vadd.f32 %v81_v41, %v80_v40  ;;  %v114_v60 = vsub.s32 0, %v113_v54  ;;  %v118_v61 = vsub.s32 2, %v113_v54  ;;  %v122_v62 = vsub.s32 4, %v113_v54 }
   0xd   :  { %v86_v47 = vadd.f32 %v85_v42, %v79_v35  ;;  %75 = vst [vmem:[%s314_s4 + $0x18] sm:$0xff] %v203_v43  ;;  %v126_v63 = vsub.s32 6, %v113_v54 }
   0xe   :  { %v90_v48 = vadd.f32 %v89_v46, %v82_v44  ;;  %v115_v0 = vrot.slane %v110_v59, %v114_v60  ;;  %v119_v1 = vrot.slane %v110_v59, %v118_v61  ;;  %v123_v2 = vrot.slane %v110_v59, %v122_v62 }
   0xf   :  { %87 = vadd.xlane.f32.xlu0 %v86_v47  ;;  %v127_v3 = vrot.slane %v110_v59, %v126_v63 }
  0x10   :  { %v91_v49 = vadd.f32 %v90_v48, %v83_v45  ;;  %v135_v4 = vrot.slane %v115_v0, %v114_v60  ;;  %v139_v5 = vrot.slane %v119_v1, %v114_v60  ;;  %v143_v6 = vrot.slane %v123_v2, %v114_v60 }
  0x11   :  { %v147_v7 = vrot.slane %v127_v3, %v114_v60 }
  0x13   :  { %92 = vadd.xlane.f32.xlu0 %v91_v49 }
  0x98   :  { %v88_v51 = vpop.xlane.xlu0 %87 }
  0x99   :  { %v95_v52 = vmul.f32 0.001953125, %v88_v51 }
  0x9b   :  { %v97_v53 = vadd.f32 1e-06, %v95_v52 }
  0x9c   :  { %v93_v55 = vpop.xlane.xlu0 %92 }
  0x9d   :  { %208 = vrsqrt.f32 %v97_v53  ;;  %v96_v57 = vmul.f32 0.001953125, %v93_v55 }
  0x9f   :  { %v98_v58 = vadd.f32 1e-06, %v96_v57 }
  0xa1   :  { %210 = vrsqrt.f32 %v98_v58 }
  0xaa   :  { %v209_v8 = vpop.eup %208 }
  0xab   :  { %v101_v9 = vmul.f32 %v209_v8, %v261_v20  ;;  %v102_v10 = vmul.f32 %v209_v8, %v263_v21  ;;  %v103_v11 = vmul.f32 %v209_v8, %v265_v22  ;;  %v104_v12 = vmul.f32 %v209_v8, %v267_v23 }
  0xad   :  { %v148_v13 = vmul.f32 %v135_v4, %v101_v9  ;;  %v149_v14 = vmul.f32 %v139_v5, %v102_v10  ;;  %v150_v15 = vmul.f32 %v143_v6, %v103_v11  ;;  %v151_v16 = vmul.f32 %v147_v7, %v104_v12 }
  0xae   :  { %v211_v17 = vpop.eup %210 }
  0xaf   :  { %v204_v18 = vpack.c.bf16 %v149_v14, %v148_v13  ;;  %v205_v19 = vpack.c.bf16 %v151_v16, %v150_v15  ;;  %v105_v24 = vmul.f32 %v211_v17, %v44_v33  ;;  %v106_v25 = vmul.f32 %v211_v17, %v45_v34 }
  0xb0   :  { %v107_v26 = vmul.f32 %v211_v17, %v46_v37  ;;  %v108_v27 = vmul.f32 %v211_v17, %v47_v38 }
  0xb1   :  { %180 = vst [vmem:[%s316_s3] sm:$0xff] %v204_v18  ;;  %181 = vst [vmem:[%s316_s3 + $0x8] sm:$0xff] %v205_v19  ;;  %v152_v20 = vmul.f32 %v135_v4, %v105_v24  ;;  %v153_v21 = vmul.f32 %v139_v5, %v106_v25 }
  0xb2   :  { %v154_v22 = vmul.f32 %v143_v6, %v107_v26  ;;  %v155_v23 = vmul.f32 %v147_v7, %v108_v27 }
  0xb3   :  { %v206_v28 = vpack.c.bf16 %v153_v21, %v152_v20 }
  0xb4   :  { %v207_v29 = vpack.c.bf16 %v155_v23, %v154_v22 }
  0xb5   :  { %182 = vst [vmem:[%s316_s3 + $0x10] sm:$0xff] %v206_v28 }
  0xb6   :  { %183 = vst [vmem:[%s316_s3 + $0x18] sm:$0xff] %v207_v29 }

// kernel: custom_llama_model.18
= control target key start
LH: loop header
LB: loop body
LE: loop exit
PB: predicated region body
PF: predicated region fallthrough
CT: control target
= control target key end

     0   :  { %7 = vsyncpa [#allocation4], 0  ;;  %s1432_s9 = smov [#allocation3]   ;;  %s1485_s0 = inlined_call_operand.vmem [shape: bf16[16,512], index: 0, kind: input, shape index: {}]   ;;  %s1486_s1 = inlined_call_operand.hbm [shape: bf16[512,512], index: 1, kind: input, shape index: {}]   ;;  %s1487_s2 = inlined_call_operand.vmem [shape: bf16[16,512], index: 2, kind: output, shape index: {}]  }
   0x1   :  { %s15_s10 = sshll.u32 %s1432_s9, 4  ;;  %s16_s10 = int_to_ptr.vmem [resolvable:$true] %s15_s10 }
   0x2   :  { %s1418_s11 = scalar_lea.vmem %s16_s10, 16384  ;;  %p1423_p1 = scmp.lt.s32.totalorder %s16_s10, %s16_s10 }
   0x3   :  { %p1419_p0 = scmp.ne.s32.totalorder %s16_s10, %s1418_s11  ;;  %p1424_p2 = scmp.lt.s32.totalorder %s1418_s11, %s1418_s11 }
   0x5   :  { %p1425_p3 = por %p1424_p2, %p1423_p1 }
   0x7   :  { %p1426_p4 = pnand %p1425_p3, %p1419_p0 }
   0x9   :  { %1429 = shalt.err (!%p1426_p4)
}
   0xa   :  { %s1433_s12 = smov 256   ;;  %s1434_s13 = smov 16  }
   0xb   :  { %21 = dma.hbm_to_vmem [thread:$0]  %s1486_s1, 16384, %s16_s10, [#allocation4], %s1433_s12, %s1433_s12, %s1434_s13  }
   0xc   :  { %1430 = dma.done.wait [#allocation4], 16384  }
   0xd   :  { %1431 = vsyncadd [#allocation4], 4294950912  ;;  %v1212_v0 = vld [vmem:[#allocation3 + $0xe4] ss:$16 sps:$4 sm:$0xff]   ;;  %v1216_v2 = vld [vmem:[#allocation3 + $0xe0] ss:$16 sps:$4 sm:$0xff]  }
   0xe   :  { %v1214_v1 = vld [vmem:[#allocation3 + $0x2e4] ss:$16 sps:$4 sm:$0xff]   ;;  %837 = vmatprep.subr.bf16.mxu0 %v1212_v0  ;;  %v1217_v3 = vld [vmem:[#allocation3 + $0x2e0] ss:$16 sps:$4 sm:$0xff]   ;;  %v1313_v51 = vld [vmem:[%s1485_s0 + $0xc] ss:$16 sps:$4 sm:$0xff]  }
   0xf   :  { %880 = vmatprep.subr.bf16.mxu1 %v1214_v1  ;;  %v1218_v4 = vld [vmem:[#allocation3 + $0xc4] ss:$16 sps:$4 sm:$0xff]   ;;  %838 = vmatpush1.bf16.msra.mxu0 %v1216_v2  ;;  %v1222_v6 = vld [vmem:[#allocation3 + $0xc0] ss:$16 sps:$4 sm:$0xff]   ;;  %v1316_v2 = vld [vmem:[#allocation3 + $0xec] ss:$16 sps:$4 sm:$0xff]  }
  0x10   :  { %881 = vmatpush1.bf16.msra.mxu1 %v1217_v3  ;;  %v1220_v5 = vld [vmem:[#allocation3 + $0x2c4] ss:$16 sps:$4 sm:$0xff]   ;;  %839 = vmatprep.subr.bf16.mxu0 %v1218_v4  ;;  %v1223_v7 = vld [vmem:[#allocation3 + $0x2c0] ss:$16 sps:$4 sm:$0xff]   ;;  %v1319_v3 = vld [vmem:[#allocation3 + $0x2ec] ss:$16 sps:$4 sm:$0xff]  }
  0x11   :  { %882 = vmatprep.subr.bf16.mxu1 %v1220_v5  ;;  %v1224_v8 = vld [vmem:[#allocation3 + $0xa4] ss:$16 sps:$4 sm:$0xff]   ;;  %v1228_v10 = vld [vmem:[#allocation3 + $0xa0] ss:$16 sps:$4 sm:$0xff]   ;;  %912 = vmatprep.mubr.bf16.mxu1 %v1313_v51  ;;  %v1467_v5 = vld [vmem:[%s1485_s0 + $0x8] ss:$16 sps:$4 sm:$0xff]  }
  0x12   :  { %v1226_v9 = vld [vmem:[#allocation3 + $0x2a4] ss:$16 sps:$4 sm:$0xff]   ;;  %v1229_v11 = vld [vmem:[#allocation3 + $0x2a0] ss:$16 sps:$4 sm:$0xff]  }
  0x13   :  { %840 = vmatpush1.bf16.msra.mxu0 %v1222_v6  ;;  %v1230_v12 = vld [vmem:[#allocation3 + $0x84] ss:$16 sps:$4 sm:$0xff]   ;;  %v1234_v14 = vld [vmem:[#allocation3 + $0x80] ss:$16 sps:$4 sm:$0xff]   ;;  %v1314_v6 = vld [vmem:[#allocation3 + $0xe8] ss:$16 sps:$4 sm:$0xff]  }
  0x14   :  { %883 = vmatpush1.bf16.msra.mxu1 %v1223_v7  ;;  %841 = vmatprep.subr.bf16.mxu0 %v1224_v8  ;;  %v1232_v13 = vld [vmem:[#allocation3 + $0x284] ss:$16 sps:$4 sm:$0xff]   ;;  %v1235_v15 = vld [vmem:[#allocation3 + $0x280] ss:$16 sps:$4 sm:$0xff]   ;;  %v1317_v7 = vld [vmem:[#allocation3 + $0x2e8] ss:$16 sps:$4 sm:$0xff]  }
  0x15   :  { %884 = vmatprep.subr.bf16.mxu1 %v1226_v9  ;;  %v1236_v16 = vld [vmem:[#allocation3 + $0x64] ss:$16 sps:$4 sm:$0xff]   ;;  %v1240_v18 = vld [vmem:[#allocation3 + $0x60] ss:$16 sps:$4 sm:$0xff]   ;;  %v1322_v8 = vld [vmem:[#allocation3 + $0xcc] ss:$16 sps:$4 sm:$0xff]  }
  0x16   :  { %v1238_v17 = vld [vmem:[#allocation3 + $0x264] ss:$16 sps:$4 sm:$0xff]   ;;  %v1241_v19 = vld [vmem:[#allocation3 + $0x260] ss:$16 sps:$4 sm:$0xff]   ;;  %v1325_v9 = vld [vmem:[#allocation3 + $0x2cc] ss:$16 sps:$4 sm:$0xff]  }
  0x17   :  { %842 = vmatpush1.bf16.msra.mxu0 %v1228_v10  ;;  %v1242_v20 = vld [vmem:[#allocation3 + $0x44] ss:$16 sps:$4 sm:$0xff]   ;;  %v1246_v22 = vld [vmem:[#allocation3 + $0x40] ss:$16 sps:$4 sm:$0xff]   ;;  %v1320_v10 = vld [vmem:[#allocation3 + $0xc8] ss:$16 sps:$4 sm:$0xff]  }
  0x18   :  { %885 = vmatpush1.bf16.msra.mxu1 %v1229_v11  ;;  %843 = vmatprep.subr.bf16.mxu0 %v1230_v12  ;;  %v1244_v21 = vld [vmem:[#allocation3 + $0x244] ss:$16 sps:$4 sm:$0xff]   ;;  %v1247_v23 = vld [vmem:[#allocation3 + $0x240] ss:$16 sps:$4 sm:$0xff]   ;;  %v1323_v11 = vld [vmem:[#allocation3 + $0x2c8] ss:$16 sps:$4 sm:$0xff]  }
  0x19   :  { %886 = vmatprep.subr.bf16.mxu1 %v1232_v13  ;;  %v1248_v24 = vld [vmem:[#allocation3 + $0x24] ss:$16 sps:$4 sm:$0xff]   ;;  %v1252_v26 = vld [vmem:[#allocation3 + $0x20] ss:$16 sps:$4 sm:$0xff]   ;;  %v1328_v12 = vld [vmem:[#allocation3 + $0xac] ss:$16 sps:$4 sm:$0xff]  }
  0x1a   :  { %v1250_v25 = vld [vmem:[#allocation3 + $0x224] ss:$16 sps:$4 sm:$0xff]   ;;  %v1253_v27 = vld [vmem:[#allocation3 + $0x220] ss:$16 sps:$4 sm:$0xff]   ;;  %v1331_v13 = vld [vmem:[#allocation3 + $0x2ac] ss:$16 sps:$4 sm:$0xff]  }
  0x1b   :  { %844 = vmatpush1.bf16.msra.mxu0 %v1234_v14  ;;  %v1254_v28 = vld [vmem:[#allocation3 + $0x4] ss:$16 sps:$4 sm:$0xff]   ;;  %v1258_v30 = vld [vmem:[#allocation3] ss:$16 sps:$4 sm:$0xff]   ;;  %v1326_v14 = vld [vmem:[#allocation3 + $0xa8] ss:$16 sps:$4 sm:$0xff]  }
  0x1c   :  { %887 = vmatpush1.bf16.msra.mxu1 %v1235_v15  ;;  %845 = vmatprep.subr.bf16.mxu0 %v1236_v16  ;;  %v1256_v29 = vld [vmem:[#allocation3 + $0x204] ss:$16 sps:$4 sm:$0xff]   ;;  %v1259_v31 = vld [vmem:[#allocation3 + $0x200] ss:$16 sps:$4 sm:$0xff]   ;;  %v1329_v15 = vld [vmem:[#allocation3 + $0x2a8] ss:$16 sps:$4 sm:$0xff]  }
  0x1d   :  { %888 = vmatprep.subr.bf16.mxu1 %v1238_v17  ;;  %v1260_v32 = vld [vmem:[#allocation3 + $0x1e4] ss:$16 sps:$4 sm:$0xff]   ;;  %v1264_v34 = vld [vmem:[#allocation3 + $0x1e0] ss:$16 sps:$4 sm:$0xff]   ;;  %v1334_v16 = vld [vmem:[#allocation3 + $0x8c] ss:$16 sps:$4 sm:$0xff]  }
  0x1e   :  { %v1262_v33 = vld [vmem:[#allocation3 + $0x3e4] ss:$16 sps:$4 sm:$0xff]   ;;  %v1265_v35 = vld [vmem:[#allocation3 + $0x3e0] ss:$16 sps:$4 sm:$0xff]   ;;  %v1337_v17 = vld [vmem:[#allocation3 + $0x28c] ss:$16 sps:$4 sm:$0xff]  }
  0x1f   :  { %846 = vmatpush1.bf16.msra.mxu0 %v1240_v18  ;;  %v1266_v36 = vld [vmem:[#allocation3 + $0x1c4] ss:$16 sps:$4 sm:$0xff]   ;;  %v1270_v38 = vld [vmem:[#allocation3 + $0x1c0] ss:$16 sps:$4 sm:$0xff]   ;;  %v1332_v18 = vld [vmem:[#allocation3 + $0x88] ss:$16 sps:$4 sm:$0xff]  }
  0x20   :  { %889 = vmatpush1.bf16.msra.mxu1 %v1241_v19  ;;  %847 = vmatprep.subr.bf16.mxu0 %v1242_v20  ;;  %v1268_v37 = vld [vmem:[#allocation3 + $0x3c4] ss:$16 sps:$4 sm:$0xff]   ;;  %v1271_v39 = vld [vmem:[#allocation3 + $0x3c0] ss:$16 sps:$4 sm:$0xff]   ;;  %v1335_v19 = vld [vmem:[#allocation3 + $0x288] ss:$16 sps:$4 sm:$0xff]  }
  0x21   :  { %890 = vmatprep.subr.bf16.mxu1 %v1244_v21  ;;  %v1272_v40 = vld [vmem:[#allocation3 + $0x1a4] ss:$16 sps:$4 sm:$0xff]   ;;  %v1276_v42 = vld [vmem:[#allocation3 + $0x1a0] ss:$16 sps:$4 sm:$0xff]   ;;  %v1340_v20 = vld [vmem:[#allocation3 + $0x6c] ss:$16 sps:$4 sm:$0xff]  }
  0x22   :  { %v1274_v41 = vld [vmem:[#allocation3 + $0x3a4] ss:$16 sps:$4 sm:$0xff]   ;;  %v1277_v43 = vld [vmem:[#allocation3 + $0x3a0] ss:$16 sps:$4 sm:$0xff]   ;;  %v1343_v21 = vld [vmem:[#allocation3 + $0x26c] ss:$16 sps:$4 sm:$0xff]  }
  0x23   :  { %848 = vmatpush1.bf16.msra.mxu0 %v1246_v22  ;;  %v1278_v44 = vld [vmem:[#allocation3 + $0x184] ss:$16 sps:$4 sm:$0xff]   ;;  %v1282_v46 = vld [vmem:[#allocation3 + $0x180] ss:$16 sps:$4 sm:$0xff]   ;;  %v1338_v22 = vld [vmem:[#allocation3 + $0x68] ss:$16 sps:$4 sm:$0xff]  }
  0x24   :  { %891 = vmatpush1.bf16.msra.mxu1 %v1247_v23  ;;  %849 = vmatprep.subr.bf16.mxu0 %v1248_v24  ;;  %v1280_v45 = vld [vmem:[#allocation3 + $0x384] ss:$16 sps:$4 sm:$0xff]   ;;  %v1283_v47 = vld [vmem:[#allocation3 + $0x380] ss:$16 sps:$4 sm:$0xff]   ;;  %v1341_v23 = vld [vmem:[#allocation3 + $0x268] ss:$16 sps:$4 sm:$0xff]  }
  0x25   :  { %892 = vmatprep.subr.bf16.mxu1 %v1250_v25  ;;  %v1284_v48 = vld [vmem:[#allocation3 + $0x164] ss:$16 sps:$4 sm:$0xff]   ;;  %v1288_v52 = vld [vmem:[#allocation3 + $0x160] ss:$16 sps:$4 sm:$0xff]   ;;  %v1346_v24 = vld [vmem:[#allocation3 + $0x4c] ss:$16 sps:$4 sm:$0xff]  }
  0x26   :  { %v1310_v49 = vld [vmem:[%s1485_s0 + $0x4] ss:$16 sps:$4 sm:$0xff]   ;;  %v1289_v53 = vld [vmem:[#allocation3 + $0x360] ss:$16 sps:$4 sm:$0xff]   ;;  %v1349_v25 = vld [vmem:[#allocation3 + $0x24c] ss:$16 sps:$4 sm:$0xff]  }
  0x27   :  { %850 = vmatpush1.bf16.msra.mxu0 %v1252_v26  ;;  %v1286_v50 = vld [vmem:[#allocation3 + $0x364] ss:$16 sps:$4 sm:$0xff]   ;;  %869 = vmatprep.mubr.bf16.mxu0 %v1310_v49  ;;  %v1294_v56 = vld [vmem:[#allocation3 + $0x140] ss:$16 sps:$4 sm:$0xff]   ;;  %v1344_v26 = vld [vmem:[#allocation3 + $0x48] ss:$16 sps:$4 sm:$0xff]  }
  0x28   :  { %893 = vmatpush1.bf16.msra.mxu1 %v1253_v27  ;;  %851 = vmatprep.subr.bf16.mxu0 %v1254_v28  ;;  %v1290_v54 = vld [vmem:[#allocation3 + $0x144] ss:$16 sps:$4 sm:$0xff]   ;;  %v1295_v57 = vld [vmem:[#allocation3 + $0x340] ss:$16 sps:$4 sm:$0xff]   ;;  %v1347_v27 = vld [vmem:[#allocation3 + $0x248] ss:$16 sps:$4 sm:$0xff]  }
  0x29   :  { %894 = vmatprep.subr.bf16.mxu1 %v1256_v29  ;;  %v1292_v55 = vld [vmem:[#allocation3 + $0x344] ss:$16 sps:$4 sm:$0xff]   ;;  %v1300_v60 = vld [vmem:[#allocation3 + $0x120] ss:$16 sps:$4 sm:$0xff]   ;;  %v1352_v28 = vld [vmem:[#allocation3 + $0x2c] ss:$16 sps:$4 sm:$0xff]  }
  0x2a   :  { %v1296_v58 = vld [vmem:[#allocation3 + $0x124] ss:$16 sps:$4 sm:$0xff]   ;;  %v1301_v61 = vld [vmem:[#allocation3 + $0x320] ss:$16 sps:$4 sm:$0xff]   ;;  %v1355_v29 = vld [vmem:[#allocation3 + $0x22c] ss:$16 sps:$4 sm:$0xff]  }
  0x2b   :  { %852 = vmatpush1.bf16.msra.mxu0 %v1258_v30  ;;  %v1298_v59 = vld [vmem:[#allocation3 + $0x324] ss:$16 sps:$4 sm:$0xff]   ;;  %v1306_v0 = vld [vmem:[#allocation3 + $0x100] ss:$16 sps:$4 sm:$0xff]   ;;  %v1350_v30 = vld [vmem:[#allocation3 + $0x28] ss:$16 sps:$4 sm:$0xff]  }
  0x2c   :  { %895 = vmatpush1.bf16.msra.mxu1 %v1259_v31  ;;  %853 = vmatprep.subr.bf16.mxu0 %v1260_v32  ;;  %v1302_v62 = vld [vmem:[#allocation3 + $0x104] ss:$16 sps:$4 sm:$0xff]   ;;  %v1307_v1 = vld [vmem:[#allocation3 + $0x300] ss:$16 sps:$4 sm:$0xff]   ;;  %v1353_v31 = vld [vmem:[#allocation3 + $0x228] ss:$16 sps:$4 sm:$0xff]  }
  0x2d   :  { %896 = vmatprep.subr.bf16.mxu1 %v1262_v33  ;;  %v1304_v63 = vld [vmem:[#allocation3 + $0x304] ss:$16 sps:$4 sm:$0xff]   ;;  %v1462_v4 = vld [vmem:[%s1485_s0] ss:$16 sps:$4 sm:$0xff]   ;;  %v1358_v32 = vld [vmem:[#allocation3 + $0xc] ss:$16 sps:$4 sm:$0xff]  }
  0x2e   :  { %v1361_v33 = vld [vmem:[#allocation3 + $0x20c] ss:$16 sps:$4 sm:$0xff]  }
  0x2f   :  { %854 = vmatpush2.bf16.msra.mxu0 %v1264_v34  ;;  %v1356_v34 = vld [vmem:[#allocation3 + $0x8] ss:$16 sps:$4 sm:$0xff]  }
  0x30   :  { %897 = vmatpush2.bf16.msra.mxu1 %v1265_v35  ;;  %855 = vmatprep.subr.bf16.mxu0 %v1266_v36  ;;  %v1359_v35 = vld [vmem:[#allocation3 + $0x208] ss:$16 sps:$4 sm:$0xff]   ;;  %v1364_v36 = vld [vmem:[#allocation3 + $0x1ec] ss:$16 sps:$4 sm:$0xff]  }
  0x31   :  { %898 = vmatprep.subr.bf16.mxu1 %v1268_v37  ;;  %v1367_v37 = vld [vmem:[#allocation3 + $0x3ec] ss:$16 sps:$4 sm:$0xff]  }
  0x33   :  { %856 = vmatpush2.bf16.msra.mxu0 %v1270_v38  ;;  %v1362_v38 = vld [vmem:[#allocation3 + $0x1e8] ss:$16 sps:$4 sm:$0xff]  }
  0x34   :  { %899 = vmatpush2.bf16.msra.mxu1 %v1271_v39  ;;  %857 = vmatprep.subr.bf16.mxu0 %v1272_v40  ;;  %v1365_v39 = vld [vmem:[#allocation3 + $0x3e8] ss:$16 sps:$4 sm:$0xff]   ;;  %v1370_v40 = vld [vmem:[#allocation3 + $0x1cc] ss:$16 sps:$4 sm:$0xff]  }
  0x35   :  { %900 = vmatprep.subr.bf16.mxu1 %v1274_v41  ;;  %v1373_v41 = vld [vmem:[#allocation3 + $0x3cc] ss:$16 sps:$4 sm:$0xff]  }
  0x37   :  { %858 = vmatpush2.bf16.msra.mxu0 %v1276_v42  ;;  %v1368_v42 = vld [vmem:[#allocation3 + $0x1c8] ss:$16 sps:$4 sm:$0xff]  }
  0x38   :  { %901 = vmatpush2.bf16.msra.mxu1 %v1277_v43  ;;  %859 = vmatprep.subr.bf16.mxu0 %v1278_v44  ;;  %v1371_v43 = vld [vmem:[#allocation3 + $0x3c8] ss:$16 sps:$4 sm:$0xff]   ;;  %v1376_v44 = vld [vmem:[#allocation3 + $0x1ac] ss:$16 sps:$4 sm:$0xff]  }
  0x39   :  { %902 = vmatprep.subr.bf16.mxu1 %v1280_v45  ;;  %v1379_v45 = vld [vmem:[#allocation3 + $0x3ac] ss:$16 sps:$4 sm:$0xff]  }
  0x3b   :  { %860 = vmatpush2.bf16.msra.mxu0 %v1282_v46  ;;  %v1374_v46 = vld [vmem:[#allocation3 + $0x1a8] ss:$16 sps:$4 sm:$0xff]  }
  0x3c   :  { %903 = vmatpush2.bf16.msra.mxu1 %v1283_v47  ;;  %861 = vmatprep.subr.bf16.mxu0 %v1284_v48  ;;  %v1377_v47 = vld [vmem:[#allocation3 + $0x3a8] ss:$16 sps:$4 sm:$0xff]   ;;  %v1382_v48 = vld [vmem:[#allocation3 + $0x18c] ss:$16 sps:$4 sm:$0xff]  }
  0x3d   :  { %904 = vmatprep.subr.bf16.mxu1 %v1286_v50  ;;  %v1380_v50 = vld [vmem:[#allocation3 + $0x188] ss:$16 sps:$4 sm:$0xff]  }
  0x3f   :  { %862 = vmatpush2.bf16.msra.mxu0 %v1288_v52  ;;  %v1388_v52 = vld [vmem:[#allocation3 + $0x16c] ss:$16 sps:$4 sm:$0xff]  }
  0x40   :  { %905 = vmatpush2.bf16.msra.mxu1 %v1289_v53  ;;  %863 = vmatprep.subr.bf16.mxu0 %v1290_v54  ;;  %v1391_v53 = vld [vmem:[#allocation3 + $0x36c] ss:$16 sps:$4 sm:$0xff]   ;;  %v1386_v54 = vld [vmem:[#allocation3 + $0x168] ss:$16 sps:$4 sm:$0xff]  }
  0x41   :  { %906 = vmatprep.subr.bf16.mxu1 %v1292_v55  ;;  %v1389_v55 = vld [vmem:[#allocation3 + $0x368] ss:$16 sps:$4 sm:$0xff]  }
  0x43   :  { %864 = vmatpush2.bf16.msra.mxu0 %v1294_v56  ;;  %v1394_v56 = vld [vmem:[#allocation3 + $0x14c] ss:$16 sps:$4 sm:$0xff]  }
  0x44   :  { %907 = vmatpush2.bf16.msra.mxu1 %v1295_v57  ;;  %865 = vmatprep.subr.bf16.mxu0 %v1296_v58  ;;  %v1397_v57 = vld [vmem:[#allocation3 + $0x34c] ss:$16 sps:$4 sm:$0xff]   ;;  %v1392_v58 = vld [vmem:[#allocation3 + $0x148] ss:$16 sps:$4 sm:$0xff]  }
  0x45   :  { %908 = vmatprep.subr.bf16.mxu1 %v1298_v59  ;;  %v1395_v59 = vld [vmem:[#allocation3 + $0x348] ss:$16 sps:$4 sm:$0xff]  }
  0x47   :  { %866 = vmatpush2.bf16.msra.mxu0 %v1300_v60  ;;  %v1400_v60 = vld [vmem:[#allocation3 + $0x12c] ss:$16 sps:$4 sm:$0xff]  }
  0x48   :  { %909 = vmatpush2.bf16.msra.mxu1 %v1301_v61  ;;  %867 = vmatprep.subr.bf16.mxu0 %v1302_v62  ;;  %v1403_v61 = vld [vmem:[#allocation3 + $0x32c] ss:$16 sps:$4 sm:$0xff]   ;;  %v1398_v62 = vld [vmem:[#allocation3 + $0x128] ss:$16 sps:$4 sm:$0xff]  }
  0x49   :  { %910 = vmatprep.subr.bf16.mxu1 %v1304_v63  ;;  %v1401_v63 = vld [vmem:[#allocation3 + $0x328] ss:$16 sps:$4 sm:$0xff]  }
  0x4b   :  { %868 = vmatpush2.bf16.msra.mxu0 %v1306_v0  ;;  %v1406_v0 = vld [vmem:[#allocation3 + $0x10c] ss:$16 sps:$4 sm:$0xff]  }
  0x4c   :  { %911 = vmatpush2.bf16.msra.mxu1 %v1307_v1  ;;  %923 = vmatprep.subr.bf16.mxu0 %v1316_v2  ;;  %v1409_v1 = vld [vmem:[#allocation3 + $0x30c] ss:$16 sps:$4 sm:$0xff]   ;;  %v1404_v2 = vld [vmem:[#allocation3 + $0x108] ss:$16 sps:$4 sm:$0xff]  }
  0x4d   :  { %966 = vmatprep.subr.bf16.mxu1 %v1319_v3  ;;  %v1407_v3 = vld [vmem:[#allocation3 + $0x308] ss:$16 sps:$4 sm:$0xff]  }
  0x4e   :  { %870 = vmatmul.mubr.bf16.vlgmr.msra.gmra.mxu0 %v1462_v4 }
  0x4f   :  { %913 = vmatmul.mubr.bf16.vlgmr.msra.gmra.mxu1 %v1467_v5  ;;  %924 = vmatpush1.bf16.msra.mxu0 %v1314_v6 }
  0x50   :  { %967 = vmatpush1.bf16.msra.mxu1 %v1317_v7  ;;  %925 = vmatprep.subr.bf16.mxu0 %v1322_v8 }
  0x51   :  { %968 = vmatprep.subr.bf16.mxu1 %v1325_v9  ;;  %955 = vmatprep.mubr.bf16.mxu0 %v1310_v49  ;;  %v1385_v49 = vld [vmem:[#allocation3 + $0x38c] ss:$16 sps:$4 sm:$0xff]  }
  0x52   :  { %998 = vmatprep.mubr.bf16.mxu1 %v1313_v51  ;;  %v1383_v51 = vld [vmem:[#allocation3 + $0x388] ss:$16 sps:$4 sm:$0xff]  }
  0x53   :  { %926 = vmatpush1.bf16.msra.mxu0 %v1320_v10 }
  0x54   :  { %969 = vmatpush1.bf16.msra.mxu1 %v1323_v11  ;;  %927 = vmatprep.subr.bf16.mxu0 %v1328_v12 }
  0x55   :  { %970 = vmatprep.subr.bf16.mxu1 %v1331_v13 }
  0x57   :  { %928 = vmatpush1.bf16.msra.mxu0 %v1326_v14 }
  0x58   :  { %971 = vmatpush1.bf16.msra.mxu1 %v1329_v15  ;;  %929 = vmatprep.subr.bf16.mxu0 %v1334_v16 }
  0x59   :  { %972 = vmatprep.subr.bf16.mxu1 %v1337_v17 }
  0x5b   :  { %930 = vmatpush1.bf16.msra.mxu0 %v1332_v18 }
  0x5c   :  { %973 = vmatpush1.bf16.msra.mxu1 %v1335_v19  ;;  %931 = vmatprep.subr.bf16.mxu0 %v1340_v20 }
  0x5d   :  { %974 = vmatprep.subr.bf16.mxu1 %v1343_v21 }
  0x5f   :  { %932 = vmatpush1.bf16.msra.mxu0 %v1338_v22 }
  0x60   :  { %975 = vmatpush1.bf16.msra.mxu1 %v1341_v23  ;;  %933 = vmatprep.subr.bf16.mxu0 %v1346_v24 }
  0x61   :  { %976 = vmatprep.subr.bf16.mxu1 %v1349_v25 }
  0x63   :  { %934 = vmatpush1.bf16.msra.mxu0 %v1344_v26 }
  0x64   :  { %977 = vmatpush1.bf16.msra.mxu1 %v1347_v27  ;;  %935 = vmatprep.subr.bf16.mxu0 %v1352_v28 }
  0x65   :  { %978 = vmatprep.subr.bf16.mxu1 %v1355_v29 }
  0x67   :  { %936 = vmatpush1.bf16.msra.mxu0 %v1350_v30 }
  0x68   :  { %979 = vmatpush1.bf16.msra.mxu1 %v1353_v31  ;;  %937 = vmatprep.subr.bf16.mxu0 %v1358_v32 }
  0x69   :  { %980 = vmatprep.subr.bf16.mxu1 %v1361_v33 }
  0x6b   :  { %938 = vmatpush1.bf16.msra.mxu0 %v1356_v34 }
  0x6c   :  { %981 = vmatpush1.bf16.msra.mxu1 %v1359_v35  ;;  %939 = vmatprep.subr.bf16.mxu0 %v1364_v36 }
  0x6d   :  { %982 = vmatprep.subr.bf16.mxu1 %v1367_v37 }
  0x6f   :  { %940 = vmatpush2.bf16.msra.mxu0 %v1362_v38 }
  0x70   :  { %983 = vmatpush2.bf16.msra.mxu1 %v1365_v39  ;;  %941 = vmatprep.subr.bf16.mxu0 %v1370_v40 }
  0x71   :  { %984 = vmatprep.subr.bf16.mxu1 %v1373_v41 }
  0x73   :  { %942 = vmatpush2.bf16.msra.mxu0 %v1368_v42 }
  0x74   :  { %985 = vmatpush2.bf16.msra.mxu1 %v1371_v43  ;;  %943 = vmatprep.subr.bf16.mxu0 %v1376_v44 }
  0x75   :  { %986 = vmatprep.subr.bf16.mxu1 %v1379_v45 }
  0x77   :  { %944 = vmatpush2.bf16.msra.mxu0 %v1374_v46 }
  0x78   :  { %987 = vmatpush2.bf16.msra.mxu1 %v1377_v47  ;;  %945 = vmatprep.subr.bf16.mxu0 %v1382_v48 }
  0x79   :  { %988 = vmatprep.subr.bf16.mxu1 %v1385_v49 }
  0x7b   :  { %946 = vmatpush2.bf16.msra.mxu0 %v1380_v50 }
  0x7c   :  { %989 = vmatpush2.bf16.msra.mxu1 %v1383_v51  ;;  %947 = vmatprep.subr.bf16.mxu0 %v1388_v52 }
  0x7d   :  { %990 = vmatprep.subr.bf16.mxu1 %v1391_v53 }
  0x7f   :  { %948 = vmatpush2.bf16.msra.mxu0 %v1386_v54 }
  0x80   :  { %991 = vmatpush2.bf16.msra.mxu1 %v1389_v55  ;;  %949 = vmatprep.subr.bf16.mxu0 %v1394_v56 }
  0x81   :  { %992 = vmatprep.subr.bf16.mxu1 %v1397_v57 }
  0x83   :  { %950 = vmatpush2.bf16.msra.mxu0 %v1392_v58 }
  0x84   :  { %993 = vmatpush2.bf16.msra.mxu1 %v1395_v59  ;;  %951 = vmatprep.subr.bf16.mxu0 %v1400_v60 }
  0x85   :  { %994 = vmatprep.subr.bf16.mxu1 %v1403_v61 }
  0x87   :  { %952 = vmatpush2.bf16.msra.mxu0 %v1398_v62 }
  0x88   :  { %995 = vmatpush2.bf16.msra.mxu1 %v1401_v63  ;;  %953 = vmatprep.subr.bf16.mxu0 %v1406_v0 }
  0x89   :  { %996 = vmatprep.subr.bf16.mxu1 %v1409_v1 }
  0x8b   :  { %954 = vmatpush2.bf16.msra.mxu0 %v1404_v2 }
  0x8c   :  { %997 = vmatpush2.bf16.msra.mxu1 %v1407_v3 }
  0x8e   :  { %956 = vmatmul.mubr.bf16.vlgmr.msra.gmra.mxu0 %v1462_v4 }
  0x8f   :  { %999 = vmatmul.mubr.bf16.vlgmr.msra.gmra.mxu1 %v1467_v5 }
 0x10e   :  { %v871_v6 = vpop.f32.mrf.mxu0 }
 0x10f   :  { %v914_v7 = vpop.f32.mrf.mxu1 }
 0x110   :  { %v915_v8 = vadd.f32 %v914_v7, %v871_v6  ;;  %v873_v9 = vpop.f32.mrf.mxu0 }
 0x111   :  { %v916_v10 = vpop.f32.mrf.mxu1 }
 0x112   :  { %v917_v11 = vadd.f32 %v916_v10, %v873_v9  ;;  %v875_v12 = vpop.f32.mrf.mxu0 }
 0x113   :  { %v918_v13 = vpop.f32.mrf.mxu1 }
 0x114   :  { %v1205_v14 = vpack.c.bf16 %v917_v11, %v915_v8  ;;  %v877_v15 = vpop.f32.mrf.mxu0  ;;  %v919_v17 = vadd.f32 %v918_v13, %v875_v12 }
 0x115   :  { %v920_v16 = vpop.f32.mrf.mxu1 }
 0x116   :  { %1060 = vst [vmem:[%s1487_s2] sm:$0xff] %v1205_v14  ;;  %v921_v18 = vadd.f32 %v920_v16, %v877_v15 }
 0x118   :  { %v1207_v4 = vpack.c.bf16 %v921_v18, %v919_v17 }
 0x11a   :  { %1062 = vst [vmem:[%s1487_s2 + $0x10] sm:$0xff] %v1207_v4 }
 0x14e   :  { %v957_v5 = vpop.f32.mrf.mxu0 }
 0x14f   :  { %v1000_v19 = vpop.f32.mrf.mxu1 }
 0x150   :  { %v959_v20 = vpop.f32.mrf.mxu0  ;;  %v1001_v22 = vadd.f32 %v1000_v19, %v957_v5 }
 0x151   :  { %v1002_v21 = vpop.f32.mrf.mxu1 }
 0x152   :  { %v1003_v23 = vadd.f32 %v1002_v21, %v959_v20  ;;  %v961_v24 = vpop.f32.mrf.mxu0 }
 0x153   :  { %v1004_v25 = vpop.f32.mrf.mxu1 }
 0x154   :  { %v1206_v26 = vpack.c.bf16 %v1003_v23, %v1001_v22  ;;  %v963_v27 = vpop.f32.mrf.mxu0  ;;  %v1005_v29 = vadd.f32 %v1004_v25, %v961_v24 }
 0x155   :  { %v1006_v28 = vpop.f32.mrf.mxu1 }
 0x156   :  { %1061 = vst [vmem:[%s1487_s2 + $0x8] sm:$0xff] %v1206_v26  ;;  %v1007_v30 = vadd.f32 %v1006_v28, %v963_v27 }
 0x158   :  { %v1208_v31 = vpack.c.bf16 %v1007_v30, %v1005_v29 }
 0x15a   :  { %1063 = vst [vmem:[%s1487_s2 + $0x18] sm:$0xff] %v1208_v31 }
 0x15b   :  { %1068 = vsyncpa [#allocation4], 1 }

// kernel: custom_llama_model.21
= control target key start
LH: loop header
LB: loop body
LE: loop exit
PB: predicated region body
PF: predicated region fallthrough
CT: control target
= control target key end

     0   :  { %s1864_s9 = smov 0   ;;  %s1866_s10 = smov 0   ;;  %s2087_s0 = inlined_call_operand.vmem [shape: bf16[16,1024], index: 0, kind: input, shape index: {}]   ;;  %s2088_s1 = inlined_call_operand.vmem [shape: bf16[1024,512], index: 1, kind: input, shape index: {}]   ;;  %s2089_s2 = inlined_call_operand.vmem [shape: bf16[16,512], index: 2, kind: output, shape index: {}]  }
   0x1   :  { %s1868_s11 = smov 0   ;;  %s1870_s12 = smov 0  }
   0x2   :  { %s1872_s13 = smov 0  }
   0x3 LB: > { %s24_s14 = sadd.s32 1, %s1842_s12  ;;  %p47_p1 = scmp.ne.s32.totalorder %s1834_s10, %s1830_s9  ;;  %s1846_s13 = sphi %s1872_s13, %s12_s13   ;;  %s1842_s12 = sphi %s1870_s12, %s2093_s12   ;;  %s1838_s11 = sphi %s1868_s11, %s2092_s11   ;;  %s1834_s10 = sphi %s1866_s10, %s2091_s10   ;;  %s1830_s9 = sphi %s1864_s9, %s2090_s9  }
   0x4   : > { %p25_p0 = scmp.ge.s32.totalorder %s24_s14, 2  ;;  %p48_p2 = scmp.eq.s32.totalorder %s1846_s13, 0 }
   0x5   : > { %s40_s16 = sadd.s32 1, %s1834_s10  ;;  %p1412_p5 = scmp.ge.s32.totalorder %s1846_s13, 2 }
   0x6   : > { %s2095_s14 = smov (%p25_p0, %s24_s14), 0  ;;  %p49_p3 = por %p48_p2, %p47_p1 }
   0x7   : > { %s36_s15 = ssub.s32 %s1842_s12, %s2095_s14  ;;  %129 = sbr.rel (%p1412_p5) target bundleno = 18 (0x12), region = 16 }
   0x8   : > { %p38_p4 = scmp.eq.s32.totalorder %s36_s15, 0 }
   0xa   : > { %s1899_s17 = scalar_select %p38_p4, %s1834_s10, %s40_s16  }
   0xc   : > { %132 = sbr.rel (!%p49_p3) target bundleno = 18 (0x12), region = 20  ;;  %s134_s18 = sand.u32 (%p49_p3), 1, %s1834_s10  }
   0xd   : > { %s1563_s19 = sshll.u32 (%p49_p3), %s1842_s12, 4  ;;  %s1413_s20 = sshll.u32 (%p49_p3), %s134_s18, 5 }
   0xe   : > { %s142_s23 = scalar_lea.vmem (%p49_p3), %s2087_s0, %s1563_s19  ;;  %s136_s24 = scalar_lea.vmem (%p49_p3), [#allocation3], %s1413_s20 }
   0xf   : > { %v155_v0 = vld [vmem:[%s142_s23] sm:$0xff] (%p49_p3)  ;;  %v157_v1 = vld [vmem:[%s142_s23 + $0x8] sm:$0xff] (%p49_p3) }
  0x10   : > { %v159_v2 = vld [vmem:[%s142_s23 + $0x20] sm:$0xff] (%p49_p3)  ;;  %156 = vst [vmem:[%s136_s24] sm:$0xff] (%p49_p3), %v155_v0  ;;  %158 = vst [vmem:[%s136_s24 + $0x8] sm:$0xff] (%p49_p3), %v157_v1  ;;  %v161_v3 = vld [vmem:[%s142_s23 + $0x28] sm:$0xff] (%p49_p3) }
  0x11   : > { %160 = vst [vmem:[%s136_s24 + $0x10] sm:$0xff] %v159_v2  ;;  %162 = vst [vmem:[%s136_s24 + $0x18] sm:$0xff] %v161_v3 }
  0x12 PF: > { %p1416_p6 = scmp.ge.s32.totalorder %s1846_s13, 1  ;;  %p182_p7 = scmp.lt.s32.totalorder %s1846_s13, 3 }
  0x14   : > { %p183_p8 = pnand %p1416_p6, %p182_p7 }
  0x15   : > { %s189_s25 = sand.u32 (!%p183_p8), 1, %s1830_s9   ;;  %s1418_s26 = sshll.u32 (!%p183_p8), %s1838_s11, 6 }
  0x16   : > { %186 = sbr.rel (%p183_p8) target bundleno = 383 (0x17f), region = 47  ;;  %s1417_s27 = sshll.u32 (!%p183_p8), %s189_s25, 5 }
  0x17   : > { %p229_p9 = scmp.lt.s32.totalorder (!%p183_p8), %s1418_s26, 127  ;;  %s1916_s4 = scalar_lea.vmem (!%p183_p8), [#allocation3], %s1417_s27 }
  0x18   : > { %p1421_p10 = scmp.ne.s32.totalorder (!%p183_p8), %s1838_s11, 0 }
  0x1b   : > { %s2097_s26 = smov (!%p229_p9, %s1418_s26), 127  ;;  %254 = sbr.rel (%p1421_p10) target bundleno = 37 (0x25), region = 55 }
  0x1c   : > { %s1564_s28 = sshll.u32 %s2097_s26, 4 }
  0x1d   : > { %s1914_s3 = scalar_lea.vmem %s2088_s1, %s1564_s28 }
  0x20   : > { %v1848_v4 = vmov 0.0  }
  0x21   : > { %255 = vst [vmem:[#allocation2 + $0x30] sm:$0xff] %v1848_v4  ;;  %256 = vst [vmem:[#allocation2] sm:$0xff] %v1848_v4 }
  0x22   : > { %257 = vst [vmem:[#allocation2 + $0x18] sm:$0xff] %v1848_v4  ;;  %258 = vst [vmem:[#allocation2 + $0x10] sm:$0xff] %v1848_v4 }
  0x23   : > { %259 = vst [vmem:[#allocation2 + $0x8] sm:$0xff] %v1848_v4  ;;  %260 = vst [vmem:[#allocation2 + $0x20] sm:$0xff] %v1848_v4 }
  0x24   : > { %261 = vst [vmem:[#allocation2 + $0x28] sm:$0xff] %v1848_v4  ;;  %262 = vst [vmem:[#allocation2 + $0x38] sm:$0xff] %v1848_v4 }
  0x25 PF: > { %v1610_v5 = vld [vmem:[%s1914_s3 + $0xe4] ss:$16 sps:$4 sm:$0xff]   ;;  %v1614_v7 = vld [vmem:[%s1914_s3 + $0xe0] ss:$16 sps:$4 sm:$0xff]   ;;  %v1711_v56 = vld [vmem:[%s1916_s4 + $0xc] ss:$16 sps:$4 sm:$0xff]  }
  0x26   : > { %v1612_v6 = vld [vmem:[%s1914_s3 + $0x2e4] ss:$16 sps:$4 sm:$0xff]   ;;  %1063 = vmatprep.subr.bf16.mxu0 %v1610_v5  ;;  %v1615_v8 = vld [vmem:[%s1914_s3 + $0x2e0] ss:$16 sps:$4 sm:$0xff]   ;;  %1138 = vmatprep.mubr.bf16.mxu1 %v1711_v56  ;;  %p1554_p11 = scmp.ne.s32.totalorder %s1838_s11, 1 }
  0x27   : > { %1106 = vmatprep.subr.bf16.mxu1 %v1612_v6  ;;  %v1616_v9 = vld [vmem:[%s1914_s3 + $0xc4] ss:$16 sps:$4 sm:$0xff]   ;;  %1064 = vmatpush1.bf16.msra.mxu0 %v1614_v7  ;;  %v1620_v11 = vld [vmem:[%s1914_s3 + $0xc0] ss:$16 sps:$4 sm:$0xff]   ;;  %v1714_v7 = vld [vmem:[%s1914_s3 + $0xec] ss:$16 sps:$4 sm:$0xff]  }
  0x28   : > { %1107 = vmatpush1.bf16.msra.mxu1 %v1615_v8  ;;  %v1618_v10 = vld [vmem:[%s1914_s3 + $0x2c4] ss:$16 sps:$4 sm:$0xff]   ;;  %1065 = vmatprep.subr.bf16.mxu0 %v1616_v9  ;;  %v1621_v12 = vld [vmem:[%s1914_s3 + $0x2c0] ss:$16 sps:$4 sm:$0xff]   ;;  %v1717_v8 = vld [vmem:[%s1914_s3 + $0x2ec] ss:$16 sps:$4 sm:$0xff]  }
  0x29   : > { %1108 = vmatprep.subr.bf16.mxu1 %v1618_v10  ;;  %v1622_v13 = vld [vmem:[%s1914_s3 + $0xa4] ss:$16 sps:$4 sm:$0xff]   ;;  %v1626_v15 = vld [vmem:[%s1914_s3 + $0xa0] ss:$16 sps:$4 sm:$0xff]   ;;  %v1991_v10 = vld [vmem:[%s1916_s4 + $0x8] ss:$16 sps:$4 sm:$0xff]  }
  0x2a   : > { %v1624_v14 = vld [vmem:[%s1914_s3 + $0x2a4] ss:$16 sps:$4 sm:$0xff]   ;;  %v1627_v16 = vld [vmem:[%s1914_s3 + $0x2a0] ss:$16 sps:$4 sm:$0xff]  }
  0x2b   : > { %1066 = vmatpush1.bf16.msra.mxu0 %v1620_v11  ;;  %v1628_v17 = vld [vmem:[%s1914_s3 + $0x84] ss:$16 sps:$4 sm:$0xff]   ;;  %v1632_v19 = vld [vmem:[%s1914_s3 + $0x80] ss:$16 sps:$4 sm:$0xff]   ;;  %v1712_v11 = vld [vmem:[%s1914_s3 + $0xe8] ss:$16 sps:$4 sm:$0xff]  }
  0x2c   : > { %1109 = vmatpush1.bf16.msra.mxu1 %v1621_v12  ;;  %1067 = vmatprep.subr.bf16.mxu0 %v1622_v13  ;;  %v1630_v18 = vld [vmem:[%s1914_s3 + $0x284] ss:$16 sps:$4 sm:$0xff]   ;;  %v1633_v20 = vld [vmem:[%s1914_s3 + $0x280] ss:$16 sps:$4 sm:$0xff]   ;;  %v1715_v12 = vld [vmem:[%s1914_s3 + $0x2e8] ss:$16 sps:$4 sm:$0xff]  }
  0x2d   : > { %1110 = vmatprep.subr.bf16.mxu1 %v1624_v14  ;;  %v1634_v21 = vld [vmem:[%s1914_s3 + $0x64] ss:$16 sps:$4 sm:$0xff]   ;;  %v1638_v23 = vld [vmem:[%s1914_s3 + $0x60] ss:$16 sps:$4 sm:$0xff]   ;;  %v1720_v13 = vld [vmem:[%s1914_s3 + $0xcc] ss:$16 sps:$4 sm:$0xff]  }
  0x2e   : > { %v1636_v22 = vld [vmem:[%s1914_s3 + $0x264] ss:$16 sps:$4 sm:$0xff]   ;;  %v1639_v24 = vld [vmem:[%s1914_s3 + $0x260] ss:$16 sps:$4 sm:$0xff]   ;;  %v1723_v14 = vld [vmem:[%s1914_s3 + $0x2cc] ss:$16 sps:$4 sm:$0xff]  }
  0x2f   : > { %1068 = vmatpush1.bf16.msra.mxu0 %v1626_v15  ;;  %v1640_v25 = vld [vmem:[%s1914_s3 + $0x44] ss:$16 sps:$4 sm:$0xff]   ;;  %v1644_v27 = vld [vmem:[%s1914_s3 + $0x40] ss:$16 sps:$4 sm:$0xff]   ;;  %v1718_v15 = vld [vmem:[%s1914_s3 + $0xc8] ss:$16 sps:$4 sm:$0xff]  }
  0x30   : > { %1111 = vmatpush1.bf16.msra.mxu1 %v1627_v16  ;;  %1069 = vmatprep.subr.bf16.mxu0 %v1628_v17  ;;  %v1642_v26 = vld [vmem:[%s1914_s3 + $0x244] ss:$16 sps:$4 sm:$0xff]   ;;  %v1645_v28 = vld [vmem:[%s1914_s3 + $0x240] ss:$16 sps:$4 sm:$0xff]   ;;  %v1721_v16 = vld [vmem:[%s1914_s3 + $0x2c8] ss:$16 sps:$4 sm:$0xff]  }
  0x31   : > { %1112 = vmatprep.subr.bf16.mxu1 %v1630_v18  ;;  %v1646_v29 = vld [vmem:[%s1914_s3 + $0x24] ss:$16 sps:$4 sm:$0xff]   ;;  %v1650_v31 = vld [vmem:[%s1914_s3 + $0x20] ss:$16 sps:$4 sm:$0xff]   ;;  %v1726_v17 = vld [vmem:[%s1914_s3 + $0xac] ss:$16 sps:$4 sm:$0xff]  }
  0x32   : > { %v1648_v30 = vld [vmem:[%s1914_s3 + $0x224] ss:$16 sps:$4 sm:$0xff]   ;;  %v1651_v32 = vld [vmem:[%s1914_s3 + $0x220] ss:$16 sps:$4 sm:$0xff]   ;;  %v1729_v18 = vld [vmem:[%s1914_s3 + $0x2ac] ss:$16 sps:$4 sm:$0xff]  }
  0x33   : > { %1070 = vmatpush1.bf16.msra.mxu0 %v1632_v19  ;;  %v1652_v33 = vld [vmem:[%s1914_s3 + $0x4] ss:$16 sps:$4 sm:$0xff]   ;;  %v1656_v35 = vld [vmem:[%s1914_s3] ss:$16 sps:$4 sm:$0xff]   ;;  %v1724_v19 = vld [vmem:[%s1914_s3 + $0xa8] ss:$16 sps:$4 sm:$0xff]  }
  0x34   : > { %1113 = vmatpush1.bf16.msra.mxu1 %v1633_v20  ;;  %1071 = vmatprep.subr.bf16.mxu0 %v1634_v21  ;;  %v1654_v34 = vld [vmem:[%s1914_s3 + $0x204] ss:$16 sps:$4 sm:$0xff]   ;;  %v1657_v36 = vld [vmem:[%s1914_s3 + $0x200] ss:$16 sps:$4 sm:$0xff]   ;;  %v1727_v20 = vld [vmem:[%s1914_s3 + $0x2a8] ss:$16 sps:$4 sm:$0xff]  }
  0x35   : > { %1114 = vmatprep.subr.bf16.mxu1 %v1636_v22  ;;  %v1658_v37 = vld [vmem:[%s1914_s3 + $0x1e4] ss:$16 sps:$4 sm:$0xff]   ;;  %v1662_v39 = vld [vmem:[%s1914_s3 + $0x1e0] ss:$16 sps:$4 sm:$0xff]   ;;  %v1732_v21 = vld [vmem:[%s1914_s3 + $0x8c] ss:$16 sps:$4 sm:$0xff]  }
  0x36   : > { %v1660_v38 = vld [vmem:[%s1914_s3 + $0x3e4] ss:$16 sps:$4 sm:$0xff]   ;;  %v1663_v40 = vld [vmem:[%s1914_s3 + $0x3e0] ss:$16 sps:$4 sm:$0xff]   ;;  %v1735_v22 = vld [vmem:[%s1914_s3 + $0x28c] ss:$16 sps:$4 sm:$0xff]  }
  0x37   : > { %1072 = vmatpush1.bf16.msra.mxu0 %v1638_v23  ;;  %v1664_v41 = vld [vmem:[%s1914_s3 + $0x1c4] ss:$16 sps:$4 sm:$0xff]   ;;  %v1668_v43 = vld [vmem:[%s1914_s3 + $0x1c0] ss:$16 sps:$4 sm:$0xff]   ;;  %v1730_v23 = vld [vmem:[%s1914_s3 + $0x88] ss:$16 sps:$4 sm:$0xff]  }
  0x38   : > { %1115 = vmatpush1.bf16.msra.mxu1 %v1639_v24  ;;  %1073 = vmatprep.subr.bf16.mxu0 %v1640_v25  ;;  %v1666_v42 = vld [vmem:[%s1914_s3 + $0x3c4] ss:$16 sps:$4 sm:$0xff]   ;;  %v1669_v44 = vld [vmem:[%s1914_s3 + $0x3c0] ss:$16 sps:$4 sm:$0xff]   ;;  %v1733_v24 = vld [vmem:[%s1914_s3 + $0x288] ss:$16 sps:$4 sm:$0xff]  }
  0x39   : > { %1116 = vmatprep.subr.bf16.mxu1 %v1642_v26  ;;  %v1670_v45 = vld [vmem:[%s1914_s3 + $0x1a4] ss:$16 sps:$4 sm:$0xff]   ;;  %v1674_v47 = vld [vmem:[%s1914_s3 + $0x1a0] ss:$16 sps:$4 sm:$0xff]   ;;  %v1738_v25 = vld [vmem:[%s1914_s3 + $0x6c] ss:$16 sps:$4 sm:$0xff]  }
  0x3a   : > { %v1672_v46 = vld [vmem:[%s1914_s3 + $0x3a4] ss:$16 sps:$4 sm:$0xff]   ;;  %v1675_v48 = vld [vmem:[%s1914_s3 + $0x3a0] ss:$16 sps:$4 sm:$0xff]   ;;  %v1741_v26 = vld [vmem:[%s1914_s3 + $0x26c] ss:$16 sps:$4 sm:$0xff]  }
  0x3b   : > { %1074 = vmatpush1.bf16.msra.mxu0 %v1644_v27  ;;  %v1676_v49 = vld [vmem:[%s1914_s3 + $0x184] ss:$16 sps:$4 sm:$0xff]   ;;  %v1680_v51 = vld [vmem:[%s1914_s3 + $0x180] ss:$16 sps:$4 sm:$0xff]   ;;  %v1736_v27 = vld [vmem:[%s1914_s3 + $0x68] ss:$16 sps:$4 sm:$0xff]  }
  0x3c   : > { %1117 = vmatpush1.bf16.msra.mxu1 %v1645_v28  ;;  %1075 = vmatprep.subr.bf16.mxu0 %v1646_v29  ;;  %v1678_v50 = vld [vmem:[%s1914_s3 + $0x384] ss:$16 sps:$4 sm:$0xff]   ;;  %v1681_v52 = vld [vmem:[%s1914_s3 + $0x380] ss:$16 sps:$4 sm:$0xff]   ;;  %v1739_v28 = vld [vmem:[%s1914_s3 + $0x268] ss:$16 sps:$4 sm:$0xff]  }
  0x3d   : > { %1118 = vmatprep.subr.bf16.mxu1 %v1648_v30  ;;  %v1682_v53 = vld [vmem:[%s1914_s3 + $0x164] ss:$16 sps:$4 sm:$0xff]   ;;  %v1686_v57 = vld [vmem:[%s1914_s3 + $0x160] ss:$16 sps:$4 sm:$0xff]   ;;  %v1744_v29 = vld [vmem:[%s1914_s3 + $0x4c] ss:$16 sps:$4 sm:$0xff]  }
  0x3e   : > { %v1708_v54 = vld [vmem:[%s1916_s4 + $0x4] ss:$16 sps:$4 sm:$0xff]   ;;  %v1687_v58 = vld [vmem:[%s1914_s3 + $0x360] ss:$16 sps:$4 sm:$0xff]   ;;  %v1747_v30 = vld [vmem:[%s1914_s3 + $0x24c] ss:$16 sps:$4 sm:$0xff]  }
  0x3f   : > { %1076 = vmatpush1.bf16.msra.mxu0 %v1650_v31  ;;  %v1684_v55 = vld [vmem:[%s1914_s3 + $0x364] ss:$16 sps:$4 sm:$0xff]   ;;  %1095 = vmatprep.mubr.bf16.mxu0 %v1708_v54  ;;  %v1692_v61 = vld [vmem:[%s1914_s3 + $0x140] ss:$16 sps:$4 sm:$0xff]   ;;  %v1742_v31 = vld [vmem:[%s1914_s3 + $0x48] ss:$16 sps:$4 sm:$0xff]  }
  0x40   : > { %1119 = vmatpush1.bf16.msra.mxu1 %v1651_v32  ;;  %1077 = vmatprep.subr.bf16.mxu0 %v1652_v33  ;;  %v1688_v59 = vld [vmem:[%s1914_s3 + $0x144] ss:$16 sps:$4 sm:$0xff]   ;;  %v1693_v62 = vld [vmem:[%s1914_s3 + $0x340] ss:$16 sps:$4 sm:$0xff]   ;;  %v1745_v32 = vld [vmem:[%s1914_s3 + $0x248] ss:$16 sps:$4 sm:$0xff]  }
  0x41   : > { %1120 = vmatprep.subr.bf16.mxu1 %v1654_v34  ;;  %v1690_v60 = vld [vmem:[%s1914_s3 + $0x344] ss:$16 sps:$4 sm:$0xff]   ;;  %v1698_v1 = vld [vmem:[%s1914_s3 + $0x120] ss:$16 sps:$4 sm:$0xff]   ;;  %v1750_v33 = vld [vmem:[%s1914_s3 + $0x2c] ss:$16 sps:$4 sm:$0xff]  }
  0x42   : > { %v1694_v63 = vld [vmem:[%s1914_s3 + $0x124] ss:$16 sps:$4 sm:$0xff]   ;;  %v1699_v2 = vld [vmem:[%s1914_s3 + $0x320] ss:$16 sps:$4 sm:$0xff]   ;;  %v1753_v34 = vld [vmem:[%s1914_s3 + $0x22c] ss:$16 sps:$4 sm:$0xff]  }
  0x43   : > { %1078 = vmatpush1.bf16.msra.mxu0 %v1656_v35  ;;  %v1696_v0 = vld [vmem:[%s1914_s3 + $0x324] ss:$16 sps:$4 sm:$0xff]   ;;  %v1704_v5 = vld [vmem:[%s1914_s3 + $0x100] ss:$16 sps:$4 sm:$0xff]   ;;  %v1748_v35 = vld [vmem:[%s1914_s3 + $0x28] ss:$16 sps:$4 sm:$0xff]  }
  0x44   : > { %1121 = vmatpush1.bf16.msra.mxu1 %v1657_v36  ;;  %1079 = vmatprep.subr.bf16.mxu0 %v1658_v37  ;;  %v1700_v3 = vld [vmem:[%s1914_s3 + $0x104] ss:$16 sps:$4 sm:$0xff]   ;;  %v1705_v6 = vld [vmem:[%s1914_s3 + $0x300] ss:$16 sps:$4 sm:$0xff]   ;;  %v1751_v36 = vld [vmem:[%s1914_s3 + $0x228] ss:$16 sps:$4 sm:$0xff]  }
  0x45   : > { %1122 = vmatprep.subr.bf16.mxu1 %v1660_v38  ;;  %v1702_v4 = vld [vmem:[%s1914_s3 + $0x304] ss:$16 sps:$4 sm:$0xff]   ;;  %v1988_v9 = vld [vmem:[%s1916_s4] ss:$16 sps:$4 sm:$0xff]   ;;  %v1756_v37 = vld [vmem:[%s1914_s3 + $0xc] ss:$16 sps:$4 sm:$0xff]  }
  0x46   : > { %v1759_v38 = vld [vmem:[%s1914_s3 + $0x20c] ss:$16 sps:$4 sm:$0xff]  }
  0x47   : > { %1080 = vmatpush2.bf16.msra.mxu0 %v1662_v39  ;;  %v1754_v39 = vld [vmem:[%s1914_s3 + $0x8] ss:$16 sps:$4 sm:$0xff]  }
  0x48   : > { %1123 = vmatpush2.bf16.msra.mxu1 %v1663_v40  ;;  %1081 = vmatprep.subr.bf16.mxu0 %v1664_v41  ;;  %v1757_v40 = vld [vmem:[%s1914_s3 + $0x208] ss:$16 sps:$4 sm:$0xff]   ;;  %v1762_v41 = vld [vmem:[%s1914_s3 + $0x1ec] ss:$16 sps:$4 sm:$0xff]  }
  0x49   : > { %1124 = vmatprep.subr.bf16.mxu1 %v1666_v42  ;;  %v1765_v42 = vld [vmem:[%s1914_s3 + $0x3ec] ss:$16 sps:$4 sm:$0xff]  }
  0x4b   : > { %1082 = vmatpush2.bf16.msra.mxu0 %v1668_v43  ;;  %v1760_v43 = vld [vmem:[%s1914_s3 + $0x1e8] ss:$16 sps:$4 sm:$0xff]  }
  0x4c   : > { %1125 = vmatpush2.bf16.msra.mxu1 %v1669_v44  ;;  %1083 = vmatprep.subr.bf16.mxu0 %v1670_v45  ;;  %v1763_v44 = vld [vmem:[%s1914_s3 + $0x3e8] ss:$16 sps:$4 sm:$0xff]   ;;  %v1768_v45 = vld [vmem:[%s1914_s3 + $0x1cc] ss:$16 sps:$4 sm:$0xff]  }
  0x4d   : > { %1126 = vmatprep.subr.bf16.mxu1 %v1672_v46  ;;  %v1771_v46 = vld [vmem:[%s1914_s3 + $0x3cc] ss:$16 sps:$4 sm:$0xff]  }
  0x4f   : > { %1084 = vmatpush2.bf16.msra.mxu0 %v1674_v47  ;;  %v1766_v47 = vld [vmem:[%s1914_s3 + $0x1c8] ss:$16 sps:$4 sm:$0xff]  }
  0x50   : > { %1127 = vmatpush2.bf16.msra.mxu1 %v1675_v48  ;;  %1085 = vmatprep.subr.bf16.mxu0 %v1676_v49  ;;  %v1769_v48 = vld [vmem:[%s1914_s3 + $0x3c8] ss:$16 sps:$4 sm:$0xff]   ;;  %v1774_v49 = vld [vmem:[%s1914_s3 + $0x1ac] ss:$16 sps:$4 sm:$0xff]  }
  0x51   : > { %1128 = vmatprep.subr.bf16.mxu1 %v1678_v50  ;;  %v1777_v50 = vld [vmem:[%s1914_s3 + $0x3ac] ss:$16 sps:$4 sm:$0xff]  }
  0x53   : > { %1086 = vmatpush2.bf16.msra.mxu0 %v1680_v51  ;;  %v1772_v51 = vld [vmem:[%s1914_s3 + $0x1a8] ss:$16 sps:$4 sm:$0xff]  }
  0x54   : > { %1129 = vmatpush2.bf16.msra.mxu1 %v1681_v52  ;;  %1087 = vmatprep.subr.bf16.mxu0 %v1682_v53  ;;  %v1775_v52 = vld [vmem:[%s1914_s3 + $0x3a8] ss:$16 sps:$4 sm:$0xff]   ;;  %v1780_v53 = vld [vmem:[%s1914_s3 + $0x18c] ss:$16 sps:$4 sm:$0xff]  }
  0x55   : > { %1130 = vmatprep.subr.bf16.mxu1 %v1684_v55  ;;  %v1778_v55 = vld [vmem:[%s1914_s3 + $0x188] ss:$16 sps:$4 sm:$0xff]  }
  0x57   : > { %1088 = vmatpush2.bf16.msra.mxu0 %v1686_v57  ;;  %v1786_v57 = vld [vmem:[%s1914_s3 + $0x16c] ss:$16 sps:$4 sm:$0xff]  }
  0x58   : > { %1131 = vmatpush2.bf16.msra.mxu1 %v1687_v58  ;;  %1089 = vmatprep.subr.bf16.mxu0 %v1688_v59  ;;  %v1789_v58 = vld [vmem:[%s1914_s3 + $0x36c] ss:$16 sps:$4 sm:$0xff]   ;;  %v1784_v59 = vld [vmem:[%s1914_s3 + $0x168] ss:$16 sps:$4 sm:$0xff]  }
  0x59   : > { %1132 = vmatprep.subr.bf16.mxu1 %v1690_v60  ;;  %v1787_v60 = vld [vmem:[%s1914_s3 + $0x368] ss:$16 sps:$4 sm:$0xff]  }
  0x5b   : > { %1090 = vmatpush2.bf16.msra.mxu0 %v1692_v61  ;;  %v1792_v61 = vld [vmem:[%s1914_s3 + $0x14c] ss:$16 sps:$4 sm:$0xff]  }
  0x5c   : > { %1133 = vmatpush2.bf16.msra.mxu1 %v1693_v62  ;;  %1091 = vmatprep.subr.bf16.mxu0 %v1694_v63  ;;  %v1795_v62 = vld [vmem:[%s1914_s3 + $0x34c] ss:$16 sps:$4 sm:$0xff]   ;;  %v1790_v63 = vld [vmem:[%s1914_s3 + $0x148] ss:$16 sps:$4 sm:$0xff]  }
  0x5d   : > { %1134 = vmatprep.subr.bf16.mxu1 %v1696_v0  ;;  %v1793_v0 = vld [vmem:[%s1914_s3 + $0x348] ss:$16 sps:$4 sm:$0xff]  }
  0x5f   : > { %1092 = vmatpush2.bf16.msra.mxu0 %v1698_v1  ;;  %v1798_v1 = vld [vmem:[%s1914_s3 + $0x12c] ss:$16 sps:$4 sm:$0xff]  }
  0x60   : > { %1135 = vmatpush2.bf16.msra.mxu1 %v1699_v2  ;;  %1093 = vmatprep.subr.bf16.mxu0 %v1700_v3  ;;  %v1801_v2 = vld [vmem:[%s1914_s3 + $0x32c] ss:$16 sps:$4 sm:$0xff]   ;;  %v1796_v3 = vld [vmem:[%s1914_s3 + $0x128] ss:$16 sps:$4 sm:$0xff]  }
  0x61   : > { %1136 = vmatprep.subr.bf16.mxu1 %v1702_v4  ;;  %v1799_v4 = vld [vmem:[%s1914_s3 + $0x328] ss:$16 sps:$4 sm:$0xff]  }
  0x63   : > { %1094 = vmatpush2.bf16.msra.mxu0 %v1704_v5  ;;  %v1804_v5 = vld [vmem:[%s1914_s3 + $0x10c] ss:$16 sps:$4 sm:$0xff]  }
  0x64   : > { %1137 = vmatpush2.bf16.msra.mxu1 %v1705_v6  ;;  %1149 = vmatprep.subr.bf16.mxu0 %v1714_v7  ;;  %v1807_v6 = vld [vmem:[%s1914_s3 + $0x30c] ss:$16 sps:$4 sm:$0xff]   ;;  %v1802_v7 = vld [vmem:[%s1914_s3 + $0x108] ss:$16 sps:$4 sm:$0xff]  }
  0x65   : > { %1192 = vmatprep.subr.bf16.mxu1 %v1717_v8  ;;  %v1805_v8 = vld [vmem:[%s1914_s3 + $0x308] ss:$16 sps:$4 sm:$0xff]  }
  0x66   : > { %1096 = vmatmul.mubr.bf16.vlgmr.msra.gmra.mxu0 %v1988_v9 }
  0x67   : > { %1139 = vmatmul.mubr.bf16.vlgmr.msra.gmra.mxu1 %v1991_v10  ;;  %1150 = vmatpush1.bf16.msra.mxu0 %v1712_v11 }
  0x68   : > { %1193 = vmatpush1.bf16.msra.mxu1 %v1715_v12  ;;  %1151 = vmatprep.subr.bf16.mxu0 %v1720_v13  ;;  %v263_v12 = vld [vmem:[#allocation2 + $0x30] sm:$0xff] }
  0x69   : > { %1194 = vmatprep.subr.bf16.mxu1 %v1723_v14  ;;  %1181 = vmatprep.mubr.bf16.mxu0 %v1708_v54  ;;  %v1783_v54 = vld [vmem:[%s1914_s3 + $0x38c] ss:$16 sps:$4 sm:$0xff]  }
  0x6a   : > { %1224 = vmatprep.mubr.bf16.mxu1 %v1711_v56  ;;  %v1781_v56 = vld [vmem:[%s1914_s3 + $0x388] ss:$16 sps:$4 sm:$0xff]  }
  0x6b   : > { %1152 = vmatpush1.bf16.msra.mxu0 %v1718_v15 }
  0x6c   : > { %1195 = vmatpush1.bf16.msra.mxu1 %v1721_v16  ;;  %1153 = vmatprep.subr.bf16.mxu0 %v1726_v17  ;;  %v264_v16 = vld [vmem:[#allocation2] sm:$0xff] }
  0x6d   : > { %1196 = vmatprep.subr.bf16.mxu1 %v1729_v18 }
  0x6f   : > { %1154 = vmatpush1.bf16.msra.mxu0 %v1724_v19 }
  0x70   : > { %1197 = vmatpush1.bf16.msra.mxu1 %v1727_v20  ;;  %1155 = vmatprep.subr.bf16.mxu0 %v1732_v21  ;;  %v267_v21 = vld [vmem:[#allocation2 + $0x8] sm:$0xff] }
  0x71   : > { %1198 = vmatprep.subr.bf16.mxu1 %v1735_v22 }
  0x73   : > { %1156 = vmatpush1.bf16.msra.mxu0 %v1730_v23 }
  0x74   : > { %1199 = vmatpush1.bf16.msra.mxu1 %v1733_v24  ;;  %1157 = vmatprep.subr.bf16.mxu0 %v1738_v25 }
  0x75   : > { %1200 = vmatprep.subr.bf16.mxu1 %v1741_v26  ;;  %v268_v26 = vld [vmem:[#allocation2 + $0x20] sm:$0xff] }
  0x77   : > { %1158 = vmatpush1.bf16.msra.mxu0 %v1736_v27 }
  0x78   : > { %1201 = vmatpush1.bf16.msra.mxu1 %v1739_v28  ;;  %1159 = vmatprep.subr.bf16.mxu0 %v1744_v29 }
  0x79   : > { %1202 = vmatprep.subr.bf16.mxu1 %v1747_v30  ;;  %v265_v30 = vld [vmem:[#allocation2 + $0x18] sm:$0xff] }
  0x7b   : > { %1160 = vmatpush1.bf16.msra.mxu0 %v1742_v31 }
  0x7c   : > { %1203 = vmatpush1.bf16.msra.mxu1 %v1745_v32  ;;  %1161 = vmatprep.subr.bf16.mxu0 %v1750_v33 }
  0x7d   : > { %1204 = vmatprep.subr.bf16.mxu1 %v1753_v34  ;;  %v266_v34 = vld [vmem:[#allocation2 + $0x10] sm:$0xff] }
  0x7f   : > { %1162 = vmatpush1.bf16.msra.mxu0 %v1748_v35 }
  0x80   : > { %1205 = vmatpush1.bf16.msra.mxu1 %v1751_v36  ;;  %1163 = vmatprep.subr.bf16.mxu0 %v1756_v37 }
  0x81   : > { %1206 = vmatprep.subr.bf16.mxu1 %v1759_v38 }
  0x83   : > { %1164 = vmatpush1.bf16.msra.mxu0 %v1754_v39  ;;  %v269_v39 = vld [vmem:[#allocation2 + $0x28] sm:$0xff] }
  0x84   : > { %1207 = vmatpush1.bf16.msra.mxu1 %v1757_v40  ;;  %1165 = vmatprep.subr.bf16.mxu0 %v1762_v41 }
  0x85   : > { %1208 = vmatprep.subr.bf16.mxu1 %v1765_v42 }
  0x87   : > { %1166 = vmatpush2.bf16.msra.mxu0 %v1760_v43 }
  0x88   : > { %1209 = vmatpush2.bf16.msra.mxu1 %v1763_v44  ;;  %1167 = vmatprep.subr.bf16.mxu0 %v1768_v45  ;;  %v270_v44 = vld [vmem:[#allocation2 + $0x38] sm:$0xff] }
  0x89   : > { %1210 = vmatprep.subr.bf16.mxu1 %v1771_v46 }
  0x8b   : > { %1168 = vmatpush2.bf16.msra.mxu0 %v1766_v47 }
  0x8c   : > { %1211 = vmatpush2.bf16.msra.mxu1 %v1769_v48  ;;  %1169 = vmatprep.subr.bf16.mxu0 %v1774_v49 }
  0x8d   : > { %1212 = vmatprep.subr.bf16.mxu1 %v1777_v50 }
  0x8f   : > { %1170 = vmatpush2.bf16.msra.mxu0 %v1772_v51 }
  0x90   : > { %1213 = vmatpush2.bf16.msra.mxu1 %v1775_v52  ;;  %1171 = vmatprep.subr.bf16.mxu0 %v1780_v53 }
  0x91   : > { %1214 = vmatprep.subr.bf16.mxu1 %v1783_v54 }
  0x93   : > { %1172 = vmatpush2.bf16.msra.mxu0 %v1778_v55 }
  0x94   : > { %1215 = vmatpush2.bf16.msra.mxu1 %v1781_v56  ;;  %1173 = vmatprep.subr.bf16.mxu0 %v1786_v57 }
  0x95   : > { %1216 = vmatprep.subr.bf16.mxu1 %v1789_v58 }
  0x97   : > { %1174 = vmatpush2.bf16.msra.mxu0 %v1784_v59 }
  0x98   : > { %1217 = vmatpush2.bf16.msra.mxu1 %v1787_v60  ;;  %1175 = vmatprep.subr.bf16.mxu0 %v1792_v61 }
  0x99   : > { %1218 = vmatprep.subr.bf16.mxu1 %v1795_v62 }
  0x9b   : > { %1176 = vmatpush2.bf16.msra.mxu0 %v1790_v63 }
  0x9c   : > { %1219 = vmatpush2.bf16.msra.mxu1 %v1793_v0  ;;  %1177 = vmatprep.subr.bf16.mxu0 %v1798_v1 }
  0x9d   : > { %1220 = vmatprep.subr.bf16.mxu1 %v1801_v2 }
  0x9f   : > { %1178 = vmatpush2.bf16.msra.mxu0 %v1796_v3 }
  0xa0   : > { %1221 = vmatpush2.bf16.msra.mxu1 %v1799_v4  ;;  %1179 = vmatprep.subr.bf16.mxu0 %v1804_v5 }
  0xa1   : > { %1222 = vmatprep.subr.bf16.mxu1 %v1807_v6 }
  0xa3   : > { %1180 = vmatpush2.bf16.msra.mxu0 %v1802_v7 }
  0xa4   : > { %1223 = vmatpush2.bf16.msra.mxu1 %v1805_v8 }
  0xa6   : > { %1182 = vmatmul.mubr.bf16.vlgmr.msra.gmra.mxu0 %v1988_v9 }
  0xa7   : > { %1225 = vmatmul.mubr.bf16.vlgmr.msra.gmra.mxu1 %v1991_v10 }
 0x126   : > { %v1097_v11 = vpop.f32.mrf.mxu0 }
 0x127   : > { %v1140_v13 = vpop.f32.mrf.mxu1 }
 0x128   : > { %v1141_v14 = vadd.f32 %v1140_v13, %v1097_v11  ;;  %v1099_v15 = vpop.f32.mrf.mxu0 }
 0x129   : > { %v1142_v17 = vpop.f32.mrf.mxu1 }
 0x12a   : > { %v1235_v18 = vadd.f32 %v1141_v14, %v263_v12  ;;  %v1143_v19 = vadd.f32 %v1142_v17, %v1099_v15  ;;  %v1101_v20 = vpop.f32.mrf.mxu0 }
 0x12b   : > { %v1144_v22 = vpop.f32.mrf.mxu1 }
 0x12c   : > { %1243 = vst [vmem:[#allocation2 + $0x30] sm:$0xff] %v1235_v18  ;;  %v1236_v23 = vadd.f32 %v1143_v19, %v264_v16  ;;  %v1145_v24 = vadd.f32 %v1144_v22, %v1101_v20  ;;  %v1103_v25 = vpop.f32.mrf.mxu0 }
 0x12d   : > { %v1146_v9 = vpop.f32.mrf.mxu1 }
 0x12e   : > { %1244 = vst [vmem:[#allocation2] sm:$0xff] %v1236_v23  ;;  %v1239_v10 = vadd.f32 %v1145_v24, %v267_v21  ;;  %v1147_v27 = vadd.f32 %v1146_v9, %v1103_v25 }
 0x130   : > { %1247 = vst [vmem:[#allocation2 + $0x8] sm:$0xff] %v1239_v10  ;;  %v1240_v28 = vadd.f32 %v1147_v27, %v268_v26 }
 0x132   : > { %1248 = vst [vmem:[#allocation2 + $0x20] sm:$0xff] %v1240_v28 }
 0x166   : > { %v1183_v29 = vpop.f32.mrf.mxu0 }
 0x167   : > { %v1226_v31 = vpop.f32.mrf.mxu1 }
 0x168   : > { %v1227_v32 = vadd.f32 %v1226_v31, %v1183_v29  ;;  %v1185_v33 = vpop.f32.mrf.mxu0 }
 0x169   : > { %v1228_v35 = vpop.f32.mrf.mxu1 }
 0x16a   : > { %v1237_v36 = vadd.f32 %v1227_v32, %v265_v30  ;;  %v1229_v37 = vadd.f32 %v1228_v35, %v1185_v33  ;;  %v1187_v38 = vpop.f32.mrf.mxu0 }
 0x16b   : > { %v1230_v40 = vpop.f32.mrf.mxu1 }
 0x16c   : > { %1245 = vst [vmem:[#allocation2 + $0x18] sm:$0xff] %v1237_v36  ;;  %v1238_v41 = vadd.f32 %v1229_v37, %v266_v34  ;;  %v1231_v42 = vadd.f32 %v1230_v40, %v1187_v38  ;;  %v1189_v43 = vpop.f32.mrf.mxu0 }
 0x16d   : > { %v1232_v45 = vpop.f32.mrf.mxu1 }
 0x16e   : > { %1246 = vst [vmem:[#allocation2 + $0x10] sm:$0xff] %v1238_v41  ;;  %v1241_v46 = vadd.f32 %v1231_v42, %v269_v39  ;;  %v1233_v47 = vadd.f32 %v1232_v45, %v1189_v43  ;;  %1254 = sbr.rel (%p1554_p11) target bundleno = 383 (0x17f), region = 59 }
 0x170   : > { %1249 = vst [vmem:[#allocation2 + $0x28] sm:$0xff] %v1241_v46  ;;  %v1242_v48 = vadd.f32 %v1233_v47, %v270_v44 }
 0x172   : > { %1250 = vst [vmem:[#allocation2 + $0x38] sm:$0xff] %v1242_v48 }
 0x173   : > { %v1255_v49 = vld [vmem:[#allocation2 + $0x30] sm:$0xff]  ;;  %v1256_v50 = vld [vmem:[#allocation2] sm:$0xff]  ;;  %v1257_v51 = vld [vmem:[#allocation2 + $0x18] sm:$0xff] }
 0x174   : > { %v1263_v52 = vmul.f32 0.9, %v1255_v49  ;;  %v1264_v53 = vmul.f32 0.9, %v1256_v50  ;;  %v1259_v55 = vld [vmem:[#allocation2 + $0x8] sm:$0xff]  ;;  %v1260_v58 = vld [vmem:[#allocation2 + $0x20] sm:$0xff] }
 0x175   : > { %v1258_v54 = vld [vmem:[#allocation2 + $0x10] sm:$0xff]  ;;  %v1265_v56 = vmul.f32 0.9, %v1257_v51  ;;  %v1267_v61 = vmul.f32 0.9, %v1259_v55 }
 0x176   : > { %v1266_v57 = vmul.f32 0.9, %v1258_v54  ;;  %v1565_v60 = vpack.c.bf16 %v1264_v53, %v1263_v52  ;;  %v1268_v62 = vmul.f32 0.9, %v1260_v58 }
 0x177   : > { %v1261_v59 = vld [vmem:[#allocation2 + $0x28] sm:$0xff] }
 0x178   : > { %v1566_v0 = vpack.c.bf16 %v1266_v57, %v1265_v56  ;;  %v1269_v1 = vmul.f32 0.9, %v1261_v59  ;;  %1295 = vst [vmem:[%s2089_s2] sm:$0xff] %v1565_v60  ;;  %v1567_v3 = vpack.c.bf16 %v1268_v62, %v1267_v61 }
 0x179   : > { %v1262_v63 = vld [vmem:[#allocation2 + $0x38] sm:$0xff] }
 0x17a   : > { %v1270_v2 = vmul.f32 0.9, %v1262_v63  ;;  %1296 = vst [vmem:[%s2089_s2 + $0x8] sm:$0xff] %v1566_v0  ;;  %1297 = vst [vmem:[%s2089_s2 + $0x10] sm:$0xff] %v1567_v3 }
 0x17c   : > { %v1568_v4 = vpack.c.bf16 %v1270_v2, %v1269_v1 }
 0x17e   : > { %1298 = vst [vmem:[%s2089_s2 + $0x18] sm:$0xff] %v1568_v4 }
 0x17f PF: > { %s12_s13 = sadd.s32 1, %s1846_s13   ;;  %s2090_s9 = smov %s1834_s10 }
 0x180   : > { %p9_p12 = scmp.ge.s32.totalorder %s12_s13, 4   ;;  %s2091_s10 = smov %s1899_s17 }
 0x181   : > { %s2092_s11 = smov %s1842_s12  ;;  %s2093_s12 = smov %s2095_s14 }
 0x182   :  { %11 = sbr.rel (!%p9_p12) target bundleno = 3 (0x3), region = 97 }

// kernel: custom_llama_model.25
= control target key start
LH: loop header
LB: loop body
LE: loop exit
PB: predicated region body
PF: predicated region fallthrough
CT: control target
= control target key end

     0   :  { %s1823_s1 = inlined_call_operand.vmem [shape: bf16[512,512], index: 1, kind: input, shape index: {}]   ;;  %s1824_s0 = inlined_call_operand.vmem [shape: bf16[16,512], index: 0, kind: input, shape index: {}]   ;;  %s1825_s2 = inlined_call_operand.vmem [shape: bf16[16,512], index: 2, kind: output, shape index: {}]  }
   0x1   :  { %v1194_v0 = vld [vmem:[%s1823_s1 + $0xe4] ss:$16 sps:$4 sm:$0xff]   ;;  %v1198_v2 = vld [vmem:[%s1823_s1 + $0xe0] ss:$16 sps:$4 sm:$0xff]   ;;  %v1295_v51 = vld [vmem:[%s1824_s0 + $0xc] ss:$16 sps:$4 sm:$0xff]  }
   0x2   :  { %v1196_v1 = vld [vmem:[%s1823_s1 + $0x2e4] ss:$16 sps:$4 sm:$0xff]   ;;  %823 = vmatprep.subr.bf16.mxu0 %v1194_v0  ;;  %v1199_v3 = vld [vmem:[%s1823_s1 + $0x2e0] ss:$16 sps:$4 sm:$0xff]   ;;  %898 = vmatprep.mubr.bf16.mxu1 %v1295_v51 }
   0x3   :  { %866 = vmatprep.subr.bf16.mxu1 %v1196_v1  ;;  %v1200_v4 = vld [vmem:[%s1823_s1 + $0xc4] ss:$16 sps:$4 sm:$0xff]   ;;  %824 = vmatpush1.bf16.msra.mxu0 %v1198_v2  ;;  %v1204_v6 = vld [vmem:[%s1823_s1 + $0xc0] ss:$16 sps:$4 sm:$0xff]   ;;  %v1298_v2 = vld [vmem:[%s1823_s1 + $0xec] ss:$16 sps:$4 sm:$0xff]  }
   0x4   :  { %867 = vmatpush1.bf16.msra.mxu1 %v1199_v3  ;;  %v1202_v5 = vld [vmem:[%s1823_s1 + $0x2c4] ss:$16 sps:$4 sm:$0xff]   ;;  %825 = vmatprep.subr.bf16.mxu0 %v1200_v4  ;;  %v1205_v7 = vld [vmem:[%s1823_s1 + $0x2c0] ss:$16 sps:$4 sm:$0xff]   ;;  %v1301_v3 = vld [vmem:[%s1823_s1 + $0x2ec] ss:$16 sps:$4 sm:$0xff]  }
   0x5   :  { %868 = vmatprep.subr.bf16.mxu1 %v1202_v5  ;;  %v1206_v8 = vld [vmem:[%s1823_s1 + $0xa4] ss:$16 sps:$4 sm:$0xff]   ;;  %v1210_v10 = vld [vmem:[%s1823_s1 + $0xa0] ss:$16 sps:$4 sm:$0xff]   ;;  %v1619_v5 = vld [vmem:[%s1824_s0 + $0x8] ss:$16 sps:$4 sm:$0xff]  }
   0x6   :  { %v1208_v9 = vld [vmem:[%s1823_s1 + $0x2a4] ss:$16 sps:$4 sm:$0xff]   ;;  %v1211_v11 = vld [vmem:[%s1823_s1 + $0x2a0] ss:$16 sps:$4 sm:$0xff]  }
   0x7   :  { %826 = vmatpush1.bf16.msra.mxu0 %v1204_v6  ;;  %v1212_v12 = vld [vmem:[%s1823_s1 + $0x84] ss:$16 sps:$4 sm:$0xff]   ;;  %v1216_v14 = vld [vmem:[%s1823_s1 + $0x80] ss:$16 sps:$4 sm:$0xff]   ;;  %v1296_v6 = vld [vmem:[%s1823_s1 + $0xe8] ss:$16 sps:$4 sm:$0xff]  }
   0x8   :  { %869 = vmatpush1.bf16.msra.mxu1 %v1205_v7  ;;  %827 = vmatprep.subr.bf16.mxu0 %v1206_v8  ;;  %v1214_v13 = vld [vmem:[%s1823_s1 + $0x284] ss:$16 sps:$4 sm:$0xff]   ;;  %v1217_v15 = vld [vmem:[%s1823_s1 + $0x280] ss:$16 sps:$4 sm:$0xff]   ;;  %v1299_v7 = vld [vmem:[%s1823_s1 + $0x2e8] ss:$16 sps:$4 sm:$0xff]  }
   0x9   :  { %870 = vmatprep.subr.bf16.mxu1 %v1208_v9  ;;  %v1218_v16 = vld [vmem:[%s1823_s1 + $0x64] ss:$16 sps:$4 sm:$0xff]   ;;  %v1222_v18 = vld [vmem:[%s1823_s1 + $0x60] ss:$16 sps:$4 sm:$0xff]   ;;  %v1304_v8 = vld [vmem:[%s1823_s1 + $0xcc] ss:$16 sps:$4 sm:$0xff]  }
   0xa   :  { %v1220_v17 = vld [vmem:[%s1823_s1 + $0x264] ss:$16 sps:$4 sm:$0xff]   ;;  %v1223_v19 = vld [vmem:[%s1823_s1 + $0x260] ss:$16 sps:$4 sm:$0xff]   ;;  %v1307_v9 = vld [vmem:[%s1823_s1 + $0x2cc] ss:$16 sps:$4 sm:$0xff]  }
   0xb   :  { %828 = vmatpush1.bf16.msra.mxu0 %v1210_v10  ;;  %v1224_v20 = vld [vmem:[%s1823_s1 + $0x44] ss:$16 sps:$4 sm:$0xff]   ;;  %v1228_v22 = vld [vmem:[%s1823_s1 + $0x40] ss:$16 sps:$4 sm:$0xff]   ;;  %v1302_v10 = vld [vmem:[%s1823_s1 + $0xc8] ss:$16 sps:$4 sm:$0xff]  }
   0xc   :  { %871 = vmatpush1.bf16.msra.mxu1 %v1211_v11  ;;  %829 = vmatprep.subr.bf16.mxu0 %v1212_v12  ;;  %v1226_v21 = vld [vmem:[%s1823_s1 + $0x244] ss:$16 sps:$4 sm:$0xff]   ;;  %v1229_v23 = vld [vmem:[%s1823_s1 + $0x240] ss:$16 sps:$4 sm:$0xff]   ;;  %v1305_v11 = vld [vmem:[%s1823_s1 + $0x2c8] ss:$16 sps:$4 sm:$0xff]  }
   0xd   :  { %872 = vmatprep.subr.bf16.mxu1 %v1214_v13  ;;  %v1230_v24 = vld [vmem:[%s1823_s1 + $0x24] ss:$16 sps:$4 sm:$0xff]   ;;  %v1234_v26 = vld [vmem:[%s1823_s1 + $0x20] ss:$16 sps:$4 sm:$0xff]   ;;  %v1310_v12 = vld [vmem:[%s1823_s1 + $0xac] ss:$16 sps:$4 sm:$0xff]  }
   0xe   :  { %v1232_v25 = vld [vmem:[%s1823_s1 + $0x224] ss:$16 sps:$4 sm:$0xff]   ;;  %v1235_v27 = vld [vmem:[%s1823_s1 + $0x220] ss:$16 sps:$4 sm:$0xff]   ;;  %v1313_v13 = vld [vmem:[%s1823_s1 + $0x2ac] ss:$16 sps:$4 sm:$0xff]  }
   0xf   :  { %830 = vmatpush1.bf16.msra.mxu0 %v1216_v14  ;;  %v1236_v28 = vld [vmem:[%s1823_s1 + $0x4] ss:$16 sps:$4 sm:$0xff]   ;;  %v1240_v30 = vld [vmem:[%s1823_s1] ss:$16 sps:$4 sm:$0xff]   ;;  %v1308_v14 = vld [vmem:[%s1823_s1 + $0xa8] ss:$16 sps:$4 sm:$0xff]  }
  0x10   :  { %873 = vmatpush1.bf16.msra.mxu1 %v1217_v15  ;;  %831 = vmatprep.subr.bf16.mxu0 %v1218_v16  ;;  %v1238_v29 = vld [vmem:[%s1823_s1 + $0x204] ss:$16 sps:$4 sm:$0xff]   ;;  %v1241_v31 = vld [vmem:[%s1823_s1 + $0x200] ss:$16 sps:$4 sm:$0xff]   ;;  %v1311_v15 = vld [vmem:[%s1823_s1 + $0x2a8] ss:$16 sps:$4 sm:$0xff]  }
  0x11   :  { %874 = vmatprep.subr.bf16.mxu1 %v1220_v17  ;;  %v1242_v32 = vld [vmem:[%s1823_s1 + $0x1e4] ss:$16 sps:$4 sm:$0xff]   ;;  %v1246_v34 = vld [vmem:[%s1823_s1 + $0x1e0] ss:$16 sps:$4 sm:$0xff]   ;;  %v1316_v16 = vld [vmem:[%s1823_s1 + $0x8c] ss:$16 sps:$4 sm:$0xff]  }
  0x12   :  { %v1244_v33 = vld [vmem:[%s1823_s1 + $0x3e4] ss:$16 sps:$4 sm:$0xff]   ;;  %v1247_v35 = vld [vmem:[%s1823_s1 + $0x3e0] ss:$16 sps:$4 sm:$0xff]   ;;  %v1319_v17 = vld [vmem:[%s1823_s1 + $0x28c] ss:$16 sps:$4 sm:$0xff]  }
  0x13   :  { %832 = vmatpush1.bf16.msra.mxu0 %v1222_v18  ;;  %v1248_v36 = vld [vmem:[%s1823_s1 + $0x1c4] ss:$16 sps:$4 sm:$0xff]   ;;  %v1252_v38 = vld [vmem:[%s1823_s1 + $0x1c0] ss:$16 sps:$4 sm:$0xff]   ;;  %v1314_v18 = vld [vmem:[%s1823_s1 + $0x88] ss:$16 sps:$4 sm:$0xff]  }
  0x14   :  { %875 = vmatpush1.bf16.msra.mxu1 %v1223_v19  ;;  %833 = vmatprep.subr.bf16.mxu0 %v1224_v20  ;;  %v1250_v37 = vld [vmem:[%s1823_s1 + $0x3c4] ss:$16 sps:$4 sm:$0xff]   ;;  %v1253_v39 = vld [vmem:[%s1823_s1 + $0x3c0] ss:$16 sps:$4 sm:$0xff]   ;;  %v1317_v19 = vld [vmem:[%s1823_s1 + $0x288] ss:$16 sps:$4 sm:$0xff]  }
  0x15   :  { %876 = vmatprep.subr.bf16.mxu1 %v1226_v21  ;;  %v1254_v40 = vld [vmem:[%s1823_s1 + $0x1a4] ss:$16 sps:$4 sm:$0xff]   ;;  %v1258_v42 = vld [vmem:[%s1823_s1 + $0x1a0] ss:$16 sps:$4 sm:$0xff]   ;;  %v1322_v20 = vld [vmem:[%s1823_s1 + $0x6c] ss:$16 sps:$4 sm:$0xff]  }
  0x16   :  { %v1256_v41 = vld [vmem:[%s1823_s1 + $0x3a4] ss:$16 sps:$4 sm:$0xff]   ;;  %v1259_v43 = vld [vmem:[%s1823_s1 + $0x3a0] ss:$16 sps:$4 sm:$0xff]   ;;  %v1325_v21 = vld [vmem:[%s1823_s1 + $0x26c] ss:$16 sps:$4 sm:$0xff]  }
  0x17   :  { %834 = vmatpush1.bf16.msra.mxu0 %v1228_v22  ;;  %v1260_v44 = vld [vmem:[%s1823_s1 + $0x184] ss:$16 sps:$4 sm:$0xff]   ;;  %v1264_v46 = vld [vmem:[%s1823_s1 + $0x180] ss:$16 sps:$4 sm:$0xff]   ;;  %v1320_v22 = vld [vmem:[%s1823_s1 + $0x68] ss:$16 sps:$4 sm:$0xff]  }
  0x18   :  { %877 = vmatpush1.bf16.msra.mxu1 %v1229_v23  ;;  %835 = vmatprep.subr.bf16.mxu0 %v1230_v24  ;;  %v1262_v45 = vld [vmem:[%s1823_s1 + $0x384] ss:$16 sps:$4 sm:$0xff]   ;;  %v1265_v47 = vld [vmem:[%s1823_s1 + $0x380] ss:$16 sps:$4 sm:$0xff]   ;;  %v1323_v23 = vld [vmem:[%s1823_s1 + $0x268] ss:$16 sps:$4 sm:$0xff]  }
  0x19   :  { %878 = vmatprep.subr.bf16.mxu1 %v1232_v25  ;;  %v1266_v48 = vld [vmem:[%s1823_s1 + $0x164] ss:$16 sps:$4 sm:$0xff]   ;;  %v1270_v52 = vld [vmem:[%s1823_s1 + $0x160] ss:$16 sps:$4 sm:$0xff]   ;;  %v1328_v24 = vld [vmem:[%s1823_s1 + $0x4c] ss:$16 sps:$4 sm:$0xff]  }
  0x1a   :  { %v1292_v49 = vld [vmem:[%s1824_s0 + $0x4] ss:$16 sps:$4 sm:$0xff]   ;;  %v1271_v53 = vld [vmem:[%s1823_s1 + $0x360] ss:$16 sps:$4 sm:$0xff]   ;;  %v1331_v25 = vld [vmem:[%s1823_s1 + $0x24c] ss:$16 sps:$4 sm:$0xff]  }
  0x1b   :  { %836 = vmatpush1.bf16.msra.mxu0 %v1234_v26  ;;  %v1268_v50 = vld [vmem:[%s1823_s1 + $0x364] ss:$16 sps:$4 sm:$0xff]   ;;  %855 = vmatprep.mubr.bf16.mxu0 %v1292_v49  ;;  %v1276_v56 = vld [vmem:[%s1823_s1 + $0x140] ss:$16 sps:$4 sm:$0xff]   ;;  %v1326_v26 = vld [vmem:[%s1823_s1 + $0x48] ss:$16 sps:$4 sm:$0xff]  }
  0x1c   :  { %879 = vmatpush1.bf16.msra.mxu1 %v1235_v27  ;;  %837 = vmatprep.subr.bf16.mxu0 %v1236_v28  ;;  %v1272_v54 = vld [vmem:[%s1823_s1 + $0x144] ss:$16 sps:$4 sm:$0xff]   ;;  %v1277_v57 = vld [vmem:[%s1823_s1 + $0x340] ss:$16 sps:$4 sm:$0xff]   ;;  %v1329_v27 = vld [vmem:[%s1823_s1 + $0x248] ss:$16 sps:$4 sm:$0xff]  }
  0x1d   :  { %880 = vmatprep.subr.bf16.mxu1 %v1238_v29  ;;  %v1274_v55 = vld [vmem:[%s1823_s1 + $0x344] ss:$16 sps:$4 sm:$0xff]   ;;  %v1282_v60 = vld [vmem:[%s1823_s1 + $0x120] ss:$16 sps:$4 sm:$0xff]   ;;  %v1334_v28 = vld [vmem:[%s1823_s1 + $0x2c] ss:$16 sps:$4 sm:$0xff]  }
  0x1e   :  { %v1278_v58 = vld [vmem:[%s1823_s1 + $0x124] ss:$16 sps:$4 sm:$0xff]   ;;  %v1283_v61 = vld [vmem:[%s1823_s1 + $0x320] ss:$16 sps:$4 sm:$0xff]   ;;  %v1337_v29 = vld [vmem:[%s1823_s1 + $0x22c] ss:$16 sps:$4 sm:$0xff]  }
  0x1f   :  { %838 = vmatpush1.bf16.msra.mxu0 %v1240_v30  ;;  %v1280_v59 = vld [vmem:[%s1823_s1 + $0x324] ss:$16 sps:$4 sm:$0xff]   ;;  %v1288_v0 = vld [vmem:[%s1823_s1 + $0x100] ss:$16 sps:$4 sm:$0xff]   ;;  %v1332_v30 = vld [vmem:[%s1823_s1 + $0x28] ss:$16 sps:$4 sm:$0xff]  }
  0x20   :  { %881 = vmatpush1.bf16.msra.mxu1 %v1241_v31  ;;  %839 = vmatprep.subr.bf16.mxu0 %v1242_v32  ;;  %v1284_v62 = vld [vmem:[%s1823_s1 + $0x104] ss:$16 sps:$4 sm:$0xff]   ;;  %v1289_v1 = vld [vmem:[%s1823_s1 + $0x300] ss:$16 sps:$4 sm:$0xff]   ;;  %v1335_v31 = vld [vmem:[%s1823_s1 + $0x228] ss:$16 sps:$4 sm:$0xff]  }
  0x21   :  { %882 = vmatprep.subr.bf16.mxu1 %v1244_v33  ;;  %v1286_v63 = vld [vmem:[%s1823_s1 + $0x304] ss:$16 sps:$4 sm:$0xff]   ;;  %v1614_v4 = vld [vmem:[%s1824_s0] ss:$16 sps:$4 sm:$0xff]   ;;  %v1340_v32 = vld [vmem:[%s1823_s1 + $0xc] ss:$16 sps:$4 sm:$0xff]  }
  0x22   :  { %v1343_v33 = vld [vmem:[%s1823_s1 + $0x20c] ss:$16 sps:$4 sm:$0xff]  }
  0x23   :  { %840 = vmatpush2.bf16.msra.mxu0 %v1246_v34  ;;  %v1338_v34 = vld [vmem:[%s1823_s1 + $0x8] ss:$16 sps:$4 sm:$0xff]  }
  0x24   :  { %883 = vmatpush2.bf16.msra.mxu1 %v1247_v35  ;;  %841 = vmatprep.subr.bf16.mxu0 %v1248_v36  ;;  %v1341_v35 = vld [vmem:[%s1823_s1 + $0x208] ss:$16 sps:$4 sm:$0xff]   ;;  %v1346_v36 = vld [vmem:[%s1823_s1 + $0x1ec] ss:$16 sps:$4 sm:$0xff]  }
  0x25   :  { %884 = vmatprep.subr.bf16.mxu1 %v1250_v37  ;;  %v1349_v37 = vld [vmem:[%s1823_s1 + $0x3ec] ss:$16 sps:$4 sm:$0xff]  }
  0x27   :  { %842 = vmatpush2.bf16.msra.mxu0 %v1252_v38  ;;  %v1344_v38 = vld [vmem:[%s1823_s1 + $0x1e8] ss:$16 sps:$4 sm:$0xff]  }
  0x28   :  { %885 = vmatpush2.bf16.msra.mxu1 %v1253_v39  ;;  %843 = vmatprep.subr.bf16.mxu0 %v1254_v40  ;;  %v1347_v39 = vld [vmem:[%s1823_s1 + $0x3e8] ss:$16 sps:$4 sm:$0xff]   ;;  %v1352_v40 = vld [vmem:[%s1823_s1 + $0x1cc] ss:$16 sps:$4 sm:$0xff]  }
  0x29   :  { %886 = vmatprep.subr.bf16.mxu1 %v1256_v41  ;;  %v1355_v41 = vld [vmem:[%s1823_s1 + $0x3cc] ss:$16 sps:$4 sm:$0xff]  }
  0x2b   :  { %844 = vmatpush2.bf16.msra.mxu0 %v1258_v42  ;;  %v1350_v42 = vld [vmem:[%s1823_s1 + $0x1c8] ss:$16 sps:$4 sm:$0xff]  }
  0x2c   :  { %887 = vmatpush2.bf16.msra.mxu1 %v1259_v43  ;;  %845 = vmatprep.subr.bf16.mxu0 %v1260_v44  ;;  %v1353_v43 = vld [vmem:[%s1823_s1 + $0x3c8] ss:$16 sps:$4 sm:$0xff]   ;;  %v1358_v44 = vld [vmem:[%s1823_s1 + $0x1ac] ss:$16 sps:$4 sm:$0xff]  }
  0x2d   :  { %888 = vmatprep.subr.bf16.mxu1 %v1262_v45  ;;  %v1361_v45 = vld [vmem:[%s1823_s1 + $0x3ac] ss:$16 sps:$4 sm:$0xff]  }
  0x2f   :  { %846 = vmatpush2.bf16.msra.mxu0 %v1264_v46  ;;  %v1356_v46 = vld [vmem:[%s1823_s1 + $0x1a8] ss:$16 sps:$4 sm:$0xff]  }
  0x30   :  { %889 = vmatpush2.bf16.msra.mxu1 %v1265_v47  ;;  %847 = vmatprep.subr.bf16.mxu0 %v1266_v48  ;;  %v1359_v47 = vld [vmem:[%s1823_s1 + $0x3a8] ss:$16 sps:$4 sm:$0xff]   ;;  %v1364_v48 = vld [vmem:[%s1823_s1 + $0x18c] ss:$16 sps:$4 sm:$0xff]  }
  0x31   :  { %890 = vmatprep.subr.bf16.mxu1 %v1268_v50  ;;  %v1362_v50 = vld [vmem:[%s1823_s1 + $0x188] ss:$16 sps:$4 sm:$0xff]  }
  0x33   :  { %848 = vmatpush2.bf16.msra.mxu0 %v1270_v52  ;;  %v1370_v52 = vld [vmem:[%s1823_s1 + $0x16c] ss:$16 sps:$4 sm:$0xff]  }
  0x34   :  { %891 = vmatpush2.bf16.msra.mxu1 %v1271_v53  ;;  %849 = vmatprep.subr.bf16.mxu0 %v1272_v54  ;;  %v1373_v53 = vld [vmem:[%s1823_s1 + $0x36c] ss:$16 sps:$4 sm:$0xff]   ;;  %v1368_v54 = vld [vmem:[%s1823_s1 + $0x168] ss:$16 sps:$4 sm:$0xff]  }
  0x35   :  { %892 = vmatprep.subr.bf16.mxu1 %v1274_v55  ;;  %v1371_v55 = vld [vmem:[%s1823_s1 + $0x368] ss:$16 sps:$4 sm:$0xff]  }
  0x37   :  { %850 = vmatpush2.bf16.msra.mxu0 %v1276_v56  ;;  %v1376_v56 = vld [vmem:[%s1823_s1 + $0x14c] ss:$16 sps:$4 sm:$0xff]  }
  0x38   :  { %893 = vmatpush2.bf16.msra.mxu1 %v1277_v57  ;;  %851 = vmatprep.subr.bf16.mxu0 %v1278_v58  ;;  %v1379_v57 = vld [vmem:[%s1823_s1 + $0x34c] ss:$16 sps:$4 sm:$0xff]   ;;  %v1374_v58 = vld [vmem:[%s1823_s1 + $0x148] ss:$16 sps:$4 sm:$0xff]  }
  0x39   :  { %894 = vmatprep.subr.bf16.mxu1 %v1280_v59  ;;  %v1377_v59 = vld [vmem:[%s1823_s1 + $0x348] ss:$16 sps:$4 sm:$0xff]  }
  0x3b   :  { %852 = vmatpush2.bf16.msra.mxu0 %v1282_v60  ;;  %v1382_v60 = vld [vmem:[%s1823_s1 + $0x12c] ss:$16 sps:$4 sm:$0xff]  }
  0x3c   :  { %895 = vmatpush2.bf16.msra.mxu1 %v1283_v61  ;;  %853 = vmatprep.subr.bf16.mxu0 %v1284_v62  ;;  %v1385_v61 = vld [vmem:[%s1823_s1 + $0x32c] ss:$16 sps:$4 sm:$0xff]   ;;  %v1380_v62 = vld [vmem:[%s1823_s1 + $0x128] ss:$16 sps:$4 sm:$0xff]  }
  0x3d   :  { %896 = vmatprep.subr.bf16.mxu1 %v1286_v63  ;;  %v1383_v63 = vld [vmem:[%s1823_s1 + $0x328] ss:$16 sps:$4 sm:$0xff]  }
  0x3f   :  { %854 = vmatpush2.bf16.msra.mxu0 %v1288_v0  ;;  %v1388_v0 = vld [vmem:[%s1823_s1 + $0x10c] ss:$16 sps:$4 sm:$0xff]  }
  0x40   :  { %897 = vmatpush2.bf16.msra.mxu1 %v1289_v1  ;;  %909 = vmatprep.subr.bf16.mxu0 %v1298_v2  ;;  %v1391_v1 = vld [vmem:[%s1823_s1 + $0x30c] ss:$16 sps:$4 sm:$0xff]   ;;  %v1386_v2 = vld [vmem:[%s1823_s1 + $0x108] ss:$16 sps:$4 sm:$0xff]  }
  0x41   :  { %952 = vmatprep.subr.bf16.mxu1 %v1301_v3  ;;  %v1389_v3 = vld [vmem:[%s1823_s1 + $0x308] ss:$16 sps:$4 sm:$0xff]  }
  0x42   :  { %856 = vmatmul.mubr.bf16.vlgmr.msra.gmra.mxu0 %v1614_v4 }
  0x43   :  { %899 = vmatmul.mubr.bf16.vlgmr.msra.gmra.mxu1 %v1619_v5  ;;  %910 = vmatpush1.bf16.msra.mxu0 %v1296_v6 }
  0x44   :  { %953 = vmatpush1.bf16.msra.mxu1 %v1299_v7  ;;  %911 = vmatprep.subr.bf16.mxu0 %v1304_v8 }
  0x45   :  { %954 = vmatprep.subr.bf16.mxu1 %v1307_v9  ;;  %941 = vmatprep.mubr.bf16.mxu0 %v1292_v49  ;;  %v1367_v49 = vld [vmem:[%s1823_s1 + $0x38c] ss:$16 sps:$4 sm:$0xff]  }
  0x46   :  { %984 = vmatprep.mubr.bf16.mxu1 %v1295_v51  ;;  %v1365_v51 = vld [vmem:[%s1823_s1 + $0x388] ss:$16 sps:$4 sm:$0xff]  }
  0x47   :  { %912 = vmatpush1.bf16.msra.mxu0 %v1302_v10 }
  0x48   :  { %955 = vmatpush1.bf16.msra.mxu1 %v1305_v11  ;;  %913 = vmatprep.subr.bf16.mxu0 %v1310_v12 }
  0x49   :  { %956 = vmatprep.subr.bf16.mxu1 %v1313_v13 }
  0x4b   :  { %914 = vmatpush1.bf16.msra.mxu0 %v1308_v14 }
  0x4c   :  { %957 = vmatpush1.bf16.msra.mxu1 %v1311_v15  ;;  %915 = vmatprep.subr.bf16.mxu0 %v1316_v16 }
  0x4d   :  { %958 = vmatprep.subr.bf16.mxu1 %v1319_v17 }
  0x4f   :  { %916 = vmatpush1.bf16.msra.mxu0 %v1314_v18 }
  0x50   :  { %959 = vmatpush1.bf16.msra.mxu1 %v1317_v19  ;;  %917 = vmatprep.subr.bf16.mxu0 %v1322_v20 }
  0x51   :  { %960 = vmatprep.subr.bf16.mxu1 %v1325_v21 }
  0x53   :  { %918 = vmatpush1.bf16.msra.mxu0 %v1320_v22 }
  0x54   :  { %961 = vmatpush1.bf16.msra.mxu1 %v1323_v23  ;;  %919 = vmatprep.subr.bf16.mxu0 %v1328_v24 }
  0x55   :  { %962 = vmatprep.subr.bf16.mxu1 %v1331_v25 }
  0x57   :  { %920 = vmatpush1.bf16.msra.mxu0 %v1326_v26 }
  0x58   :  { %963 = vmatpush1.bf16.msra.mxu1 %v1329_v27  ;;  %921 = vmatprep.subr.bf16.mxu0 %v1334_v28 }
  0x59   :  { %964 = vmatprep.subr.bf16.mxu1 %v1337_v29 }
  0x5b   :  { %922 = vmatpush1.bf16.msra.mxu0 %v1332_v30 }
  0x5c   :  { %965 = vmatpush1.bf16.msra.mxu1 %v1335_v31  ;;  %923 = vmatprep.subr.bf16.mxu0 %v1340_v32 }
  0x5d   :  { %966 = vmatprep.subr.bf16.mxu1 %v1343_v33 }
  0x5f   :  { %924 = vmatpush1.bf16.msra.mxu0 %v1338_v34 }
  0x60   :  { %967 = vmatpush1.bf16.msra.mxu1 %v1341_v35  ;;  %925 = vmatprep.subr.bf16.mxu0 %v1346_v36 }
  0x61   :  { %968 = vmatprep.subr.bf16.mxu1 %v1349_v37 }
  0x63   :  { %926 = vmatpush2.bf16.msra.mxu0 %v1344_v38 }
  0x64   :  { %969 = vmatpush2.bf16.msra.mxu1 %v1347_v39  ;;  %927 = vmatprep.subr.bf16.mxu0 %v1352_v40 }
  0x65   :  { %970 = vmatprep.subr.bf16.mxu1 %v1355_v41 }
  0x67   :  { %928 = vmatpush2.bf16.msra.mxu0 %v1350_v42 }
  0x68   :  { %971 = vmatpush2.bf16.msra.mxu1 %v1353_v43  ;;  %929 = vmatprep.subr.bf16.mxu0 %v1358_v44 }
  0x69   :  { %972 = vmatprep.subr.bf16.mxu1 %v1361_v45 }
  0x6b   :  { %930 = vmatpush2.bf16.msra.mxu0 %v1356_v46 }
  0x6c   :  { %973 = vmatpush2.bf16.msra.mxu1 %v1359_v47  ;;  %931 = vmatprep.subr.bf16.mxu0 %v1364_v48 }
  0x6d   :  { %974 = vmatprep.subr.bf16.mxu1 %v1367_v49 }
  0x6f   :  { %932 = vmatpush2.bf16.msra.mxu0 %v1362_v50 }
  0x70   :  { %975 = vmatpush2.bf16.msra.mxu1 %v1365_v51  ;;  %933 = vmatprep.subr.bf16.mxu0 %v1370_v52 }
  0x71   :  { %976 = vmatprep.subr.bf16.mxu1 %v1373_v53 }
  0x73   :  { %934 = vmatpush2.bf16.msra.mxu0 %v1368_v54 }
  0x74   :  { %977 = vmatpush2.bf16.msra.mxu1 %v1371_v55  ;;  %935 = vmatprep.subr.bf16.mxu0 %v1376_v56 }
  0x75   :  { %978 = vmatprep.subr.bf16.mxu1 %v1379_v57 }
  0x77   :  { %936 = vmatpush2.bf16.msra.mxu0 %v1374_v58 }
  0x78   :  { %979 = vmatpush2.bf16.msra.mxu1 %v1377_v59  ;;  %937 = vmatprep.subr.bf16.mxu0 %v1382_v60 }
  0x79   :  { %980 = vmatprep.subr.bf16.mxu1 %v1385_v61 }
  0x7b   :  { %938 = vmatpush2.bf16.msra.mxu0 %v1380_v62 }
  0x7c   :  { %981 = vmatpush2.bf16.msra.mxu1 %v1383_v63  ;;  %939 = vmatprep.subr.bf16.mxu0 %v1388_v0 }
  0x7d   :  { %982 = vmatprep.subr.bf16.mxu1 %v1391_v1 }
  0x7f   :  { %940 = vmatpush2.bf16.msra.mxu0 %v1386_v2 }
  0x80   :  { %983 = vmatpush2.bf16.msra.mxu1 %v1389_v3 }
  0x82   :  { %942 = vmatmul.mubr.bf16.vlgmr.msra.gmra.mxu0 %v1614_v4 }
  0x83   :  { %985 = vmatmul.mubr.bf16.vlgmr.msra.gmra.mxu1 %v1619_v5 }
 0x102   :  { %v857_v6 = vpop.f32.mrf.mxu0 }
 0x103   :  { %v900_v7 = vpop.f32.mrf.mxu1 }
 0x104   :  { %v901_v8 = vadd.f32 %v900_v7, %v857_v6  ;;  %v859_v9 = vpop.f32.mrf.mxu0 }
 0x105   :  { %v902_v10 = vpop.f32.mrf.mxu1 }
 0x106   :  { %v903_v11 = vadd.f32 %v902_v10, %v859_v9  ;;  %v861_v12 = vpop.f32.mrf.mxu0 }
 0x107   :  { %v904_v13 = vpop.f32.mrf.mxu1 }
 0x108   :  { %v1190_v14 = vpack.c.bf16 %v903_v11, %v901_v8  ;;  %v863_v15 = vpop.f32.mrf.mxu0  ;;  %v905_v17 = vadd.f32 %v904_v13, %v861_v12 }
 0x109   :  { %v906_v16 = vpop.f32.mrf.mxu1 }
 0x10a   :  { %1046 = vst [vmem:[%s1825_s2] sm:$0xff] %v1190_v14  ;;  %v907_v18 = vadd.f32 %v906_v16, %v863_v15 }
 0x10c   :  { %v1192_v4 = vpack.c.bf16 %v907_v18, %v905_v17 }
 0x10e   :  { %1048 = vst [vmem:[%s1825_s2 + $0x10] sm:$0xff] %v1192_v4 }
 0x142   :  { %v943_v5 = vpop.f32.mrf.mxu0 }
 0x143   :  { %v986_v19 = vpop.f32.mrf.mxu1 }
 0x144   :  { %v945_v20 = vpop.f32.mrf.mxu0  ;;  %v987_v22 = vadd.f32 %v986_v19, %v943_v5 }
 0x145   :  { %v988_v21 = vpop.f32.mrf.mxu1 }
 0x146   :  { %v989_v23 = vadd.f32 %v988_v21, %v945_v20  ;;  %v947_v24 = vpop.f32.mrf.mxu0 }
 0x147   :  { %v990_v25 = vpop.f32.mrf.mxu1 }
 0x148   :  { %v1191_v26 = vpack.c.bf16 %v989_v23, %v987_v22  ;;  %v949_v27 = vpop.f32.mrf.mxu0  ;;  %v991_v29 = vadd.f32 %v990_v25, %v947_v24 }
 0x149   :  { %v992_v28 = vpop.f32.mrf.mxu1 }
 0x14a   :  { %1047 = vst [vmem:[%s1825_s2 + $0x8] sm:$0xff] %v1191_v26  ;;  %v993_v30 = vadd.f32 %v992_v28, %v949_v27 }
 0x14c   :  { %v1193_v31 = vpack.c.bf16 %v993_v30, %v991_v29 }
 0x14e   :  { %1049 = vst [vmem:[%s1825_s2 + $0x18] sm:$0xff] %v1193_v31 }

// kernel: custom_llama_model.23
= control target key start
LH: loop header
LB: loop body
LE: loop exit
PB: predicated region body
PF: predicated region fallthrough
CT: control target
= control target key end

     0   :  { %s2104_s9 = smov 0   ;;  %s2106_s10 = smov 0   ;;  %s2598_s0 = inlined_call_operand.vmem [shape: bf16[16,512], index: 0, kind: input, shape index: {}]   ;;  %s2599_s1 = inlined_call_operand.vmem [shape: bf16[512,1024], index: 1, kind: input, shape index: {}]   ;;  %s2600_s2 = inlined_call_operand.vmem [shape: bf16[16,1024], index: 2, kind: output, shape index: {}]  }
   0x1   :  { %s2108_s11 = smov 0   ;;  %s2110_s12 = smov 0  }
   0x2   :  { %s2112_s13 = smov 0  }
   0x3 LB: > { %s27_s14 = sadd.s32 1, %s2083_s12  ;;  %s1653_s15 = sadd.s32 4294967295, %s2087_s13   ;;  %s2087_s13 = sphi %s2112_s13, %s12_s13   ;;  %s2083_s12 = sphi %s2110_s12, %s2605_s12   ;;  %s2079_s11 = sphi %s2108_s11, %s2604_s11   ;;  %s2075_s10 = sphi %s2106_s10, %s2603_s10   ;;  %s2071_s9 = sphi %s2104_s9, %s2602_s9  }
   0x4   : > { %p29_p0 = scmp.ge.s32.totalorder %s27_s14, 2  ;;  %p75_p1 = scmp.ne.s32.totalorder %s2075_s10, %s2071_s9 }
   0x5   : > { %p76_p2 = scmp.eq.s32.totalorder %s2087_s13, 0  ;;  %p107_p4 = scmp.eq.s32.totalorder %s1653_s15, 1 }
   0x6   : > { %s2607_s14 = smov (%p29_p0, %s27_s14), 0  ;;  %s68_s17 = sadd.s32 1, %s2075_s10 }
   0x7   : > { %p77_p3 = por %p76_p2, %p75_p1  ;;  %s64_s16 = ssub.s32 %s2083_s12, %s2607_s14 }
   0x8   : > { %p66_p5 = scmp.eq.s32.totalorder %s64_s16, 0  ;;  %p2139_p6 = por %p107_p4, %p75_p1 }
   0x9   : > { %p1657_p7 = scmp.ge.s32.totalorder %s2087_s13, 2 }
   0xa   : > { %s2144_s19 = scalar_select %p66_p5, %s2075_s10, %s68_s17  }
   0xb   : > { %144 = sbr.rel (%p1657_p7) target bundleno = 84 (0x54), region = 20 }
  0x10   : > { %147 = sbr.rel (!%p77_p3) target bundleno = 84 (0x54), region = 24  ;;  %s149_s20 = sand.u32 (%p77_p3), 1, %s2075_s10  }
  0x11   : > { %s1805_s21 = sshll.u32 (%p77_p3), %s2083_s12, 4  ;;  %s1658_s22 = sshll.u32 (%p77_p3), %s149_s20, 10 }
  0x12   : > { %s2152_s25 = scalar_lea.vmem (%p77_p3), %s2599_s1, %s1805_s21  ;;  %s2157_s26 = scalar_lea.vmem (%p77_p3), [#allocation3], %s1658_s22 }
  0x13   : > { %v170_v0 = vld [vmem:[%s2152_s25] sm:$0xff] (%p77_p3)  ;;  %v172_v1 = vld [vmem:[%s2152_s25 + $0x8] sm:$0xff] (%p77_p3) }
  0x14   : > { %v174_v2 = vld [vmem:[%s2152_s25 + $0x20] sm:$0xff] (%p77_p3)  ;;  %171 = vst [vmem:[%s2157_s26] sm:$0xff] (%p77_p3), %v170_v0  ;;  %173 = vst [vmem:[%s2157_s26 + $0x8] sm:$0xff] (%p77_p3), %v172_v1  ;;  %v176_v3 = vld [vmem:[%s2152_s25 + $0x28] sm:$0xff] (%p77_p3) }
  0x15   : > { %175 = vst [vmem:[%s2157_s26 + $0x10] sm:$0xff] %v174_v2  ;;  %v178_v4 = vld [vmem:[%s2152_s25 + $0x40] sm:$0xff]  ;;  %v180_v5 = vld [vmem:[%s2152_s25 + $0x48] sm:$0xff]  ;;  %177 = vst [vmem:[%s2157_s26 + $0x18] sm:$0xff] %v176_v3 }
  0x16   : > { %179 = vst [vmem:[%s2157_s26 + $0x20] sm:$0xff] %v178_v4  ;;  %181 = vst [vmem:[%s2157_s26 + $0x28] sm:$0xff] %v180_v5  ;;  %v182_v6 = vld [vmem:[%s2152_s25 + $0x60] sm:$0xff]  ;;  %v184_v7 = vld [vmem:[%s2152_s25 + $0x68] sm:$0xff] }
  0x17   : > { %v186_v8 = vld [vmem:[%s2152_s25 + $0x80] sm:$0xff]  ;;  %183 = vst [vmem:[%s2157_s26 + $0x30] sm:$0xff] %v182_v6  ;;  %185 = vst [vmem:[%s2157_s26 + $0x38] sm:$0xff] %v184_v7  ;;  %v188_v9 = vld [vmem:[%s2152_s25 + $0x88] sm:$0xff] }
  0x18   : > { %187 = vst [vmem:[%s2157_s26 + $0x40] sm:$0xff] %v186_v8  ;;  %v190_v10 = vld [vmem:[%s2152_s25 + $0xa0] sm:$0xff]  ;;  %v192_v11 = vld [vmem:[%s2152_s25 + $0xa8] sm:$0xff]  ;;  %189 = vst [vmem:[%s2157_s26 + $0x48] sm:$0xff] %v188_v9 }
  0x19   : > { %191 = vst [vmem:[%s2157_s26 + $0x50] sm:$0xff] %v190_v10  ;;  %193 = vst [vmem:[%s2157_s26 + $0x58] sm:$0xff] %v192_v11  ;;  %v194_v12 = vld [vmem:[%s2152_s25 + $0xc0] sm:$0xff]  ;;  %v196_v13 = vld [vmem:[%s2152_s25 + $0xc8] sm:$0xff] }
  0x1a   : > { %v198_v14 = vld [vmem:[%s2152_s25 + $0xe0] sm:$0xff]  ;;  %195 = vst [vmem:[%s2157_s26 + $0x60] sm:$0xff] %v194_v12  ;;  %197 = vst [vmem:[%s2157_s26 + $0x68] sm:$0xff] %v196_v13  ;;  %v200_v15 = vld [vmem:[%s2152_s25 + $0xe8] sm:$0xff] }
  0x1b   : > { %199 = vst [vmem:[%s2157_s26 + $0x70] sm:$0xff] %v198_v14  ;;  %v202_v16 = vld [vmem:[%s2152_s25 + $0x100] sm:$0xff]  ;;  %v204_v17 = vld [vmem:[%s2152_s25 + $0x108] sm:$0xff]  ;;  %201 = vst [vmem:[%s2157_s26 + $0x78] sm:$0xff] %v200_v15 }
  0x1c   : > { %203 = vst [vmem:[%s2157_s26 + $0x80] sm:$0xff] %v202_v16  ;;  %205 = vst [vmem:[%s2157_s26 + $0x88] sm:$0xff] %v204_v17  ;;  %v206_v18 = vld [vmem:[%s2152_s25 + $0x120] sm:$0xff]  ;;  %v208_v19 = vld [vmem:[%s2152_s25 + $0x128] sm:$0xff] }
  0x1d   : > { %v210_v20 = vld [vmem:[%s2152_s25 + $0x140] sm:$0xff]  ;;  %207 = vst [vmem:[%s2157_s26 + $0x90] sm:$0xff] %v206_v18  ;;  %209 = vst [vmem:[%s2157_s26 + $0x98] sm:$0xff] %v208_v19  ;;  %v212_v21 = vld [vmem:[%s2152_s25 + $0x148] sm:$0xff] }
  0x1e   : > { %211 = vst [vmem:[%s2157_s26 + $0xa0] sm:$0xff] %v210_v20  ;;  %v214_v22 = vld [vmem:[%s2152_s25 + $0x160] sm:$0xff]  ;;  %v216_v23 = vld [vmem:[%s2152_s25 + $0x168] sm:$0xff]  ;;  %213 = vst [vmem:[%s2157_s26 + $0xa8] sm:$0xff] %v212_v21 }
  0x1f   : > { %215 = vst [vmem:[%s2157_s26 + $0xb0] sm:$0xff] %v214_v22  ;;  %217 = vst [vmem:[%s2157_s26 + $0xb8] sm:$0xff] %v216_v23  ;;  %v218_v24 = vld [vmem:[%s2152_s25 + $0x180] sm:$0xff]  ;;  %v220_v25 = vld [vmem:[%s2152_s25 + $0x188] sm:$0xff] }
  0x20   : > { %v222_v26 = vld [vmem:[%s2152_s25 + $0x1a0] sm:$0xff]  ;;  %219 = vst [vmem:[%s2157_s26 + $0xc0] sm:$0xff] %v218_v24  ;;  %221 = vst [vmem:[%s2157_s26 + $0xc8] sm:$0xff] %v220_v25  ;;  %v224_v27 = vld [vmem:[%s2152_s25 + $0x1a8] sm:$0xff] }
  0x21   : > { %223 = vst [vmem:[%s2157_s26 + $0xd0] sm:$0xff] %v222_v26  ;;  %v226_v28 = vld [vmem:[%s2152_s25 + $0x1c0] sm:$0xff]  ;;  %v228_v29 = vld [vmem:[%s2152_s25 + $0x1c8] sm:$0xff]  ;;  %225 = vst [vmem:[%s2157_s26 + $0xd8] sm:$0xff] %v224_v27 }
  0x22   : > { %227 = vst [vmem:[%s2157_s26 + $0xe0] sm:$0xff] %v226_v28  ;;  %229 = vst [vmem:[%s2157_s26 + $0xe8] sm:$0xff] %v228_v29  ;;  %v230_v30 = vld [vmem:[%s2152_s25 + $0x1e0] sm:$0xff]  ;;  %v232_v31 = vld [vmem:[%s2152_s25 + $0x1e8] sm:$0xff] }
  0x23   : > { %v234_v32 = vld [vmem:[%s2152_s25 + $0x200] sm:$0xff]  ;;  %231 = vst [vmem:[%s2157_s26 + $0xf0] sm:$0xff] %v230_v30  ;;  %233 = vst [vmem:[%s2157_s26 + $0xf8] sm:$0xff] %v232_v31  ;;  %v236_v33 = vld [vmem:[%s2152_s25 + $0x208] sm:$0xff] }
  0x24   : > { %235 = vst [vmem:[%s2157_s26 + $0x100] sm:$0xff] %v234_v32  ;;  %v238_v34 = vld [vmem:[%s2152_s25 + $0x220] sm:$0xff]  ;;  %v240_v35 = vld [vmem:[%s2152_s25 + $0x228] sm:$0xff]  ;;  %237 = vst [vmem:[%s2157_s26 + $0x108] sm:$0xff] %v236_v33 }
  0x25   : > { %239 = vst [vmem:[%s2157_s26 + $0x110] sm:$0xff] %v238_v34  ;;  %241 = vst [vmem:[%s2157_s26 + $0x118] sm:$0xff] %v240_v35  ;;  %v242_v36 = vld [vmem:[%s2152_s25 + $0x240] sm:$0xff]  ;;  %v244_v37 = vld [vmem:[%s2152_s25 + $0x248] sm:$0xff] }
  0x26   : > { %v246_v38 = vld [vmem:[%s2152_s25 + $0x260] sm:$0xff]  ;;  %243 = vst [vmem:[%s2157_s26 + $0x120] sm:$0xff] %v242_v36  ;;  %245 = vst [vmem:[%s2157_s26 + $0x128] sm:$0xff] %v244_v37  ;;  %v248_v39 = vld [vmem:[%s2152_s25 + $0x268] sm:$0xff] }
  0x27   : > { %247 = vst [vmem:[%s2157_s26 + $0x130] sm:$0xff] %v246_v38  ;;  %v250_v40 = vld [vmem:[%s2152_s25 + $0x280] sm:$0xff]  ;;  %v252_v41 = vld [vmem:[%s2152_s25 + $0x288] sm:$0xff]  ;;  %249 = vst [vmem:[%s2157_s26 + $0x138] sm:$0xff] %v248_v39 }
  0x28   : > { %251 = vst [vmem:[%s2157_s26 + $0x140] sm:$0xff] %v250_v40  ;;  %253 = vst [vmem:[%s2157_s26 + $0x148] sm:$0xff] %v252_v41  ;;  %v254_v42 = vld [vmem:[%s2152_s25 + $0x2a0] sm:$0xff]  ;;  %v256_v43 = vld [vmem:[%s2152_s25 + $0x2a8] sm:$0xff] }
  0x29   : > { %v258_v44 = vld [vmem:[%s2152_s25 + $0x2c0] sm:$0xff]  ;;  %255 = vst [vmem:[%s2157_s26 + $0x150] sm:$0xff] %v254_v42  ;;  %257 = vst [vmem:[%s2157_s26 + $0x158] sm:$0xff] %v256_v43  ;;  %v260_v45 = vld [vmem:[%s2152_s25 + $0x2c8] sm:$0xff] }
  0x2a   : > { %259 = vst [vmem:[%s2157_s26 + $0x160] sm:$0xff] %v258_v44  ;;  %v262_v46 = vld [vmem:[%s2152_s25 + $0x2e0] sm:$0xff]  ;;  %v264_v47 = vld [vmem:[%s2152_s25 + $0x2e8] sm:$0xff]  ;;  %261 = vst [vmem:[%s2157_s26 + $0x168] sm:$0xff] %v260_v45 }
  0x2b   : > { %263 = vst [vmem:[%s2157_s26 + $0x170] sm:$0xff] %v262_v46  ;;  %265 = vst [vmem:[%s2157_s26 + $0x178] sm:$0xff] %v264_v47  ;;  %v266_v48 = vld [vmem:[%s2152_s25 + $0x300] sm:$0xff]  ;;  %v268_v49 = vld [vmem:[%s2152_s25 + $0x308] sm:$0xff] }
  0x2c   : > { %v270_v50 = vld [vmem:[%s2152_s25 + $0x320] sm:$0xff]  ;;  %267 = vst [vmem:[%s2157_s26 + $0x180] sm:$0xff] %v266_v48  ;;  %269 = vst [vmem:[%s2157_s26 + $0x188] sm:$0xff] %v268_v49  ;;  %v272_v51 = vld [vmem:[%s2152_s25 + $0x328] sm:$0xff] }
  0x2d   : > { %271 = vst [vmem:[%s2157_s26 + $0x190] sm:$0xff] %v270_v50  ;;  %v274_v52 = vld [vmem:[%s2152_s25 + $0x340] sm:$0xff]  ;;  %v276_v53 = vld [vmem:[%s2152_s25 + $0x348] sm:$0xff]  ;;  %273 = vst [vmem:[%s2157_s26 + $0x198] sm:$0xff] %v272_v51 }
  0x2e   : > { %275 = vst [vmem:[%s2157_s26 + $0x1a0] sm:$0xff] %v274_v52  ;;  %277 = vst [vmem:[%s2157_s26 + $0x1a8] sm:$0xff] %v276_v53  ;;  %v278_v54 = vld [vmem:[%s2152_s25 + $0x360] sm:$0xff]  ;;  %v280_v55 = vld [vmem:[%s2152_s25 + $0x368] sm:$0xff] }
  0x2f   : > { %v282_v56 = vld [vmem:[%s2152_s25 + $0x380] sm:$0xff]  ;;  %279 = vst [vmem:[%s2157_s26 + $0x1b0] sm:$0xff] %v278_v54  ;;  %281 = vst [vmem:[%s2157_s26 + $0x1b8] sm:$0xff] %v280_v55  ;;  %v284_v57 = vld [vmem:[%s2152_s25 + $0x388] sm:$0xff] }
  0x30   : > { %283 = vst [vmem:[%s2157_s26 + $0x1c0] sm:$0xff] %v282_v56  ;;  %v286_v58 = vld [vmem:[%s2152_s25 + $0x3a0] sm:$0xff]  ;;  %v288_v59 = vld [vmem:[%s2152_s25 + $0x3a8] sm:$0xff]  ;;  %285 = vst [vmem:[%s2157_s26 + $0x1c8] sm:$0xff] %v284_v57 }
  0x31   : > { %287 = vst [vmem:[%s2157_s26 + $0x1d0] sm:$0xff] %v286_v58  ;;  %289 = vst [vmem:[%s2157_s26 + $0x1d8] sm:$0xff] %v288_v59  ;;  %v290_v60 = vld [vmem:[%s2152_s25 + $0x3c0] sm:$0xff]  ;;  %v292_v61 = vld [vmem:[%s2152_s25 + $0x3c8] sm:$0xff] }
  0x32   : > { %v294_v62 = vld [vmem:[%s2152_s25 + $0x3e0] sm:$0xff]  ;;  %291 = vst [vmem:[%s2157_s26 + $0x1e0] sm:$0xff] %v290_v60  ;;  %293 = vst [vmem:[%s2157_s26 + $0x1e8] sm:$0xff] %v292_v61  ;;  %v296_v63 = vld [vmem:[%s2152_s25 + $0x3e8] sm:$0xff] }
  0x33   : > { %295 = vst [vmem:[%s2157_s26 + $0x1f0] sm:$0xff] %v294_v62  ;;  %v298_v0 = vld [vmem:[%s2152_s25 + $0x400] sm:$0xff]  ;;  %v300_v1 = vld [vmem:[%s2152_s25 + $0x408] sm:$0xff]  ;;  %297 = vst [vmem:[%s2157_s26 + $0x1f8] sm:$0xff] %v296_v63 }
  0x34   : > { %299 = vst [vmem:[%s2157_s26 + $0x200] sm:$0xff] %v298_v0  ;;  %301 = vst [vmem:[%s2157_s26 + $0x208] sm:$0xff] %v300_v1  ;;  %v302_v2 = vld [vmem:[%s2152_s25 + $0x420] sm:$0xff]  ;;  %v304_v3 = vld [vmem:[%s2152_s25 + $0x428] sm:$0xff] }
  0x35   : > { %v306_v4 = vld [vmem:[%s2152_s25 + $0x440] sm:$0xff]  ;;  %303 = vst [vmem:[%s2157_s26 + $0x210] sm:$0xff] %v302_v2  ;;  %305 = vst [vmem:[%s2157_s26 + $0x218] sm:$0xff] %v304_v3  ;;  %v308_v5 = vld [vmem:[%s2152_s25 + $0x448] sm:$0xff] }
  0x36   : > { %307 = vst [vmem:[%s2157_s26 + $0x220] sm:$0xff] %v306_v4  ;;  %v310_v6 = vld [vmem:[%s2152_s25 + $0x460] sm:$0xff]  ;;  %v312_v7 = vld [vmem:[%s2152_s25 + $0x468] sm:$0xff]  ;;  %309 = vst [vmem:[%s2157_s26 + $0x228] sm:$0xff] %v308_v5 }
  0x37   : > { %311 = vst [vmem:[%s2157_s26 + $0x230] sm:$0xff] %v310_v6  ;;  %313 = vst [vmem:[%s2157_s26 + $0x238] sm:$0xff] %v312_v7  ;;  %v314_v8 = vld [vmem:[%s2152_s25 + $0x480] sm:$0xff]  ;;  %v316_v9 = vld [vmem:[%s2152_s25 + $0x488] sm:$0xff] }
  0x38   : > { %v318_v10 = vld [vmem:[%s2152_s25 + $0x4a0] sm:$0xff]  ;;  %315 = vst [vmem:[%s2157_s26 + $0x240] sm:$0xff] %v314_v8  ;;  %317 = vst [vmem:[%s2157_s26 + $0x248] sm:$0xff] %v316_v9  ;;  %v320_v11 = vld [vmem:[%s2152_s25 + $0x4a8] sm:$0xff] }
  0x39   : > { %319 = vst [vmem:[%s2157_s26 + $0x250] sm:$0xff] %v318_v10  ;;  %v322_v12 = vld [vmem:[%s2152_s25 + $0x4c0] sm:$0xff]  ;;  %v324_v13 = vld [vmem:[%s2152_s25 + $0x4c8] sm:$0xff]  ;;  %321 = vst [vmem:[%s2157_s26 + $0x258] sm:$0xff] %v320_v11 }
  0x3a   : > { %323 = vst [vmem:[%s2157_s26 + $0x260] sm:$0xff] %v322_v12  ;;  %325 = vst [vmem:[%s2157_s26 + $0x268] sm:$0xff] %v324_v13  ;;  %v326_v14 = vld [vmem:[%s2152_s25 + $0x4e0] sm:$0xff]  ;;  %v328_v15 = vld [vmem:[%s2152_s25 + $0x4e8] sm:$0xff] }
  0x3b   : > { %v330_v16 = vld [vmem:[%s2152_s25 + $0x500] sm:$0xff]  ;;  %327 = vst [vmem:[%s2157_s26 + $0x270] sm:$0xff] %v326_v14  ;;  %329 = vst [vmem:[%s2157_s26 + $0x278] sm:$0xff] %v328_v15  ;;  %v332_v17 = vld [vmem:[%s2152_s25 + $0x508] sm:$0xff] }
  0x3c   : > { %331 = vst [vmem:[%s2157_s26 + $0x280] sm:$0xff] %v330_v16  ;;  %v334_v18 = vld [vmem:[%s2152_s25 + $0x520] sm:$0xff]  ;;  %v336_v19 = vld [vmem:[%s2152_s25 + $0x528] sm:$0xff]  ;;  %333 = vst [vmem:[%s2157_s26 + $0x288] sm:$0xff] %v332_v17 }
  0x3d   : > { %335 = vst [vmem:[%s2157_s26 + $0x290] sm:$0xff] %v334_v18  ;;  %337 = vst [vmem:[%s2157_s26 + $0x298] sm:$0xff] %v336_v19  ;;  %v338_v20 = vld [vmem:[%s2152_s25 + $0x540] sm:$0xff]  ;;  %v340_v21 = vld [vmem:[%s2152_s25 + $0x548] sm:$0xff] }
  0x3e   : > { %v342_v22 = vld [vmem:[%s2152_s25 + $0x560] sm:$0xff]  ;;  %339 = vst [vmem:[%s2157_s26 + $0x2a0] sm:$0xff] %v338_v20  ;;  %341 = vst [vmem:[%s2157_s26 + $0x2a8] sm:$0xff] %v340_v21  ;;  %v344_v23 = vld [vmem:[%s2152_s25 + $0x568] sm:$0xff] }
  0x3f   : > { %343 = vst [vmem:[%s2157_s26 + $0x2b0] sm:$0xff] %v342_v22  ;;  %v346_v24 = vld [vmem:[%s2152_s25 + $0x580] sm:$0xff]  ;;  %v348_v25 = vld [vmem:[%s2152_s25 + $0x588] sm:$0xff]  ;;  %345 = vst [vmem:[%s2157_s26 + $0x2b8] sm:$0xff] %v344_v23 }
  0x40   : > { %347 = vst [vmem:[%s2157_s26 + $0x2c0] sm:$0xff] %v346_v24  ;;  %349 = vst [vmem:[%s2157_s26 + $0x2c8] sm:$0xff] %v348_v25  ;;  %v350_v26 = vld [vmem:[%s2152_s25 + $0x5a0] sm:$0xff]  ;;  %v352_v27 = vld [vmem:[%s2152_s25 + $0x5a8] sm:$0xff] }
  0x41   : > { %v354_v28 = vld [vmem:[%s2152_s25 + $0x5c0] sm:$0xff]  ;;  %351 = vst [vmem:[%s2157_s26 + $0x2d0] sm:$0xff] %v350_v26  ;;  %353 = vst [vmem:[%s2157_s26 + $0x2d8] sm:$0xff] %v352_v27  ;;  %v356_v29 = vld [vmem:[%s2152_s25 + $0x5c8] sm:$0xff] }
  0x42   : > { %355 = vst [vmem:[%s2157_s26 + $0x2e0] sm:$0xff] %v354_v28  ;;  %v358_v30 = vld [vmem:[%s2152_s25 + $0x5e0] sm:$0xff]  ;;  %v360_v31 = vld [vmem:[%s2152_s25 + $0x5e8] sm:$0xff]  ;;  %357 = vst [vmem:[%s2157_s26 + $0x2e8] sm:$0xff] %v356_v29 }
  0x43   : > { %359 = vst [vmem:[%s2157_s26 + $0x2f0] sm:$0xff] %v358_v30  ;;  %361 = vst [vmem:[%s2157_s26 + $0x2f8] sm:$0xff] %v360_v31  ;;  %v362_v32 = vld [vmem:[%s2152_s25 + $0x600] sm:$0xff]  ;;  %v364_v33 = vld [vmem:[%s2152_s25 + $0x608] sm:$0xff] }
  0x44   : > { %v366_v34 = vld [vmem:[%s2152_s25 + $0x620] sm:$0xff]  ;;  %363 = vst [vmem:[%s2157_s26 + $0x300] sm:$0xff] %v362_v32  ;;  %365 = vst [vmem:[%s2157_s26 + $0x308] sm:$0xff] %v364_v33  ;;  %v368_v35 = vld [vmem:[%s2152_s25 + $0x628] sm:$0xff] }
  0x45   : > { %367 = vst [vmem:[%s2157_s26 + $0x310] sm:$0xff] %v366_v34  ;;  %v370_v36 = vld [vmem:[%s2152_s25 + $0x640] sm:$0xff]  ;;  %v372_v37 = vld [vmem:[%s2152_s25 + $0x648] sm:$0xff]  ;;  %369 = vst [vmem:[%s2157_s26 + $0x318] sm:$0xff] %v368_v35 }
  0x46   : > { %371 = vst [vmem:[%s2157_s26 + $0x320] sm:$0xff] %v370_v36  ;;  %373 = vst [vmem:[%s2157_s26 + $0x328] sm:$0xff] %v372_v37  ;;  %v374_v38 = vld [vmem:[%s2152_s25 + $0x660] sm:$0xff]  ;;  %v376_v39 = vld [vmem:[%s2152_s25 + $0x668] sm:$0xff] }
  0x47   : > { %v378_v40 = vld [vmem:[%s2152_s25 + $0x680] sm:$0xff]  ;;  %375 = vst [vmem:[%s2157_s26 + $0x330] sm:$0xff] %v374_v38  ;;  %377 = vst [vmem:[%s2157_s26 + $0x338] sm:$0xff] %v376_v39  ;;  %v380_v41 = vld [vmem:[%s2152_s25 + $0x688] sm:$0xff] }
  0x48   : > { %379 = vst [vmem:[%s2157_s26 + $0x340] sm:$0xff] %v378_v40  ;;  %v382_v42 = vld [vmem:[%s2152_s25 + $0x6a0] sm:$0xff]  ;;  %v384_v43 = vld [vmem:[%s2152_s25 + $0x6a8] sm:$0xff]  ;;  %381 = vst [vmem:[%s2157_s26 + $0x348] sm:$0xff] %v380_v41 }
  0x49   : > { %383 = vst [vmem:[%s2157_s26 + $0x350] sm:$0xff] %v382_v42  ;;  %385 = vst [vmem:[%s2157_s26 + $0x358] sm:$0xff] %v384_v43  ;;  %v386_v44 = vld [vmem:[%s2152_s25 + $0x6c0] sm:$0xff]  ;;  %v388_v45 = vld [vmem:[%s2152_s25 + $0x6c8] sm:$0xff] }
  0x4a   : > { %v390_v46 = vld [vmem:[%s2152_s25 + $0x6e0] sm:$0xff]  ;;  %387 = vst [vmem:[%s2157_s26 + $0x360] sm:$0xff] %v386_v44  ;;  %389 = vst [vmem:[%s2157_s26 + $0x368] sm:$0xff] %v388_v45  ;;  %v392_v47 = vld [vmem:[%s2152_s25 + $0x6e8] sm:$0xff] }
  0x4b   : > { %391 = vst [vmem:[%s2157_s26 + $0x370] sm:$0xff] %v390_v46  ;;  %v394_v48 = vld [vmem:[%s2152_s25 + $0x700] sm:$0xff]  ;;  %v396_v49 = vld [vmem:[%s2152_s25 + $0x708] sm:$0xff]  ;;  %393 = vst [vmem:[%s2157_s26 + $0x378] sm:$0xff] %v392_v47 }
  0x4c   : > { %395 = vst [vmem:[%s2157_s26 + $0x380] sm:$0xff] %v394_v48  ;;  %397 = vst [vmem:[%s2157_s26 + $0x388] sm:$0xff] %v396_v49  ;;  %v398_v50 = vld [vmem:[%s2152_s25 + $0x720] sm:$0xff]  ;;  %v400_v51 = vld [vmem:[%s2152_s25 + $0x728] sm:$0xff] }
  0x4d   : > { %v402_v52 = vld [vmem:[%s2152_s25 + $0x740] sm:$0xff]  ;;  %399 = vst [vmem:[%s2157_s26 + $0x390] sm:$0xff] %v398_v50  ;;  %401 = vst [vmem:[%s2157_s26 + $0x398] sm:$0xff] %v400_v51  ;;  %v404_v53 = vld [vmem:[%s2152_s25 + $0x748] sm:$0xff] }
  0x4e   : > { %403 = vst [vmem:[%s2157_s26 + $0x3a0] sm:$0xff] %v402_v52  ;;  %v406_v54 = vld [vmem:[%s2152_s25 + $0x760] sm:$0xff]  ;;  %v408_v55 = vld [vmem:[%s2152_s25 + $0x768] sm:$0xff]  ;;  %405 = vst [vmem:[%s2157_s26 + $0x3a8] sm:$0xff] %v404_v53 }
  0x4f   : > { %407 = vst [vmem:[%s2157_s26 + $0x3b0] sm:$0xff] %v406_v54  ;;  %409 = vst [vmem:[%s2157_s26 + $0x3b8] sm:$0xff] %v408_v55  ;;  %v410_v56 = vld [vmem:[%s2152_s25 + $0x780] sm:$0xff]  ;;  %v412_v57 = vld [vmem:[%s2152_s25 + $0x788] sm:$0xff] }
  0x50   : > { %v414_v58 = vld [vmem:[%s2152_s25 + $0x7a0] sm:$0xff]  ;;  %411 = vst [vmem:[%s2157_s26 + $0x3c0] sm:$0xff] %v410_v56  ;;  %413 = vst [vmem:[%s2157_s26 + $0x3c8] sm:$0xff] %v412_v57  ;;  %v416_v59 = vld [vmem:[%s2152_s25 + $0x7a8] sm:$0xff] }
  0x51   : > { %415 = vst [vmem:[%s2157_s26 + $0x3d0] sm:$0xff] %v414_v58  ;;  %v418_v60 = vld [vmem:[%s2152_s25 + $0x7c0] sm:$0xff]  ;;  %v420_v61 = vld [vmem:[%s2152_s25 + $0x7c8] sm:$0xff]  ;;  %417 = vst [vmem:[%s2157_s26 + $0x3d8] sm:$0xff] %v416_v59 }
  0x52   : > { %419 = vst [vmem:[%s2157_s26 + $0x3e0] sm:$0xff] %v418_v60  ;;  %421 = vst [vmem:[%s2157_s26 + $0x3e8] sm:$0xff] %v420_v61  ;;  %v422_v62 = vld [vmem:[%s2152_s25 + $0x7e0] sm:$0xff]  ;;  %v424_v63 = vld [vmem:[%s2152_s25 + $0x7e8] sm:$0xff] }
  0x53   : > { %423 = vst [vmem:[%s2157_s26 + $0x3f0] sm:$0xff] %v422_v62  ;;  %425 = vst [vmem:[%s2157_s26 + $0x3f8] sm:$0xff] %v424_v63 }
  0x54 PF: > { %p1661_p8 = scmp.ge.s32.totalorder %s2087_s13, 1  ;;  %p430_p9 = scmp.lt.s32.totalorder %s2087_s13, 3 }
  0x56   : > { %p431_p10 = pnand %p1661_p8, %p430_p9 }
  0x57   : > { %s437_s27 = sand.u32 (!%p431_p10), 1, %s2071_s9  }
  0x58   : > { %434 = sbr.rel (%p431_p10) target bundleno = 436 (0x1b4), region = 47  ;;  %s1662_s28 = sshll.u32 (!%p431_p10), %s437_s27, 10 }
  0x59   : > { %s2427_s5 = scalar_lea.vmem (!%p431_p10), [#allocation3], %s1662_s28  ;;  %s1663_s16 = sshll.u32 (!%p431_p10), %s437_s27, 5 }
  0x5a   : > { %s466_s17 = scalar_lea.vmem (!%p431_p10), [#allocation4], %s1663_s16 }
  0x5d   : > { %v2420_v0 = vld [vmem:[%s2598_s0 + $0x4] ss:$16 sps:$4 sm:$0xff]   ;;  %v2425_v1 = vld [vmem:[%s2598_s0 + $0xc] ss:$16 sps:$4 sm:$0xff]   ;;  %v1855_v4 = vld [vmem:[%s2427_s5 + $0xe0] ss:$16 sps:$4 sm:$0xff]  }
  0x5e   : > { %v1851_v2 = vld [vmem:[%s2427_s5 + $0xe4] ss:$16 sps:$4 sm:$0xff]   ;;  %1327 = vmatprep.mubr.bf16.mxu0 %v2420_v0  ;;  %1370 = vmatprep.mubr.bf16.mxu1 %v2425_v1  ;;  %v1856_v5 = vld [vmem:[%s2427_s5 + $0x2e0] ss:$16 sps:$4 sm:$0xff]   ;;  %s1810_s9 = sshll.u32 (%p2139_p6), %s2079_s11, 4 }
  0x5f   : > { %v1853_v3 = vld [vmem:[%s2427_s5 + $0x2e4] ss:$16 sps:$4 sm:$0xff]   ;;  %1295 = vmatprep.subr.bf16.mxu0 %v1851_v2  ;;  %v1861_v8 = vld [vmem:[%s2427_s5 + $0xc0] ss:$16 sps:$4 sm:$0xff]   ;;  %s1534_s22 = scalar_lea.vmem (%p2139_p6), %s2600_s2, %s1810_s9 }
  0x60   : > { %1338 = vmatprep.subr.bf16.mxu1 %v1853_v3  ;;  %v1857_v6 = vld [vmem:[%s2427_s5 + $0xc4] ss:$16 sps:$4 sm:$0xff]   ;;  %1296 = vmatpush1.bf16.msra.mxu0 %v1855_v4  ;;  %v1862_v9 = vld [vmem:[%s2427_s5 + $0x2c0] ss:$16 sps:$4 sm:$0xff]   ;;  %v1955_v4 = vld [vmem:[%s2427_s5 + $0xec] ss:$16 sps:$4 sm:$0xff]  }
  0x61   : > { %1339 = vmatpush1.bf16.msra.mxu1 %v1856_v5  ;;  %v1859_v7 = vld [vmem:[%s2427_s5 + $0x2c4] ss:$16 sps:$4 sm:$0xff]   ;;  %1297 = vmatprep.subr.bf16.mxu0 %v1857_v6  ;;  %v1867_v12 = vld [vmem:[%s2427_s5 + $0xa0] ss:$16 sps:$4 sm:$0xff]   ;;  %v1958_v5 = vld [vmem:[%s2427_s5 + $0x2ec] ss:$16 sps:$4 sm:$0xff]  }
  0x62   : > { %1340 = vmatprep.subr.bf16.mxu1 %v1859_v7  ;;  %v1863_v10 = vld [vmem:[%s2427_s5 + $0xa4] ss:$16 sps:$4 sm:$0xff]   ;;  %v1868_v13 = vld [vmem:[%s2427_s5 + $0x2a0] ss:$16 sps:$4 sm:$0xff]   ;;  %v2505_v7 = vld [vmem:[%s2598_s0 + $0x8] ss:$16 sps:$4 sm:$0xff]  }
  0x63   : > { %v1865_v11 = vld [vmem:[%s2427_s5 + $0x2a4] ss:$16 sps:$4 sm:$0xff]   ;;  %v1873_v16 = vld [vmem:[%s2427_s5 + $0x80] ss:$16 sps:$4 sm:$0xff]  }
  0x64   : > { %1298 = vmatpush1.bf16.msra.mxu0 %v1861_v8  ;;  %v1869_v14 = vld [vmem:[%s2427_s5 + $0x84] ss:$16 sps:$4 sm:$0xff]   ;;  %v1874_v17 = vld [vmem:[%s2427_s5 + $0x280] ss:$16 sps:$4 sm:$0xff]   ;;  %v1953_v8 = vld [vmem:[%s2427_s5 + $0xe8] ss:$16 sps:$4 sm:$0xff]  }
  0x65   : > { %1341 = vmatpush1.bf16.msra.mxu1 %v1862_v9  ;;  %1299 = vmatprep.subr.bf16.mxu0 %v1863_v10  ;;  %v1871_v15 = vld [vmem:[%s2427_s5 + $0x284] ss:$16 sps:$4 sm:$0xff]   ;;  %v1879_v20 = vld [vmem:[%s2427_s5 + $0x60] ss:$16 sps:$4 sm:$0xff]   ;;  %v1956_v9 = vld [vmem:[%s2427_s5 + $0x2e8] ss:$16 sps:$4 sm:$0xff]  }
  0x66   : > { %1342 = vmatprep.subr.bf16.mxu1 %v1865_v11  ;;  %v1875_v18 = vld [vmem:[%s2427_s5 + $0x64] ss:$16 sps:$4 sm:$0xff]   ;;  %v1880_v21 = vld [vmem:[%s2427_s5 + $0x260] ss:$16 sps:$4 sm:$0xff]   ;;  %v1961_v10 = vld [vmem:[%s2427_s5 + $0xcc] ss:$16 sps:$4 sm:$0xff]  }
  0x67   : > { %v1877_v19 = vld [vmem:[%s2427_s5 + $0x264] ss:$16 sps:$4 sm:$0xff]   ;;  %v1885_v24 = vld [vmem:[%s2427_s5 + $0x40] ss:$16 sps:$4 sm:$0xff]   ;;  %v1964_v11 = vld [vmem:[%s2427_s5 + $0x2cc] ss:$16 sps:$4 sm:$0xff]  }
  0x68   : > { %1300 = vmatpush1.bf16.msra.mxu0 %v1867_v12  ;;  %v1881_v22 = vld [vmem:[%s2427_s5 + $0x44] ss:$16 sps:$4 sm:$0xff]   ;;  %v1886_v25 = vld [vmem:[%s2427_s5 + $0x240] ss:$16 sps:$4 sm:$0xff]   ;;  %v1959_v12 = vld [vmem:[%s2427_s5 + $0xc8] ss:$16 sps:$4 sm:$0xff]  }
  0x69   : > { %1343 = vmatpush1.bf16.msra.mxu1 %v1868_v13  ;;  %1301 = vmatprep.subr.bf16.mxu0 %v1869_v14  ;;  %v1883_v23 = vld [vmem:[%s2427_s5 + $0x244] ss:$16 sps:$4 sm:$0xff]   ;;  %v1891_v28 = vld [vmem:[%s2427_s5 + $0x20] ss:$16 sps:$4 sm:$0xff]   ;;  %v1962_v13 = vld [vmem:[%s2427_s5 + $0x2c8] ss:$16 sps:$4 sm:$0xff]  }
  0x6a   : > { %1344 = vmatprep.subr.bf16.mxu1 %v1871_v15  ;;  %v1887_v26 = vld [vmem:[%s2427_s5 + $0x24] ss:$16 sps:$4 sm:$0xff]   ;;  %v1892_v29 = vld [vmem:[%s2427_s5 + $0x220] ss:$16 sps:$4 sm:$0xff]   ;;  %v1967_v14 = vld [vmem:[%s2427_s5 + $0xac] ss:$16 sps:$4 sm:$0xff]  }
  0x6b   : > { %v1889_v27 = vld [vmem:[%s2427_s5 + $0x224] ss:$16 sps:$4 sm:$0xff]   ;;  %v1897_v32 = vld [vmem:[%s2427_s5] ss:$16 sps:$4 sm:$0xff]   ;;  %v1970_v15 = vld [vmem:[%s2427_s5 + $0x2ac] ss:$16 sps:$4 sm:$0xff]  }
  0x6c   : > { %1302 = vmatpush1.bf16.msra.mxu0 %v1873_v16  ;;  %v1893_v30 = vld [vmem:[%s2427_s5 + $0x4] ss:$16 sps:$4 sm:$0xff]   ;;  %v1898_v33 = vld [vmem:[%s2427_s5 + $0x200] ss:$16 sps:$4 sm:$0xff]   ;;  %v1965_v16 = vld [vmem:[%s2427_s5 + $0xa8] ss:$16 sps:$4 sm:$0xff]  }
  0x6d   : > { %1345 = vmatpush1.bf16.msra.mxu1 %v1874_v17  ;;  %1303 = vmatprep.subr.bf16.mxu0 %v1875_v18  ;;  %v1895_v31 = vld [vmem:[%s2427_s5 + $0x204] ss:$16 sps:$4 sm:$0xff]   ;;  %v1903_v36 = vld [vmem:[%s2427_s5 + $0x1e0] ss:$16 sps:$4 sm:$0xff]   ;;  %v1968_v17 = vld [vmem:[%s2427_s5 + $0x2a8] ss:$16 sps:$4 sm:$0xff]  }
  0x6e   : > { %1346 = vmatprep.subr.bf16.mxu1 %v1877_v19  ;;  %v1899_v34 = vld [vmem:[%s2427_s5 + $0x1e4] ss:$16 sps:$4 sm:$0xff]   ;;  %v1904_v37 = vld [vmem:[%s2427_s5 + $0x3e0] ss:$16 sps:$4 sm:$0xff]   ;;  %v1973_v18 = vld [vmem:[%s2427_s5 + $0x8c] ss:$16 sps:$4 sm:$0xff]  }
  0x6f   : > { %v1901_v35 = vld [vmem:[%s2427_s5 + $0x3e4] ss:$16 sps:$4 sm:$0xff]   ;;  %v1909_v40 = vld [vmem:[%s2427_s5 + $0x1c0] ss:$16 sps:$4 sm:$0xff]   ;;  %v1976_v19 = vld [vmem:[%s2427_s5 + $0x28c] ss:$16 sps:$4 sm:$0xff]  }
  0x70   : > { %1304 = vmatpush1.bf16.msra.mxu0 %v1879_v20  ;;  %v1905_v38 = vld [vmem:[%s2427_s5 + $0x1c4] ss:$16 sps:$4 sm:$0xff]   ;;  %v1910_v41 = vld [vmem:[%s2427_s5 + $0x3c0] ss:$16 sps:$4 sm:$0xff]   ;;  %v1971_v20 = vld [vmem:[%s2427_s5 + $0x88] ss:$16 sps:$4 sm:$0xff]  }
  0x71   : > { %1347 = vmatpush1.bf16.msra.mxu1 %v1880_v21  ;;  %1305 = vmatprep.subr.bf16.mxu0 %v1881_v22  ;;  %v1907_v39 = vld [vmem:[%s2427_s5 + $0x3c4] ss:$16 sps:$4 sm:$0xff]   ;;  %v1915_v44 = vld [vmem:[%s2427_s5 + $0x1a0] ss:$16 sps:$4 sm:$0xff]   ;;  %v1974_v21 = vld [vmem:[%s2427_s5 + $0x288] ss:$16 sps:$4 sm:$0xff]  }
  0x72   : > { %1348 = vmatprep.subr.bf16.mxu1 %v1883_v23  ;;  %v1911_v42 = vld [vmem:[%s2427_s5 + $0x1a4] ss:$16 sps:$4 sm:$0xff]   ;;  %v1916_v45 = vld [vmem:[%s2427_s5 + $0x3a0] ss:$16 sps:$4 sm:$0xff]   ;;  %v1977_v22 = vld [vmem:[%s2427_s5 + $0x68] ss:$16 sps:$4 sm:$0xff]  }
  0x73   : > { %v1913_v43 = vld [vmem:[%s2427_s5 + $0x3a4] ss:$16 sps:$4 sm:$0xff]   ;;  %v1921_v48 = vld [vmem:[%s2427_s5 + $0x180] ss:$16 sps:$4 sm:$0xff]   ;;  %v1980_v23 = vld [vmem:[%s2427_s5 + $0x268] ss:$16 sps:$4 sm:$0xff]  }
  0x74   : > { %1306 = vmatpush1.bf16.msra.mxu0 %v1885_v24  ;;  %v1917_v46 = vld [vmem:[%s2427_s5 + $0x184] ss:$16 sps:$4 sm:$0xff]   ;;  %v1922_v49 = vld [vmem:[%s2427_s5 + $0x380] ss:$16 sps:$4 sm:$0xff]   ;;  %v1985_v24 = vld [vmem:[%s2427_s5 + $0x4c] ss:$16 sps:$4 sm:$0xff]  }
  0x75   : > { %1349 = vmatpush1.bf16.msra.mxu1 %v1886_v25  ;;  %1307 = vmatprep.subr.bf16.mxu0 %v1887_v26  ;;  %v1919_v47 = vld [vmem:[%s2427_s5 + $0x384] ss:$16 sps:$4 sm:$0xff]   ;;  %v1927_v52 = vld [vmem:[%s2427_s5 + $0x160] ss:$16 sps:$4 sm:$0xff]   ;;  %v1988_v25 = vld [vmem:[%s2427_s5 + $0x24c] ss:$16 sps:$4 sm:$0xff]  }
  0x76   : > { %1350 = vmatprep.subr.bf16.mxu1 %v1889_v27  ;;  %v1923_v50 = vld [vmem:[%s2427_s5 + $0x164] ss:$16 sps:$4 sm:$0xff]   ;;  %v1928_v53 = vld [vmem:[%s2427_s5 + $0x360] ss:$16 sps:$4 sm:$0xff]   ;;  %v1983_v26 = vld [vmem:[%s2427_s5 + $0x48] ss:$16 sps:$4 sm:$0xff]  }
  0x77   : > { %v1925_v51 = vld [vmem:[%s2427_s5 + $0x364] ss:$16 sps:$4 sm:$0xff]   ;;  %v1933_v56 = vld [vmem:[%s2427_s5 + $0x140] ss:$16 sps:$4 sm:$0xff]   ;;  %v1986_v27 = vld [vmem:[%s2427_s5 + $0x248] ss:$16 sps:$4 sm:$0xff]  }
  0x78   : > { %1308 = vmatpush1.bf16.msra.mxu0 %v1891_v28  ;;  %v1929_v54 = vld [vmem:[%s2427_s5 + $0x144] ss:$16 sps:$4 sm:$0xff]   ;;  %v1934_v57 = vld [vmem:[%s2427_s5 + $0x340] ss:$16 sps:$4 sm:$0xff]   ;;  %v1991_v28 = vld [vmem:[%s2427_s5 + $0x2c] ss:$16 sps:$4 sm:$0xff]  }
  0x79   : > { %1351 = vmatpush1.bf16.msra.mxu1 %v1892_v29  ;;  %1309 = vmatprep.subr.bf16.mxu0 %v1893_v30  ;;  %v1931_v55 = vld [vmem:[%s2427_s5 + $0x344] ss:$16 sps:$4 sm:$0xff]   ;;  %v1939_v60 = vld [vmem:[%s2427_s5 + $0x120] ss:$16 sps:$4 sm:$0xff]   ;;  %v1994_v29 = vld [vmem:[%s2427_s5 + $0x22c] ss:$16 sps:$4 sm:$0xff]  }
  0x7a   : > { %1352 = vmatprep.subr.bf16.mxu1 %v1895_v31  ;;  %v1935_v58 = vld [vmem:[%s2427_s5 + $0x124] ss:$16 sps:$4 sm:$0xff]   ;;  %v1940_v61 = vld [vmem:[%s2427_s5 + $0x320] ss:$16 sps:$4 sm:$0xff]   ;;  %v1989_v30 = vld [vmem:[%s2427_s5 + $0x28] ss:$16 sps:$4 sm:$0xff]  }
  0x7b   : > { %v1937_v59 = vld [vmem:[%s2427_s5 + $0x324] ss:$16 sps:$4 sm:$0xff]   ;;  %v1945_v2 = vld [vmem:[%s2427_s5 + $0x100] ss:$16 sps:$4 sm:$0xff]   ;;  %v1992_v31 = vld [vmem:[%s2427_s5 + $0x228] ss:$16 sps:$4 sm:$0xff]  }
  0x7c   : > { %1310 = vmatpush1.bf16.msra.mxu0 %v1897_v32  ;;  %v1941_v62 = vld [vmem:[%s2427_s5 + $0x104] ss:$16 sps:$4 sm:$0xff]   ;;  %v1946_v3 = vld [vmem:[%s2427_s5 + $0x300] ss:$16 sps:$4 sm:$0xff]   ;;  %v1997_v32 = vld [vmem:[%s2427_s5 + $0xc] ss:$16 sps:$4 sm:$0xff]  }
  0x7d   : > { %1353 = vmatpush1.bf16.msra.mxu1 %v1898_v33  ;;  %1311 = vmatprep.subr.bf16.mxu0 %v1899_v34  ;;  %v1943_v63 = vld [vmem:[%s2427_s5 + $0x304] ss:$16 sps:$4 sm:$0xff]   ;;  %v2500_v6 = vld [vmem:[%s2598_s0] ss:$16 sps:$4 sm:$0xff]   ;;  %v2000_v33 = vld [vmem:[%s2427_s5 + $0x20c] ss:$16 sps:$4 sm:$0xff]  }
  0x7e   : > { %1354 = vmatprep.subr.bf16.mxu1 %v1901_v35  ;;  %v1995_v34 = vld [vmem:[%s2427_s5 + $0x8] ss:$16 sps:$4 sm:$0xff]  }
  0x7f   : > { %v1998_v35 = vld [vmem:[%s2427_s5 + $0x208] ss:$16 sps:$4 sm:$0xff]  }
  0x80   : > { %1312 = vmatpush2.bf16.msra.mxu0 %v1903_v36  ;;  %v2003_v36 = vld [vmem:[%s2427_s5 + $0x1ec] ss:$16 sps:$4 sm:$0xff]  }
  0x81   : > { %1355 = vmatpush2.bf16.msra.mxu1 %v1904_v37  ;;  %1313 = vmatprep.subr.bf16.mxu0 %v1905_v38  ;;  %v2006_v37 = vld [vmem:[%s2427_s5 + $0x3ec] ss:$16 sps:$4 sm:$0xff]   ;;  %v2001_v38 = vld [vmem:[%s2427_s5 + $0x1e8] ss:$16 sps:$4 sm:$0xff]  }
  0x82   : > { %1356 = vmatprep.subr.bf16.mxu1 %v1907_v39  ;;  %v2004_v39 = vld [vmem:[%s2427_s5 + $0x3e8] ss:$16 sps:$4 sm:$0xff]  }
  0x84   : > { %1314 = vmatpush2.bf16.msra.mxu0 %v1909_v40  ;;  %v2009_v40 = vld [vmem:[%s2427_s5 + $0x1cc] ss:$16 sps:$4 sm:$0xff]  }
  0x85   : > { %1357 = vmatpush2.bf16.msra.mxu1 %v1910_v41  ;;  %1315 = vmatprep.subr.bf16.mxu0 %v1911_v42  ;;  %v2012_v41 = vld [vmem:[%s2427_s5 + $0x3cc] ss:$16 sps:$4 sm:$0xff]   ;;  %v2007_v42 = vld [vmem:[%s2427_s5 + $0x1c8] ss:$16 sps:$4 sm:$0xff]  }
  0x86   : > { %1358 = vmatprep.subr.bf16.mxu1 %v1913_v43  ;;  %v2010_v43 = vld [vmem:[%s2427_s5 + $0x3c8] ss:$16 sps:$4 sm:$0xff]  }
  0x88   : > { %1316 = vmatpush2.bf16.msra.mxu0 %v1915_v44  ;;  %v2015_v44 = vld [vmem:[%s2427_s5 + $0x1ac] ss:$16 sps:$4 sm:$0xff]  }
  0x89   : > { %1359 = vmatpush2.bf16.msra.mxu1 %v1916_v45  ;;  %1317 = vmatprep.subr.bf16.mxu0 %v1917_v46  ;;  %v2018_v45 = vld [vmem:[%s2427_s5 + $0x3ac] ss:$16 sps:$4 sm:$0xff]   ;;  %v2013_v46 = vld [vmem:[%s2427_s5 + $0x1a8] ss:$16 sps:$4 sm:$0xff]  }
  0x8a   : > { %1360 = vmatprep.subr.bf16.mxu1 %v1919_v47  ;;  %v2016_v47 = vld [vmem:[%s2427_s5 + $0x3a8] ss:$16 sps:$4 sm:$0xff]  }
  0x8c   : > { %1318 = vmatpush2.bf16.msra.mxu0 %v1921_v48  ;;  %v2021_v48 = vld [vmem:[%s2427_s5 + $0x18c] ss:$16 sps:$4 sm:$0xff]  }
  0x8d   : > { %1361 = vmatpush2.bf16.msra.mxu1 %v1922_v49  ;;  %1319 = vmatprep.subr.bf16.mxu0 %v1923_v50  ;;  %v2024_v49 = vld [vmem:[%s2427_s5 + $0x38c] ss:$16 sps:$4 sm:$0xff]   ;;  %v2019_v50 = vld [vmem:[%s2427_s5 + $0x188] ss:$16 sps:$4 sm:$0xff]  }
  0x8e   : > { %1362 = vmatprep.subr.bf16.mxu1 %v1925_v51  ;;  %v2022_v51 = vld [vmem:[%s2427_s5 + $0x388] ss:$16 sps:$4 sm:$0xff]  }
  0x90   : > { %1320 = vmatpush2.bf16.msra.mxu0 %v1927_v52  ;;  %v2027_v52 = vld [vmem:[%s2427_s5 + $0x16c] ss:$16 sps:$4 sm:$0xff]  }
  0x91   : > { %1363 = vmatpush2.bf16.msra.mxu1 %v1928_v53  ;;  %1321 = vmatprep.subr.bf16.mxu0 %v1929_v54  ;;  %v2030_v53 = vld [vmem:[%s2427_s5 + $0x36c] ss:$16 sps:$4 sm:$0xff]   ;;  %v2025_v54 = vld [vmem:[%s2427_s5 + $0x168] ss:$16 sps:$4 sm:$0xff]  }
  0x92   : > { %1364 = vmatprep.subr.bf16.mxu1 %v1931_v55  ;;  %v2028_v55 = vld [vmem:[%s2427_s5 + $0x368] ss:$16 sps:$4 sm:$0xff]  }
  0x94   : > { %1322 = vmatpush2.bf16.msra.mxu0 %v1933_v56  ;;  %v2033_v56 = vld [vmem:[%s2427_s5 + $0x14c] ss:$16 sps:$4 sm:$0xff]  }
  0x95   : > { %1365 = vmatpush2.bf16.msra.mxu1 %v1934_v57  ;;  %1323 = vmatprep.subr.bf16.mxu0 %v1935_v58  ;;  %v2036_v57 = vld [vmem:[%s2427_s5 + $0x34c] ss:$16 sps:$4 sm:$0xff]   ;;  %v2031_v58 = vld [vmem:[%s2427_s5 + $0x148] ss:$16 sps:$4 sm:$0xff]  }
  0x96   : > { %1366 = vmatprep.subr.bf16.mxu1 %v1937_v59  ;;  %v2034_v59 = vld [vmem:[%s2427_s5 + $0x348] ss:$16 sps:$4 sm:$0xff]  }
  0x98   : > { %1324 = vmatpush2.bf16.msra.mxu0 %v1939_v60  ;;  %v2039_v60 = vld [vmem:[%s2427_s5 + $0x12c] ss:$16 sps:$4 sm:$0xff]  }
  0x99   : > { %1367 = vmatpush2.bf16.msra.mxu1 %v1940_v61  ;;  %1325 = vmatprep.subr.bf16.mxu0 %v1941_v62  ;;  %v2042_v61 = vld [vmem:[%s2427_s5 + $0x32c] ss:$16 sps:$4 sm:$0xff]   ;;  %v2037_v62 = vld [vmem:[%s2427_s5 + $0x128] ss:$16 sps:$4 sm:$0xff]  }
  0x9a   : > { %1368 = vmatprep.subr.bf16.mxu1 %v1943_v63  ;;  %v2040_v63 = vld [vmem:[%s2427_s5 + $0x328] ss:$16 sps:$4 sm:$0xff]  }
  0x9c   : > { %1326 = vmatpush2.bf16.msra.mxu0 %v1945_v2  ;;  %v2045_v2 = vld [vmem:[%s2427_s5 + $0x10c] ss:$16 sps:$4 sm:$0xff]  }
  0x9d   : > { %1369 = vmatpush2.bf16.msra.mxu1 %v1946_v3  ;;  %1381 = vmatprep.subr.bf16.mxu0 %v1955_v4  ;;  %v2048_v3 = vld [vmem:[%s2427_s5 + $0x30c] ss:$16 sps:$4 sm:$0xff]   ;;  %v2043_v4 = vld [vmem:[%s2427_s5 + $0x108] ss:$16 sps:$4 sm:$0xff]  }
  0x9e   : > { %1424 = vmatprep.subr.bf16.mxu1 %v1958_v5  ;;  %v2046_v5 = vld [vmem:[%s2427_s5 + $0x308] ss:$16 sps:$4 sm:$0xff]  }
  0x9f   : > { %1328 = vmatmul.mubr.bf16.vlgmr.msra.gmra.mxu0 %v2500_v6 }
  0xa0   : > { %1371 = vmatmul.mubr.bf16.vlgmr.msra.gmra.mxu1 %v2505_v7  ;;  %1382 = vmatpush1.bf16.msra.mxu0 %v1953_v8 }
  0xa1   : > { %1425 = vmatpush1.bf16.msra.mxu1 %v1956_v9  ;;  %1383 = vmatprep.subr.bf16.mxu0 %v1961_v10 }
  0xa2   : > { %1426 = vmatprep.subr.bf16.mxu1 %v1964_v11  ;;  %1413 = vmatprep.mubr.bf16.mxu0 %v2420_v0  ;;  %v1979_v0 = vld [vmem:[%s2427_s5 + $0x6c] ss:$16 sps:$4 sm:$0xff]  }
  0xa3   : > { %1456 = vmatprep.mubr.bf16.mxu1 %v2425_v1  ;;  %v1982_v1 = vld [vmem:[%s2427_s5 + $0x26c] ss:$16 sps:$4 sm:$0xff]  }
  0xa4   : > { %1384 = vmatpush1.bf16.msra.mxu0 %v1959_v12 }
  0xa5   : > { %1427 = vmatpush1.bf16.msra.mxu1 %v1962_v13  ;;  %1385 = vmatprep.subr.bf16.mxu0 %v1967_v14 }
  0xa6   : > { %1428 = vmatprep.subr.bf16.mxu1 %v1970_v15 }
  0xa8   : > { %1386 = vmatpush1.bf16.msra.mxu0 %v1965_v16 }
  0xa9   : > { %1429 = vmatpush1.bf16.msra.mxu1 %v1968_v17  ;;  %1387 = vmatprep.subr.bf16.mxu0 %v1973_v18 }
  0xaa   : > { %1430 = vmatprep.subr.bf16.mxu1 %v1976_v19 }
  0xac   : > { %1388 = vmatpush1.bf16.msra.mxu0 %v1971_v20 }
  0xad   : > { %1431 = vmatpush1.bf16.msra.mxu1 %v1974_v21  ;;  %1389 = vmatprep.subr.bf16.mxu0 %v1979_v0 }
  0xae   : > { %1432 = vmatprep.subr.bf16.mxu1 %v1982_v1 }
  0xb0   : > { %1390 = vmatpush1.bf16.msra.mxu0 %v1977_v22 }
  0xb1   : > { %1433 = vmatpush1.bf16.msra.mxu1 %v1980_v23  ;;  %1391 = vmatprep.subr.bf16.mxu0 %v1985_v24 }
  0xb2   : > { %1434 = vmatprep.subr.bf16.mxu1 %v1988_v25 }
  0xb4   : > { %1392 = vmatpush1.bf16.msra.mxu0 %v1983_v26 }
  0xb5   : > { %1435 = vmatpush1.bf16.msra.mxu1 %v1986_v27  ;;  %1393 = vmatprep.subr.bf16.mxu0 %v1991_v28 }
  0xb6   : > { %1436 = vmatprep.subr.bf16.mxu1 %v1994_v29 }
  0xb8   : > { %1394 = vmatpush1.bf16.msra.mxu0 %v1989_v30 }
  0xb9   : > { %1437 = vmatpush1.bf16.msra.mxu1 %v1992_v31  ;;  %1395 = vmatprep.subr.bf16.mxu0 %v1997_v32 }
  0xba   : > { %1438 = vmatprep.subr.bf16.mxu1 %v2000_v33 }
  0xbc   : > { %1396 = vmatpush1.bf16.msra.mxu0 %v1995_v34 }
  0xbd   : > { %1439 = vmatpush1.bf16.msra.mxu1 %v1998_v35  ;;  %1397 = vmatprep.subr.bf16.mxu0 %v2003_v36 }
  0xbe   : > { %1440 = vmatprep.subr.bf16.mxu1 %v2006_v37 }
  0xc0   : > { %1398 = vmatpush2.bf16.msra.mxu0 %v2001_v38 }
  0xc1   : > { %1441 = vmatpush2.bf16.msra.mxu1 %v2004_v39  ;;  %1399 = vmatprep.subr.bf16.mxu0 %v2009_v40 }
  0xc2   : > { %1442 = vmatprep.subr.bf16.mxu1 %v2012_v41 }
  0xc4   : > { %1400 = vmatpush2.bf16.msra.mxu0 %v2007_v42 }
  0xc5   : > { %1443 = vmatpush2.bf16.msra.mxu1 %v2010_v43  ;;  %1401 = vmatprep.subr.bf16.mxu0 %v2015_v44 }
  0xc6   : > { %1444 = vmatprep.subr.bf16.mxu1 %v2018_v45 }
  0xc8   : > { %1402 = vmatpush2.bf16.msra.mxu0 %v2013_v46 }
  0xc9   : > { %1445 = vmatpush2.bf16.msra.mxu1 %v2016_v47  ;;  %1403 = vmatprep.subr.bf16.mxu0 %v2021_v48 }
  0xca   : > { %1446 = vmatprep.subr.bf16.mxu1 %v2024_v49 }
  0xcc   : > { %1404 = vmatpush2.bf16.msra.mxu0 %v2019_v50 }
  0xcd   : > { %1447 = vmatpush2.bf16.msra.mxu1 %v2022_v51  ;;  %1405 = vmatprep.subr.bf16.mxu0 %v2027_v52 }
  0xce   : > { %1448 = vmatprep.subr.bf16.mxu1 %v2030_v53 }
  0xd0   : > { %1406 = vmatpush2.bf16.msra.mxu0 %v2025_v54 }
  0xd1   : > { %1449 = vmatpush2.bf16.msra.mxu1 %v2028_v55  ;;  %1407 = vmatprep.subr.bf16.mxu0 %v2033_v56 }
  0xd2   : > { %1450 = vmatprep.subr.bf16.mxu1 %v2036_v57 }
  0xd4   : > { %1408 = vmatpush2.bf16.msra.mxu0 %v2031_v58 }
  0xd5   : > { %1451 = vmatpush2.bf16.msra.mxu1 %v2034_v59  ;;  %1409 = vmatprep.subr.bf16.mxu0 %v2039_v60 }
  0xd6   : > { %1452 = vmatprep.subr.bf16.mxu1 %v2042_v61 }
  0xd8   : > { %1410 = vmatpush2.bf16.msra.mxu0 %v2037_v62 }
  0xd9   : > { %1453 = vmatpush2.bf16.msra.mxu1 %v2040_v63  ;;  %1411 = vmatprep.subr.bf16.mxu0 %v2045_v2 }
  0xda   : > { %1454 = vmatprep.subr.bf16.mxu1 %v2048_v3 }
  0xdc   : > { %1412 = vmatpush2.bf16.msra.mxu0 %v2043_v4 }
  0xdd   : > { %1455 = vmatpush2.bf16.msra.mxu1 %v2046_v5 }
  0xdf   : > { %1414 = vmatmul.mubr.bf16.vlgmr.msra.gmra.mxu0 %v2500_v6 }
  0xe0   : > { %1457 = vmatmul.mubr.bf16.vlgmr.msra.gmra.mxu1 %v2505_v7 }
 0x15f   : > { %v1329_v8 = vpop.f32.mrf.mxu0 }
 0x160   : > { %v1372_v9 = vpop.f32.mrf.mxu1 }
 0x161   : > { %v1373_v10 = vadd.f32 %v1372_v9, %v1329_v8  ;;  %v1331_v11 = vpop.f32.mrf.mxu0 }
 0x162   : > { %v1374_v12 = vpop.f32.mrf.mxu1 }
 0x163   : > { %v1375_v13 = vadd.f32 %v1374_v12, %v1331_v11  ;;  %v1333_v14 = vpop.f32.mrf.mxu0 }
 0x164   : > { %v1376_v15 = vpop.f32.mrf.mxu1 }
 0x165   : > { %v1806_v16 = vpack.c.bf16 %v1375_v13, %v1373_v10  ;;  %v1335_v17 = vpop.f32.mrf.mxu0  ;;  %v1377_v19 = vadd.f32 %v1376_v15, %v1333_v14 }
 0x166   : > { %v1378_v18 = vpop.f32.mrf.mxu1 }
 0x167   : > { %1518 = vst [vmem:[%s466_s17] sm:$0xff] %v1806_v16  ;;  %v1379_v20 = vadd.f32 %v1378_v18, %v1335_v17 }
 0x169   : > { %v1808_v6 = vpack.c.bf16 %v1379_v20, %v1377_v19 }
 0x16b   : > { %1520 = vst [vmem:[%s466_s17 + $0x10] sm:$0xff] %v1808_v6 }
 0x16e   : > { %v1547_v32 = vld [vmem:[%s466_s17] sm:$0xff] (%p2139_p6) }
 0x16f   : > { %1548 = vst [vmem:[%s1534_s22] sm:$0xff] (%p2139_p6), %v1547_v32 }
 0x172   : > { %v1551_v34 = vld [vmem:[%s466_s17 + $0x10] sm:$0xff] (%p2139_p6) }
 0x173   : > { %1552 = vst [vmem:[%s1534_s22 + $0x20] sm:$0xff] (%p2139_p6), %v1551_v34 }
 0x19f   : > { %v1415_v7 = vpop.f32.mrf.mxu0 }
 0x1a0   : > { %v1458_v21 = vpop.f32.mrf.mxu1 }
 0x1a1   : > { %v1417_v0 = vpop.f32.mrf.mxu0  ;;  %v1459_v22 = vadd.f32 %v1458_v21, %v1415_v7 }
 0x1a2   : > { %v1460_v1 = vpop.f32.mrf.mxu1 }
 0x1a3   : > { %v1461_v23 = vadd.f32 %v1460_v1, %v1417_v0  ;;  %v1419_v24 = vpop.f32.mrf.mxu0 }
 0x1a4   : > { %v1462_v25 = vpop.f32.mrf.mxu1 }
 0x1a5   : > { %v1807_v26 = vpack.c.bf16 %v1461_v23, %v1459_v22  ;;  %v1421_v27 = vpop.f32.mrf.mxu0  ;;  %v1463_v29 = vadd.f32 %v1462_v25, %v1419_v24 }
 0x1a6   : > { %v1464_v28 = vpop.f32.mrf.mxu1 }
 0x1a7   : > { %1519 = vst [vmem:[%s466_s17 + $0x8] sm:$0xff] %v1807_v26  ;;  %v1465_v30 = vadd.f32 %v1464_v28, %v1421_v27  ;;  %1528 = sbr.rel (!%p2139_p6) target bundleno = 436 (0x1b4), region = 63 }
 0x1a9   : > { %v1809_v31 = vpack.c.bf16 %v1465_v30, %v1463_v29 }
 0x1ab   : > { %1521 = vst [vmem:[%s466_s17 + $0x18] sm:$0xff] %v1809_v31 }
 0x1ae   : > { %v1549_v33 = vld [vmem:[%s466_s17 + $0x8] sm:$0xff] }
 0x1af   : > { %1550 = vst [vmem:[%s1534_s22 + $0x8] sm:$0xff] %v1549_v33 }
 0x1b2   : > { %v1553_v35 = vld [vmem:[%s466_s17 + $0x18] sm:$0xff] }
 0x1b3   : > { %1554 = vst [vmem:[%s1534_s22 + $0x28] sm:$0xff] %v1553_v35 }
 0x1b4 PF: > { %s12_s13 = sadd.s32 1, %s2087_s13   ;;  %s2602_s9 = smov %s2075_s10 }
 0x1b5   : > { %p9_p11 = scmp.ge.s32.totalorder %s12_s13, 4   ;;  %s2603_s10 = smov %s2144_s19 }
 0x1b6   : > { %s2604_s11 = smov %s2083_s12  ;;  %s2605_s12 = smov %s2607_s14 }
 0x1b7   :  { %11 = sbr.rel (!%p9_p11) target bundleno = 3 (0x3), region = 120 }

// kernel: custom_llama_model.20
= control target key start
LH: loop header
LB: loop body
LE: loop exit
PB: predicated region body
PF: predicated region fallthrough
CT: control target
= control target key end

     0   :  { %s3871_s12 = smov 0   ;;  %s3873_s13 = smov 0   ;;  %s4798_s0 = inlined_call_operand.vmem [shape: bf16[16,512], index: 0, kind: input, shape index: {}]   ;;  %s4799_s1 = inlined_call_operand.vmem [shape: bf16[512,1024], index: 1, kind: input, shape index: {}]   ;;  %s4800_s2 = inlined_call_operand.vmem [shape: bf16[512,1024], index: 2, kind: input, shape index: {}]   ;;  %s4801_s3 = inlined_call_operand.vmem [shape: bf16[16,1024], index: 3, kind: output, shape index: {}]  }
   0x1   :  { %s3875_s14 = smov 0   ;;  %s3877_s15 = smov 0  }
   0x2   :  { %s3879_s16 = smov 0  }
   0x3 LB: > { %s28_s17 = sadd.s32 1, %s3845_s15  ;;  %s3046_s18 = sadd.s32 4294967295, %s3849_s16   ;;  %s3849_s16 = sphi %s3879_s16, %s13_s16   ;;  %s3845_s15 = sphi %s3877_s15, %s4807_s15   ;;  %s3841_s14 = sphi %s3875_s14, %s4806_s14   ;;  %s3837_s13 = sphi %s3873_s13, %s4805_s13   ;;  %s3833_s12 = sphi %s3871_s12, %s4804_s12  }
   0x4   : > { %p30_p0 = scmp.ge.s32.totalorder %s28_s17, 2  ;;  %p76_p1 = scmp.ne.s32.totalorder %s3837_s13, %s3833_s12 }
   0x5   : > { %p77_p2 = scmp.eq.s32.totalorder %s3849_s16, 0  ;;  %p136_p4 = scmp.eq.s32.totalorder %s3046_s18, 1 }
   0x6   : > { %s4809_s17 = smov (%p30_p0, %s28_s17), 0  ;;  %s69_s21 = sadd.s32 1, %s3837_s13 }
   0x7   : > { %p3903_p3 = por %p77_p2, %p76_p1  ;;  %s65_s20 = ssub.s32 %s3845_s15, %s4809_s17 }
   0x8   : > { %p67_p5 = scmp.eq.s32.totalorder %s65_s20, 0  ;;  %p3910_p6 = por %p136_p4, %p76_p1 }
   0x9   : > { %p3050_p7 = scmp.ge.s32.totalorder %s3849_s16, 2 }
   0xa   : > { %s3915_s23 = scalar_select %p67_p5, %s3837_s13, %s69_s21  }
   0xb   : > { %173 = sbr.rel (%p3050_p7) target bundleno = 152 (0x98), region = 20 }
  0x10   : > { %176 = sbr.rel (!%p3903_p3) target bundleno = 84 (0x54), region = 24  ;;  %s178_s24 = sand.u32 (%p3903_p3), 1, %s3837_s13  }
  0x11   : > { %s3338_s25 = sshll.u32 (%p3903_p3), %s3845_s15, 4  ;;  %s3051_s26 = sshll.u32 (%p3903_p3), %s178_s24, 10 }
  0x12   : > { %s3925_s29 = scalar_lea.vmem (%p3903_p3), %s4799_s1, %s3338_s25  ;;  %s3930_s30 = scalar_lea.vmem (%p3903_p3), [#allocation4], %s3051_s26 }
  0x13   : > { %v199_v0 = vld [vmem:[%s3925_s29] sm:$0xff] (%p3903_p3)  ;;  %v201_v1 = vld [vmem:[%s3925_s29 + $0x8] sm:$0xff] (%p3903_p3) }
  0x14   : > { %v203_v2 = vld [vmem:[%s3925_s29 + $0x20] sm:$0xff] (%p3903_p3)  ;;  %200 = vst [vmem:[%s3930_s30] sm:$0xff] (%p3903_p3), %v199_v0  ;;  %202 = vst [vmem:[%s3930_s30 + $0x8] sm:$0xff] (%p3903_p3), %v201_v1  ;;  %v205_v3 = vld [vmem:[%s3925_s29 + $0x28] sm:$0xff] (%p3903_p3) }
  0x15   : > { %204 = vst [vmem:[%s3930_s30 + $0x10] sm:$0xff] %v203_v2  ;;  %v207_v4 = vld [vmem:[%s3925_s29 + $0x40] sm:$0xff]  ;;  %v209_v5 = vld [vmem:[%s3925_s29 + $0x48] sm:$0xff]  ;;  %206 = vst [vmem:[%s3930_s30 + $0x18] sm:$0xff] %v205_v3 }
  0x16   : > { %208 = vst [vmem:[%s3930_s30 + $0x20] sm:$0xff] %v207_v4  ;;  %210 = vst [vmem:[%s3930_s30 + $0x28] sm:$0xff] %v209_v5  ;;  %v211_v6 = vld [vmem:[%s3925_s29 + $0x60] sm:$0xff]  ;;  %v213_v7 = vld [vmem:[%s3925_s29 + $0x68] sm:$0xff] }
  0x17   : > { %v215_v8 = vld [vmem:[%s3925_s29 + $0x80] sm:$0xff]  ;;  %212 = vst [vmem:[%s3930_s30 + $0x30] sm:$0xff] %v211_v6  ;;  %214 = vst [vmem:[%s3930_s30 + $0x38] sm:$0xff] %v213_v7  ;;  %v217_v9 = vld [vmem:[%s3925_s29 + $0x88] sm:$0xff] }
  0x18   : > { %216 = vst [vmem:[%s3930_s30 + $0x40] sm:$0xff] %v215_v8  ;;  %v219_v10 = vld [vmem:[%s3925_s29 + $0xa0] sm:$0xff]  ;;  %v221_v11 = vld [vmem:[%s3925_s29 + $0xa8] sm:$0xff]  ;;  %218 = vst [vmem:[%s3930_s30 + $0x48] sm:$0xff] %v217_v9 }
  0x19   : > { %220 = vst [vmem:[%s3930_s30 + $0x50] sm:$0xff] %v219_v10  ;;  %222 = vst [vmem:[%s3930_s30 + $0x58] sm:$0xff] %v221_v11  ;;  %v223_v12 = vld [vmem:[%s3925_s29 + $0xc0] sm:$0xff]  ;;  %v225_v13 = vld [vmem:[%s3925_s29 + $0xc8] sm:$0xff] }
  0x1a   : > { %v227_v14 = vld [vmem:[%s3925_s29 + $0xe0] sm:$0xff]  ;;  %224 = vst [vmem:[%s3930_s30 + $0x60] sm:$0xff] %v223_v12  ;;  %226 = vst [vmem:[%s3930_s30 + $0x68] sm:$0xff] %v225_v13  ;;  %v229_v15 = vld [vmem:[%s3925_s29 + $0xe8] sm:$0xff] }
  0x1b   : > { %228 = vst [vmem:[%s3930_s30 + $0x70] sm:$0xff] %v227_v14  ;;  %v231_v16 = vld [vmem:[%s3925_s29 + $0x100] sm:$0xff]  ;;  %v233_v17 = vld [vmem:[%s3925_s29 + $0x108] sm:$0xff]  ;;  %230 = vst [vmem:[%s3930_s30 + $0x78] sm:$0xff] %v229_v15 }
  0x1c   : > { %232 = vst [vmem:[%s3930_s30 + $0x80] sm:$0xff] %v231_v16  ;;  %234 = vst [vmem:[%s3930_s30 + $0x88] sm:$0xff] %v233_v17  ;;  %v235_v18 = vld [vmem:[%s3925_s29 + $0x120] sm:$0xff]  ;;  %v237_v19 = vld [vmem:[%s3925_s29 + $0x128] sm:$0xff] }
  0x1d   : > { %v239_v20 = vld [vmem:[%s3925_s29 + $0x140] sm:$0xff]  ;;  %236 = vst [vmem:[%s3930_s30 + $0x90] sm:$0xff] %v235_v18  ;;  %238 = vst [vmem:[%s3930_s30 + $0x98] sm:$0xff] %v237_v19  ;;  %v241_v21 = vld [vmem:[%s3925_s29 + $0x148] sm:$0xff] }
  0x1e   : > { %240 = vst [vmem:[%s3930_s30 + $0xa0] sm:$0xff] %v239_v20  ;;  %v243_v22 = vld [vmem:[%s3925_s29 + $0x160] sm:$0xff]  ;;  %v245_v23 = vld [vmem:[%s3925_s29 + $0x168] sm:$0xff]  ;;  %242 = vst [vmem:[%s3930_s30 + $0xa8] sm:$0xff] %v241_v21 }
  0x1f   : > { %244 = vst [vmem:[%s3930_s30 + $0xb0] sm:$0xff] %v243_v22  ;;  %246 = vst [vmem:[%s3930_s30 + $0xb8] sm:$0xff] %v245_v23  ;;  %v247_v24 = vld [vmem:[%s3925_s29 + $0x180] sm:$0xff]  ;;  %v249_v25 = vld [vmem:[%s3925_s29 + $0x188] sm:$0xff] }
  0x20   : > { %v251_v26 = vld [vmem:[%s3925_s29 + $0x1a0] sm:$0xff]  ;;  %248 = vst [vmem:[%s3930_s30 + $0xc0] sm:$0xff] %v247_v24  ;;  %250 = vst [vmem:[%s3930_s30 + $0xc8] sm:$0xff] %v249_v25  ;;  %v253_v27 = vld [vmem:[%s3925_s29 + $0x1a8] sm:$0xff] }
  0x21   : > { %252 = vst [vmem:[%s3930_s30 + $0xd0] sm:$0xff] %v251_v26  ;;  %v255_v28 = vld [vmem:[%s3925_s29 + $0x1c0] sm:$0xff]  ;;  %v257_v29 = vld [vmem:[%s3925_s29 + $0x1c8] sm:$0xff]  ;;  %254 = vst [vmem:[%s3930_s30 + $0xd8] sm:$0xff] %v253_v27 }
  0x22   : > { %256 = vst [vmem:[%s3930_s30 + $0xe0] sm:$0xff] %v255_v28  ;;  %258 = vst [vmem:[%s3930_s30 + $0xe8] sm:$0xff] %v257_v29  ;;  %v259_v30 = vld [vmem:[%s3925_s29 + $0x1e0] sm:$0xff]  ;;  %v261_v31 = vld [vmem:[%s3925_s29 + $0x1e8] sm:$0xff] }
  0x23   : > { %v263_v32 = vld [vmem:[%s3925_s29 + $0x200] sm:$0xff]  ;;  %260 = vst [vmem:[%s3930_s30 + $0xf0] sm:$0xff] %v259_v30  ;;  %262 = vst [vmem:[%s3930_s30 + $0xf8] sm:$0xff] %v261_v31  ;;  %v265_v33 = vld [vmem:[%s3925_s29 + $0x208] sm:$0xff] }
  0x24   : > { %264 = vst [vmem:[%s3930_s30 + $0x100] sm:$0xff] %v263_v32  ;;  %v267_v34 = vld [vmem:[%s3925_s29 + $0x220] sm:$0xff]  ;;  %v269_v35 = vld [vmem:[%s3925_s29 + $0x228] sm:$0xff]  ;;  %266 = vst [vmem:[%s3930_s30 + $0x108] sm:$0xff] %v265_v33 }
  0x25   : > { %268 = vst [vmem:[%s3930_s30 + $0x110] sm:$0xff] %v267_v34  ;;  %270 = vst [vmem:[%s3930_s30 + $0x118] sm:$0xff] %v269_v35  ;;  %v271_v36 = vld [vmem:[%s3925_s29 + $0x240] sm:$0xff]  ;;  %v273_v37 = vld [vmem:[%s3925_s29 + $0x248] sm:$0xff] }
  0x26   : > { %v275_v38 = vld [vmem:[%s3925_s29 + $0x260] sm:$0xff]  ;;  %272 = vst [vmem:[%s3930_s30 + $0x120] sm:$0xff] %v271_v36  ;;  %274 = vst [vmem:[%s3930_s30 + $0x128] sm:$0xff] %v273_v37  ;;  %v277_v39 = vld [vmem:[%s3925_s29 + $0x268] sm:$0xff] }
  0x27   : > { %276 = vst [vmem:[%s3930_s30 + $0x130] sm:$0xff] %v275_v38  ;;  %v279_v40 = vld [vmem:[%s3925_s29 + $0x280] sm:$0xff]  ;;  %v281_v41 = vld [vmem:[%s3925_s29 + $0x288] sm:$0xff]  ;;  %278 = vst [vmem:[%s3930_s30 + $0x138] sm:$0xff] %v277_v39 }
  0x28   : > { %280 = vst [vmem:[%s3930_s30 + $0x140] sm:$0xff] %v279_v40  ;;  %282 = vst [vmem:[%s3930_s30 + $0x148] sm:$0xff] %v281_v41  ;;  %v283_v42 = vld [vmem:[%s3925_s29 + $0x2a0] sm:$0xff]  ;;  %v285_v43 = vld [vmem:[%s3925_s29 + $0x2a8] sm:$0xff] }
  0x29   : > { %v287_v44 = vld [vmem:[%s3925_s29 + $0x2c0] sm:$0xff]  ;;  %284 = vst [vmem:[%s3930_s30 + $0x150] sm:$0xff] %v283_v42  ;;  %286 = vst [vmem:[%s3930_s30 + $0x158] sm:$0xff] %v285_v43  ;;  %v289_v45 = vld [vmem:[%s3925_s29 + $0x2c8] sm:$0xff] }
  0x2a   : > { %288 = vst [vmem:[%s3930_s30 + $0x160] sm:$0xff] %v287_v44  ;;  %v291_v46 = vld [vmem:[%s3925_s29 + $0x2e0] sm:$0xff]  ;;  %v293_v47 = vld [vmem:[%s3925_s29 + $0x2e8] sm:$0xff]  ;;  %290 = vst [vmem:[%s3930_s30 + $0x168] sm:$0xff] %v289_v45 }
  0x2b   : > { %292 = vst [vmem:[%s3930_s30 + $0x170] sm:$0xff] %v291_v46  ;;  %294 = vst [vmem:[%s3930_s30 + $0x178] sm:$0xff] %v293_v47  ;;  %v295_v48 = vld [vmem:[%s3925_s29 + $0x300] sm:$0xff]  ;;  %v297_v49 = vld [vmem:[%s3925_s29 + $0x308] sm:$0xff] }
  0x2c   : > { %v299_v50 = vld [vmem:[%s3925_s29 + $0x320] sm:$0xff]  ;;  %296 = vst [vmem:[%s3930_s30 + $0x180] sm:$0xff] %v295_v48  ;;  %298 = vst [vmem:[%s3930_s30 + $0x188] sm:$0xff] %v297_v49  ;;  %v301_v51 = vld [vmem:[%s3925_s29 + $0x328] sm:$0xff] }
  0x2d   : > { %300 = vst [vmem:[%s3930_s30 + $0x190] sm:$0xff] %v299_v50  ;;  %v303_v52 = vld [vmem:[%s3925_s29 + $0x340] sm:$0xff]  ;;  %v305_v53 = vld [vmem:[%s3925_s29 + $0x348] sm:$0xff]  ;;  %302 = vst [vmem:[%s3930_s30 + $0x198] sm:$0xff] %v301_v51 }
  0x2e   : > { %304 = vst [vmem:[%s3930_s30 + $0x1a0] sm:$0xff] %v303_v52  ;;  %306 = vst [vmem:[%s3930_s30 + $0x1a8] sm:$0xff] %v305_v53  ;;  %v307_v54 = vld [vmem:[%s3925_s29 + $0x360] sm:$0xff]  ;;  %v309_v55 = vld [vmem:[%s3925_s29 + $0x368] sm:$0xff] }
  0x2f   : > { %v311_v56 = vld [vmem:[%s3925_s29 + $0x380] sm:$0xff]  ;;  %308 = vst [vmem:[%s3930_s30 + $0x1b0] sm:$0xff] %v307_v54  ;;  %310 = vst [vmem:[%s3930_s30 + $0x1b8] sm:$0xff] %v309_v55  ;;  %v313_v57 = vld [vmem:[%s3925_s29 + $0x388] sm:$0xff] }
  0x30   : > { %312 = vst [vmem:[%s3930_s30 + $0x1c0] sm:$0xff] %v311_v56  ;;  %v315_v58 = vld [vmem:[%s3925_s29 + $0x3a0] sm:$0xff]  ;;  %v317_v59 = vld [vmem:[%s3925_s29 + $0x3a8] sm:$0xff]  ;;  %314 = vst [vmem:[%s3930_s30 + $0x1c8] sm:$0xff] %v313_v57 }
  0x31   : > { %316 = vst [vmem:[%s3930_s30 + $0x1d0] sm:$0xff] %v315_v58  ;;  %318 = vst [vmem:[%s3930_s30 + $0x1d8] sm:$0xff] %v317_v59  ;;  %v319_v60 = vld [vmem:[%s3925_s29 + $0x3c0] sm:$0xff]  ;;  %v321_v61 = vld [vmem:[%s3925_s29 + $0x3c8] sm:$0xff] }
  0x32   : > { %v323_v62 = vld [vmem:[%s3925_s29 + $0x3e0] sm:$0xff]  ;;  %320 = vst [vmem:[%s3930_s30 + $0x1e0] sm:$0xff] %v319_v60  ;;  %322 = vst [vmem:[%s3930_s30 + $0x1e8] sm:$0xff] %v321_v61  ;;  %v325_v63 = vld [vmem:[%s3925_s29 + $0x3e8] sm:$0xff] }
  0x33   : > { %324 = vst [vmem:[%s3930_s30 + $0x1f0] sm:$0xff] %v323_v62  ;;  %v327_v0 = vld [vmem:[%s3925_s29 + $0x400] sm:$0xff]  ;;  %v329_v1 = vld [vmem:[%s3925_s29 + $0x408] sm:$0xff]  ;;  %326 = vst [vmem:[%s3930_s30 + $0x1f8] sm:$0xff] %v325_v63 }
  0x34   : > { %328 = vst [vmem:[%s3930_s30 + $0x200] sm:$0xff] %v327_v0  ;;  %330 = vst [vmem:[%s3930_s30 + $0x208] sm:$0xff] %v329_v1  ;;  %v331_v2 = vld [vmem:[%s3925_s29 + $0x420] sm:$0xff]  ;;  %v333_v3 = vld [vmem:[%s3925_s29 + $0x428] sm:$0xff] }
  0x35   : > { %v335_v4 = vld [vmem:[%s3925_s29 + $0x440] sm:$0xff]  ;;  %332 = vst [vmem:[%s3930_s30 + $0x210] sm:$0xff] %v331_v2  ;;  %334 = vst [vmem:[%s3930_s30 + $0x218] sm:$0xff] %v333_v3  ;;  %v337_v5 = vld [vmem:[%s3925_s29 + $0x448] sm:$0xff] }
  0x36   : > { %336 = vst [vmem:[%s3930_s30 + $0x220] sm:$0xff] %v335_v4  ;;  %v339_v6 = vld [vmem:[%s3925_s29 + $0x460] sm:$0xff]  ;;  %v341_v7 = vld [vmem:[%s3925_s29 + $0x468] sm:$0xff]  ;;  %338 = vst [vmem:[%s3930_s30 + $0x228] sm:$0xff] %v337_v5 }
  0x37   : > { %340 = vst [vmem:[%s3930_s30 + $0x230] sm:$0xff] %v339_v6  ;;  %342 = vst [vmem:[%s3930_s30 + $0x238] sm:$0xff] %v341_v7  ;;  %v343_v8 = vld [vmem:[%s3925_s29 + $0x480] sm:$0xff]  ;;  %v345_v9 = vld [vmem:[%s3925_s29 + $0x488] sm:$0xff] }
  0x38   : > { %v347_v10 = vld [vmem:[%s3925_s29 + $0x4a0] sm:$0xff]  ;;  %344 = vst [vmem:[%s3930_s30 + $0x240] sm:$0xff] %v343_v8  ;;  %346 = vst [vmem:[%s3930_s30 + $0x248] sm:$0xff] %v345_v9  ;;  %v349_v11 = vld [vmem:[%s3925_s29 + $0x4a8] sm:$0xff] }
  0x39   : > { %348 = vst [vmem:[%s3930_s30 + $0x250] sm:$0xff] %v347_v10  ;;  %v351_v12 = vld [vmem:[%s3925_s29 + $0x4c0] sm:$0xff]  ;;  %v353_v13 = vld [vmem:[%s3925_s29 + $0x4c8] sm:$0xff]  ;;  %350 = vst [vmem:[%s3930_s30 + $0x258] sm:$0xff] %v349_v11 }
  0x3a   : > { %352 = vst [vmem:[%s3930_s30 + $0x260] sm:$0xff] %v351_v12  ;;  %354 = vst [vmem:[%s3930_s30 + $0x268] sm:$0xff] %v353_v13  ;;  %v355_v14 = vld [vmem:[%s3925_s29 + $0x4e0] sm:$0xff]  ;;  %v357_v15 = vld [vmem:[%s3925_s29 + $0x4e8] sm:$0xff] }
  0x3b   : > { %v359_v16 = vld [vmem:[%s3925_s29 + $0x500] sm:$0xff]  ;;  %356 = vst [vmem:[%s3930_s30 + $0x270] sm:$0xff] %v355_v14  ;;  %358 = vst [vmem:[%s3930_s30 + $0x278] sm:$0xff] %v357_v15  ;;  %v361_v17 = vld [vmem:[%s3925_s29 + $0x508] sm:$0xff] }
  0x3c   : > { %360 = vst [vmem:[%s3930_s30 + $0x280] sm:$0xff] %v359_v16  ;;  %v363_v18 = vld [vmem:[%s3925_s29 + $0x520] sm:$0xff]  ;;  %v365_v19 = vld [vmem:[%s3925_s29 + $0x528] sm:$0xff]  ;;  %362 = vst [vmem:[%s3930_s30 + $0x288] sm:$0xff] %v361_v17 }
  0x3d   : > { %364 = vst [vmem:[%s3930_s30 + $0x290] sm:$0xff] %v363_v18  ;;  %366 = vst [vmem:[%s3930_s30 + $0x298] sm:$0xff] %v365_v19  ;;  %v367_v20 = vld [vmem:[%s3925_s29 + $0x540] sm:$0xff]  ;;  %v369_v21 = vld [vmem:[%s3925_s29 + $0x548] sm:$0xff] }
  0x3e   : > { %v371_v22 = vld [vmem:[%s3925_s29 + $0x560] sm:$0xff]  ;;  %368 = vst [vmem:[%s3930_s30 + $0x2a0] sm:$0xff] %v367_v20  ;;  %370 = vst [vmem:[%s3930_s30 + $0x2a8] sm:$0xff] %v369_v21  ;;  %v373_v23 = vld [vmem:[%s3925_s29 + $0x568] sm:$0xff] }
  0x3f   : > { %372 = vst [vmem:[%s3930_s30 + $0x2b0] sm:$0xff] %v371_v22  ;;  %v375_v24 = vld [vmem:[%s3925_s29 + $0x580] sm:$0xff]  ;;  %v377_v25 = vld [vmem:[%s3925_s29 + $0x588] sm:$0xff]  ;;  %374 = vst [vmem:[%s3930_s30 + $0x2b8] sm:$0xff] %v373_v23 }
  0x40   : > { %376 = vst [vmem:[%s3930_s30 + $0x2c0] sm:$0xff] %v375_v24  ;;  %378 = vst [vmem:[%s3930_s30 + $0x2c8] sm:$0xff] %v377_v25  ;;  %v379_v26 = vld [vmem:[%s3925_s29 + $0x5a0] sm:$0xff]  ;;  %v381_v27 = vld [vmem:[%s3925_s29 + $0x5a8] sm:$0xff] }
  0x41   : > { %v383_v28 = vld [vmem:[%s3925_s29 + $0x5c0] sm:$0xff]  ;;  %380 = vst [vmem:[%s3930_s30 + $0x2d0] sm:$0xff] %v379_v26  ;;  %382 = vst [vmem:[%s3930_s30 + $0x2d8] sm:$0xff] %v381_v27  ;;  %v385_v29 = vld [vmem:[%s3925_s29 + $0x5c8] sm:$0xff] }
  0x42   : > { %384 = vst [vmem:[%s3930_s30 + $0x2e0] sm:$0xff] %v383_v28  ;;  %v387_v30 = vld [vmem:[%s3925_s29 + $0x5e0] sm:$0xff]  ;;  %v389_v31 = vld [vmem:[%s3925_s29 + $0x5e8] sm:$0xff]  ;;  %386 = vst [vmem:[%s3930_s30 + $0x2e8] sm:$0xff] %v385_v29 }
  0x43   : > { %388 = vst [vmem:[%s3930_s30 + $0x2f0] sm:$0xff] %v387_v30  ;;  %390 = vst [vmem:[%s3930_s30 + $0x2f8] sm:$0xff] %v389_v31  ;;  %v391_v32 = vld [vmem:[%s3925_s29 + $0x600] sm:$0xff]  ;;  %v393_v33 = vld [vmem:[%s3925_s29 + $0x608] sm:$0xff] }
  0x44   : > { %v395_v34 = vld [vmem:[%s3925_s29 + $0x620] sm:$0xff]  ;;  %392 = vst [vmem:[%s3930_s30 + $0x300] sm:$0xff] %v391_v32  ;;  %394 = vst [vmem:[%s3930_s30 + $0x308] sm:$0xff] %v393_v33  ;;  %v397_v35 = vld [vmem:[%s3925_s29 + $0x628] sm:$0xff] }
  0x45   : > { %396 = vst [vmem:[%s3930_s30 + $0x310] sm:$0xff] %v395_v34  ;;  %v399_v36 = vld [vmem:[%s3925_s29 + $0x640] sm:$0xff]  ;;  %v401_v37 = vld [vmem:[%s3925_s29 + $0x648] sm:$0xff]  ;;  %398 = vst [vmem:[%s3930_s30 + $0x318] sm:$0xff] %v397_v35 }
  0x46   : > { %400 = vst [vmem:[%s3930_s30 + $0x320] sm:$0xff] %v399_v36  ;;  %402 = vst [vmem:[%s3930_s30 + $0x328] sm:$0xff] %v401_v37  ;;  %v403_v38 = vld [vmem:[%s3925_s29 + $0x660] sm:$0xff]  ;;  %v405_v39 = vld [vmem:[%s3925_s29 + $0x668] sm:$0xff] }
  0x47   : > { %v407_v40 = vld [vmem:[%s3925_s29 + $0x680] sm:$0xff]  ;;  %404 = vst [vmem:[%s3930_s30 + $0x330] sm:$0xff] %v403_v38  ;;  %406 = vst [vmem:[%s3930_s30 + $0x338] sm:$0xff] %v405_v39  ;;  %v409_v41 = vld [vmem:[%s3925_s29 + $0x688] sm:$0xff] }
  0x48   : > { %408 = vst [vmem:[%s3930_s30 + $0x340] sm:$0xff] %v407_v40  ;;  %v411_v42 = vld [vmem:[%s3925_s29 + $0x6a0] sm:$0xff]  ;;  %v413_v43 = vld [vmem:[%s3925_s29 + $0x6a8] sm:$0xff]  ;;  %410 = vst [vmem:[%s3930_s30 + $0x348] sm:$0xff] %v409_v41 }
  0x49   : > { %412 = vst [vmem:[%s3930_s30 + $0x350] sm:$0xff] %v411_v42  ;;  %414 = vst [vmem:[%s3930_s30 + $0x358] sm:$0xff] %v413_v43  ;;  %v415_v44 = vld [vmem:[%s3925_s29 + $0x6c0] sm:$0xff]  ;;  %v417_v45 = vld [vmem:[%s3925_s29 + $0x6c8] sm:$0xff] }
  0x4a   : > { %v419_v46 = vld [vmem:[%s3925_s29 + $0x6e0] sm:$0xff]  ;;  %416 = vst [vmem:[%s3930_s30 + $0x360] sm:$0xff] %v415_v44  ;;  %418 = vst [vmem:[%s3930_s30 + $0x368] sm:$0xff] %v417_v45  ;;  %v421_v47 = vld [vmem:[%s3925_s29 + $0x6e8] sm:$0xff] }
  0x4b   : > { %420 = vst [vmem:[%s3930_s30 + $0x370] sm:$0xff] %v419_v46  ;;  %v423_v48 = vld [vmem:[%s3925_s29 + $0x700] sm:$0xff]  ;;  %v425_v49 = vld [vmem:[%s3925_s29 + $0x708] sm:$0xff]  ;;  %422 = vst [vmem:[%s3930_s30 + $0x378] sm:$0xff] %v421_v47 }
  0x4c   : > { %424 = vst [vmem:[%s3930_s30 + $0x380] sm:$0xff] %v423_v48  ;;  %426 = vst [vmem:[%s3930_s30 + $0x388] sm:$0xff] %v425_v49  ;;  %v427_v50 = vld [vmem:[%s3925_s29 + $0x720] sm:$0xff]  ;;  %v429_v51 = vld [vmem:[%s3925_s29 + $0x728] sm:$0xff] }
  0x4d   : > { %v431_v52 = vld [vmem:[%s3925_s29 + $0x740] sm:$0xff]  ;;  %428 = vst [vmem:[%s3930_s30 + $0x390] sm:$0xff] %v427_v50  ;;  %430 = vst [vmem:[%s3930_s30 + $0x398] sm:$0xff] %v429_v51  ;;  %v433_v53 = vld [vmem:[%s3925_s29 + $0x748] sm:$0xff] }
  0x4e   : > { %432 = vst [vmem:[%s3930_s30 + $0x3a0] sm:$0xff] %v431_v52  ;;  %v435_v54 = vld [vmem:[%s3925_s29 + $0x760] sm:$0xff]  ;;  %v437_v55 = vld [vmem:[%s3925_s29 + $0x768] sm:$0xff]  ;;  %434 = vst [vmem:[%s3930_s30 + $0x3a8] sm:$0xff] %v433_v53 }
  0x4f   : > { %436 = vst [vmem:[%s3930_s30 + $0x3b0] sm:$0xff] %v435_v54  ;;  %438 = vst [vmem:[%s3930_s30 + $0x3b8] sm:$0xff] %v437_v55  ;;  %v439_v56 = vld [vmem:[%s3925_s29 + $0x780] sm:$0xff]  ;;  %v441_v57 = vld [vmem:[%s3925_s29 + $0x788] sm:$0xff] }
  0x50   : > { %v443_v58 = vld [vmem:[%s3925_s29 + $0x7a0] sm:$0xff]  ;;  %440 = vst [vmem:[%s3930_s30 + $0x3c0] sm:$0xff] %v439_v56  ;;  %442 = vst [vmem:[%s3930_s30 + $0x3c8] sm:$0xff] %v441_v57  ;;  %v445_v59 = vld [vmem:[%s3925_s29 + $0x7a8] sm:$0xff] }
  0x51   : > { %444 = vst [vmem:[%s3930_s30 + $0x3d0] sm:$0xff] %v443_v58  ;;  %v447_v60 = vld [vmem:[%s3925_s29 + $0x7c0] sm:$0xff]  ;;  %v449_v61 = vld [vmem:[%s3925_s29 + $0x7c8] sm:$0xff]  ;;  %446 = vst [vmem:[%s3930_s30 + $0x3d8] sm:$0xff] %v445_v59 }
  0x52   : > { %448 = vst [vmem:[%s3930_s30 + $0x3e0] sm:$0xff] %v447_v60  ;;  %450 = vst [vmem:[%s3930_s30 + $0x3e8] sm:$0xff] %v449_v61  ;;  %v451_v62 = vld [vmem:[%s3925_s29 + $0x7e0] sm:$0xff]  ;;  %v453_v63 = vld [vmem:[%s3925_s29 + $0x7e8] sm:$0xff] }
  0x53   : > { %452 = vst [vmem:[%s3930_s30 + $0x3f0] sm:$0xff] %v451_v62  ;;  %454 = vst [vmem:[%s3930_s30 + $0x3f8] sm:$0xff] %v453_v63 }
  0x54 PF: > { %460 = sbr.rel (!%p3903_p3) target bundleno = 152 (0x98), region = 47  ;;  %s462_s4 = sand.u32 (%p3903_p3), 1, %s3837_s13  }
  0x55   : > { %s3339_s5 = sshll.u32 (%p3903_p3), %s3845_s15, 4  ;;  %s3054_s6 = sshll.u32 (%p3903_p3), %s462_s4, 10 }
  0x56   : > { %s4192_s9 = scalar_lea.vmem (%p3903_p3), %s4800_s2, %s3339_s5  ;;  %s4197_s10 = scalar_lea.vmem (%p3903_p3), [#allocation5], %s3054_s6 }
  0x57   : > { %v483_v0 = vld [vmem:[%s4192_s9] sm:$0xff] (%p3903_p3)  ;;  %v485_v1 = vld [vmem:[%s4192_s9 + $0x8] sm:$0xff] (%p3903_p3) }
  0x58   : > { %v487_v2 = vld [vmem:[%s4192_s9 + $0x20] sm:$0xff] (%p3903_p3)  ;;  %484 = vst [vmem:[%s4197_s10] sm:$0xff] (%p3903_p3), %v483_v0  ;;  %486 = vst [vmem:[%s4197_s10 + $0x8] sm:$0xff] (%p3903_p3), %v485_v1  ;;  %v489_v3 = vld [vmem:[%s4192_s9 + $0x28] sm:$0xff] (%p3903_p3) }
  0x59   : > { %488 = vst [vmem:[%s4197_s10 + $0x10] sm:$0xff] %v487_v2  ;;  %v491_v4 = vld [vmem:[%s4192_s9 + $0x40] sm:$0xff]  ;;  %v493_v5 = vld [vmem:[%s4192_s9 + $0x48] sm:$0xff]  ;;  %490 = vst [vmem:[%s4197_s10 + $0x18] sm:$0xff] %v489_v3 }
  0x5a   : > { %492 = vst [vmem:[%s4197_s10 + $0x20] sm:$0xff] %v491_v4  ;;  %494 = vst [vmem:[%s4197_s10 + $0x28] sm:$0xff] %v493_v5  ;;  %v495_v6 = vld [vmem:[%s4192_s9 + $0x60] sm:$0xff]  ;;  %v497_v7 = vld [vmem:[%s4192_s9 + $0x68] sm:$0xff] }
  0x5b   : > { %v499_v8 = vld [vmem:[%s4192_s9 + $0x80] sm:$0xff]  ;;  %496 = vst [vmem:[%s4197_s10 + $0x30] sm:$0xff] %v495_v6  ;;  %498 = vst [vmem:[%s4197_s10 + $0x38] sm:$0xff] %v497_v7  ;;  %v501_v9 = vld [vmem:[%s4192_s9 + $0x88] sm:$0xff] }
  0x5c   : > { %500 = vst [vmem:[%s4197_s10 + $0x40] sm:$0xff] %v499_v8  ;;  %v503_v10 = vld [vmem:[%s4192_s9 + $0xa0] sm:$0xff]  ;;  %v505_v11 = vld [vmem:[%s4192_s9 + $0xa8] sm:$0xff]  ;;  %502 = vst [vmem:[%s4197_s10 + $0x48] sm:$0xff] %v501_v9 }
  0x5d   : > { %504 = vst [vmem:[%s4197_s10 + $0x50] sm:$0xff] %v503_v10  ;;  %506 = vst [vmem:[%s4197_s10 + $0x58] sm:$0xff] %v505_v11  ;;  %v507_v12 = vld [vmem:[%s4192_s9 + $0xc0] sm:$0xff]  ;;  %v509_v13 = vld [vmem:[%s4192_s9 + $0xc8] sm:$0xff] }
  0x5e   : > { %v511_v14 = vld [vmem:[%s4192_s9 + $0xe0] sm:$0xff]  ;;  %508 = vst [vmem:[%s4197_s10 + $0x60] sm:$0xff] %v507_v12  ;;  %510 = vst [vmem:[%s4197_s10 + $0x68] sm:$0xff] %v509_v13  ;;  %v513_v15 = vld [vmem:[%s4192_s9 + $0xe8] sm:$0xff] }
  0x5f   : > { %512 = vst [vmem:[%s4197_s10 + $0x70] sm:$0xff] %v511_v14  ;;  %v515_v16 = vld [vmem:[%s4192_s9 + $0x100] sm:$0xff]  ;;  %v517_v17 = vld [vmem:[%s4192_s9 + $0x108] sm:$0xff]  ;;  %514 = vst [vmem:[%s4197_s10 + $0x78] sm:$0xff] %v513_v15 }
  0x60   : > { %516 = vst [vmem:[%s4197_s10 + $0x80] sm:$0xff] %v515_v16  ;;  %518 = vst [vmem:[%s4197_s10 + $0x88] sm:$0xff] %v517_v17  ;;  %v519_v18 = vld [vmem:[%s4192_s9 + $0x120] sm:$0xff]  ;;  %v521_v19 = vld [vmem:[%s4192_s9 + $0x128] sm:$0xff] }
  0x61   : > { %v523_v20 = vld [vmem:[%s4192_s9 + $0x140] sm:$0xff]  ;;  %520 = vst [vmem:[%s4197_s10 + $0x90] sm:$0xff] %v519_v18  ;;  %522 = vst [vmem:[%s4197_s10 + $0x98] sm:$0xff] %v521_v19  ;;  %v525_v21 = vld [vmem:[%s4192_s9 + $0x148] sm:$0xff] }
  0x62   : > { %524 = vst [vmem:[%s4197_s10 + $0xa0] sm:$0xff] %v523_v20  ;;  %v527_v22 = vld [vmem:[%s4192_s9 + $0x160] sm:$0xff]  ;;  %v529_v23 = vld [vmem:[%s4192_s9 + $0x168] sm:$0xff]  ;;  %526 = vst [vmem:[%s4197_s10 + $0xa8] sm:$0xff] %v525_v21 }
  0x63   : > { %528 = vst [vmem:[%s4197_s10 + $0xb0] sm:$0xff] %v527_v22  ;;  %530 = vst [vmem:[%s4197_s10 + $0xb8] sm:$0xff] %v529_v23  ;;  %v531_v24 = vld [vmem:[%s4192_s9 + $0x180] sm:$0xff]  ;;  %v533_v25 = vld [vmem:[%s4192_s9 + $0x188] sm:$0xff] }
  0x64   : > { %v535_v26 = vld [vmem:[%s4192_s9 + $0x1a0] sm:$0xff]  ;;  %532 = vst [vmem:[%s4197_s10 + $0xc0] sm:$0xff] %v531_v24  ;;  %534 = vst [vmem:[%s4197_s10 + $0xc8] sm:$0xff] %v533_v25  ;;  %v537_v27 = vld [vmem:[%s4192_s9 + $0x1a8] sm:$0xff] }
  0x65   : > { %536 = vst [vmem:[%s4197_s10 + $0xd0] sm:$0xff] %v535_v26  ;;  %v539_v28 = vld [vmem:[%s4192_s9 + $0x1c0] sm:$0xff]  ;;  %v541_v29 = vld [vmem:[%s4192_s9 + $0x1c8] sm:$0xff]  ;;  %538 = vst [vmem:[%s4197_s10 + $0xd8] sm:$0xff] %v537_v27 }
  0x66   : > { %540 = vst [vmem:[%s4197_s10 + $0xe0] sm:$0xff] %v539_v28  ;;  %542 = vst [vmem:[%s4197_s10 + $0xe8] sm:$0xff] %v541_v29  ;;  %v543_v30 = vld [vmem:[%s4192_s9 + $0x1e0] sm:$0xff]  ;;  %v545_v31 = vld [vmem:[%s4192_s9 + $0x1e8] sm:$0xff] }
  0x67   : > { %v547_v32 = vld [vmem:[%s4192_s9 + $0x200] sm:$0xff]  ;;  %544 = vst [vmem:[%s4197_s10 + $0xf0] sm:$0xff] %v543_v30  ;;  %546 = vst [vmem:[%s4197_s10 + $0xf8] sm:$0xff] %v545_v31  ;;  %v549_v33 = vld [vmem:[%s4192_s9 + $0x208] sm:$0xff] }
  0x68   : > { %548 = vst [vmem:[%s4197_s10 + $0x100] sm:$0xff] %v547_v32  ;;  %v551_v34 = vld [vmem:[%s4192_s9 + $0x220] sm:$0xff]  ;;  %v553_v35 = vld [vmem:[%s4192_s9 + $0x228] sm:$0xff]  ;;  %550 = vst [vmem:[%s4197_s10 + $0x108] sm:$0xff] %v549_v33 }
  0x69   : > { %552 = vst [vmem:[%s4197_s10 + $0x110] sm:$0xff] %v551_v34  ;;  %554 = vst [vmem:[%s4197_s10 + $0x118] sm:$0xff] %v553_v35  ;;  %v555_v36 = vld [vmem:[%s4192_s9 + $0x240] sm:$0xff]  ;;  %v557_v37 = vld [vmem:[%s4192_s9 + $0x248] sm:$0xff] }
  0x6a   : > { %v559_v38 = vld [vmem:[%s4192_s9 + $0x260] sm:$0xff]  ;;  %556 = vst [vmem:[%s4197_s10 + $0x120] sm:$0xff] %v555_v36  ;;  %558 = vst [vmem:[%s4197_s10 + $0x128] sm:$0xff] %v557_v37  ;;  %v561_v39 = vld [vmem:[%s4192_s9 + $0x268] sm:$0xff] }
  0x6b   : > { %560 = vst [vmem:[%s4197_s10 + $0x130] sm:$0xff] %v559_v38  ;;  %v563_v40 = vld [vmem:[%s4192_s9 + $0x280] sm:$0xff]  ;;  %v565_v41 = vld [vmem:[%s4192_s9 + $0x288] sm:$0xff]  ;;  %562 = vst [vmem:[%s4197_s10 + $0x138] sm:$0xff] %v561_v39 }
  0x6c   : > { %564 = vst [vmem:[%s4197_s10 + $0x140] sm:$0xff] %v563_v40  ;;  %566 = vst [vmem:[%s4197_s10 + $0x148] sm:$0xff] %v565_v41  ;;  %v567_v42 = vld [vmem:[%s4192_s9 + $0x2a0] sm:$0xff]  ;;  %v569_v43 = vld [vmem:[%s4192_s9 + $0x2a8] sm:$0xff] }
  0x6d   : > { %v571_v44 = vld [vmem:[%s4192_s9 + $0x2c0] sm:$0xff]  ;;  %568 = vst [vmem:[%s4197_s10 + $0x150] sm:$0xff] %v567_v42  ;;  %570 = vst [vmem:[%s4197_s10 + $0x158] sm:$0xff] %v569_v43  ;;  %v573_v45 = vld [vmem:[%s4192_s9 + $0x2c8] sm:$0xff] }
  0x6e   : > { %572 = vst [vmem:[%s4197_s10 + $0x160] sm:$0xff] %v571_v44  ;;  %v575_v46 = vld [vmem:[%s4192_s9 + $0x2e0] sm:$0xff]  ;;  %v577_v47 = vld [vmem:[%s4192_s9 + $0x2e8] sm:$0xff]  ;;  %574 = vst [vmem:[%s4197_s10 + $0x168] sm:$0xff] %v573_v45 }
  0x6f   : > { %576 = vst [vmem:[%s4197_s10 + $0x170] sm:$0xff] %v575_v46  ;;  %578 = vst [vmem:[%s4197_s10 + $0x178] sm:$0xff] %v577_v47  ;;  %v579_v48 = vld [vmem:[%s4192_s9 + $0x300] sm:$0xff]  ;;  %v581_v49 = vld [vmem:[%s4192_s9 + $0x308] sm:$0xff] }
  0x70   : > { %v583_v50 = vld [vmem:[%s4192_s9 + $0x320] sm:$0xff]  ;;  %580 = vst [vmem:[%s4197_s10 + $0x180] sm:$0xff] %v579_v48  ;;  %582 = vst [vmem:[%s4197_s10 + $0x188] sm:$0xff] %v581_v49  ;;  %v585_v51 = vld [vmem:[%s4192_s9 + $0x328] sm:$0xff] }
  0x71   : > { %584 = vst [vmem:[%s4197_s10 + $0x190] sm:$0xff] %v583_v50  ;;  %v587_v52 = vld [vmem:[%s4192_s9 + $0x340] sm:$0xff]  ;;  %v589_v53 = vld [vmem:[%s4192_s9 + $0x348] sm:$0xff]  ;;  %586 = vst [vmem:[%s4197_s10 + $0x198] sm:$0xff] %v585_v51 }
  0x72   : > { %588 = vst [vmem:[%s4197_s10 + $0x1a0] sm:$0xff] %v587_v52  ;;  %590 = vst [vmem:[%s4197_s10 + $0x1a8] sm:$0xff] %v589_v53  ;;  %v591_v54 = vld [vmem:[%s4192_s9 + $0x360] sm:$0xff]  ;;  %v593_v55 = vld [vmem:[%s4192_s9 + $0x368] sm:$0xff] }
  0x73   : > { %v595_v56 = vld [vmem:[%s4192_s9 + $0x380] sm:$0xff]  ;;  %592 = vst [vmem:[%s4197_s10 + $0x1b0] sm:$0xff] %v591_v54  ;;  %594 = vst [vmem:[%s4197_s10 + $0x1b8] sm:$0xff] %v593_v55  ;;  %v597_v57 = vld [vmem:[%s4192_s9 + $0x388] sm:$0xff] }
  0x74   : > { %596 = vst [vmem:[%s4197_s10 + $0x1c0] sm:$0xff] %v595_v56  ;;  %v599_v58 = vld [vmem:[%s4192_s9 + $0x3a0] sm:$0xff]  ;;  %v601_v59 = vld [vmem:[%s4192_s9 + $0x3a8] sm:$0xff]  ;;  %598 = vst [vmem:[%s4197_s10 + $0x1c8] sm:$0xff] %v597_v57 }
  0x75   : > { %600 = vst [vmem:[%s4197_s10 + $0x1d0] sm:$0xff] %v599_v58  ;;  %602 = vst [vmem:[%s4197_s10 + $0x1d8] sm:$0xff] %v601_v59  ;;  %v603_v60 = vld [vmem:[%s4192_s9 + $0x3c0] sm:$0xff]  ;;  %v605_v61 = vld [vmem:[%s4192_s9 + $0x3c8] sm:$0xff] }
  0x76   : > { %v607_v62 = vld [vmem:[%s4192_s9 + $0x3e0] sm:$0xff]  ;;  %604 = vst [vmem:[%s4197_s10 + $0x1e0] sm:$0xff] %v603_v60  ;;  %606 = vst [vmem:[%s4197_s10 + $0x1e8] sm:$0xff] %v605_v61  ;;  %v609_v63 = vld [vmem:[%s4192_s9 + $0x3e8] sm:$0xff] }
  0x77   : > { %608 = vst [vmem:[%s4197_s10 + $0x1f0] sm:$0xff] %v607_v62  ;;  %v611_v0 = vld [vmem:[%s4192_s9 + $0x400] sm:$0xff]  ;;  %v613_v1 = vld [vmem:[%s4192_s9 + $0x408] sm:$0xff]  ;;  %610 = vst [vmem:[%s4197_s10 + $0x1f8] sm:$0xff] %v609_v63 }
  0x78   : > { %612 = vst [vmem:[%s4197_s10 + $0x200] sm:$0xff] %v611_v0  ;;  %614 = vst [vmem:[%s4197_s10 + $0x208] sm:$0xff] %v613_v1  ;;  %v615_v2 = vld [vmem:[%s4192_s9 + $0x420] sm:$0xff]  ;;  %v617_v3 = vld [vmem:[%s4192_s9 + $0x428] sm:$0xff] }
  0x79   : > { %v619_v4 = vld [vmem:[%s4192_s9 + $0x440] sm:$0xff]  ;;  %616 = vst [vmem:[%s4197_s10 + $0x210] sm:$0xff] %v615_v2  ;;  %618 = vst [vmem:[%s4197_s10 + $0x218] sm:$0xff] %v617_v3  ;;  %v621_v5 = vld [vmem:[%s4192_s9 + $0x448] sm:$0xff] }
  0x7a   : > { %620 = vst [vmem:[%s4197_s10 + $0x220] sm:$0xff] %v619_v4  ;;  %v623_v6 = vld [vmem:[%s4192_s9 + $0x460] sm:$0xff]  ;;  %v625_v7 = vld [vmem:[%s4192_s9 + $0x468] sm:$0xff]  ;;  %622 = vst [vmem:[%s4197_s10 + $0x228] sm:$0xff] %v621_v5 }
  0x7b   : > { %624 = vst [vmem:[%s4197_s10 + $0x230] sm:$0xff] %v623_v6  ;;  %626 = vst [vmem:[%s4197_s10 + $0x238] sm:$0xff] %v625_v7  ;;  %v627_v8 = vld [vmem:[%s4192_s9 + $0x480] sm:$0xff]  ;;  %v629_v9 = vld [vmem:[%s4192_s9 + $0x488] sm:$0xff] }
  0x7c   : > { %v631_v10 = vld [vmem:[%s4192_s9 + $0x4a0] sm:$0xff]  ;;  %628 = vst [vmem:[%s4197_s10 + $0x240] sm:$0xff] %v627_v8  ;;  %630 = vst [vmem:[%s4197_s10 + $0x248] sm:$0xff] %v629_v9  ;;  %v633_v11 = vld [vmem:[%s4192_s9 + $0x4a8] sm:$0xff] }
  0x7d   : > { %632 = vst [vmem:[%s4197_s10 + $0x250] sm:$0xff] %v631_v10  ;;  %v635_v12 = vld [vmem:[%s4192_s9 + $0x4c0] sm:$0xff]  ;;  %v637_v13 = vld [vmem:[%s4192_s9 + $0x4c8] sm:$0xff]  ;;  %634 = vst [vmem:[%s4197_s10 + $0x258] sm:$0xff] %v633_v11 }
  0x7e   : > { %636 = vst [vmem:[%s4197_s10 + $0x260] sm:$0xff] %v635_v12  ;;  %638 = vst [vmem:[%s4197_s10 + $0x268] sm:$0xff] %v637_v13  ;;  %v639_v14 = vld [vmem:[%s4192_s9 + $0x4e0] sm:$0xff]  ;;  %v641_v15 = vld [vmem:[%s4192_s9 + $0x4e8] sm:$0xff] }
  0x7f   : > { %v643_v16 = vld [vmem:[%s4192_s9 + $0x500] sm:$0xff]  ;;  %640 = vst [vmem:[%s4197_s10 + $0x270] sm:$0xff] %v639_v14  ;;  %642 = vst [vmem:[%s4197_s10 + $0x278] sm:$0xff] %v641_v15  ;;  %v645_v17 = vld [vmem:[%s4192_s9 + $0x508] sm:$0xff] }
  0x80   : > { %644 = vst [vmem:[%s4197_s10 + $0x280] sm:$0xff] %v643_v16  ;;  %v647_v18 = vld [vmem:[%s4192_s9 + $0x520] sm:$0xff]  ;;  %v649_v19 = vld [vmem:[%s4192_s9 + $0x528] sm:$0xff]  ;;  %646 = vst [vmem:[%s4197_s10 + $0x288] sm:$0xff] %v645_v17 }
  0x81   : > { %648 = vst [vmem:[%s4197_s10 + $0x290] sm:$0xff] %v647_v18  ;;  %650 = vst [vmem:[%s4197_s10 + $0x298] sm:$0xff] %v649_v19  ;;  %v651_v20 = vld [vmem:[%s4192_s9 + $0x540] sm:$0xff]  ;;  %v653_v21 = vld [vmem:[%s4192_s9 + $0x548] sm:$0xff] }
  0x82   : > { %v655_v22 = vld [vmem:[%s4192_s9 + $0x560] sm:$0xff]  ;;  %652 = vst [vmem:[%s4197_s10 + $0x2a0] sm:$0xff] %v651_v20  ;;  %654 = vst [vmem:[%s4197_s10 + $0x2a8] sm:$0xff] %v653_v21  ;;  %v657_v23 = vld [vmem:[%s4192_s9 + $0x568] sm:$0xff] }
  0x83   : > { %656 = vst [vmem:[%s4197_s10 + $0x2b0] sm:$0xff] %v655_v22  ;;  %v659_v24 = vld [vmem:[%s4192_s9 + $0x580] sm:$0xff]  ;;  %v661_v25 = vld [vmem:[%s4192_s9 + $0x588] sm:$0xff]  ;;  %658 = vst [vmem:[%s4197_s10 + $0x2b8] sm:$0xff] %v657_v23 }
  0x84   : > { %660 = vst [vmem:[%s4197_s10 + $0x2c0] sm:$0xff] %v659_v24  ;;  %662 = vst [vmem:[%s4197_s10 + $0x2c8] sm:$0xff] %v661_v25  ;;  %v663_v26 = vld [vmem:[%s4192_s9 + $0x5a0] sm:$0xff]  ;;  %v665_v27 = vld [vmem:[%s4192_s9 + $0x5a8] sm:$0xff] }
  0x85   : > { %v667_v28 = vld [vmem:[%s4192_s9 + $0x5c0] sm:$0xff]  ;;  %664 = vst [vmem:[%s4197_s10 + $0x2d0] sm:$0xff] %v663_v26  ;;  %666 = vst [vmem:[%s4197_s10 + $0x2d8] sm:$0xff] %v665_v27  ;;  %v669_v29 = vld [vmem:[%s4192_s9 + $0x5c8] sm:$0xff] }
  0x86   : > { %668 = vst [vmem:[%s4197_s10 + $0x2e0] sm:$0xff] %v667_v28  ;;  %v671_v30 = vld [vmem:[%s4192_s9 + $0x5e0] sm:$0xff]  ;;  %v673_v31 = vld [vmem:[%s4192_s9 + $0x5e8] sm:$0xff]  ;;  %670 = vst [vmem:[%s4197_s10 + $0x2e8] sm:$0xff] %v669_v29 }
  0x87   : > { %672 = vst [vmem:[%s4197_s10 + $0x2f0] sm:$0xff] %v671_v30  ;;  %674 = vst [vmem:[%s4197_s10 + $0x2f8] sm:$0xff] %v673_v31  ;;  %v675_v32 = vld [vmem:[%s4192_s9 + $0x600] sm:$0xff]  ;;  %v677_v33 = vld [vmem:[%s4192_s9 + $0x608] sm:$0xff] }
  0x88   : > { %v679_v34 = vld [vmem:[%s4192_s9 + $0x620] sm:$0xff]  ;;  %676 = vst [vmem:[%s4197_s10 + $0x300] sm:$0xff] %v675_v32  ;;  %678 = vst [vmem:[%s4197_s10 + $0x308] sm:$0xff] %v677_v33  ;;  %v681_v35 = vld [vmem:[%s4192_s9 + $0x628] sm:$0xff] }
  0x89   : > { %680 = vst [vmem:[%s4197_s10 + $0x310] sm:$0xff] %v679_v34  ;;  %v683_v36 = vld [vmem:[%s4192_s9 + $0x640] sm:$0xff]  ;;  %v685_v37 = vld [vmem:[%s4192_s9 + $0x648] sm:$0xff]  ;;  %682 = vst [vmem:[%s4197_s10 + $0x318] sm:$0xff] %v681_v35 }
  0x8a   : > { %684 = vst [vmem:[%s4197_s10 + $0x320] sm:$0xff] %v683_v36  ;;  %686 = vst [vmem:[%s4197_s10 + $0x328] sm:$0xff] %v685_v37  ;;  %v687_v38 = vld [vmem:[%s4192_s9 + $0x660] sm:$0xff]  ;;  %v689_v39 = vld [vmem:[%s4192_s9 + $0x668] sm:$0xff] }
  0x8b   : > { %v691_v40 = vld [vmem:[%s4192_s9 + $0x680] sm:$0xff]  ;;  %688 = vst [vmem:[%s4197_s10 + $0x330] sm:$0xff] %v687_v38  ;;  %690 = vst [vmem:[%s4197_s10 + $0x338] sm:$0xff] %v689_v39  ;;  %v693_v41 = vld [vmem:[%s4192_s9 + $0x688] sm:$0xff] }
  0x8c   : > { %692 = vst [vmem:[%s4197_s10 + $0x340] sm:$0xff] %v691_v40  ;;  %v695_v42 = vld [vmem:[%s4192_s9 + $0x6a0] sm:$0xff]  ;;  %v697_v43 = vld [vmem:[%s4192_s9 + $0x6a8] sm:$0xff]  ;;  %694 = vst [vmem:[%s4197_s10 + $0x348] sm:$0xff] %v693_v41 }
  0x8d   : > { %696 = vst [vmem:[%s4197_s10 + $0x350] sm:$0xff] %v695_v42  ;;  %698 = vst [vmem:[%s4197_s10 + $0x358] sm:$0xff] %v697_v43  ;;  %v699_v44 = vld [vmem:[%s4192_s9 + $0x6c0] sm:$0xff]  ;;  %v701_v45 = vld [vmem:[%s4192_s9 + $0x6c8] sm:$0xff] }
  0x8e   : > { %v703_v46 = vld [vmem:[%s4192_s9 + $0x6e0] sm:$0xff]  ;;  %700 = vst [vmem:[%s4197_s10 + $0x360] sm:$0xff] %v699_v44  ;;  %702 = vst [vmem:[%s4197_s10 + $0x368] sm:$0xff] %v701_v45  ;;  %v705_v47 = vld [vmem:[%s4192_s9 + $0x6e8] sm:$0xff] }
  0x8f   : > { %704 = vst [vmem:[%s4197_s10 + $0x370] sm:$0xff] %v703_v46  ;;  %v707_v48 = vld [vmem:[%s4192_s9 + $0x700] sm:$0xff]  ;;  %v709_v49 = vld [vmem:[%s4192_s9 + $0x708] sm:$0xff]  ;;  %706 = vst [vmem:[%s4197_s10 + $0x378] sm:$0xff] %v705_v47 }
  0x90   : > { %708 = vst [vmem:[%s4197_s10 + $0x380] sm:$0xff] %v707_v48  ;;  %710 = vst [vmem:[%s4197_s10 + $0x388] sm:$0xff] %v709_v49  ;;  %v711_v50 = vld [vmem:[%s4192_s9 + $0x720] sm:$0xff]  ;;  %v713_v51 = vld [vmem:[%s4192_s9 + $0x728] sm:$0xff] }
  0x91   : > { %v715_v52 = vld [vmem:[%s4192_s9 + $0x740] sm:$0xff]  ;;  %712 = vst [vmem:[%s4197_s10 + $0x390] sm:$0xff] %v711_v50  ;;  %714 = vst [vmem:[%s4197_s10 + $0x398] sm:$0xff] %v713_v51  ;;  %v717_v53 = vld [vmem:[%s4192_s9 + $0x748] sm:$0xff] }
  0x92   : > { %716 = vst [vmem:[%s4197_s10 + $0x3a0] sm:$0xff] %v715_v52  ;;  %v719_v54 = vld [vmem:[%s4192_s9 + $0x760] sm:$0xff]  ;;  %v721_v55 = vld [vmem:[%s4192_s9 + $0x768] sm:$0xff]  ;;  %718 = vst [vmem:[%s4197_s10 + $0x3a8] sm:$0xff] %v717_v53 }
  0x93   : > { %720 = vst [vmem:[%s4197_s10 + $0x3b0] sm:$0xff] %v719_v54  ;;  %722 = vst [vmem:[%s4197_s10 + $0x3b8] sm:$0xff] %v721_v55  ;;  %v723_v56 = vld [vmem:[%s4192_s9 + $0x780] sm:$0xff]  ;;  %v725_v57 = vld [vmem:[%s4192_s9 + $0x788] sm:$0xff] }
  0x94   : > { %v727_v58 = vld [vmem:[%s4192_s9 + $0x7a0] sm:$0xff]  ;;  %724 = vst [vmem:[%s4197_s10 + $0x3c0] sm:$0xff] %v723_v56  ;;  %726 = vst [vmem:[%s4197_s10 + $0x3c8] sm:$0xff] %v725_v57  ;;  %v729_v59 = vld [vmem:[%s4192_s9 + $0x7a8] sm:$0xff] }
  0x95   : > { %728 = vst [vmem:[%s4197_s10 + $0x3d0] sm:$0xff] %v727_v58  ;;  %v731_v60 = vld [vmem:[%s4192_s9 + $0x7c0] sm:$0xff]  ;;  %v733_v61 = vld [vmem:[%s4192_s9 + $0x7c8] sm:$0xff]  ;;  %730 = vst [vmem:[%s4197_s10 + $0x3d8] sm:$0xff] %v729_v59 }
  0x96   : > { %732 = vst [vmem:[%s4197_s10 + $0x3e0] sm:$0xff] %v731_v60  ;;  %734 = vst [vmem:[%s4197_s10 + $0x3e8] sm:$0xff] %v733_v61  ;;  %v735_v62 = vld [vmem:[%s4192_s9 + $0x7e0] sm:$0xff]  ;;  %v737_v63 = vld [vmem:[%s4192_s9 + $0x7e8] sm:$0xff] }
  0x97   : > { %736 = vst [vmem:[%s4197_s10 + $0x3f0] sm:$0xff] %v735_v62  ;;  %738 = vst [vmem:[%s4197_s10 + $0x3f8] sm:$0xff] %v737_v63 }
  0x98 PF: > { %p3057_p8 = scmp.ge.s32.totalorder %s3849_s16, 1  ;;  %p743_p9 = scmp.lt.s32.totalorder %s3849_s16, 3 }
  0x9a   : > { %p744_p10 = pnand %p3057_p8, %p743_p9 }
  0x9b   : > { %s750_s11 = sand.u32 (!%p744_p10), 1, %s3833_s12  }
  0x9c   : > { %747 = sbr.rel (%p744_p10) target bundleno = 634 (0x27a), region = 70  ;;  %s4462_s20 = sshll.u32 (!%p744_p10), %s750_s11, 10 }
  0x9d   : > { %s4471_s25 = scalar_lea.vmem (!%p744_p10), [#allocation4], %s4462_s20  ;;  %s4579_s30 = scalar_lea.vmem (!%p744_p10), [#allocation5], %s4462_s20 }
  0x9e   : > { %s3060_s19 = sshll.u32 (!%p744_p10), %s750_s11, 5 }
  0x9f   : > { %s4767_s20 = scalar_lea.vmem (!%p744_p10), [#allocation6], %s3060_s19 }
  0xa1   : > { %v4458_v0 = vld [vmem:[%s4798_s0 + $0x4] ss:$16 sps:$4 sm:$0xff]   ;;  %v4467_v1 = vld [vmem:[%s4798_s0 + $0xc] ss:$16 sps:$4 sm:$0xff]   ;;  %v3389_v4 = vld [vmem:[%s4471_s25 + $0xe0] ss:$16 sps:$4 sm:$0xff]  }
  0xa2   : > { %1663 = vmatprep.mubr.bf16.mxu0 %v4458_v0  ;;  %v3385_v2 = vld [vmem:[%s4471_s25 + $0xe4] ss:$16 sps:$4 sm:$0xff]   ;;  %1706 = vmatprep.mubr.bf16.mxu1 %v4467_v1  ;;  %v3390_v5 = vld [vmem:[%s4471_s25 + $0x2e0] ss:$16 sps:$4 sm:$0xff]   ;;  %s3344_s12 = sshll.u32 (%p3910_p6), %s3841_s14, 4 }
  0xa3   : > { %v3387_v3 = vld [vmem:[%s4471_s25 + $0x2e4] ss:$16 sps:$4 sm:$0xff]   ;;  %1631 = vmatprep.subr.bf16.mxu0 %v3385_v2  ;;  %v3395_v8 = vld [vmem:[%s4471_s25 + $0xc0] ss:$16 sps:$4 sm:$0xff]   ;;  %s2906_s24 = scalar_lea.vmem (%p3910_p6), %s4801_s3, %s3344_s12 }
  0xa4   : > { %1674 = vmatprep.subr.bf16.mxu1 %v3387_v3  ;;  %v3391_v6 = vld [vmem:[%s4471_s25 + $0xc4] ss:$16 sps:$4 sm:$0xff]   ;;  %1632 = vmatpush1.bf16.msra.mxu0 %v3389_v4  ;;  %v3396_v9 = vld [vmem:[%s4471_s25 + $0x2c0] ss:$16 sps:$4 sm:$0xff]   ;;  %v3489_v4 = vld [vmem:[%s4471_s25 + $0xec] ss:$16 sps:$4 sm:$0xff]  }
  0xa5   : > { %1675 = vmatpush1.bf16.msra.mxu1 %v3390_v5  ;;  %v3393_v7 = vld [vmem:[%s4471_s25 + $0x2c4] ss:$16 sps:$4 sm:$0xff]   ;;  %1633 = vmatprep.subr.bf16.mxu0 %v3391_v6  ;;  %v3401_v12 = vld [vmem:[%s4471_s25 + $0xa0] ss:$16 sps:$4 sm:$0xff]   ;;  %v3492_v5 = vld [vmem:[%s4471_s25 + $0x2ec] ss:$16 sps:$4 sm:$0xff]  }
  0xa6   : > { %1676 = vmatprep.subr.bf16.mxu1 %v3393_v7  ;;  %v3397_v10 = vld [vmem:[%s4471_s25 + $0xa4] ss:$16 sps:$4 sm:$0xff]   ;;  %v3402_v13 = vld [vmem:[%s4471_s25 + $0x2a0] ss:$16 sps:$4 sm:$0xff]   ;;  %v4548_v7 = vld [vmem:[%s4798_s0 + $0x8] ss:$16 sps:$4 sm:$0xff]  }
  0xa7   : > { %v3399_v11 = vld [vmem:[%s4471_s25 + $0x2a4] ss:$16 sps:$4 sm:$0xff]   ;;  %v3407_v16 = vld [vmem:[%s4471_s25 + $0x80] ss:$16 sps:$4 sm:$0xff]  }
  0xa8   : > { %1634 = vmatpush1.bf16.msra.mxu0 %v3395_v8  ;;  %v3403_v14 = vld [vmem:[%s4471_s25 + $0x84] ss:$16 sps:$4 sm:$0xff]   ;;  %v3408_v17 = vld [vmem:[%s4471_s25 + $0x280] ss:$16 sps:$4 sm:$0xff]   ;;  %v3487_v8 = vld [vmem:[%s4471_s25 + $0xe8] ss:$16 sps:$4 sm:$0xff]  }
  0xa9   : > { %1677 = vmatpush1.bf16.msra.mxu1 %v3396_v9  ;;  %1635 = vmatprep.subr.bf16.mxu0 %v3397_v10  ;;  %v3405_v15 = vld [vmem:[%s4471_s25 + $0x284] ss:$16 sps:$4 sm:$0xff]   ;;  %v3413_v20 = vld [vmem:[%s4471_s25 + $0x60] ss:$16 sps:$4 sm:$0xff]   ;;  %v3490_v9 = vld [vmem:[%s4471_s25 + $0x2e8] ss:$16 sps:$4 sm:$0xff]  }
  0xaa   : > { %1678 = vmatprep.subr.bf16.mxu1 %v3399_v11  ;;  %v3409_v18 = vld [vmem:[%s4471_s25 + $0x64] ss:$16 sps:$4 sm:$0xff]   ;;  %v3414_v21 = vld [vmem:[%s4471_s25 + $0x260] ss:$16 sps:$4 sm:$0xff]   ;;  %v3495_v10 = vld [vmem:[%s4471_s25 + $0xcc] ss:$16 sps:$4 sm:$0xff]  }
  0xab   : > { %v3411_v19 = vld [vmem:[%s4471_s25 + $0x264] ss:$16 sps:$4 sm:$0xff]   ;;  %v3419_v24 = vld [vmem:[%s4471_s25 + $0x40] ss:$16 sps:$4 sm:$0xff]   ;;  %v3498_v11 = vld [vmem:[%s4471_s25 + $0x2cc] ss:$16 sps:$4 sm:$0xff]  }
  0xac   : > { %1636 = vmatpush1.bf16.msra.mxu0 %v3401_v12  ;;  %v3415_v22 = vld [vmem:[%s4471_s25 + $0x44] ss:$16 sps:$4 sm:$0xff]   ;;  %v3420_v25 = vld [vmem:[%s4471_s25 + $0x240] ss:$16 sps:$4 sm:$0xff]   ;;  %v3493_v12 = vld [vmem:[%s4471_s25 + $0xc8] ss:$16 sps:$4 sm:$0xff]  }
  0xad   : > { %1679 = vmatpush1.bf16.msra.mxu1 %v3402_v13  ;;  %1637 = vmatprep.subr.bf16.mxu0 %v3403_v14  ;;  %v3417_v23 = vld [vmem:[%s4471_s25 + $0x244] ss:$16 sps:$4 sm:$0xff]   ;;  %v3425_v28 = vld [vmem:[%s4471_s25 + $0x20] ss:$16 sps:$4 sm:$0xff]   ;;  %v3496_v13 = vld [vmem:[%s4471_s25 + $0x2c8] ss:$16 sps:$4 sm:$0xff]  }
  0xae   : > { %1680 = vmatprep.subr.bf16.mxu1 %v3405_v15  ;;  %v3421_v26 = vld [vmem:[%s4471_s25 + $0x24] ss:$16 sps:$4 sm:$0xff]   ;;  %v3426_v29 = vld [vmem:[%s4471_s25 + $0x220] ss:$16 sps:$4 sm:$0xff]   ;;  %v3501_v14 = vld [vmem:[%s4471_s25 + $0xac] ss:$16 sps:$4 sm:$0xff]  }
  0xaf   : > { %v3423_v27 = vld [vmem:[%s4471_s25 + $0x224] ss:$16 sps:$4 sm:$0xff]   ;;  %v3431_v32 = vld [vmem:[%s4471_s25] ss:$16 sps:$4 sm:$0xff]   ;;  %v3504_v15 = vld [vmem:[%s4471_s25 + $0x2ac] ss:$16 sps:$4 sm:$0xff]  }
  0xb0   : > { %1638 = vmatpush1.bf16.msra.mxu0 %v3407_v16  ;;  %v3427_v30 = vld [vmem:[%s4471_s25 + $0x4] ss:$16 sps:$4 sm:$0xff]   ;;  %v3432_v33 = vld [vmem:[%s4471_s25 + $0x200] ss:$16 sps:$4 sm:$0xff]   ;;  %v3499_v16 = vld [vmem:[%s4471_s25 + $0xa8] ss:$16 sps:$4 sm:$0xff]  }
  0xb1   : > { %1681 = vmatpush1.bf16.msra.mxu1 %v3408_v17  ;;  %1639 = vmatprep.subr.bf16.mxu0 %v3409_v18  ;;  %v3429_v31 = vld [vmem:[%s4471_s25 + $0x204] ss:$16 sps:$4 sm:$0xff]   ;;  %v3437_v36 = vld [vmem:[%s4471_s25 + $0x1e0] ss:$16 sps:$4 sm:$0xff]   ;;  %v3502_v17 = vld [vmem:[%s4471_s25 + $0x2a8] ss:$16 sps:$4 sm:$0xff]  }
  0xb2   : > { %1682 = vmatprep.subr.bf16.mxu1 %v3411_v19  ;;  %v3433_v34 = vld [vmem:[%s4471_s25 + $0x1e4] ss:$16 sps:$4 sm:$0xff]   ;;  %v3438_v37 = vld [vmem:[%s4471_s25 + $0x3e0] ss:$16 sps:$4 sm:$0xff]   ;;  %v3507_v18 = vld [vmem:[%s4471_s25 + $0x8c] ss:$16 sps:$4 sm:$0xff]  }
  0xb3   : > { %v3435_v35 = vld [vmem:[%s4471_s25 + $0x3e4] ss:$16 sps:$4 sm:$0xff]   ;;  %v3443_v40 = vld [vmem:[%s4471_s25 + $0x1c0] ss:$16 sps:$4 sm:$0xff]   ;;  %v3510_v19 = vld [vmem:[%s4471_s25 + $0x28c] ss:$16 sps:$4 sm:$0xff]  }
  0xb4   : > { %1640 = vmatpush1.bf16.msra.mxu0 %v3413_v20  ;;  %v3439_v38 = vld [vmem:[%s4471_s25 + $0x1c4] ss:$16 sps:$4 sm:$0xff]   ;;  %v3444_v41 = vld [vmem:[%s4471_s25 + $0x3c0] ss:$16 sps:$4 sm:$0xff]   ;;  %v3505_v20 = vld [vmem:[%s4471_s25 + $0x88] ss:$16 sps:$4 sm:$0xff]  }
  0xb5   : > { %1683 = vmatpush1.bf16.msra.mxu1 %v3414_v21  ;;  %1641 = vmatprep.subr.bf16.mxu0 %v3415_v22  ;;  %v3441_v39 = vld [vmem:[%s4471_s25 + $0x3c4] ss:$16 sps:$4 sm:$0xff]   ;;  %v3449_v44 = vld [vmem:[%s4471_s25 + $0x1a0] ss:$16 sps:$4 sm:$0xff]   ;;  %v3508_v21 = vld [vmem:[%s4471_s25 + $0x288] ss:$16 sps:$4 sm:$0xff]  }
  0xb6   : > { %1684 = vmatprep.subr.bf16.mxu1 %v3417_v23  ;;  %v3445_v42 = vld [vmem:[%s4471_s25 + $0x1a4] ss:$16 sps:$4 sm:$0xff]   ;;  %v3450_v45 = vld [vmem:[%s4471_s25 + $0x3a0] ss:$16 sps:$4 sm:$0xff]   ;;  %v3513_v22 = vld [vmem:[%s4471_s25 + $0x6c] ss:$16 sps:$4 sm:$0xff]  }
  0xb7   : > { %v3447_v43 = vld [vmem:[%s4471_s25 + $0x3a4] ss:$16 sps:$4 sm:$0xff]   ;;  %v3455_v48 = vld [vmem:[%s4471_s25 + $0x180] ss:$16 sps:$4 sm:$0xff]   ;;  %v3516_v23 = vld [vmem:[%s4471_s25 + $0x26c] ss:$16 sps:$4 sm:$0xff]  }
  0xb8   : > { %1642 = vmatpush1.bf16.msra.mxu0 %v3419_v24  ;;  %v3451_v46 = vld [vmem:[%s4471_s25 + $0x184] ss:$16 sps:$4 sm:$0xff]   ;;  %v3456_v49 = vld [vmem:[%s4471_s25 + $0x380] ss:$16 sps:$4 sm:$0xff]   ;;  %v3511_v24 = vld [vmem:[%s4471_s25 + $0x68] ss:$16 sps:$4 sm:$0xff]  }
  0xb9   : > { %1685 = vmatpush1.bf16.msra.mxu1 %v3420_v25  ;;  %1643 = vmatprep.subr.bf16.mxu0 %v3421_v26  ;;  %v3453_v47 = vld [vmem:[%s4471_s25 + $0x384] ss:$16 sps:$4 sm:$0xff]   ;;  %v3461_v52 = vld [vmem:[%s4471_s25 + $0x160] ss:$16 sps:$4 sm:$0xff]   ;;  %v3514_v25 = vld [vmem:[%s4471_s25 + $0x268] ss:$16 sps:$4 sm:$0xff]  }
  0xba   : > { %1686 = vmatprep.subr.bf16.mxu1 %v3423_v27  ;;  %v3457_v50 = vld [vmem:[%s4471_s25 + $0x164] ss:$16 sps:$4 sm:$0xff]   ;;  %v3462_v53 = vld [vmem:[%s4471_s25 + $0x360] ss:$16 sps:$4 sm:$0xff]   ;;  %v3519_v26 = vld [vmem:[%s4471_s25 + $0x4c] ss:$16 sps:$4 sm:$0xff]  }
  0xbb   : > { %v3459_v51 = vld [vmem:[%s4471_s25 + $0x364] ss:$16 sps:$4 sm:$0xff]   ;;  %v3467_v56 = vld [vmem:[%s4471_s25 + $0x140] ss:$16 sps:$4 sm:$0xff]   ;;  %v3522_v27 = vld [vmem:[%s4471_s25 + $0x24c] ss:$16 sps:$4 sm:$0xff]  }
  0xbc   : > { %1644 = vmatpush1.bf16.msra.mxu0 %v3425_v28  ;;  %v3463_v54 = vld [vmem:[%s4471_s25 + $0x144] ss:$16 sps:$4 sm:$0xff]   ;;  %v3468_v57 = vld [vmem:[%s4471_s25 + $0x340] ss:$16 sps:$4 sm:$0xff]   ;;  %v3517_v28 = vld [vmem:[%s4471_s25 + $0x48] ss:$16 sps:$4 sm:$0xff]  }
  0xbd   : > { %1687 = vmatpush1.bf16.msra.mxu1 %v3426_v29  ;;  %1645 = vmatprep.subr.bf16.mxu0 %v3427_v30  ;;  %v3465_v55 = vld [vmem:[%s4471_s25 + $0x344] ss:$16 sps:$4 sm:$0xff]   ;;  %v3473_v60 = vld [vmem:[%s4471_s25 + $0x120] ss:$16 sps:$4 sm:$0xff]   ;;  %v3520_v29 = vld [vmem:[%s4471_s25 + $0x248] ss:$16 sps:$4 sm:$0xff]  }
  0xbe   : > { %1688 = vmatprep.subr.bf16.mxu1 %v3429_v31  ;;  %v3469_v58 = vld [vmem:[%s4471_s25 + $0x124] ss:$16 sps:$4 sm:$0xff]   ;;  %v3474_v61 = vld [vmem:[%s4471_s25 + $0x320] ss:$16 sps:$4 sm:$0xff]   ;;  %v3525_v30 = vld [vmem:[%s4471_s25 + $0x2c] ss:$16 sps:$4 sm:$0xff]  }
  0xbf   : > { %v3471_v59 = vld [vmem:[%s4471_s25 + $0x324] ss:$16 sps:$4 sm:$0xff]   ;;  %v3479_v2 = vld [vmem:[%s4471_s25 + $0x100] ss:$16 sps:$4 sm:$0xff]   ;;  %v3528_v31 = vld [vmem:[%s4471_s25 + $0x22c] ss:$16 sps:$4 sm:$0xff]  }
  0xc0   : > { %1646 = vmatpush1.bf16.msra.mxu0 %v3431_v32  ;;  %v3475_v62 = vld [vmem:[%s4471_s25 + $0x104] ss:$16 sps:$4 sm:$0xff]   ;;  %v3480_v3 = vld [vmem:[%s4471_s25 + $0x300] ss:$16 sps:$4 sm:$0xff]   ;;  %v3523_v32 = vld [vmem:[%s4471_s25 + $0x28] ss:$16 sps:$4 sm:$0xff]  }
  0xc1   : > { %1689 = vmatpush1.bf16.msra.mxu1 %v3432_v33  ;;  %1647 = vmatprep.subr.bf16.mxu0 %v3433_v34  ;;  %v3477_v63 = vld [vmem:[%s4471_s25 + $0x304] ss:$16 sps:$4 sm:$0xff]   ;;  %v4543_v6 = vld [vmem:[%s4798_s0] ss:$16 sps:$4 sm:$0xff]   ;;  %v3526_v33 = vld [vmem:[%s4471_s25 + $0x228] ss:$16 sps:$4 sm:$0xff]  }
  0xc2   : > { %1690 = vmatprep.subr.bf16.mxu1 %v3435_v35  ;;  %v3531_v34 = vld [vmem:[%s4471_s25 + $0xc] ss:$16 sps:$4 sm:$0xff]  }
  0xc3   : > { %v3534_v35 = vld [vmem:[%s4471_s25 + $0x20c] ss:$16 sps:$4 sm:$0xff]  }
  0xc4   : > { %1648 = vmatpush2.bf16.msra.mxu0 %v3437_v36  ;;  %v3529_v36 = vld [vmem:[%s4471_s25 + $0x8] ss:$16 sps:$4 sm:$0xff]  }
  0xc5   : > { %1691 = vmatpush2.bf16.msra.mxu1 %v3438_v37  ;;  %1649 = vmatprep.subr.bf16.mxu0 %v3439_v38  ;;  %v3532_v37 = vld [vmem:[%s4471_s25 + $0x208] ss:$16 sps:$4 sm:$0xff]   ;;  %v3537_v38 = vld [vmem:[%s4471_s25 + $0x1ec] ss:$16 sps:$4 sm:$0xff]  }
  0xc6   : > { %1692 = vmatprep.subr.bf16.mxu1 %v3441_v39  ;;  %v3540_v39 = vld [vmem:[%s4471_s25 + $0x3ec] ss:$16 sps:$4 sm:$0xff]  }
  0xc8   : > { %1650 = vmatpush2.bf16.msra.mxu0 %v3443_v40  ;;  %v3535_v40 = vld [vmem:[%s4471_s25 + $0x1e8] ss:$16 sps:$4 sm:$0xff]  }
  0xc9   : > { %1693 = vmatpush2.bf16.msra.mxu1 %v3444_v41  ;;  %1651 = vmatprep.subr.bf16.mxu0 %v3445_v42  ;;  %v3538_v41 = vld [vmem:[%s4471_s25 + $0x3e8] ss:$16 sps:$4 sm:$0xff]   ;;  %v3543_v42 = vld [vmem:[%s4471_s25 + $0x1cc] ss:$16 sps:$4 sm:$0xff]  }
  0xca   : > { %1694 = vmatprep.subr.bf16.mxu1 %v3447_v43  ;;  %v3546_v43 = vld [vmem:[%s4471_s25 + $0x3cc] ss:$16 sps:$4 sm:$0xff]  }
  0xcc   : > { %1652 = vmatpush2.bf16.msra.mxu0 %v3449_v44  ;;  %v3541_v44 = vld [vmem:[%s4471_s25 + $0x1c8] ss:$16 sps:$4 sm:$0xff]  }
  0xcd   : > { %1695 = vmatpush2.bf16.msra.mxu1 %v3450_v45  ;;  %1653 = vmatprep.subr.bf16.mxu0 %v3451_v46  ;;  %v3544_v45 = vld [vmem:[%s4471_s25 + $0x3c8] ss:$16 sps:$4 sm:$0xff]   ;;  %v3549_v46 = vld [vmem:[%s4471_s25 + $0x1ac] ss:$16 sps:$4 sm:$0xff]  }
  0xce   : > { %1696 = vmatprep.subr.bf16.mxu1 %v3453_v47  ;;  %v3552_v47 = vld [vmem:[%s4471_s25 + $0x3ac] ss:$16 sps:$4 sm:$0xff]  }
  0xd0   : > { %1654 = vmatpush2.bf16.msra.mxu0 %v3455_v48  ;;  %v3547_v48 = vld [vmem:[%s4471_s25 + $0x1a8] ss:$16 sps:$4 sm:$0xff]  }
  0xd1   : > { %1697 = vmatpush2.bf16.msra.mxu1 %v3456_v49  ;;  %1655 = vmatprep.subr.bf16.mxu0 %v3457_v50  ;;  %v3550_v49 = vld [vmem:[%s4471_s25 + $0x3a8] ss:$16 sps:$4 sm:$0xff]   ;;  %v3555_v50 = vld [vmem:[%s4471_s25 + $0x18c] ss:$16 sps:$4 sm:$0xff]  }
  0xd2   : > { %1698 = vmatprep.subr.bf16.mxu1 %v3459_v51  ;;  %v3558_v51 = vld [vmem:[%s4471_s25 + $0x38c] ss:$16 sps:$4 sm:$0xff]  }
  0xd4   : > { %1656 = vmatpush2.bf16.msra.mxu0 %v3461_v52  ;;  %v3553_v52 = vld [vmem:[%s4471_s25 + $0x188] ss:$16 sps:$4 sm:$0xff]  }
  0xd5   : > { %1699 = vmatpush2.bf16.msra.mxu1 %v3462_v53  ;;  %1657 = vmatprep.subr.bf16.mxu0 %v3463_v54  ;;  %v3556_v53 = vld [vmem:[%s4471_s25 + $0x388] ss:$16 sps:$4 sm:$0xff]   ;;  %v3561_v54 = vld [vmem:[%s4471_s25 + $0x16c] ss:$16 sps:$4 sm:$0xff]  }
  0xd6   : > { %1700 = vmatprep.subr.bf16.mxu1 %v3465_v55  ;;  %v3564_v55 = vld [vmem:[%s4471_s25 + $0x36c] ss:$16 sps:$4 sm:$0xff]  }
  0xd8   : > { %1658 = vmatpush2.bf16.msra.mxu0 %v3467_v56  ;;  %v3559_v56 = vld [vmem:[%s4471_s25 + $0x168] ss:$16 sps:$4 sm:$0xff]  }
  0xd9   : > { %1701 = vmatpush2.bf16.msra.mxu1 %v3468_v57  ;;  %1659 = vmatprep.subr.bf16.mxu0 %v3469_v58  ;;  %v3562_v57 = vld [vmem:[%s4471_s25 + $0x368] ss:$16 sps:$4 sm:$0xff]   ;;  %v3567_v58 = vld [vmem:[%s4471_s25 + $0x14c] ss:$16 sps:$4 sm:$0xff]  }
  0xda   : > { %1702 = vmatprep.subr.bf16.mxu1 %v3471_v59  ;;  %v3570_v59 = vld [vmem:[%s4471_s25 + $0x34c] ss:$16 sps:$4 sm:$0xff]  }
  0xdc   : > { %1660 = vmatpush2.bf16.msra.mxu0 %v3473_v60  ;;  %v3565_v60 = vld [vmem:[%s4471_s25 + $0x148] ss:$16 sps:$4 sm:$0xff]  }
  0xdd   : > { %1703 = vmatpush2.bf16.msra.mxu1 %v3474_v61  ;;  %1661 = vmatprep.subr.bf16.mxu0 %v3475_v62  ;;  %v3568_v61 = vld [vmem:[%s4471_s25 + $0x348] ss:$16 sps:$4 sm:$0xff]   ;;  %v3573_v62 = vld [vmem:[%s4471_s25 + $0x12c] ss:$16 sps:$4 sm:$0xff]  }
  0xde   : > { %1704 = vmatprep.subr.bf16.mxu1 %v3477_v63  ;;  %v3576_v63 = vld [vmem:[%s4471_s25 + $0x32c] ss:$16 sps:$4 sm:$0xff]  }
  0xe0   : > { %1662 = vmatpush2.bf16.msra.mxu0 %v3479_v2  ;;  %v3571_v2 = vld [vmem:[%s4471_s25 + $0x128] ss:$16 sps:$4 sm:$0xff]  }
  0xe1   : > { %1705 = vmatpush2.bf16.msra.mxu1 %v3480_v3  ;;  %1717 = vmatprep.subr.bf16.mxu0 %v3489_v4  ;;  %v3574_v3 = vld [vmem:[%s4471_s25 + $0x328] ss:$16 sps:$4 sm:$0xff]   ;;  %v3579_v4 = vld [vmem:[%s4471_s25 + $0x10c] ss:$16 sps:$4 sm:$0xff]  }
  0xe2   : > { %1760 = vmatprep.subr.bf16.mxu1 %v3492_v5  ;;  %v3582_v5 = vld [vmem:[%s4471_s25 + $0x30c] ss:$16 sps:$4 sm:$0xff]  }
  0xe3   : > { %1664 = vmatmul.mubr.bf16.vlgmr.msra.gmra.mxu0 %v4543_v6 }
  0xe4   : > { %1707 = vmatmul.mubr.bf16.vlgmr.msra.gmra.mxu1 %v4548_v7  ;;  %1718 = vmatpush1.bf16.msra.mxu0 %v3487_v8  ;;  %v3577_v8 = vld [vmem:[%s4471_s25 + $0x108] ss:$16 sps:$4 sm:$0xff]  }
  0xe5   : > { %1761 = vmatpush1.bf16.msra.mxu1 %v3490_v9  ;;  %1719 = vmatprep.subr.bf16.mxu0 %v3495_v10  ;;  %v3580_v9 = vld [vmem:[%s4471_s25 + $0x308] ss:$16 sps:$4 sm:$0xff]   ;;  %v3585_v10 = vld [vmem:[%s4579_s30 + $0xe4] ss:$16 sps:$4 sm:$0xff]  }
  0xe6   : > { %1762 = vmatprep.subr.bf16.mxu1 %v3498_v11  ;;  %1749 = vmatprep.mubr.bf16.mxu0 %v4458_v0  ;;  %v3588_v11 = vld [vmem:[%s4579_s30 + $0x2e4] ss:$16 sps:$4 sm:$0xff]  }
  0xe7   : > { %1792 = vmatprep.mubr.bf16.mxu1 %v4467_v1 }
  0xe8   : > { %1720 = vmatpush1.bf16.msra.mxu0 %v3493_v12  ;;  %v3583_v12 = vld [vmem:[%s4579_s30 + $0xe0] ss:$16 sps:$4 sm:$0xff]  }
  0xe9   : > { %1763 = vmatpush1.bf16.msra.mxu1 %v3496_v13  ;;  %1721 = vmatprep.subr.bf16.mxu0 %v3501_v14  ;;  %v3586_v13 = vld [vmem:[%s4579_s30 + $0x2e0] ss:$16 sps:$4 sm:$0xff]   ;;  %v3591_v14 = vld [vmem:[%s4579_s30 + $0xc4] ss:$16 sps:$4 sm:$0xff]  }
  0xea   : > { %1764 = vmatprep.subr.bf16.mxu1 %v3504_v15  ;;  %v3594_v15 = vld [vmem:[%s4579_s30 + $0x2c4] ss:$16 sps:$4 sm:$0xff]  }
  0xec   : > { %1722 = vmatpush1.bf16.msra.mxu0 %v3499_v16  ;;  %v3589_v16 = vld [vmem:[%s4579_s30 + $0xc0] ss:$16 sps:$4 sm:$0xff]  }
  0xed   : > { %1765 = vmatpush1.bf16.msra.mxu1 %v3502_v17  ;;  %1723 = vmatprep.subr.bf16.mxu0 %v3507_v18  ;;  %v3592_v17 = vld [vmem:[%s4579_s30 + $0x2c0] ss:$16 sps:$4 sm:$0xff]   ;;  %v3597_v18 = vld [vmem:[%s4579_s30 + $0xa4] ss:$16 sps:$4 sm:$0xff]  }
  0xee   : > { %1766 = vmatprep.subr.bf16.mxu1 %v3510_v19  ;;  %v3600_v19 = vld [vmem:[%s4579_s30 + $0x2a4] ss:$16 sps:$4 sm:$0xff]  }
  0xf0   : > { %1724 = vmatpush1.bf16.msra.mxu0 %v3505_v20  ;;  %v3595_v20 = vld [vmem:[%s4579_s30 + $0xa0] ss:$16 sps:$4 sm:$0xff]  }
  0xf1   : > { %1767 = vmatpush1.bf16.msra.mxu1 %v3508_v21  ;;  %1725 = vmatprep.subr.bf16.mxu0 %v3513_v22  ;;  %v3598_v21 = vld [vmem:[%s4579_s30 + $0x2a0] ss:$16 sps:$4 sm:$0xff]   ;;  %v3603_v22 = vld [vmem:[%s4579_s30 + $0x84] ss:$16 sps:$4 sm:$0xff]  }
  0xf2   : > { %1768 = vmatprep.subr.bf16.mxu1 %v3516_v23  ;;  %v3606_v23 = vld [vmem:[%s4579_s30 + $0x284] ss:$16 sps:$4 sm:$0xff]  }
  0xf4   : > { %1726 = vmatpush1.bf16.msra.mxu0 %v3511_v24  ;;  %v3601_v24 = vld [vmem:[%s4579_s30 + $0x80] ss:$16 sps:$4 sm:$0xff]  }
  0xf5   : > { %1769 = vmatpush1.bf16.msra.mxu1 %v3514_v25  ;;  %1727 = vmatprep.subr.bf16.mxu0 %v3519_v26  ;;  %v3604_v25 = vld [vmem:[%s4579_s30 + $0x280] ss:$16 sps:$4 sm:$0xff]  }
  0xf6   : > { %1770 = vmatprep.subr.bf16.mxu1 %v3522_v27  ;;  %v3607_v26 = vld [vmem:[%s4579_s30 + $0x60] ss:$16 sps:$4 sm:$0xff]  }
  0xf7   : > { %v3610_v27 = vld [vmem:[%s4579_s30 + $0x260] ss:$16 sps:$4 sm:$0xff]  }
  0xf8   : > { %1728 = vmatpush1.bf16.msra.mxu0 %v3517_v28  ;;  %v3615_v28 = vld [vmem:[%s4579_s30 + $0x44] ss:$16 sps:$4 sm:$0xff]  }
  0xf9   : > { %1771 = vmatpush1.bf16.msra.mxu1 %v3520_v29  ;;  %1729 = vmatprep.subr.bf16.mxu0 %v3525_v30  ;;  %v3618_v29 = vld [vmem:[%s4579_s30 + $0x244] ss:$16 sps:$4 sm:$0xff]   ;;  %v3613_v30 = vld [vmem:[%s4579_s30 + $0x40] ss:$16 sps:$4 sm:$0xff]  }
  0xfa   : > { %1772 = vmatprep.subr.bf16.mxu1 %v3528_v31  ;;  %v3616_v31 = vld [vmem:[%s4579_s30 + $0x240] ss:$16 sps:$4 sm:$0xff]  }
  0xfc   : > { %1730 = vmatpush1.bf16.msra.mxu0 %v3523_v32  ;;  %v3621_v32 = vld [vmem:[%s4579_s30 + $0x24] ss:$16 sps:$4 sm:$0xff]  }
  0xfd   : > { %1773 = vmatpush1.bf16.msra.mxu1 %v3526_v33  ;;  %1731 = vmatprep.subr.bf16.mxu0 %v3531_v34  ;;  %v3624_v33 = vld [vmem:[%s4579_s30 + $0x224] ss:$16 sps:$4 sm:$0xff]   ;;  %v3619_v34 = vld [vmem:[%s4579_s30 + $0x20] ss:$16 sps:$4 sm:$0xff]  }
  0xfe   : > { %1774 = vmatprep.subr.bf16.mxu1 %v3534_v35  ;;  %v3622_v35 = vld [vmem:[%s4579_s30 + $0x220] ss:$16 sps:$4 sm:$0xff]  }
 0x100   : > { %1732 = vmatpush1.bf16.msra.mxu0 %v3529_v36  ;;  %v3627_v36 = vld [vmem:[%s4579_s30 + $0x4] ss:$16 sps:$4 sm:$0xff]  }
 0x101   : > { %1775 = vmatpush1.bf16.msra.mxu1 %v3532_v37  ;;  %1733 = vmatprep.subr.bf16.mxu0 %v3537_v38  ;;  %v3630_v37 = vld [vmem:[%s4579_s30 + $0x204] ss:$16 sps:$4 sm:$0xff]   ;;  %v3625_v38 = vld [vmem:[%s4579_s30] ss:$16 sps:$4 sm:$0xff]  }
 0x102   : > { %1776 = vmatprep.subr.bf16.mxu1 %v3540_v39  ;;  %v3628_v39 = vld [vmem:[%s4579_s30 + $0x200] ss:$16 sps:$4 sm:$0xff]  }
 0x104   : > { %1734 = vmatpush2.bf16.msra.mxu0 %v3535_v40  ;;  %v3633_v40 = vld [vmem:[%s4579_s30 + $0x1e4] ss:$16 sps:$4 sm:$0xff]  }
 0x105   : > { %1777 = vmatpush2.bf16.msra.mxu1 %v3538_v41  ;;  %1735 = vmatprep.subr.bf16.mxu0 %v3543_v42  ;;  %v3636_v41 = vld [vmem:[%s4579_s30 + $0x3e4] ss:$16 sps:$4 sm:$0xff]   ;;  %v3631_v42 = vld [vmem:[%s4579_s30 + $0x1e0] ss:$16 sps:$4 sm:$0xff]  }
 0x106   : > { %1778 = vmatprep.subr.bf16.mxu1 %v3546_v43  ;;  %v3634_v43 = vld [vmem:[%s4579_s30 + $0x3e0] ss:$16 sps:$4 sm:$0xff]  }
 0x108   : > { %1736 = vmatpush2.bf16.msra.mxu0 %v3541_v44  ;;  %v3639_v44 = vld [vmem:[%s4579_s30 + $0x1c4] ss:$16 sps:$4 sm:$0xff]  }
 0x109   : > { %1779 = vmatpush2.bf16.msra.mxu1 %v3544_v45  ;;  %1737 = vmatprep.subr.bf16.mxu0 %v3549_v46  ;;  %v3642_v45 = vld [vmem:[%s4579_s30 + $0x3c4] ss:$16 sps:$4 sm:$0xff]   ;;  %v3637_v46 = vld [vmem:[%s4579_s30 + $0x1c0] ss:$16 sps:$4 sm:$0xff]  }
 0x10a   : > { %1780 = vmatprep.subr.bf16.mxu1 %v3552_v47  ;;  %v3640_v47 = vld [vmem:[%s4579_s30 + $0x3c0] ss:$16 sps:$4 sm:$0xff]  }
 0x10c   : > { %1738 = vmatpush2.bf16.msra.mxu0 %v3547_v48  ;;  %v3645_v48 = vld [vmem:[%s4579_s30 + $0x1a4] ss:$16 sps:$4 sm:$0xff]  }
 0x10d   : > { %1781 = vmatpush2.bf16.msra.mxu1 %v3550_v49  ;;  %1739 = vmatprep.subr.bf16.mxu0 %v3555_v50  ;;  %v3648_v49 = vld [vmem:[%s4579_s30 + $0x3a4] ss:$16 sps:$4 sm:$0xff]   ;;  %v3643_v50 = vld [vmem:[%s4579_s30 + $0x1a0] ss:$16 sps:$4 sm:$0xff]  }
 0x10e   : > { %1782 = vmatprep.subr.bf16.mxu1 %v3558_v51  ;;  %v3646_v51 = vld [vmem:[%s4579_s30 + $0x3a0] ss:$16 sps:$4 sm:$0xff]  }
 0x110   : > { %1740 = vmatpush2.bf16.msra.mxu0 %v3553_v52  ;;  %v3651_v52 = vld [vmem:[%s4579_s30 + $0x184] ss:$16 sps:$4 sm:$0xff]  }
 0x111   : > { %1783 = vmatpush2.bf16.msra.mxu1 %v3556_v53  ;;  %1741 = vmatprep.subr.bf16.mxu0 %v3561_v54  ;;  %v3654_v53 = vld [vmem:[%s4579_s30 + $0x384] ss:$16 sps:$4 sm:$0xff]   ;;  %v3649_v54 = vld [vmem:[%s4579_s30 + $0x180] ss:$16 sps:$4 sm:$0xff]  }
 0x112   : > { %1784 = vmatprep.subr.bf16.mxu1 %v3564_v55  ;;  %v3652_v55 = vld [vmem:[%s4579_s30 + $0x380] ss:$16 sps:$4 sm:$0xff]  }
 0x114   : > { %1742 = vmatpush2.bf16.msra.mxu0 %v3559_v56  ;;  %v3657_v56 = vld [vmem:[%s4579_s30 + $0x164] ss:$16 sps:$4 sm:$0xff]  }
 0x115   : > { %1785 = vmatpush2.bf16.msra.mxu1 %v3562_v57  ;;  %1743 = vmatprep.subr.bf16.mxu0 %v3567_v58  ;;  %v3660_v57 = vld [vmem:[%s4579_s30 + $0x364] ss:$16 sps:$4 sm:$0xff]   ;;  %v3655_v58 = vld [vmem:[%s4579_s30 + $0x160] ss:$16 sps:$4 sm:$0xff]  }
 0x116   : > { %1786 = vmatprep.subr.bf16.mxu1 %v3570_v59  ;;  %v3658_v59 = vld [vmem:[%s4579_s30 + $0x360] ss:$16 sps:$4 sm:$0xff]  }
 0x118   : > { %1744 = vmatpush2.bf16.msra.mxu0 %v3565_v60  ;;  %v3663_v60 = vld [vmem:[%s4579_s30 + $0x144] ss:$16 sps:$4 sm:$0xff]  }
 0x119   : > { %1787 = vmatpush2.bf16.msra.mxu1 %v3568_v61  ;;  %1745 = vmatprep.subr.bf16.mxu0 %v3573_v62  ;;  %v3666_v61 = vld [vmem:[%s4579_s30 + $0x344] ss:$16 sps:$4 sm:$0xff]   ;;  %v3661_v62 = vld [vmem:[%s4579_s30 + $0x140] ss:$16 sps:$4 sm:$0xff]  }
 0x11a   : > { %1788 = vmatprep.subr.bf16.mxu1 %v3576_v63  ;;  %v3664_v63 = vld [vmem:[%s4579_s30 + $0x340] ss:$16 sps:$4 sm:$0xff]  }
 0x11c   : > { %1746 = vmatpush2.bf16.msra.mxu0 %v3571_v2  ;;  %v3669_v2 = vld [vmem:[%s4579_s30 + $0x124] ss:$16 sps:$4 sm:$0xff]  }
 0x11d   : > { %1789 = vmatpush2.bf16.msra.mxu1 %v3574_v3  ;;  %1747 = vmatprep.subr.bf16.mxu0 %v3579_v4  ;;  %v3672_v3 = vld [vmem:[%s4579_s30 + $0x324] ss:$16 sps:$4 sm:$0xff]   ;;  %v3667_v4 = vld [vmem:[%s4579_s30 + $0x120] ss:$16 sps:$4 sm:$0xff]  }
 0x11e   : > { %1790 = vmatprep.subr.bf16.mxu1 %v3582_v5  ;;  %v3670_v5 = vld [vmem:[%s4579_s30 + $0x320] ss:$16 sps:$4 sm:$0xff]  }
 0x120   : > { %1748 = vmatpush2.bf16.msra.mxu0 %v3577_v8  ;;  %v3675_v8 = vld [vmem:[%s4579_s30 + $0x104] ss:$16 sps:$4 sm:$0xff]  }
 0x121   : > { %1791 = vmatpush2.bf16.msra.mxu1 %v3580_v9  ;;  %2595 = vmatprep.subr.bf16.mxu0 %v3585_v10  ;;  %v3678_v9 = vld [vmem:[%s4579_s30 + $0x304] ss:$16 sps:$4 sm:$0xff]   ;;  %v3673_v10 = vld [vmem:[%s4579_s30 + $0x100] ss:$16 sps:$4 sm:$0xff]  }
 0x122   : > { %2638 = vmatprep.subr.bf16.mxu1 %v3588_v11  ;;  %v3676_v11 = vld [vmem:[%s4579_s30 + $0x300] ss:$16 sps:$4 sm:$0xff]  }
 0x123   : > { %1750 = vmatmul.mubr.bf16.vlgmr.msra.gmra.mxu0 %v4543_v6 }
 0x124   : > { %1793 = vmatmul.mubr.bf16.vlgmr.msra.gmra.mxu1 %v4548_v7  ;;  %2596 = vmatpush1.bf16.msra.mxu0 %v3583_v12  ;;  %v3681_v12 = vld [vmem:[%s4579_s30 + $0xec] ss:$16 sps:$4 sm:$0xff]  }
 0x125   : > { %2639 = vmatpush1.bf16.msra.mxu1 %v3586_v13  ;;  %2597 = vmatprep.subr.bf16.mxu0 %v3591_v14  ;;  %v3684_v13 = vld [vmem:[%s4579_s30 + $0x2ec] ss:$16 sps:$4 sm:$0xff]   ;;  %v3679_v14 = vld [vmem:[%s4579_s30 + $0xe8] ss:$16 sps:$4 sm:$0xff]  }
 0x126   : > { %2640 = vmatprep.subr.bf16.mxu1 %v3594_v15  ;;  %2627 = vmatprep.mubr.bf16.mxu0 %v4458_v0  ;;  %v3609_v0 = vld [vmem:[%s4579_s30 + $0x64] ss:$16 sps:$4 sm:$0xff]   ;;  %v3682_v15 = vld [vmem:[%s4579_s30 + $0x2e8] ss:$16 sps:$4 sm:$0xff]  }
 0x127   : > { %2670 = vmatprep.mubr.bf16.mxu1 %v4467_v1  ;;  %v3612_v1 = vld [vmem:[%s4579_s30 + $0x264] ss:$16 sps:$4 sm:$0xff]  }
 0x128   : > { %2598 = vmatpush1.bf16.msra.mxu0 %v3589_v16  ;;  %v3687_v16 = vld [vmem:[%s4579_s30 + $0xcc] ss:$16 sps:$4 sm:$0xff]  }
 0x129   : > { %2641 = vmatpush1.bf16.msra.mxu1 %v3592_v17  ;;  %2599 = vmatprep.subr.bf16.mxu0 %v3597_v18  ;;  %v3690_v17 = vld [vmem:[%s4579_s30 + $0x2cc] ss:$16 sps:$4 sm:$0xff]   ;;  %v3685_v18 = vld [vmem:[%s4579_s30 + $0xc8] ss:$16 sps:$4 sm:$0xff]  }
 0x12a   : > { %2642 = vmatprep.subr.bf16.mxu1 %v3600_v19  ;;  %v3688_v19 = vld [vmem:[%s4579_s30 + $0x2c8] ss:$16 sps:$4 sm:$0xff]  }
 0x12c   : > { %2600 = vmatpush1.bf16.msra.mxu0 %v3595_v20  ;;  %v3693_v20 = vld [vmem:[%s4579_s30 + $0xac] ss:$16 sps:$4 sm:$0xff]  }
 0x12d   : > { %2643 = vmatpush1.bf16.msra.mxu1 %v3598_v21  ;;  %2601 = vmatprep.subr.bf16.mxu0 %v3603_v22  ;;  %v3696_v21 = vld [vmem:[%s4579_s30 + $0x2ac] ss:$16 sps:$4 sm:$0xff]   ;;  %v3691_v22 = vld [vmem:[%s4579_s30 + $0xa8] ss:$16 sps:$4 sm:$0xff]  }
 0x12e   : > { %2644 = vmatprep.subr.bf16.mxu1 %v3606_v23  ;;  %v3694_v23 = vld [vmem:[%s4579_s30 + $0x2a8] ss:$16 sps:$4 sm:$0xff]  }
 0x130   : > { %2602 = vmatpush1.bf16.msra.mxu0 %v3601_v24  ;;  %v3699_v24 = vld [vmem:[%s4579_s30 + $0x8c] ss:$16 sps:$4 sm:$0xff]  }
 0x131   : > { %2645 = vmatpush1.bf16.msra.mxu1 %v3604_v25  ;;  %2603 = vmatprep.subr.bf16.mxu0 %v3609_v0  ;;  %v3702_v25 = vld [vmem:[%s4579_s30 + $0x28c] ss:$16 sps:$4 sm:$0xff]   ;;  %v3697_v0 = vld [vmem:[%s4579_s30 + $0x88] ss:$16 sps:$4 sm:$0xff]  }
 0x132   : > { %2646 = vmatprep.subr.bf16.mxu1 %v3612_v1  ;;  %v3700_v1 = vld [vmem:[%s4579_s30 + $0x288] ss:$16 sps:$4 sm:$0xff]  }
 0x134   : > { %2604 = vmatpush1.bf16.msra.mxu0 %v3607_v26  ;;  %v3705_v26 = vld [vmem:[%s4579_s30 + $0x6c] ss:$16 sps:$4 sm:$0xff]  }
 0x135   : > { %2647 = vmatpush1.bf16.msra.mxu1 %v3610_v27  ;;  %2605 = vmatprep.subr.bf16.mxu0 %v3615_v28  ;;  %v3708_v27 = vld [vmem:[%s4579_s30 + $0x26c] ss:$16 sps:$4 sm:$0xff]   ;;  %v3703_v28 = vld [vmem:[%s4579_s30 + $0x68] ss:$16 sps:$4 sm:$0xff]  }
 0x136   : > { %2648 = vmatprep.subr.bf16.mxu1 %v3618_v29  ;;  %v3706_v29 = vld [vmem:[%s4579_s30 + $0x268] ss:$16 sps:$4 sm:$0xff]  }
 0x138   : > { %2606 = vmatpush1.bf16.msra.mxu0 %v3613_v30  ;;  %v3711_v30 = vld [vmem:[%s4579_s30 + $0x4c] ss:$16 sps:$4 sm:$0xff]  }
 0x139   : > { %2649 = vmatpush1.bf16.msra.mxu1 %v3616_v31  ;;  %2607 = vmatprep.subr.bf16.mxu0 %v3621_v32  ;;  %v3714_v31 = vld [vmem:[%s4579_s30 + $0x24c] ss:$16 sps:$4 sm:$0xff]   ;;  %v3709_v32 = vld [vmem:[%s4579_s30 + $0x48] ss:$16 sps:$4 sm:$0xff]  }
 0x13a   : > { %2650 = vmatprep.subr.bf16.mxu1 %v3624_v33  ;;  %v3712_v33 = vld [vmem:[%s4579_s30 + $0x248] ss:$16 sps:$4 sm:$0xff]  }
 0x13c   : > { %2608 = vmatpush1.bf16.msra.mxu0 %v3619_v34  ;;  %v3717_v34 = vld [vmem:[%s4579_s30 + $0x2c] ss:$16 sps:$4 sm:$0xff]  }
 0x13d   : > { %2651 = vmatpush1.bf16.msra.mxu1 %v3622_v35  ;;  %2609 = vmatprep.subr.bf16.mxu0 %v3627_v36  ;;  %v3720_v35 = vld [vmem:[%s4579_s30 + $0x22c] ss:$16 sps:$4 sm:$0xff]   ;;  %v3715_v36 = vld [vmem:[%s4579_s30 + $0x28] ss:$16 sps:$4 sm:$0xff]  }
 0x13e   : > { %2652 = vmatprep.subr.bf16.mxu1 %v3630_v37  ;;  %v3718_v37 = vld [vmem:[%s4579_s30 + $0x228] ss:$16 sps:$4 sm:$0xff]  }
 0x140   : > { %2610 = vmatpush1.bf16.msra.mxu0 %v3625_v38  ;;  %v3723_v38 = vld [vmem:[%s4579_s30 + $0xc] ss:$16 sps:$4 sm:$0xff]  }
 0x141   : > { %2653 = vmatpush1.bf16.msra.mxu1 %v3628_v39  ;;  %2611 = vmatprep.subr.bf16.mxu0 %v3633_v40  ;;  %v3726_v39 = vld [vmem:[%s4579_s30 + $0x20c] ss:$16 sps:$4 sm:$0xff]   ;;  %v3721_v40 = vld [vmem:[%s4579_s30 + $0x8] ss:$16 sps:$4 sm:$0xff]  }
 0x142   : > { %2654 = vmatprep.subr.bf16.mxu1 %v3636_v41  ;;  %v3724_v41 = vld [vmem:[%s4579_s30 + $0x208] ss:$16 sps:$4 sm:$0xff]  }
 0x144   : > { %2612 = vmatpush2.bf16.msra.mxu0 %v3631_v42  ;;  %v3729_v42 = vld [vmem:[%s4579_s30 + $0x1ec] ss:$16 sps:$4 sm:$0xff]  }
 0x145   : > { %2655 = vmatpush2.bf16.msra.mxu1 %v3634_v43  ;;  %2613 = vmatprep.subr.bf16.mxu0 %v3639_v44  ;;  %v3732_v43 = vld [vmem:[%s4579_s30 + $0x3ec] ss:$16 sps:$4 sm:$0xff]   ;;  %v3727_v44 = vld [vmem:[%s4579_s30 + $0x1e8] ss:$16 sps:$4 sm:$0xff]  }
 0x146   : > { %2656 = vmatprep.subr.bf16.mxu1 %v3642_v45  ;;  %v3730_v45 = vld [vmem:[%s4579_s30 + $0x3e8] ss:$16 sps:$4 sm:$0xff]  }
 0x148   : > { %2614 = vmatpush2.bf16.msra.mxu0 %v3637_v46  ;;  %v3735_v46 = vld [vmem:[%s4579_s30 + $0x1cc] ss:$16 sps:$4 sm:$0xff]  }
 0x149   : > { %2657 = vmatpush2.bf16.msra.mxu1 %v3640_v47  ;;  %2615 = vmatprep.subr.bf16.mxu0 %v3645_v48  ;;  %v3738_v47 = vld [vmem:[%s4579_s30 + $0x3cc] ss:$16 sps:$4 sm:$0xff]   ;;  %v3733_v48 = vld [vmem:[%s4579_s30 + $0x1c8] ss:$16 sps:$4 sm:$0xff]  }
 0x14a   : > { %2658 = vmatprep.subr.bf16.mxu1 %v3648_v49  ;;  %v3736_v49 = vld [vmem:[%s4579_s30 + $0x3c8] ss:$16 sps:$4 sm:$0xff]  }
 0x14c   : > { %2616 = vmatpush2.bf16.msra.mxu0 %v3643_v50  ;;  %v3741_v50 = vld [vmem:[%s4579_s30 + $0x1ac] ss:$16 sps:$4 sm:$0xff]  }
 0x14d   : > { %2659 = vmatpush2.bf16.msra.mxu1 %v3646_v51  ;;  %2617 = vmatprep.subr.bf16.mxu0 %v3651_v52  ;;  %v3744_v51 = vld [vmem:[%s4579_s30 + $0x3ac] ss:$16 sps:$4 sm:$0xff]   ;;  %v3739_v52 = vld [vmem:[%s4579_s30 + $0x1a8] ss:$16 sps:$4 sm:$0xff]  }
 0x14e   : > { %2660 = vmatprep.subr.bf16.mxu1 %v3654_v53  ;;  %v3742_v53 = vld [vmem:[%s4579_s30 + $0x3a8] ss:$16 sps:$4 sm:$0xff]  }
 0x150   : > { %2618 = vmatpush2.bf16.msra.mxu0 %v3649_v54  ;;  %v3747_v54 = vld [vmem:[%s4579_s30 + $0x18c] ss:$16 sps:$4 sm:$0xff]  }
 0x151   : > { %2661 = vmatpush2.bf16.msra.mxu1 %v3652_v55  ;;  %2619 = vmatprep.subr.bf16.mxu0 %v3657_v56  ;;  %v3750_v55 = vld [vmem:[%s4579_s30 + $0x38c] ss:$16 sps:$4 sm:$0xff]   ;;  %v3745_v56 = vld [vmem:[%s4579_s30 + $0x188] ss:$16 sps:$4 sm:$0xff]  }
 0x152   : > { %2662 = vmatprep.subr.bf16.mxu1 %v3660_v57  ;;  %v3748_v57 = vld [vmem:[%s4579_s30 + $0x388] ss:$16 sps:$4 sm:$0xff]  }
 0x154   : > { %2620 = vmatpush2.bf16.msra.mxu0 %v3655_v58  ;;  %v3753_v58 = vld [vmem:[%s4579_s30 + $0x16c] ss:$16 sps:$4 sm:$0xff]  }
 0x155   : > { %2663 = vmatpush2.bf16.msra.mxu1 %v3658_v59  ;;  %2621 = vmatprep.subr.bf16.mxu0 %v3663_v60  ;;  %v3756_v59 = vld [vmem:[%s4579_s30 + $0x36c] ss:$16 sps:$4 sm:$0xff]   ;;  %v3751_v60 = vld [vmem:[%s4579_s30 + $0x168] ss:$16 sps:$4 sm:$0xff]  }
 0x156   : > { %2664 = vmatprep.subr.bf16.mxu1 %v3666_v61  ;;  %v3754_v61 = vld [vmem:[%s4579_s30 + $0x368] ss:$16 sps:$4 sm:$0xff]  }
 0x158   : > { %2622 = vmatpush2.bf16.msra.mxu0 %v3661_v62  ;;  %v3759_v62 = vld [vmem:[%s4579_s30 + $0x14c] ss:$16 sps:$4 sm:$0xff]  }
 0x159   : > { %2665 = vmatpush2.bf16.msra.mxu1 %v3664_v63  ;;  %2623 = vmatprep.subr.bf16.mxu0 %v3669_v2  ;;  %v3762_v63 = vld [vmem:[%s4579_s30 + $0x34c] ss:$16 sps:$4 sm:$0xff]   ;;  %v3757_v2 = vld [vmem:[%s4579_s30 + $0x148] ss:$16 sps:$4 sm:$0xff]  }
 0x15a   : > { %2666 = vmatprep.subr.bf16.mxu1 %v3672_v3  ;;  %v3760_v3 = vld [vmem:[%s4579_s30 + $0x348] ss:$16 sps:$4 sm:$0xff]  }
 0x15c   : > { %2624 = vmatpush2.bf16.msra.mxu0 %v3667_v4  ;;  %v3765_v4 = vld [vmem:[%s4579_s30 + $0x12c] ss:$16 sps:$4 sm:$0xff]  }
 0x15d   : > { %2667 = vmatpush2.bf16.msra.mxu1 %v3670_v5  ;;  %2625 = vmatprep.subr.bf16.mxu0 %v3675_v8  ;;  %v3768_v5 = vld [vmem:[%s4579_s30 + $0x32c] ss:$16 sps:$4 sm:$0xff]   ;;  %v3763_v8 = vld [vmem:[%s4579_s30 + $0x128] ss:$16 sps:$4 sm:$0xff]  }
 0x15e   : > { %2668 = vmatprep.subr.bf16.mxu1 %v3678_v9  ;;  %v3766_v9 = vld [vmem:[%s4579_s30 + $0x328] ss:$16 sps:$4 sm:$0xff]  }
 0x160   : > { %2626 = vmatpush2.bf16.msra.mxu0 %v3673_v10  ;;  %v3771_v10 = vld [vmem:[%s4579_s30 + $0x10c] ss:$16 sps:$4 sm:$0xff]  }
 0x161   : > { %2669 = vmatpush2.bf16.msra.mxu1 %v3676_v11  ;;  %2681 = vmatprep.subr.bf16.mxu0 %v3681_v12  ;;  %v3774_v11 = vld [vmem:[%s4579_s30 + $0x30c] ss:$16 sps:$4 sm:$0xff]   ;;  %v3769_v12 = vld [vmem:[%s4579_s30 + $0x108] ss:$16 sps:$4 sm:$0xff]  }
 0x162   : > { %2724 = vmatprep.subr.bf16.mxu1 %v3684_v13  ;;  %v3772_v13 = vld [vmem:[%s4579_s30 + $0x308] ss:$16 sps:$4 sm:$0xff]  }
 0x163   : > { %2628 = vmatmul.mubr.bf16.vlgmr.msra.gmra.mxu0 %v4543_v6  ;;  %v3807_v6 = vld [vmem:[%s4798_s0 + $0x4] ss:$16 sps:$4 sm:$0xff]  }
 0x164   : > { %2671 = vmatmul.mubr.bf16.vlgmr.msra.gmra.mxu1 %v4548_v7  ;;  %2682 = vmatpush1.bf16.msra.mxu0 %v3679_v14  ;;  %v3808_v7 = vld [vmem:[%s4798_s0 + $0xc] ss:$16 sps:$4 sm:$0xff]   ;;  %v3809_v14 = vld [vmem:[%s4798_s0] ss:$16 sps:$4 sm:$0xff]  }
 0x165   : > { %2725 = vmatpush1.bf16.msra.mxu1 %v3682_v15  ;;  %2683 = vmatprep.subr.bf16.mxu0 %v3687_v16  ;;  %v3810_v15 = vld [vmem:[%s4798_s0 + $0x8] ss:$16 sps:$4 sm:$0xff]  }
 0x166   : > { %2726 = vmatprep.subr.bf16.mxu1 %v3690_v17  ;;  %2713 = vmatprep.mubr.bf16.mxu0 %v3807_v6 }
 0x167   : > { %2756 = vmatprep.mubr.bf16.mxu1 %v3808_v7 }
 0x168   : > { %2684 = vmatpush1.bf16.msra.mxu0 %v3685_v18 }
 0x169   : > { %2727 = vmatpush1.bf16.msra.mxu1 %v3688_v19  ;;  %2685 = vmatprep.subr.bf16.mxu0 %v3693_v20 }
 0x16a   : > { %2728 = vmatprep.subr.bf16.mxu1 %v3696_v21 }
 0x16c   : > { %2686 = vmatpush1.bf16.msra.mxu0 %v3691_v22 }
 0x16d   : > { %2729 = vmatpush1.bf16.msra.mxu1 %v3694_v23  ;;  %2687 = vmatprep.subr.bf16.mxu0 %v3699_v24 }
 0x16e   : > { %2730 = vmatprep.subr.bf16.mxu1 %v3702_v25 }
 0x170   : > { %2688 = vmatpush1.bf16.msra.mxu0 %v3697_v0 }
 0x171   : > { %2731 = vmatpush1.bf16.msra.mxu1 %v3700_v1  ;;  %2689 = vmatprep.subr.bf16.mxu0 %v3705_v26 }
 0x172   : > { %2732 = vmatprep.subr.bf16.mxu1 %v3708_v27 }
 0x174   : > { %2690 = vmatpush1.bf16.msra.mxu0 %v3703_v28 }
 0x175   : > { %2733 = vmatpush1.bf16.msra.mxu1 %v3706_v29  ;;  %2691 = vmatprep.subr.bf16.mxu0 %v3711_v30 }
 0x176   : > { %2734 = vmatprep.subr.bf16.mxu1 %v3714_v31 }
 0x178   : > { %2692 = vmatpush1.bf16.msra.mxu0 %v3709_v32 }
 0x179   : > { %2735 = vmatpush1.bf16.msra.mxu1 %v3712_v33  ;;  %2693 = vmatprep.subr.bf16.mxu0 %v3717_v34 }
 0x17a   : > { %2736 = vmatprep.subr.bf16.mxu1 %v3720_v35 }
 0x17c   : > { %2694 = vmatpush1.bf16.msra.mxu0 %v3715_v36 }
 0x17d   : > { %2737 = vmatpush1.bf16.msra.mxu1 %v3718_v37  ;;  %2695 = vmatprep.subr.bf16.mxu0 %v3723_v38 }
 0x17e   : > { %2738 = vmatprep.subr.bf16.mxu1 %v3726_v39 }
 0x180   : > { %2696 = vmatpush1.bf16.msra.mxu0 %v3721_v40 }
 0x181   : > { %2739 = vmatpush1.bf16.msra.mxu1 %v3724_v41  ;;  %2697 = vmatprep.subr.bf16.mxu0 %v3729_v42 }
 0x182   : > { %2740 = vmatprep.subr.bf16.mxu1 %v3732_v43 }
 0x184   : > { %2698 = vmatpush2.bf16.msra.mxu0 %v3727_v44 }
 0x185   : > { %2741 = vmatpush2.bf16.msra.mxu1 %v3730_v45  ;;  %2699 = vmatprep.subr.bf16.mxu0 %v3735_v46 }
 0x186   : > { %2742 = vmatprep.subr.bf16.mxu1 %v3738_v47 }
 0x188   : > { %2700 = vmatpush2.bf16.msra.mxu0 %v3733_v48 }
 0x189   : > { %2743 = vmatpush2.bf16.msra.mxu1 %v3736_v49  ;;  %2701 = vmatprep.subr.bf16.mxu0 %v3741_v50 }
 0x18a   : > { %2744 = vmatprep.subr.bf16.mxu1 %v3744_v51 }
 0x18c   : > { %2702 = vmatpush2.bf16.msra.mxu0 %v3739_v52 }
 0x18d   : > { %2745 = vmatpush2.bf16.msra.mxu1 %v3742_v53  ;;  %2703 = vmatprep.subr.bf16.mxu0 %v3747_v54 }
 0x18e   : > { %2746 = vmatprep.subr.bf16.mxu1 %v3750_v55 }
 0x190   : > { %2704 = vmatpush2.bf16.msra.mxu0 %v3745_v56 }
 0x191   : > { %2747 = vmatpush2.bf16.msra.mxu1 %v3748_v57  ;;  %2705 = vmatprep.subr.bf16.mxu0 %v3753_v58 }
 0x192   : > { %2748 = vmatprep.subr.bf16.mxu1 %v3756_v59 }
 0x194   : > { %2706 = vmatpush2.bf16.msra.mxu0 %v3751_v60 }
 0x195   : > { %2749 = vmatpush2.bf16.msra.mxu1 %v3754_v61  ;;  %2707 = vmatprep.subr.bf16.mxu0 %v3759_v62 }
 0x196   : > { %2750 = vmatprep.subr.bf16.mxu1 %v3762_v63 }
 0x198   : > { %2708 = vmatpush2.bf16.msra.mxu0 %v3757_v2 }
 0x199   : > { %2751 = vmatpush2.bf16.msra.mxu1 %v3760_v3  ;;  %2709 = vmatprep.subr.bf16.mxu0 %v3765_v4 }
 0x19a   : > { %2752 = vmatprep.subr.bf16.mxu1 %v3768_v5 }
 0x19c   : > { %2710 = vmatpush2.bf16.msra.mxu0 %v3763_v8 }
 0x19d   : > { %2753 = vmatpush2.bf16.msra.mxu1 %v3766_v9  ;;  %2711 = vmatprep.subr.bf16.mxu0 %v3771_v10 }
 0x19e   : > { %2754 = vmatprep.subr.bf16.mxu1 %v3774_v11 }
 0x1a0   : > { %2712 = vmatpush2.bf16.msra.mxu0 %v3769_v12 }
 0x1a1   : > { %2755 = vmatpush2.bf16.msra.mxu1 %v3772_v13 }
 0x1a3   : > { %2714 = vmatmul.mubr.bf16.vlgmr.msra.gmra.mxu0 %v3809_v14  ;;  %v1665_v16 = vpop.f32.mrf.mxu0 }
 0x1a4   : > { %2757 = vmatmul.mubr.bf16.vlgmr.msra.gmra.mxu1 %v3810_v15  ;;  %v1708_v17 = vpop.f32.mrf.mxu1 }
 0x1a5   : > { %v1667_v18 = vpop.f32.mrf.mxu0  ;;  %v1709_v6 = vadd.f32 %v1708_v17, %v1665_v16 }
 0x1a6   : > { %v1710_v19 = vpop.f32.mrf.mxu1 }
 0x1a7   : > { %v1669_v20 = vpop.f32.mrf.mxu0  ;;  %v1711_v7 = vadd.f32 %v1710_v19, %v1667_v18  ;;  %v3321_v24 = vmul.f32 -1.442695, %v1709_v6 }
 0x1a8   : > { %v1712_v21 = vpop.f32.mrf.mxu1 }
 0x1a9   : > { %v1671_v22 = vpop.f32.mrf.mxu0  ;;  %v1713_v25 = vadd.f32 %v1712_v21, %v1669_v20  ;;  %v3322_v0 = vmul.f32 -1.442695, %v1711_v7  ;;  %3775 = vpow2.f32 %v3321_v24 }
 0x1aa   : > { %v1714_v23 = vpop.f32.mrf.mxu1 }
 0x1ab   : > { %v1715_v1 = vadd.f32 %v1714_v23, %v1671_v22  ;;  %v3325_v26 = vmul.f32 -1.442695, %v1713_v25  ;;  %3777 = vpow2.f32 %v3322_v0 }
 0x1ad   : > { %v3326_v27 = vmul.f32 -1.442695, %v1715_v1  ;;  %3779 = vpow2.f32 %v3325_v26 }
 0x1af   : > { %3781 = vpow2.f32 %v3326_v27 }
 0x1b6   : > { %v3776_v28 = vpop.eup %3775 }
 0x1b7   : > { %v2818_v30 = vadd.f32 1.0, %v3776_v28 }
 0x1b8   : > { %v3778_v29 = vpop.eup %3777 }
 0x1b9   : > { %v2819_v32 = vadd.f32 1.0, %v3778_v29  ;;  %3783 = vrcp.f32 %v2818_v30 }
 0x1ba   : > { %v3780_v31 = vpop.eup %3779 }
 0x1bb   : > { %v2822_v34 = vadd.f32 1.0, %v3780_v31  ;;  %3785 = vrcp.f32 %v2819_v32 }
 0x1bc   : > { %v3782_v33 = vpop.eup %3781 }
 0x1bd   : > { %v2823_v37 = vadd.f32 1.0, %v3782_v33  ;;  %3787 = vrcp.f32 %v2822_v34 }
 0x1bf   : > { %3789 = vrcp.f32 %v2823_v37 }
 0x1c6   : > { %v3784_v44 = vpop.eup %3783 }
 0x1c7   : > { %v2842_v52 = vmul.f32 %v3784_v44, %v1709_v6 }
 0x1c8   : > { %v3786_v45 = vpop.eup %3785 }
 0x1c9   : > { %v2843_v53 = vmul.f32 %v3786_v45, %v1711_v7 }
 0x1ca   : > { %v3788_v51 = vpop.eup %3787 }
 0x1cb   : > { %v2846_v63 = vmul.f32 %v3788_v51, %v1713_v25 }
 0x1cc   : > { %v3790_v55 = vpop.eup %3789 }
 0x1cd   : > { %v2847_v2 = vmul.f32 %v3790_v55, %v1715_v1 }
 0x1e3   : > { %v1751_v35 = vpop.f32.mrf.mxu0 }
 0x1e4   : > { %v1794_v36 = vpop.f32.mrf.mxu1 }
 0x1e5   : > { %v1753_v38 = vpop.f32.mrf.mxu0  ;;  %v1795_v10 = vadd.f32 %v1794_v36, %v1751_v35 }
 0x1e6   : > { %v1796_v39 = vpop.f32.mrf.mxu1 }
 0x1e7   : > { %v1755_v40 = vpop.f32.mrf.mxu0  ;;  %v1797_v11 = vadd.f32 %v1796_v39, %v1753_v38  ;;  %v3323_v12 = vmul.f32 -1.442695, %v1795_v10 }
 0x1e8   : > { %v1798_v41 = vpop.f32.mrf.mxu1 }
 0x1e9   : > { %v1757_v42 = vpop.f32.mrf.mxu0  ;;  %v1799_v13 = vadd.f32 %v1798_v41, %v1755_v40  ;;  %v3324_v14 = vmul.f32 -1.442695, %v1797_v11  ;;  %3791 = vpow2.f32 %v3323_v12 }
 0x1ea   : > { %v1800_v43 = vpop.f32.mrf.mxu1 }
 0x1eb   : > { %v1801_v15 = vadd.f32 %v1800_v43, %v1757_v42  ;;  %v3327_v16 = vmul.f32 -1.442695, %v1799_v13  ;;  %3793 = vpow2.f32 %v3324_v14 }
 0x1ed   : > { %v3328_v17 = vmul.f32 -1.442695, %v1801_v15  ;;  %3795 = vpow2.f32 %v3327_v16 }
 0x1ef   : > { %3797 = vpow2.f32 %v3328_v17 }
 0x1f6   : > { %v3792_v18 = vpop.eup %3791 }
 0x1f7   : > { %v2820_v20 = vadd.f32 1.0, %v3792_v18 }
 0x1f8   : > { %v3794_v19 = vpop.eup %3793 }
 0x1f9   : > { %v2821_v6 = vadd.f32 1.0, %v3794_v19  ;;  %3799 = vrcp.f32 %v2820_v20 }
 0x1fa   : > { %v3796_v21 = vpop.eup %3795 }
 0x1fb   : > { %v2824_v22 = vadd.f32 1.0, %v3796_v21  ;;  %3801 = vrcp.f32 %v2821_v6 }
 0x1fc   : > { %v3798_v7 = vpop.eup %3797 }
 0x1fd   : > { %v2825_v23 = vadd.f32 1.0, %v3798_v7  ;;  %3803 = vrcp.f32 %v2824_v22 }
 0x1ff   : > { %3805 = vrcp.f32 %v2825_v23 }
 0x206   : > { %v3800_v24 = vpop.eup %3799 }
 0x207   : > { %v2844_v30 = vmul.f32 %v3800_v24, %v1795_v10 }
 0x208   : > { %v3802_v25 = vpop.eup %3801 }
 0x209   : > { %v2845_v31 = vmul.f32 %v3802_v25, %v1797_v11 }
 0x20a   : > { %v3804_v29 = vpop.eup %3803 }
 0x20b   : > { %v2848_v41 = vmul.f32 %v3804_v29, %v1799_v13 }
 0x20c   : > { %v3806_v33 = vpop.eup %3805 }
 0x20d   : > { %v2849_v42 = vmul.f32 %v3806_v33, %v1801_v15 }
 0x223   : > { %v2629_v46 = vpop.f32.mrf.mxu0 }
 0x224   : > { %v2672_v47 = vpop.f32.mrf.mxu1 }
 0x225   : > { %v2673_v48 = vadd.f32 %v2672_v47, %v2629_v46  ;;  %v2631_v49 = vpop.f32.mrf.mxu0 }
 0x226   : > { %v2674_v50 = vpop.f32.mrf.mxu1 }
 0x227   : > { %v2675_v54 = vadd.f32 %v2674_v50, %v2631_v49  ;;  %v2633_v56 = vpop.f32.mrf.mxu0  ;;  %v2858_v58 = vmul.f32 %v2842_v52, %v2673_v48 }
 0x228   : > { %v2676_v57 = vpop.f32.mrf.mxu1 }
 0x229   : > { %v2859_v59 = vmul.f32 %v2843_v53, %v2675_v54  ;;  %v2677_v60 = vadd.f32 %v2676_v57, %v2633_v56  ;;  %v2635_v61 = vpop.f32.mrf.mxu0 }
 0x22a   : > { %v2678_v62 = vpop.f32.mrf.mxu1 }
 0x22b   : > { %v3340_v3 = vpack.c.bf16 %v2859_v59, %v2858_v58  ;;  %v2679_v4 = vadd.f32 %v2678_v62, %v2635_v61  ;;  %v2862_v5 = vmul.f32 %v2846_v63, %v2677_v60 }
 0x22d   : > { %2890 = vst [vmem:[%s4767_s20] sm:$0xff] %v3340_v3  ;;  %v2863_v8 = vmul.f32 %v2847_v2, %v2679_v4 }
 0x22f   : > { %v3342_v9 = vpack.c.bf16 %v2863_v8, %v2862_v5 }
 0x231   : > { %2892 = vst [vmem:[%s4767_s20 + $0x10] sm:$0xff] %v3342_v9 }
 0x234   : > { %v2919_v48 = vld [vmem:[%s4767_s20] sm:$0xff] (%p3910_p6) }
 0x235   : > { %2920 = vst [vmem:[%s2906_s24] sm:$0xff] (%p3910_p6), %v2919_v48 }
 0x238   : > { %v2923_v50 = vld [vmem:[%s4767_s20 + $0x10] sm:$0xff] (%p3910_p6) }
 0x239   : > { %2924 = vst [vmem:[%s2906_s24 + $0x20] sm:$0xff] (%p3910_p6), %v2923_v50 }
 0x263   : > { %v2715_v0 = vpop.f32.mrf.mxu0 }
 0x264   : > { %v2758_v1 = vpop.f32.mrf.mxu1 }
 0x265   : > { %v2759_v26 = vadd.f32 %v2758_v1, %v2715_v0  ;;  %v2717_v27 = vpop.f32.mrf.mxu0 }
 0x266   : > { %v2760_v28 = vpop.f32.mrf.mxu1 }
 0x267   : > { %v2761_v32 = vadd.f32 %v2760_v28, %v2717_v27  ;;  %v2719_v34 = vpop.f32.mrf.mxu0  ;;  %v2860_v36 = vmul.f32 %v2844_v30, %v2759_v26 }
 0x268   : > { %v2762_v35 = vpop.f32.mrf.mxu1 }
 0x269   : > { %v2861_v37 = vmul.f32 %v2845_v31, %v2761_v32  ;;  %v2763_v38 = vadd.f32 %v2762_v35, %v2719_v34  ;;  %v2721_v39 = vpop.f32.mrf.mxu0 }
 0x26a   : > { %v2764_v40 = vpop.f32.mrf.mxu1 }
 0x26b   : > { %v3341_v43 = vpack.c.bf16 %v2861_v37, %v2860_v36  ;;  %v2765_v44 = vadd.f32 %v2764_v40, %v2721_v39  ;;  %v2864_v45 = vmul.f32 %v2848_v41, %v2763_v38 }
 0x26d   : > { %2891 = vst [vmem:[%s4767_s20 + $0x8] sm:$0xff] %v3341_v43  ;;  %v2865_v46 = vmul.f32 %v2849_v42, %v2765_v44  ;;  %2900 = sbr.rel (!%p3910_p6) target bundleno = 634 (0x27a), region = 90 }
 0x26f   : > { %v3343_v47 = vpack.c.bf16 %v2865_v46, %v2864_v45 }
 0x271   : > { %2893 = vst [vmem:[%s4767_s20 + $0x18] sm:$0xff] %v3343_v47 }
 0x274   : > { %v2921_v49 = vld [vmem:[%s4767_s20 + $0x8] sm:$0xff] }
 0x275   : > { %2922 = vst [vmem:[%s2906_s24 + $0x8] sm:$0xff] %v2921_v49 }
 0x278   : > { %v2925_v51 = vld [vmem:[%s4767_s20 + $0x18] sm:$0xff] }
 0x279   : > { %2926 = vst [vmem:[%s2906_s24 + $0x28] sm:$0xff] %v2925_v51 }
 0x27a PF: > { %s13_s16 = sadd.s32 1, %s3849_s16   ;;  %s4804_s12 = smov %s3837_s13 }
 0x27b   : > { %p10_p11 = scmp.ge.s32.totalorder %s13_s16, 4   ;;  %s4805_s13 = smov %s3915_s23 }
 0x27c   : > { %s4806_s14 = smov %s3845_s15  ;;  %s4807_s15 = smov %s4809_s17 }
 0x27d   :  { %12 = sbr.rel (!%p10_p11) target bundleno = 3 (0x3), region = 155 }

// kernel: custom_llama_model.29
= control target key start
LH: loop header
LB: loop body
LE: loop exit
PB: predicated region body
PF: predicated region fallthrough
CT: control target
= control target key end

     0   :  { %s320_s0 = inlined_call_operand.vmem [shape: bf16[16,512], index: 0, kind: input, shape index: {}]   ;;  %s321_s1 = inlined_call_operand.vmem [shape: bf16[16,512], index: 1, kind: input, shape index: {}, may-alias: {1,4}]   ;;  %s322_s2 = inlined_call_operand.vmem [shape: bf16[1,512], index: 2, kind: input, shape index: {}]   ;;  %s323_s3 = inlined_call_operand.hbm [shape: bf16[16,512], index: 3, kind: output, shape index: {0}]   ;;  %s324_s4 = inlined_call_operand.vmem [shape: bf16[16,512], index: 4, kind: output, shape index: {1}, may-alias: {1,4}]  }
   0x1   :  { %v17_v0 = vld [vmem:[%s320_s0] sm:$0xff]  ;;  %v18_v1 = vld [vmem:[%s320_s0 + $0x8] sm:$0xff]  ;;  %v19_v8 = vld [vmem:[%s320_s0 + $0x10] sm:$0xff] }
   0x2   :  { %v29_v2 = vld [vmem:[%s321_s1] sm:$0xff]  ;;  %v21_v3 = vunpack.c.l.bf16 %v17_v0  ;;  %v22_v4 = vunpack.c.h.bf16 %v17_v0  ;;  %v23_v5 = vunpack.c.l.bf16 %v18_v1  ;;  %v24_v6 = vunpack.c.h.bf16 %v18_v1  ;;  %v30_v7 = vld [vmem:[%s321_s1 + $0x8] sm:$0xff]  ;;  %v20_v9 = vld [vmem:[%s320_s0 + $0x18] sm:$0xff] }
   0x3   :  { %v33_v10 = vunpack.c.l.bf16 %v29_v2  ;;  %v34_v11 = vunpack.c.h.bf16 %v29_v2  ;;  %v35_v12 = vunpack.c.l.bf16 %v30_v7  ;;  %v36_v13 = vunpack.c.h.bf16 %v30_v7  ;;  %v31_v14 = vld [vmem:[%s321_s1 + $0x10] sm:$0xff]  ;;  %v32_v15 = vld [vmem:[%s321_s1 + $0x18] sm:$0xff] }
   0x4   :  { %10 = vsyncpa [#allocation3], 0  ;;  %v25_v16 = vunpack.c.l.bf16 %v19_v8  ;;  %v26_v17 = vunpack.c.h.bf16 %v19_v8  ;;  %v27_v18 = vunpack.c.l.bf16 %v20_v9  ;;  %v28_v19 = vunpack.c.h.bf16 %v20_v9  ;;  %v110_v57 = vld [vmem:[%s322_s2] sm:$0xf]  ;;  %s250_s2 = smov [#allocation2]  }
   0x5   :  { %v41_v20 = vadd.f32 %v33_v10, %v21_v3  ;;  %v42_v21 = vadd.f32 %v34_v11, %v22_v4  ;;  %v43_v22 = vadd.f32 %v35_v12, %v23_v5  ;;  %v44_v23 = vadd.f32 %v36_v13, %v24_v6 }
   0x6   :  { %v37_v24 = vunpack.c.l.bf16 %v31_v14  ;;  %v38_v25 = vunpack.c.h.bf16 %v31_v14  ;;  %v39_v26 = vunpack.c.l.bf16 %v32_v15  ;;  %v40_v27 = vunpack.c.h.bf16 %v32_v15 }
   0x7   :  { %v214_v28 = vpack.c.bf16 %v44_v23, %v43_v22  ;;  %v77_v29 = vmul.f32 %v41_v20, %v41_v20  ;;  %v78_v30 = vmul.f32 %v42_v21, %v42_v21  ;;  %v79_v31 = vmul.f32 %v43_v22, %v43_v22 }
   0x8   :  { %v213_v32 = vpack.c.bf16 %v42_v21, %v41_v20  ;;  %v45_v33 = vadd.f32 %v37_v24, %v25_v16  ;;  %v46_v34 = vadd.f32 %v38_v25, %v26_v17  ;;  %v80_v35 = vmul.f32 %v44_v23, %v44_v23 }
   0x9   :  { %74 = vst [vmem:[%s324_s4 + $0x8] sm:$0xff] %v214_v28  ;;  %v85_v36 = vadd.f32 %v78_v30, %v77_v29  ;;  %v47_v37 = vadd.f32 %v39_v26, %v27_v18  ;;  %v48_v38 = vadd.f32 %v40_v27, %v28_v19  ;;  %v113_v51 = vlaneseq }
   0xa   :  { %73 = vst [vmem:[%s324_s4] sm:$0xff] %v213_v32  ;;  %v215_v39 = vpack.c.bf16 %v46_v34, %v45_v33  ;;  %v81_v40 = vmul.f32 %v45_v33, %v45_v33  ;;  %v82_v41 = vmul.f32 %v46_v34, %v46_v34  ;;  %v111_v59 = vunpack.c.l.bf16 %v110_v57 }
   0xb   :  { %v86_v42 = vadd.f32 %v85_v36, %v79_v31  ;;  %v216_v43 = vpack.c.bf16 %v48_v38, %v47_v37  ;;  %v83_v44 = vmul.f32 %v47_v37, %v47_v37  ;;  %v84_v45 = vmul.f32 %v48_v38, %v48_v38 }
   0xc   :  { %75 = vst [vmem:[%s324_s4 + $0x10] sm:$0xff] %v215_v39  ;;  %v90_v46 = vadd.f32 %v82_v41, %v81_v40  ;;  %v114_v55 = vshrl.u32 %v113_v51, 7 }
   0xd   :  { %v87_v47 = vadd.f32 %v86_v42, %v80_v35  ;;  %76 = vst [vmem:[%s324_s4 + $0x18] sm:$0xff] %v216_v43  ;;  %s190_s4 = sshll.u32 %s250_s2, 4  ;;  %s191_s4 = int_to_ptr.vmem [resolvable:$true] %s190_s4 }
   0xe   :  { %v91_v48 = vadd.f32 %v90_v46, %v83_v44  ;;  %v115_v60 = vsub.s32 0, %v114_v55  ;;  %v119_v61 = vsub.s32 2, %v114_v55  ;;  %v123_v62 = vsub.s32 4, %v114_v55  ;;  %s228_s13 = scalar_lea.vmem %s191_s4, 512  ;;  %p233_p1 = scmp.lt.s32.totalorder %s191_s4, %s191_s4 }
   0xf   :  { %88 = vadd.xlane.f32.xlu0 %v87_v47  ;;  %v127_v63 = vsub.s32 6, %v114_v55  ;;  %p229_p0 = scmp.ne.s32.totalorder %s191_s4, %s228_s13  ;;  %p234_p2 = scmp.lt.s32.totalorder %s228_s13, %s228_s13 }
  0x10   :  { %v92_v49 = vadd.f32 %v91_v48, %v84_v45  ;;  %v116_v0 = vrot.slane %v111_v59, %v115_v60  ;;  %v120_v1 = vrot.slane %v111_v59, %v119_v61  ;;  %v124_v2 = vrot.slane %v111_v59, %v123_v62 }
  0x11   :  { %v128_v3 = vrot.slane %v111_v59, %v127_v63  ;;  %p235_p3 = por %p234_p2, %p233_p1 }
  0x12   :  { %v136_v4 = vrot.slane %v116_v0, %v115_v60  ;;  %v140_v5 = vrot.slane %v120_v1, %v115_v60  ;;  %v144_v6 = vrot.slane %v124_v2, %v115_v60 }
  0x13   :  { %93 = vadd.xlane.f32.xlu0 %v92_v49  ;;  %v148_v7 = vrot.slane %v128_v3, %v115_v60  ;;  %p236_p4 = pnand %p235_p3, %p229_p0 }
  0x98   :  { %v89_v50 = vpop.xlane.xlu0 %88 }
  0x99   :  { %v96_v52 = vmul.f32 0.001953125, %v89_v50 }
  0x9b   :  { %v98_v53 = vadd.f32 1e-06, %v96_v52 }
  0x9c   :  { %v94_v54 = vpop.xlane.xlu0 %93 }
  0x9d   :  { %224 = vrsqrt.f32 %v98_v53  ;;  %v97_v56 = vmul.f32 0.001953125, %v94_v54 }
  0x9f   :  { %v99_v58 = vadd.f32 1e-06, %v97_v56 }
  0xa1   :  { %226 = vrsqrt.f32 %v99_v58 }
  0xaa   :  { %v225_v8 = vpop.eup %224 }
  0xab   :  { %v102_v9 = vmul.f32 %v225_v8, %v41_v20  ;;  %v103_v10 = vmul.f32 %v225_v8, %v42_v21  ;;  %v104_v11 = vmul.f32 %v225_v8, %v43_v22  ;;  %v105_v12 = vmul.f32 %v225_v8, %v44_v23 }
  0xad   :  { %v149_v13 = vmul.f32 %v136_v4, %v102_v9  ;;  %v150_v14 = vmul.f32 %v140_v5, %v103_v10  ;;  %v151_v15 = vmul.f32 %v144_v6, %v104_v11  ;;  %v152_v16 = vmul.f32 %v148_v7, %v105_v12 }
  0xae   :  { %v227_v17 = vpop.eup %226 }
  0xaf   :  { %v106_v18 = vmul.f32 %v227_v17, %v45_v33  ;;  %v107_v19 = vmul.f32 %v227_v17, %v46_v34  ;;  %v108_v24 = vmul.f32 %v227_v17, %v47_v37  ;;  %v109_v25 = vmul.f32 %v227_v17, %v48_v38 }
  0xb0   :  { %v217_v26 = vpack.c.bf16 %v150_v14, %v149_v13  ;;  %v218_v27 = vpack.c.bf16 %v152_v16, %v151_v15 }
  0xb1   :  { %v153_v28 = vmul.f32 %v136_v4, %v106_v18  ;;  %v154_v29 = vmul.f32 %v140_v5, %v107_v19  ;;  %v155_v30 = vmul.f32 %v144_v6, %v108_v24  ;;  %v156_v20 = vmul.f32 %v148_v7, %v109_v25 }
  0xb2   :  { %181 = vst [vmem:[#allocation2] sm:$0xff] %v217_v26  ;;  %182 = vst [vmem:[#allocation2 + $0x8] sm:$0xff] %v218_v27 }
  0xb3   :  { %v219_v21 = vpack.c.bf16 %v154_v29, %v153_v28  ;;  %v220_v22 = vpack.c.bf16 %v156_v20, %v155_v30 }
  0xb5   :  { %183 = vst [vmem:[#allocation2 + $0x10] sm:$0xff] %v219_v21  ;;  %184 = vst [vmem:[#allocation2 + $0x18] sm:$0xff] %v220_v22 }
  0xb6   :  { %239 = shalt.err (!%p236_p4)
}
  0xb7   :  { %s251_s14 = smov 256   ;;  %s252_s15 = smov 16  }
  0xb8   :  { %196 = dma.vmem_to_hbm [thread:$0]  %s191_s4, 512, %s323_s3, [#allocation3], %s251_s14, %s251_s14, %s252_s15  }
  0xb9   :  { %248 = dma.done.wait [#allocation3], 512  }
  0xba   :  { %249 = vsyncadd [#allocation3], 4294966784 }
  0xbb   :  { %204 = vsyncpa [#allocation3], 1 }

// kernel: custom_llama_model.28
= control target key start
LH: loop header
LB: loop body
LE: loop exit
PB: predicated region body
PF: predicated region fallthrough
CT: control target
= control target key end

     0   :  { %s1864_s9 = smov 0   ;;  %s1866_s10 = smov 0   ;;  %s2087_s0 = inlined_call_operand.vmem [shape: bf16[16,1024], index: 0, kind: input, shape index: {}]   ;;  %s2088_s1 = inlined_call_operand.vmem [shape: bf16[1024,512], index: 1, kind: input, shape index: {}]   ;;  %s2089_s2 = inlined_call_operand.vmem [shape: bf16[16,512], index: 2, kind: output, shape index: {}]  }
   0x1   :  { %s1868_s11 = smov 0   ;;  %s1870_s12 = smov 0  }
   0x2   :  { %s1872_s13 = smov 0  }
   0x3 LB: > { %s24_s14 = sadd.s32 1, %s1842_s12  ;;  %p47_p1 = scmp.ne.s32.totalorder %s1834_s10, %s1830_s9  ;;  %s1846_s13 = sphi %s1872_s13, %s12_s13   ;;  %s1842_s12 = sphi %s1870_s12, %s2093_s12   ;;  %s1838_s11 = sphi %s1868_s11, %s2092_s11   ;;  %s1834_s10 = sphi %s1866_s10, %s2091_s10   ;;  %s1830_s9 = sphi %s1864_s9, %s2090_s9  }
   0x4   : > { %p25_p0 = scmp.ge.s32.totalorder %s24_s14, 2  ;;  %p48_p2 = scmp.eq.s32.totalorder %s1846_s13, 0 }
   0x5   : > { %s40_s16 = sadd.s32 1, %s1834_s10  ;;  %p1412_p5 = scmp.ge.s32.totalorder %s1846_s13, 2 }
   0x6   : > { %s2095_s14 = smov (%p25_p0, %s24_s14), 0  ;;  %p49_p3 = por %p48_p2, %p47_p1 }
   0x7   : > { %s36_s15 = ssub.s32 %s1842_s12, %s2095_s14  ;;  %129 = sbr.rel (%p1412_p5) target bundleno = 18 (0x12), region = 16 }
   0x8   : > { %p38_p4 = scmp.eq.s32.totalorder %s36_s15, 0 }
   0xa   : > { %s1899_s17 = scalar_select %p38_p4, %s1834_s10, %s40_s16  }
   0xc   : > { %132 = sbr.rel (!%p49_p3) target bundleno = 18 (0x12), region = 20  ;;  %s134_s18 = sand.u32 (%p49_p3), 1, %s1834_s10  }
   0xd   : > { %s1563_s19 = sshll.u32 (%p49_p3), %s1842_s12, 4  ;;  %s1413_s20 = sshll.u32 (%p49_p3), %s134_s18, 5 }
   0xe   : > { %s142_s23 = scalar_lea.vmem (%p49_p3), %s2087_s0, %s1563_s19  ;;  %s136_s24 = scalar_lea.vmem (%p49_p3), [#allocation3], %s1413_s20 }
   0xf   : > { %v155_v0 = vld [vmem:[%s142_s23] sm:$0xff] (%p49_p3)  ;;  %v157_v1 = vld [vmem:[%s142_s23 + $0x8] sm:$0xff] (%p49_p3) }
  0x10   : > { %v159_v2 = vld [vmem:[%s142_s23 + $0x20] sm:$0xff] (%p49_p3)  ;;  %156 = vst [vmem:[%s136_s24] sm:$0xff] (%p49_p3), %v155_v0  ;;  %158 = vst [vmem:[%s136_s24 + $0x8] sm:$0xff] (%p49_p3), %v157_v1  ;;  %v161_v3 = vld [vmem:[%s142_s23 + $0x28] sm:$0xff] (%p49_p3) }
  0x11   : > { %160 = vst [vmem:[%s136_s24 + $0x10] sm:$0xff] %v159_v2  ;;  %162 = vst [vmem:[%s136_s24 + $0x18] sm:$0xff] %v161_v3 }
  0x12 PF: > { %p1416_p6 = scmp.ge.s32.totalorder %s1846_s13, 1  ;;  %p182_p7 = scmp.lt.s32.totalorder %s1846_s13, 3 }
  0x14   : > { %p183_p8 = pnand %p1416_p6, %p182_p7 }
  0x15   : > { %s189_s25 = sand.u32 (!%p183_p8), 1, %s1830_s9   ;;  %s1418_s26 = sshll.u32 (!%p183_p8), %s1838_s11, 6 }
  0x16   : > { %186 = sbr.rel (%p183_p8) target bundleno = 383 (0x17f), region = 47  ;;  %s1417_s27 = sshll.u32 (!%p183_p8), %s189_s25, 5 }
  0x17   : > { %p229_p9 = scmp.lt.s32.totalorder (!%p183_p8), %s1418_s26, 127  ;;  %s1916_s4 = scalar_lea.vmem (!%p183_p8), [#allocation3], %s1417_s27 }
  0x18   : > { %p1421_p10 = scmp.ne.s32.totalorder (!%p183_p8), %s1838_s11, 0 }
  0x1b   : > { %s2097_s26 = smov (!%p229_p9, %s1418_s26), 127  ;;  %254 = sbr.rel (%p1421_p10) target bundleno = 37 (0x25), region = 55 }
  0x1c   : > { %s1564_s28 = sshll.u32 %s2097_s26, 4 }
  0x1d   : > { %s1914_s3 = scalar_lea.vmem %s2088_s1, %s1564_s28 }
  0x20   : > { %v1848_v4 = vmov 0.0  }
  0x21   : > { %255 = vst [vmem:[#allocation2 + $0x30] sm:$0xff] %v1848_v4  ;;  %256 = vst [vmem:[#allocation2] sm:$0xff] %v1848_v4 }
  0x22   : > { %257 = vst [vmem:[#allocation2 + $0x18] sm:$0xff] %v1848_v4  ;;  %258 = vst [vmem:[#allocation2 + $0x10] sm:$0xff] %v1848_v4 }
  0x23   : > { %259 = vst [vmem:[#allocation2 + $0x8] sm:$0xff] %v1848_v4  ;;  %260 = vst [vmem:[#allocation2 + $0x20] sm:$0xff] %v1848_v4 }
  0x24   : > { %261 = vst [vmem:[#allocation2 + $0x28] sm:$0xff] %v1848_v4  ;;  %262 = vst [vmem:[#allocation2 + $0x38] sm:$0xff] %v1848_v4 }
  0x25 PF: > { %v1610_v5 = vld [vmem:[%s1914_s3 + $0xe4] ss:$16 sps:$4 sm:$0xff]   ;;  %v1614_v7 = vld [vmem:[%s1914_s3 + $0xe0] ss:$16 sps:$4 sm:$0xff]   ;;  %v1711_v56 = vld [vmem:[%s1916_s4 + $0xc] ss:$16 sps:$4 sm:$0xff]  }
  0x26   : > { %v1612_v6 = vld [vmem:[%s1914_s3 + $0x2e4] ss:$16 sps:$4 sm:$0xff]   ;;  %1063 = vmatprep.subr.bf16.mxu0 %v1610_v5  ;;  %v1615_v8 = vld [vmem:[%s1914_s3 + $0x2e0] ss:$16 sps:$4 sm:$0xff]   ;;  %1138 = vmatprep.mubr.bf16.mxu1 %v1711_v56  ;;  %p1554_p11 = scmp.ne.s32.totalorder %s1838_s11, 1 }
  0x27   : > { %1106 = vmatprep.subr.bf16.mxu1 %v1612_v6  ;;  %v1616_v9 = vld [vmem:[%s1914_s3 + $0xc4] ss:$16 sps:$4 sm:$0xff]   ;;  %1064 = vmatpush1.bf16.msra.mxu0 %v1614_v7  ;;  %v1620_v11 = vld [vmem:[%s1914_s3 + $0xc0] ss:$16 sps:$4 sm:$0xff]   ;;  %v1714_v7 = vld [vmem:[%s1914_s3 + $0xec] ss:$16 sps:$4 sm:$0xff]  }
  0x28   : > { %1107 = vmatpush1.bf16.msra.mxu1 %v1615_v8  ;;  %v1618_v10 = vld [vmem:[%s1914_s3 + $0x2c4] ss:$16 sps:$4 sm:$0xff]   ;;  %1065 = vmatprep.subr.bf16.mxu0 %v1616_v9  ;;  %v1621_v12 = vld [vmem:[%s1914_s3 + $0x2c0] ss:$16 sps:$4 sm:$0xff]   ;;  %v1717_v8 = vld [vmem:[%s1914_s3 + $0x2ec] ss:$16 sps:$4 sm:$0xff]  }
  0x29   : > { %1108 = vmatprep.subr.bf16.mxu1 %v1618_v10  ;;  %v1622_v13 = vld [vmem:[%s1914_s3 + $0xa4] ss:$16 sps:$4 sm:$0xff]   ;;  %v1626_v15 = vld [vmem:[%s1914_s3 + $0xa0] ss:$16 sps:$4 sm:$0xff]   ;;  %v1991_v10 = vld [vmem:[%s1916_s4 + $0x8] ss:$16 sps:$4 sm:$0xff]  }
  0x2a   : > { %v1624_v14 = vld [vmem:[%s1914_s3 + $0x2a4] ss:$16 sps:$4 sm:$0xff]   ;;  %v1627_v16 = vld [vmem:[%s1914_s3 + $0x2a0] ss:$16 sps:$4 sm:$0xff]  }
  0x2b   : > { %1066 = vmatpush1.bf16.msra.mxu0 %v1620_v11  ;;  %v1628_v17 = vld [vmem:[%s1914_s3 + $0x84] ss:$16 sps:$4 sm:$0xff]   ;;  %v1632_v19 = vld [vmem:[%s1914_s3 + $0x80] ss:$16 sps:$4 sm:$0xff]   ;;  %v1712_v11 = vld [vmem:[%s1914_s3 + $0xe8] ss:$16 sps:$4 sm:$0xff]  }
  0x2c   : > { %1109 = vmatpush1.bf16.msra.mxu1 %v1621_v12  ;;  %1067 = vmatprep.subr.bf16.mxu0 %v1622_v13  ;;  %v1630_v18 = vld [vmem:[%s1914_s3 + $0x284] ss:$16 sps:$4 sm:$0xff]   ;;  %v1633_v20 = vld [vmem:[%s1914_s3 + $0x280] ss:$16 sps:$4 sm:$0xff]   ;;  %v1715_v12 = vld [vmem:[%s1914_s3 + $0x2e8] ss:$16 sps:$4 sm:$0xff]  }
  0x2d   : > { %1110 = vmatprep.subr.bf16.mxu1 %v1624_v14  ;;  %v1634_v21 = vld [vmem:[%s1914_s3 + $0x64] ss:$16 sps:$4 sm:$0xff]   ;;  %v1638_v23 = vld [vmem:[%s1914_s3 + $0x60] ss:$16 sps:$4 sm:$0xff]   ;;  %v1720_v13 = vld [vmem:[%s1914_s3 + $0xcc] ss:$16 sps:$4 sm:$0xff]  }
  0x2e   : > { %v1636_v22 = vld [vmem:[%s1914_s3 + $0x264] ss:$16 sps:$4 sm:$0xff]   ;;  %v1639_v24 = vld [vmem:[%s1914_s3 + $0x260] ss:$16 sps:$4 sm:$0xff]   ;;  %v1723_v14 = vld [vmem:[%s1914_s3 + $0x2cc] ss:$16 sps:$4 sm:$0xff]  }
  0x2f   : > { %1068 = vmatpush1.bf16.msra.mxu0 %v1626_v15  ;;  %v1640_v25 = vld [vmem:[%s1914_s3 + $0x44] ss:$16 sps:$4 sm:$0xff]   ;;  %v1644_v27 = vld [vmem:[%s1914_s3 + $0x40] ss:$16 sps:$4 sm:$0xff]   ;;  %v1718_v15 = vld [vmem:[%s1914_s3 + $0xc8] ss:$16 sps:$4 sm:$0xff]  }
  0x30   : > { %1111 = vmatpush1.bf16.msra.mxu1 %v1627_v16  ;;  %1069 = vmatprep.subr.bf16.mxu0 %v1628_v17  ;;  %v1642_v26 = vld [vmem:[%s1914_s3 + $0x244] ss:$16 sps:$4 sm:$0xff]   ;;  %v1645_v28 = vld [vmem:[%s1914_s3 + $0x240] ss:$16 sps:$4 sm:$0xff]   ;;  %v1721_v16 = vld [vmem:[%s1914_s3 + $0x2c8] ss:$16 sps:$4 sm:$0xff]  }
  0x31   : > { %1112 = vmatprep.subr.bf16.mxu1 %v1630_v18  ;;  %v1646_v29 = vld [vmem:[%s1914_s3 + $0x24] ss:$16 sps:$4 sm:$0xff]   ;;  %v1650_v31 = vld [vmem:[%s1914_s3 + $0x20] ss:$16 sps:$4 sm:$0xff]   ;;  %v1726_v17 = vld [vmem:[%s1914_s3 + $0xac] ss:$16 sps:$4 sm:$0xff]  }
  0x32   : > { %v1648_v30 = vld [vmem:[%s1914_s3 + $0x224] ss:$16 sps:$4 sm:$0xff]   ;;  %v1651_v32 = vld [vmem:[%s1914_s3 + $0x220] ss:$16 sps:$4 sm:$0xff]   ;;  %v1729_v18 = vld [vmem:[%s1914_s3 + $0x2ac] ss:$16 sps:$4 sm:$0xff]  }
  0x33   : > { %1070 = vmatpush1.bf16.msra.mxu0 %v1632_v19  ;;  %v1652_v33 = vld [vmem:[%s1914_s3 + $0x4] ss:$16 sps:$4 sm:$0xff]   ;;  %v1656_v35 = vld [vmem:[%s1914_s3] ss:$16 sps:$4 sm:$0xff]   ;;  %v1724_v19 = vld [vmem:[%s1914_s3 + $0xa8] ss:$16 sps:$4 sm:$0xff]  }
  0x34   : > { %1113 = vmatpush1.bf16.msra.mxu1 %v1633_v20  ;;  %1071 = vmatprep.subr.bf16.mxu0 %v1634_v21  ;;  %v1654_v34 = vld [vmem:[%s1914_s3 + $0x204] ss:$16 sps:$4 sm:$0xff]   ;;  %v1657_v36 = vld [vmem:[%s1914_s3 + $0x200] ss:$16 sps:$4 sm:$0xff]   ;;  %v1727_v20 = vld [vmem:[%s1914_s3 + $0x2a8] ss:$16 sps:$4 sm:$0xff]  }
  0x35   : > { %1114 = vmatprep.subr.bf16.mxu1 %v1636_v22  ;;  %v1658_v37 = vld [vmem:[%s1914_s3 + $0x1e4] ss:$16 sps:$4 sm:$0xff]   ;;  %v1662_v39 = vld [vmem:[%s1914_s3 + $0x1e0] ss:$16 sps:$4 sm:$0xff]   ;;  %v1732_v21 = vld [vmem:[%s1914_s3 + $0x8c] ss:$16 sps:$4 sm:$0xff]  }
  0x36   : > { %v1660_v38 = vld [vmem:[%s1914_s3 + $0x3e4] ss:$16 sps:$4 sm:$0xff]   ;;  %v1663_v40 = vld [vmem:[%s1914_s3 + $0x3e0] ss:$16 sps:$4 sm:$0xff]   ;;  %v1735_v22 = vld [vmem:[%s1914_s3 + $0x28c] ss:$16 sps:$4 sm:$0xff]  }
  0x37   : > { %1072 = vmatpush1.bf16.msra.mxu0 %v1638_v23  ;;  %v1664_v41 = vld [vmem:[%s1914_s3 + $0x1c4] ss:$16 sps:$4 sm:$0xff]   ;;  %v1668_v43 = vld [vmem:[%s1914_s3 + $0x1c0] ss:$16 sps:$4 sm:$0xff]   ;;  %v1730_v23 = vld [vmem:[%s1914_s3 + $0x88] ss:$16 sps:$4 sm:$0xff]  }
  0x38   : > { %1115 = vmatpush1.bf16.msra.mxu1 %v1639_v24  ;;  %1073 = vmatprep.subr.bf16.mxu0 %v1640_v25  ;;  %v1666_v42 = vld [vmem:[%s1914_s3 + $0x3c4] ss:$16 sps:$4 sm:$0xff]   ;;  %v1669_v44 = vld [vmem:[%s1914_s3 + $0x3c0] ss:$16 sps:$4 sm:$0xff]   ;;  %v1733_v24 = vld [vmem:[%s1914_s3 + $0x288] ss:$16 sps:$4 sm:$0xff]  }
  0x39   : > { %1116 = vmatprep.subr.bf16.mxu1 %v1642_v26  ;;  %v1670_v45 = vld [vmem:[%s1914_s3 + $0x1a4] ss:$16 sps:$4 sm:$0xff]   ;;  %v1674_v47 = vld [vmem:[%s1914_s3 + $0x1a0] ss:$16 sps:$4 sm:$0xff]   ;;  %v1738_v25 = vld [vmem:[%s1914_s3 + $0x6c] ss:$16 sps:$4 sm:$0xff]  }
  0x3a   : > { %v1672_v46 = vld [vmem:[%s1914_s3 + $0x3a4] ss:$16 sps:$4 sm:$0xff]   ;;  %v1675_v48 = vld [vmem:[%s1914_s3 + $0x3a0] ss:$16 sps:$4 sm:$0xff]   ;;  %v1741_v26 = vld [vmem:[%s1914_s3 + $0x26c] ss:$16 sps:$4 sm:$0xff]  }
  0x3b   : > { %1074 = vmatpush1.bf16.msra.mxu0 %v1644_v27  ;;  %v1676_v49 = vld [vmem:[%s1914_s3 + $0x184] ss:$16 sps:$4 sm:$0xff]   ;;  %v1680_v51 = vld [vmem:[%s1914_s3 + $0x180] ss:$16 sps:$4 sm:$0xff]   ;;  %v1736_v27 = vld [vmem:[%s1914_s3 + $0x68] ss:$16 sps:$4 sm:$0xff]  }
  0x3c   : > { %1117 = vmatpush1.bf16.msra.mxu1 %v1645_v28  ;;  %1075 = vmatprep.subr.bf16.mxu0 %v1646_v29  ;;  %v1678_v50 = vld [vmem:[%s1914_s3 + $0x384] ss:$16 sps:$4 sm:$0xff]   ;;  %v1681_v52 = vld [vmem:[%s1914_s3 + $0x380] ss:$16 sps:$4 sm:$0xff]   ;;  %v1739_v28 = vld [vmem:[%s1914_s3 + $0x268] ss:$16 sps:$4 sm:$0xff]  }
  0x3d   : > { %1118 = vmatprep.subr.bf16.mxu1 %v1648_v30  ;;  %v1682_v53 = vld [vmem:[%s1914_s3 + $0x164] ss:$16 sps:$4 sm:$0xff]   ;;  %v1686_v57 = vld [vmem:[%s1914_s3 + $0x160] ss:$16 sps:$4 sm:$0xff]   ;;  %v1744_v29 = vld [vmem:[%s1914_s3 + $0x4c] ss:$16 sps:$4 sm:$0xff]  }
  0x3e   : > { %v1708_v54 = vld [vmem:[%s1916_s4 + $0x4] ss:$16 sps:$4 sm:$0xff]   ;;  %v1687_v58 = vld [vmem:[%s1914_s3 + $0x360] ss:$16 sps:$4 sm:$0xff]   ;;  %v1747_v30 = vld [vmem:[%s1914_s3 + $0x24c] ss:$16 sps:$4 sm:$0xff]  }
  0x3f   : > { %1076 = vmatpush1.bf16.msra.mxu0 %v1650_v31  ;;  %v1684_v55 = vld [vmem:[%s1914_s3 + $0x364] ss:$16 sps:$4 sm:$0xff]   ;;  %1095 = vmatprep.mubr.bf16.mxu0 %v1708_v54  ;;  %v1692_v61 = vld [vmem:[%s1914_s3 + $0x140] ss:$16 sps:$4 sm:$0xff]   ;;  %v1742_v31 = vld [vmem:[%s1914_s3 + $0x48] ss:$16 sps:$4 sm:$0xff]  }
  0x40   : > { %1119 = vmatpush1.bf16.msra.mxu1 %v1651_v32  ;;  %1077 = vmatprep.subr.bf16.mxu0 %v1652_v33  ;;  %v1688_v59 = vld [vmem:[%s1914_s3 + $0x144] ss:$16 sps:$4 sm:$0xff]   ;;  %v1693_v62 = vld [vmem:[%s1914_s3 + $0x340] ss:$16 sps:$4 sm:$0xff]   ;;  %v1745_v32 = vld [vmem:[%s1914_s3 + $0x248] ss:$16 sps:$4 sm:$0xff]  }
  0x41   : > { %1120 = vmatprep.subr.bf16.mxu1 %v1654_v34  ;;  %v1690_v60 = vld [vmem:[%s1914_s3 + $0x344] ss:$16 sps:$4 sm:$0xff]   ;;  %v1698_v1 = vld [vmem:[%s1914_s3 + $0x120] ss:$16 sps:$4 sm:$0xff]   ;;  %v1750_v33 = vld [vmem:[%s1914_s3 + $0x2c] ss:$16 sps:$4 sm:$0xff]  }
  0x42   : > { %v1694_v63 = vld [vmem:[%s1914_s3 + $0x124] ss:$16 sps:$4 sm:$0xff]   ;;  %v1699_v2 = vld [vmem:[%s1914_s3 + $0x320] ss:$16 sps:$4 sm:$0xff]   ;;  %v1753_v34 = vld [vmem:[%s1914_s3 + $0x22c] ss:$16 sps:$4 sm:$0xff]  }
  0x43   : > { %1078 = vmatpush1.bf16.msra.mxu0 %v1656_v35  ;;  %v1696_v0 = vld [vmem:[%s1914_s3 + $0x324] ss:$16 sps:$4 sm:$0xff]   ;;  %v1704_v5 = vld [vmem:[%s1914_s3 + $0x100] ss:$16 sps:$4 sm:$0xff]   ;;  %v1748_v35 = vld [vmem:[%s1914_s3 + $0x28] ss:$16 sps:$4 sm:$0xff]  }
  0x44   : > { %1121 = vmatpush1.bf16.msra.mxu1 %v1657_v36  ;;  %1079 = vmatprep.subr.bf16.mxu0 %v1658_v37  ;;  %v1700_v3 = vld [vmem:[%s1914_s3 + $0x104] ss:$16 sps:$4 sm:$0xff]   ;;  %v1705_v6 = vld [vmem:[%s1914_s3 + $0x300] ss:$16 sps:$4 sm:$0xff]   ;;  %v1751_v36 = vld [vmem:[%s1914_s3 + $0x228] ss:$16 sps:$4 sm:$0xff]  }
  0x45   : > { %1122 = vmatprep.subr.bf16.mxu1 %v1660_v38  ;;  %v1702_v4 = vld [vmem:[%s1914_s3 + $0x304] ss:$16 sps:$4 sm:$0xff]   ;;  %v1988_v9 = vld [vmem:[%s1916_s4] ss:$16 sps:$4 sm:$0xff]   ;;  %v1756_v37 = vld [vmem:[%s1914_s3 + $0xc] ss:$16 sps:$4 sm:$0xff]  }
  0x46   : > { %v1759_v38 = vld [vmem:[%s1914_s3 + $0x20c] ss:$16 sps:$4 sm:$0xff]  }
  0x47   : > { %1080 = vmatpush2.bf16.msra.mxu0 %v1662_v39  ;;  %v1754_v39 = vld [vmem:[%s1914_s3 + $0x8] ss:$16 sps:$4 sm:$0xff]  }
  0x48   : > { %1123 = vmatpush2.bf16.msra.mxu1 %v1663_v40  ;;  %1081 = vmatprep.subr.bf16.mxu0 %v1664_v41  ;;  %v1757_v40 = vld [vmem:[%s1914_s3 + $0x208] ss:$16 sps:$4 sm:$0xff]   ;;  %v1762_v41 = vld [vmem:[%s1914_s3 + $0x1ec] ss:$16 sps:$4 sm:$0xff]  }
  0x49   : > { %1124 = vmatprep.subr.bf16.mxu1 %v1666_v42  ;;  %v1765_v42 = vld [vmem:[%s1914_s3 + $0x3ec] ss:$16 sps:$4 sm:$0xff]  }
  0x4b   : > { %1082 = vmatpush2.bf16.msra.mxu0 %v1668_v43  ;;  %v1760_v43 = vld [vmem:[%s1914_s3 + $0x1e8] ss:$16 sps:$4 sm:$0xff]  }
  0x4c   : > { %1125 = vmatpush2.bf16.msra.mxu1 %v1669_v44  ;;  %1083 = vmatprep.subr.bf16.mxu0 %v1670_v45  ;;  %v1763_v44 = vld [vmem:[%s1914_s3 + $0x3e8] ss:$16 sps:$4 sm:$0xff]   ;;  %v1768_v45 = vld [vmem:[%s1914_s3 + $0x1cc] ss:$16 sps:$4 sm:$0xff]  }
  0x4d   : > { %1126 = vmatprep.subr.bf16.mxu1 %v1672_v46  ;;  %v1771_v46 = vld [vmem:[%s1914_s3 + $0x3cc] ss:$16 sps:$4 sm:$0xff]  }
  0x4f   : > { %1084 = vmatpush2.bf16.msra.mxu0 %v1674_v47  ;;  %v1766_v47 = vld [vmem:[%s1914_s3 + $0x1c8] ss:$16 sps:$4 sm:$0xff]  }
  0x50   : > { %1127 = vmatpush2.bf16.msra.mxu1 %v1675_v48  ;;  %1085 = vmatprep.subr.bf16.mxu0 %v1676_v49  ;;  %v1769_v48 = vld [vmem:[%s1914_s3 + $0x3c8] ss:$16 sps:$4 sm:$0xff]   ;;  %v1774_v49 = vld [vmem:[%s1914_s3 + $0x1ac] ss:$16 sps:$4 sm:$0xff]  }
  0x51   : > { %1128 = vmatprep.subr.bf16.mxu1 %v1678_v50  ;;  %v1777_v50 = vld [vmem:[%s1914_s3 + $0x3ac] ss:$16 sps:$4 sm:$0xff]  }
  0x53   : > { %1086 = vmatpush2.bf16.msra.mxu0 %v1680_v51  ;;  %v1772_v51 = vld [vmem:[%s1914_s3 + $0x1a8] ss:$16 sps:$4 sm:$0xff]  }
  0x54   : > { %1129 = vmatpush2.bf16.msra.mxu1 %v1681_v52  ;;  %1087 = vmatprep.subr.bf16.mxu0 %v1682_v53  ;;  %v1775_v52 = vld [vmem:[%s1914_s3 + $0x3a8] ss:$16 sps:$4 sm:$0xff]   ;;  %v1780_v53 = vld [vmem:[%s1914_s3 + $0x18c] ss:$16 sps:$4 sm:$0xff]  }
  0x55   : > { %1130 = vmatprep.subr.bf16.mxu1 %v1684_v55  ;;  %v1778_v55 = vld [vmem:[%s1914_s3 + $0x188] ss:$16 sps:$4 sm:$0xff]  }
  0x57   : > { %1088 = vmatpush2.bf16.msra.mxu0 %v1686_v57  ;;  %v1786_v57 = vld [vmem:[%s1914_s3 + $0x16c] ss:$16 sps:$4 sm:$0xff]  }
  0x58   : > { %1131 = vmatpush2.bf16.msra.mxu1 %v1687_v58  ;;  %1089 = vmatprep.subr.bf16.mxu0 %v1688_v59  ;;  %v1789_v58 = vld [vmem:[%s1914_s3 + $0x36c] ss:$16 sps:$4 sm:$0xff]   ;;  %v1784_v59 = vld [vmem:[%s1914_s3 + $0x168] ss:$16 sps:$4 sm:$0xff]  }
  0x59   : > { %1132 = vmatprep.subr.bf16.mxu1 %v1690_v60  ;;  %v1787_v60 = vld [vmem:[%s1914_s3 + $0x368] ss:$16 sps:$4 sm:$0xff]  }
  0x5b   : > { %1090 = vmatpush2.bf16.msra.mxu0 %v1692_v61  ;;  %v1792_v61 = vld [vmem:[%s1914_s3 + $0x14c] ss:$16 sps:$4 sm:$0xff]  }
  0x5c   : > { %1133 = vmatpush2.bf16.msra.mxu1 %v1693_v62  ;;  %1091 = vmatprep.subr.bf16.mxu0 %v1694_v63  ;;  %v1795_v62 = vld [vmem:[%s1914_s3 + $0x34c] ss:$16 sps:$4 sm:$0xff]   ;;  %v1790_v63 = vld [vmem:[%s1914_s3 + $0x148] ss:$16 sps:$4 sm:$0xff]  }
  0x5d   : > { %1134 = vmatprep.subr.bf16.mxu1 %v1696_v0  ;;  %v1793_v0 = vld [vmem:[%s1914_s3 + $0x348] ss:$16 sps:$4 sm:$0xff]  }
  0x5f   : > { %1092 = vmatpush2.bf16.msra.mxu0 %v1698_v1  ;;  %v1798_v1 = vld [vmem:[%s1914_s3 + $0x12c] ss:$16 sps:$4 sm:$0xff]  }
  0x60   : > { %1135 = vmatpush2.bf16.msra.mxu1 %v1699_v2  ;;  %1093 = vmatprep.subr.bf16.mxu0 %v1700_v3  ;;  %v1801_v2 = vld [vmem:[%s1914_s3 + $0x32c] ss:$16 sps:$4 sm:$0xff]   ;;  %v1796_v3 = vld [vmem:[%s1914_s3 + $0x128] ss:$16 sps:$4 sm:$0xff]  }
  0x61   : > { %1136 = vmatprep.subr.bf16.mxu1 %v1702_v4  ;;  %v1799_v4 = vld [vmem:[%s1914_s3 + $0x328] ss:$16 sps:$4 sm:$0xff]  }
  0x63   : > { %1094 = vmatpush2.bf16.msra.mxu0 %v1704_v5  ;;  %v1804_v5 = vld [vmem:[%s1914_s3 + $0x10c] ss:$16 sps:$4 sm:$0xff]  }
  0x64   : > { %1137 = vmatpush2.bf16.msra.mxu1 %v1705_v6  ;;  %1149 = vmatprep.subr.bf16.mxu0 %v1714_v7  ;;  %v1807_v6 = vld [vmem:[%s1914_s3 + $0x30c] ss:$16 sps:$4 sm:$0xff]   ;;  %v1802_v7 = vld [vmem:[%s1914_s3 + $0x108] ss:$16 sps:$4 sm:$0xff]  }
  0x65   : > { %1192 = vmatprep.subr.bf16.mxu1 %v1717_v8  ;;  %v1805_v8 = vld [vmem:[%s1914_s3 + $0x308] ss:$16 sps:$4 sm:$0xff]  }
  0x66   : > { %1096 = vmatmul.mubr.bf16.vlgmr.msra.gmra.mxu0 %v1988_v9 }
  0x67   : > { %1139 = vmatmul.mubr.bf16.vlgmr.msra.gmra.mxu1 %v1991_v10  ;;  %1150 = vmatpush1.bf16.msra.mxu0 %v1712_v11 }
  0x68   : > { %1193 = vmatpush1.bf16.msra.mxu1 %v1715_v12  ;;  %1151 = vmatprep.subr.bf16.mxu0 %v1720_v13  ;;  %v263_v12 = vld [vmem:[#allocation2 + $0x30] sm:$0xff] }
  0x69   : > { %1194 = vmatprep.subr.bf16.mxu1 %v1723_v14  ;;  %1181 = vmatprep.mubr.bf16.mxu0 %v1708_v54  ;;  %v1783_v54 = vld [vmem:[%s1914_s3 + $0x38c] ss:$16 sps:$4 sm:$0xff]  }
  0x6a   : > { %1224 = vmatprep.mubr.bf16.mxu1 %v1711_v56  ;;  %v1781_v56 = vld [vmem:[%s1914_s3 + $0x388] ss:$16 sps:$4 sm:$0xff]  }
  0x6b   : > { %1152 = vmatpush1.bf16.msra.mxu0 %v1718_v15 }
  0x6c   : > { %1195 = vmatpush1.bf16.msra.mxu1 %v1721_v16  ;;  %1153 = vmatprep.subr.bf16.mxu0 %v1726_v17  ;;  %v264_v16 = vld [vmem:[#allocation2] sm:$0xff] }
  0x6d   : > { %1196 = vmatprep.subr.bf16.mxu1 %v1729_v18 }
  0x6f   : > { %1154 = vmatpush1.bf16.msra.mxu0 %v1724_v19 }
  0x70   : > { %1197 = vmatpush1.bf16.msra.mxu1 %v1727_v20  ;;  %1155 = vmatprep.subr.bf16.mxu0 %v1732_v21  ;;  %v267_v21 = vld [vmem:[#allocation2 + $0x8] sm:$0xff] }
  0x71   : > { %1198 = vmatprep.subr.bf16.mxu1 %v1735_v22 }
  0x73   : > { %1156 = vmatpush1.bf16.msra.mxu0 %v1730_v23 }
  0x74   : > { %1199 = vmatpush1.bf16.msra.mxu1 %v1733_v24  ;;  %1157 = vmatprep.subr.bf16.mxu0 %v1738_v25 }
  0x75   : > { %1200 = vmatprep.subr.bf16.mxu1 %v1741_v26  ;;  %v268_v26 = vld [vmem:[#allocation2 + $0x20] sm:$0xff] }
  0x77   : > { %1158 = vmatpush1.bf16.msra.mxu0 %v1736_v27 }
  0x78   : > { %1201 = vmatpush1.bf16.msra.mxu1 %v1739_v28  ;;  %1159 = vmatprep.subr.bf16.mxu0 %v1744_v29 }
  0x79   : > { %1202 = vmatprep.subr.bf16.mxu1 %v1747_v30  ;;  %v265_v30 = vld [vmem:[#allocation2 + $0x18] sm:$0xff] }
  0x7b   : > { %1160 = vmatpush1.bf16.msra.mxu0 %v1742_v31 }
  0x7c   : > { %1203 = vmatpush1.bf16.msra.mxu1 %v1745_v32  ;;  %1161 = vmatprep.subr.bf16.mxu0 %v1750_v33 }
  0x7d   : > { %1204 = vmatprep.subr.bf16.mxu1 %v1753_v34  ;;  %v266_v34 = vld [vmem:[#allocation2 + $0x10] sm:$0xff] }
  0x7f   : > { %1162 = vmatpush1.bf16.msra.mxu0 %v1748_v35 }
  0x80   : > { %1205 = vmatpush1.bf16.msra.mxu1 %v1751_v36  ;;  %1163 = vmatprep.subr.bf16.mxu0 %v1756_v37 }
  0x81   : > { %1206 = vmatprep.subr.bf16.mxu1 %v1759_v38 }
  0x83   : > { %1164 = vmatpush1.bf16.msra.mxu0 %v1754_v39  ;;  %v269_v39 = vld [vmem:[#allocation2 + $0x28] sm:$0xff] }
  0x84   : > { %1207 = vmatpush1.bf16.msra.mxu1 %v1757_v40  ;;  %1165 = vmatprep.subr.bf16.mxu0 %v1762_v41 }
  0x85   : > { %1208 = vmatprep.subr.bf16.mxu1 %v1765_v42 }
  0x87   : > { %1166 = vmatpush2.bf16.msra.mxu0 %v1760_v43 }
  0x88   : > { %1209 = vmatpush2.bf16.msra.mxu1 %v1763_v44  ;;  %1167 = vmatprep.subr.bf16.mxu0 %v1768_v45  ;;  %v270_v44 = vld [vmem:[#allocation2 + $0x38] sm:$0xff] }
  0x89   : > { %1210 = vmatprep.subr.bf16.mxu1 %v1771_v46 }
  0x8b   : > { %1168 = vmatpush2.bf16.msra.mxu0 %v1766_v47 }
  0x8c   : > { %1211 = vmatpush2.bf16.msra.mxu1 %v1769_v48  ;;  %1169 = vmatprep.subr.bf16.mxu0 %v1774_v49 }
  0x8d   : > { %1212 = vmatprep.subr.bf16.mxu1 %v1777_v50 }
  0x8f   : > { %1170 = vmatpush2.bf16.msra.mxu0 %v1772_v51 }
  0x90   : > { %1213 = vmatpush2.bf16.msra.mxu1 %v1775_v52  ;;  %1171 = vmatprep.subr.bf16.mxu0 %v1780_v53 }
  0x91   : > { %1214 = vmatprep.subr.bf16.mxu1 %v1783_v54 }
  0x93   : > { %1172 = vmatpush2.bf16.msra.mxu0 %v1778_v55 }
  0x94   : > { %1215 = vmatpush2.bf16.msra.mxu1 %v1781_v56  ;;  %1173 = vmatprep.subr.bf16.mxu0 %v1786_v57 }
  0x95   : > { %1216 = vmatprep.subr.bf16.mxu1 %v1789_v58 }
  0x97   : > { %1174 = vmatpush2.bf16.msra.mxu0 %v1784_v59 }
  0x98   : > { %1217 = vmatpush2.bf16.msra.mxu1 %v1787_v60  ;;  %1175 = vmatprep.subr.bf16.mxu0 %v1792_v61 }
  0x99   : > { %1218 = vmatprep.subr.bf16.mxu1 %v1795_v62 }
  0x9b   : > { %1176 = vmatpush2.bf16.msra.mxu0 %v1790_v63 }
  0x9c   : > { %1219 = vmatpush2.bf16.msra.mxu1 %v1793_v0  ;;  %1177 = vmatprep.subr.bf16.mxu0 %v1798_v1 }
  0x9d   : > { %1220 = vmatprep.subr.bf16.mxu1 %v1801_v2 }
  0x9f   : > { %1178 = vmatpush2.bf16.msra.mxu0 %v1796_v3 }
  0xa0   : > { %1221 = vmatpush2.bf16.msra.mxu1 %v1799_v4  ;;  %1179 = vmatprep.subr.bf16.mxu0 %v1804_v5 }
  0xa1   : > { %1222 = vmatprep.subr.bf16.mxu1 %v1807_v6 }
  0xa3   : > { %1180 = vmatpush2.bf16.msra.mxu0 %v1802_v7 }
  0xa4   : > { %1223 = vmatpush2.bf16.msra.mxu1 %v1805_v8 }
  0xa6   : > { %1182 = vmatmul.mubr.bf16.vlgmr.msra.gmra.mxu0 %v1988_v9 }
  0xa7   : > { %1225 = vmatmul.mubr.bf16.vlgmr.msra.gmra.mxu1 %v1991_v10 }
 0x126   : > { %v1097_v11 = vpop.f32.mrf.mxu0 }
 0x127   : > { %v1140_v13 = vpop.f32.mrf.mxu1 }
 0x128   : > { %v1141_v14 = vadd.f32 %v1140_v13, %v1097_v11  ;;  %v1099_v15 = vpop.f32.mrf.mxu0 }
 0x129   : > { %v1142_v17 = vpop.f32.mrf.mxu1 }
 0x12a   : > { %v1235_v18 = vadd.f32 %v1141_v14, %v263_v12  ;;  %v1143_v19 = vadd.f32 %v1142_v17, %v1099_v15  ;;  %v1101_v20 = vpop.f32.mrf.mxu0 }
 0x12b   : > { %v1144_v22 = vpop.f32.mrf.mxu1 }
 0x12c   : > { %1243 = vst [vmem:[#allocation2 + $0x30] sm:$0xff] %v1235_v18  ;;  %v1236_v23 = vadd.f32 %v1143_v19, %v264_v16  ;;  %v1145_v24 = vadd.f32 %v1144_v22, %v1101_v20  ;;  %v1103_v25 = vpop.f32.mrf.mxu0 }
 0x12d   : > { %v1146_v9 = vpop.f32.mrf.mxu1 }
 0x12e   : > { %1244 = vst [vmem:[#allocation2] sm:$0xff] %v1236_v23  ;;  %v1239_v10 = vadd.f32 %v1145_v24, %v267_v21  ;;  %v1147_v27 = vadd.f32 %v1146_v9, %v1103_v25 }
 0x130   : > { %1247 = vst [vmem:[#allocation2 + $0x8] sm:$0xff] %v1239_v10  ;;  %v1240_v28 = vadd.f32 %v1147_v27, %v268_v26 }
 0x132   : > { %1248 = vst [vmem:[#allocation2 + $0x20] sm:$0xff] %v1240_v28 }
 0x166   : > { %v1183_v29 = vpop.f32.mrf.mxu0 }
 0x167   : > { %v1226_v31 = vpop.f32.mrf.mxu1 }
 0x168   : > { %v1227_v32 = vadd.f32 %v1226_v31, %v1183_v29  ;;  %v1185_v33 = vpop.f32.mrf.mxu0 }
 0x169   : > { %v1228_v35 = vpop.f32.mrf.mxu1 }
 0x16a   : > { %v1237_v36 = vadd.f32 %v1227_v32, %v265_v30  ;;  %v1229_v37 = vadd.f32 %v1228_v35, %v1185_v33  ;;  %v1187_v38 = vpop.f32.mrf.mxu0 }
 0x16b   : > { %v1230_v40 = vpop.f32.mrf.mxu1 }
 0x16c   : > { %1245 = vst [vmem:[#allocation2 + $0x18] sm:$0xff] %v1237_v36  ;;  %v1238_v41 = vadd.f32 %v1229_v37, %v266_v34  ;;  %v1231_v42 = vadd.f32 %v1230_v40, %v1187_v38  ;;  %v1189_v43 = vpop.f32.mrf.mxu0 }
 0x16d   : > { %v1232_v45 = vpop.f32.mrf.mxu1 }
 0x16e   : > { %1246 = vst [vmem:[#allocation2 + $0x10] sm:$0xff] %v1238_v41  ;;  %v1241_v46 = vadd.f32 %v1231_v42, %v269_v39  ;;  %v1233_v47 = vadd.f32 %v1232_v45, %v1189_v43  ;;  %1254 = sbr.rel (%p1554_p11) target bundleno = 383 (0x17f), region = 59 }
 0x170   : > { %1249 = vst [vmem:[#allocation2 + $0x28] sm:$0xff] %v1241_v46  ;;  %v1242_v48 = vadd.f32 %v1233_v47, %v270_v44 }
 0x172   : > { %1250 = vst [vmem:[#allocation2 + $0x38] sm:$0xff] %v1242_v48 }
 0x173   : > { %v1255_v49 = vld [vmem:[#allocation2 + $0x30] sm:$0xff]  ;;  %v1256_v50 = vld [vmem:[#allocation2] sm:$0xff]  ;;  %v1257_v51 = vld [vmem:[#allocation2 + $0x18] sm:$0xff] }
 0x174   : > { %v1263_v52 = vmul.f32 1.1, %v1255_v49  ;;  %v1264_v53 = vmul.f32 1.1, %v1256_v50  ;;  %v1259_v55 = vld [vmem:[#allocation2 + $0x8] sm:$0xff]  ;;  %v1260_v58 = vld [vmem:[#allocation2 + $0x20] sm:$0xff] }
 0x175   : > { %v1258_v54 = vld [vmem:[#allocation2 + $0x10] sm:$0xff]  ;;  %v1265_v56 = vmul.f32 1.1, %v1257_v51  ;;  %v1267_v61 = vmul.f32 1.1, %v1259_v55 }
 0x176   : > { %v1266_v57 = vmul.f32 1.1, %v1258_v54  ;;  %v1565_v60 = vpack.c.bf16 %v1264_v53, %v1263_v52  ;;  %v1268_v62 = vmul.f32 1.1, %v1260_v58 }
 0x177   : > { %v1261_v59 = vld [vmem:[#allocation2 + $0x28] sm:$0xff] }
 0x178   : > { %v1566_v0 = vpack.c.bf16 %v1266_v57, %v1265_v56  ;;  %v1269_v1 = vmul.f32 1.1, %v1261_v59  ;;  %1295 = vst [vmem:[%s2089_s2] sm:$0xff] %v1565_v60  ;;  %v1567_v3 = vpack.c.bf16 %v1268_v62, %v1267_v61 }
 0x179   : > { %v1262_v63 = vld [vmem:[#allocation2 + $0x38] sm:$0xff] }
 0x17a   : > { %v1270_v2 = vmul.f32 1.1, %v1262_v63  ;;  %1296 = vst [vmem:[%s2089_s2 + $0x8] sm:$0xff] %v1566_v0  ;;  %1297 = vst [vmem:[%s2089_s2 + $0x10] sm:$0xff] %v1567_v3 }
 0x17c   : > { %v1568_v4 = vpack.c.bf16 %v1270_v2, %v1269_v1 }
 0x17e   : > { %1298 = vst [vmem:[%s2089_s2 + $0x18] sm:$0xff] %v1568_v4 }
 0x17f PF: > { %s12_s13 = sadd.s32 1, %s1846_s13   ;;  %s2090_s9 = smov %s1834_s10 }
 0x180   : > { %p9_p12 = scmp.ge.s32.totalorder %s12_s13, 4   ;;  %s2091_s10 = smov %s1899_s17 }
 0x181   : > { %s2092_s11 = smov %s1842_s12  ;;  %s2093_s12 = smov %s2095_s14 }
 0x182   :  { %11 = sbr.rel (!%p9_p12) target bundleno = 3 (0x3), region = 97 }

</bundles_post_ra>
